<compile_context>
chip_gen: v7x
topology: tpu7x:2x2x1
jax: 0.10.0
libtpu: 0.0.40
codegen_flags: <defaults>
</compile_context>

<pallas_src>
from functools import partial

import jax
import jax.numpy as jnp
from jax import lax
from jax.experimental import pallas as pl
from jax.experimental.pallas import tpu as pltpu


def _round_up(x, m):
    return (x + m - 1) // m * m


def _geom(H, W):
    """Row geometry of the flattened, spatially padded image."""
    Wp = W + 2                              # padded image width
    Npad = (H + 2) * Wp                     # rows of the padded image (flat)
    ext = Wp + 1                            # extra zero rows each side (taps)
    M = _round_up(Npad, 8)                  # matmul M dim, sublane aligned
    Next = _round_up(M + 2 * ext, 16)       # scratch rows (bf16 packing)
    return Wp, Npad, ext, M, Next


def _basic_block_kernel(x_ref, w1_ref, w2_ref, s1_ref, b1_ref, s2_ref, b2_ref,
                        o_ref, pbuf_ref, *, H, W, Cpad):
    """Fused BasicBlock for one batch element.

    x_ref     : (1, H*W, Cpad)  bf16  input, flattened spatial, lane-dense C
    w?_ref    : (9, Cpad, Cpad) bf16  conv taps, tap-major (dy*3 + dx)
    s?/b?_ref : (1, Cpad)       f32   folded BN scale / bias
    o_ref     : (1, H*W, Cpad)  f32   output
    pbuf_ref  : (Next, Cpad)    bf16  zero-padded row-major padded image
    """
    Wp, Npad, ext, M, Next = _geom(H, W)
    # Flat-row offset of tap (dy, dx) relative to the output pixel's row.
    offs = [(dy - 1) * Wp + (dx - 1) for dy in range(3) for dx in range(3)]

    # Hoist BN scale/bias loads (broadcast against (W, Cpad) chunks below).
    s1 = s1_ref[...]
    b1 = b1_ref[...]
    s2 = s2_ref[...]
    b2 = b2_ref[...]

    def conv3x3(w_ref):
        # 9 shifted-row matmuls: each tap is a (M, Cpad) x (Cpad, Cpad) bf16
        # MXU matmul with f32 accumulation.  Slices only move along the
        # sublane (row) axis; channels stay whole vregs in the lane dim.
        acc = jnp.zeros((M, Cpad), jnp.float32)
        for t, off in enumerate(offs):
            lhs = pbuf_ref[pl.ds(ext + off, M), :]
            acc = acc + jnp.dot(lhs, w_ref[t],
                                preferred_element_type=jnp.float32)
        return acc

    # Stage 0: build the zero-padded, row-major image of x in VMEM.  The halo
    # only ever exists in VMEM — no wrapper-side jnp.pad / extra HBM pass.
    pbuf_ref[...] = jnp.zeros_like(pbuf_ref)
    for y in range(H):
        dst = ext + (y + 1) * Wp + 1
        pbuf_ref[pl.ds(dst, W), :] = x_ref[0, pl.ds(y * W, W), :]

    # conv1 -> bn1 -> relu, written back into pbuf as the padded out1.
    # Only pixel rows are written, so the padding ring stays exactly zero.
    acc1 = conv3x3(w1_ref)
    for y in range(H):
        src = (y + 1) * Wp + 1
        chunk = jnp.maximum(acc1[src:src + W, :] * s1 + b1, 0.0)
        pbuf_ref[pl.ds(ext + src, W), :] = chunk.astype(pbuf_ref.dtype)

    # conv2 -> bn2 -> + identity residual (from the VMEM-resident input
    # block, no extra DMA) -> relu -> lane-dense aligned output store.
    acc2 = conv3x3(w2_ref)
    for y in range(H):
        src = (y + 1) * Wp + 1
        res = x_ref[0, pl.ds(y * W, W), :].astype(jnp.float32)
        out = jnp.maximum(acc2[src:src + W, :] * s2 + b2 + res, 0.0)
        o_ref[0, pl.ds(y * W, W), :] = out.astype(o_ref.dtype)


def _fold_bn(gamma, beta, mean, var, eps=1e-5):
    scale = gamma / jnp.sqrt(var + eps)
    bias = beta - mean * scale
    return scale, bias


def _pad_channels_2d(v, Cpad):
    C = v.shape[0]
    return jnp.pad(v, (0, Cpad - C)).reshape(1, Cpad).astype(jnp.float32)


def _prep_weight(w_hwio, Cpad):
    """(3, 3, Cin, Cout) HWIO -> (9, Cpad, Cpad) bf16, zero-padded channels."""
    kh, kw, Cin, Cout = w_hwio.shape
    w = jnp.pad(w_hwio, ((0, 0), (0, 0), (0, Cpad - Cin), (0, Cpad - Cout)))
    return w.reshape(kh * kw, Cpad, Cpad).astype(jnp.bfloat16)


def basic_block_forward(x_nchw, params):
    """BasicBlock forward (stride=1, identity shortcut). NCHW in / NCHW out."""
    # TODO(synk): a production model would stay NHWC end-to-end and drop these
    # transposes; they are only here to match the PyTorch NCHW interface.
    x = jnp.transpose(x_nchw, (0, 2, 3, 1))                  # NCHW -> NHWC
    N, H, W, C = x.shape
    Cpad = _round_up(C, 128)                                 # lane-dense C
    _, _, _, _, Next = _geom(H, W)

    s1, b1 = _fold_bn(params["bn1_gamma"], params["bn1_beta"],
                      params["bn1_mean"], params["bn1_var"])
    s2, b2 = _fold_bn(params["bn2_gamma"], params["bn2_beta"],
                      params["bn2_mean"], params["bn2_var"])

    # Lane-dense, bf16 activations: (N, H*W, Cpad).  The reshape is free
    # layout plumbing; there is no spatial pre-padding pass.
    x_flat = jnp.pad(x, ((0, 0), (0, 0), (0, 0), (0, Cpad - C)))
    x_flat = x_flat.reshape(N, H * W, Cpad).astype(jnp.bfloat16)

    kernel = partial(_basic_block_kernel, H=H, W=W, Cpad=Cpad)
    out = pl.pallas_call(
        kernel,
        out_shape=jax.ShapeDtypeStruct((N, H * W, Cpad), jnp.float32),
        grid=(N,),
        in_specs=[
            pl.BlockSpec((1, H * W, Cpad), lambda n: (n, 0, 0)),   # x
            pl.BlockSpec((9, Cpad, Cpad), lambda n: (0, 0, 0)),    # w1
            pl.BlockSpec((9, Cpad, Cpad), lambda n: (0, 0, 0)),    # w2
            pl.BlockSpec((1, Cpad), lambda n: (0, 0)),             # s1
            pl.BlockSpec((1, Cpad), lambda n: (0, 0)),             # b1
            pl.BlockSpec((1, Cpad), lambda n: (0, 0)),             # s2
            pl.BlockSpec((1, Cpad), lambda n: (0, 0)),             # b2
        ],
        out_specs=pl.BlockSpec((1, H * W, Cpad), lambda n: (n, 0, 0)),
        scratch_shapes=[pltpu.VMEM((Next, Cpad), jnp.bfloat16)],
        compiler_params=pltpu.CompilerParams(
            dimension_semantics=("parallel",)),
    )(x_flat,
      _prep_weight(params["w1"], Cpad), _prep_weight(params["w2"], Cpad),
      _pad_channels_2d(s1, Cpad), _pad_channels_2d(b1, Cpad),
      _pad_channels_2d(s2, Cpad), _pad_channels_2d(b2, Cpad))

    out = out.reshape(N, H, W, Cpad)[..., :C]                # drop channel pad
    return jnp.transpose(out, (0, 3, 1, 2))                  # NHWC -> NCHW


def _reference_basic_block(x_nchw, params):
    """Pure-JAX f32 reference for correctness checking."""
    x = jnp.transpose(x_nchw, (0, 2, 3, 1)).astype(jnp.float32)

    def conv(v, w):
        return lax.conv_general_dilated(
            v, w, window_strides=(1, 1), padding="SAME",
            dimension_numbers=("NHWC", "HWIO", "NHWC"))

    s1, b1 = _fold_bn(params["bn1_gamma"], params["bn1_beta"],
                      params["bn1_mean"], params["bn1_var"])
    s2, b2 = _fold_bn(params["bn2_gamma"], params["bn2_beta"],
                      params["bn2_mean"], params["bn2_var"])
    o1 = jnp.maximum(conv(x, params["w1"]) * s1 + b1, 0.0)
    o2 = jnp.maximum(conv(o1, params["w2"]) * s2 + b2 + x, 0.0)
    return jnp.transpose(o2, (0, 3, 1, 2))


def make_params(key, inplanes, planes):
    ks = jax.random.split(key, 10)
    # PyTorch conv weights are OIHW -> store as HWIO for the NHWC kernel.
    w1 = 0.1 * jax.random.normal(ks[0], (planes, inplanes, 3, 3), jnp.float32)
    w2 = 0.1 * jax.random.normal(ks[1], (planes, planes, 3, 3), jnp.float32)
    return {
        "w1": jnp.transpose(w1, (2, 3, 1, 0)),               # (3,3,Cin,Cout)
        "w2": jnp.transpose(w2, (2, 3, 1, 0)),
        "bn1_gamma": 1.0 + 0.1 * jax.random.normal(ks[2], (planes,), jnp.float32),
        "bn1_beta": 0.05 * jax.random.normal(ks[3], (planes,), jnp.float32),
        "bn1_mean": 0.1 * jax.random.normal(ks[4], (planes,), jnp.float32),
        "bn1_var": 1.0 + 0.1 * jnp.abs(jax.random.normal(ks[5], (planes,), jnp.float32)),
        "bn2_gamma": 1.0 + 0.1 * jax.random.normal(ks[6], (planes,), jnp.float32),
        "bn2_beta": 0.05 * jax.random.normal(ks[7], (planes,), jnp.float32),
        "bn2_mean": 0.1 * jax.random.normal(ks[8], (planes,), jnp.float32),
        "bn2_var": 1.0 + 0.1 * jnp.abs(jax.random.normal(ks[9], (planes,), jnp.float32)),
    }


if __name__ == "__main__":
    key = jax.random.PRNGKey(0)
    k_x, k_p = jax.random.split(key)

    N, C, H, W = 2, 4, 16, 16          # inplanes = planes = 4, stride = 1
    x = jax.random.normal(k_x, (N, C, H, W), jnp.float32)
    params = make_params(k_p, inplanes=C, planes=C)

    out = jax.jit(basic_block_forward)(x, params)
    out = jax.block_until_ready(out)

    ref = _reference_basic_block(x, params)

    assert out.shape == (N, C, H, W)
    assert bool(jnp.all(out >= 0.0))                      # final ReLU
    # bf16 MXU operands -> loose tolerance vs the f32 reference.
    assert bool(jnp.allclose(out, ref, atol=1e-1, rtol=1e-1)), (
        "max abs err %f" % float(jnp.max(jnp.abs(out - ref))))
    print("KERNEL_OK")
</pallas_src>

<mosaic_0001>
module attributes {stable_mosaic.version = 11 : i64} {
  func.func @_basic_block_kernel(%arg0: i32, %arg1: memref<1x256x128xbf16, #tpu.memory_space<vmem>>, %arg2: memref<9x128x128xbf16, #tpu.memory_space<vmem>>, %arg3: memref<9x128x128xbf16, #tpu.memory_space<vmem>>, %arg4: memref<1x128xf32, #tpu.memory_space<vmem>>, %arg5: memref<1x128xf32, #tpu.memory_space<vmem>>, %arg6: memref<1x128xf32, #tpu.memory_space<vmem>>, %arg7: memref<1x128xf32, #tpu.memory_space<vmem>>, %arg8: memref<1x256x128xf32, #tpu.memory_space<vmem>>, %arg9: memref<368x128xbf16, #tpu.memory_space<vmem>>) attributes {dimension_semantics = [#tpu.dimension_semantics<parallel>], iteration_bounds = array<i64: 2>, scalar_prefetch = 0 : i64, scratch_operands = 1 : i64, tpu.core_type = #tpu.core_type<tc>, window_params = [{transform_indices = @transform_0, window_bounds = array<i64: 1, 256, 128>}, {pipeline_mode = #tpu.pipeline_mode<synchronous>, transform_indices = @transform_1, window_bounds = array<i64: 9, 128, 128>}, {pipeline_mode = #tpu.pipeline_mode<synchronous>, transform_indices = @transform_2, window_bounds = array<i64: 9, 128, 128>}, {pipeline_mode = #tpu.pipeline_mode<synchronous>, transform_indices = @transform_3, window_bounds = array<i64: 1, 128>}, {pipeline_mode = #tpu.pipeline_mode<synchronous>, transform_indices = @transform_4, window_bounds = array<i64: 1, 128>}, {pipeline_mode = #tpu.pipeline_mode<synchronous>, transform_indices = @transform_5, window_bounds = array<i64: 1, 128>}, {pipeline_mode = #tpu.pipeline_mode<synchronous>, transform_indices = @transform_6, window_bounds = array<i64: 1, 128>}, {transform_indices = @transform_7, window_bounds = array<i64: 1, 256, 128>}]} {
    %c0 = arith.constant 0 : index
    %c0_0 = arith.constant 0 : index
    %0 = vector.load %arg4[%c0, %c0_0] : memref<1x128xf32, #tpu.memory_space<vmem>>, vector<1x128xf32>
    %c0_1 = arith.constant 0 : index
    %c0_2 = arith.constant 0 : index
    %1 = vector.load %arg5[%c0_1, %c0_2] : memref<1x128xf32, #tpu.memory_space<vmem>>, vector<1x128xf32>
    %c0_3 = arith.constant 0 : index
    %c0_4 = arith.constant 0 : index
    %2 = vector.load %arg6[%c0_3, %c0_4] : memref<1x128xf32, #tpu.memory_space<vmem>>, vector<1x128xf32>
    %c0_5 = arith.constant 0 : index
    %c0_6 = arith.constant 0 : index
    %3 = vector.load %arg7[%c0_5, %c0_6] : memref<1x128xf32, #tpu.memory_space<vmem>>, vector<1x128xf32>
    %cst = arith.constant 0.000000e+00 : bf16
    %4 = vector.broadcast %cst : bf16 to vector<368x128xbf16>
    %c0_7 = arith.constant 0 : index
    %c0_8 = arith.constant 0 : index
    %5 = vector.load %arg9[%c0_7, %c0_8] : memref<368x128xbf16, #tpu.memory_space<vmem>>, vector<368x128xbf16>
    tpu.vector_store %arg9[%c0_7, %c0_8], %4 {strides = array<i32>} : memref<368x128xbf16, #tpu.memory_space<vmem>>, vector<368x128xbf16>,
    %c0_9 = arith.constant 0 : index
    %c0_10 = arith.constant 0 : index
    %c0_11 = arith.constant 0 : index
    %6 = vector.load %arg1[%c0_9, %c0_10, %c0_11] : memref<1x256x128xbf16, #tpu.memory_space<vmem>>, vector<1x16x128xbf16>
    %7 = vector.shape_cast %6 : vector<1x16x128xbf16> to vector<16x128xbf16>
    %c38 = arith.constant 38 : index
    %c0_12 = arith.constant 0 : index
    %8 = vector.load %arg9[%c38, %c0_12] : memref<368x128xbf16, #tpu.memory_space<vmem>>, vector<16x128xbf16>
    tpu.vector_store %arg9[%c38, %c0_12], %7 {strides = array<i32>} : memref<368x128xbf16, #tpu.memory_space<vmem>>, vector<16x128xbf16>,
    %c0_13 = arith.constant 0 : index
    %c16 = arith.constant 16 : index
    %c0_14 = arith.constant 0 : index
    %9 = vector.load %arg1[%c0_13, %c16, %c0_14] : memref<1x256x128xbf16, #tpu.memory_space<vmem>>, vector<1x16x128xbf16>
    %10 = vector.shape_cast %9 : vector<1x16x128xbf16> to vector<16x128xbf16>
    %c56 = arith.constant 56 : index
    %c0_15 = arith.constant 0 : index
    %11 = vector.load %arg9[%c56, %c0_15] : memref<368x128xbf16, #tpu.memory_space<vmem>>, vector<16x128xbf16>
    tpu.vector_store %arg9[%c56, %c0_15], %10 {strides = array<i32>} : memref<368x128xbf16, #tpu.memory_space<vmem>>, vector<16x128xbf16>,
    %c0_16 = arith.constant 0 : index
    %c32 = arith.constant 32 : index
    %c0_17 = arith.constant 0 : index
    %12 = vector.load %arg1[%c0_16, %c32, %c0_17] : memref<1x256x128xbf16, #tpu.memory_space<vmem>>, vector<1x16x128xbf16>
    %13 = vector.shape_cast %12 : vector<1x16x128xbf16> to vector<16x128xbf16>
    %c74 = arith.constant 74 : index
    %c0_18 = arith.constant 0 : index
    %14 = vector.load %arg9[%c74, %c0_18] : memref<368x128xbf16, #tpu.memory_space<vmem>>, vector<16x128xbf16>
    tpu.vector_store %arg9[%c74, %c0_18], %13 {strides = array<i32>} : memref<368x128xbf16, #tpu.memory_space<vmem>>, vector<16x128xbf16>,
    %c0_19 = arith.constant 0 : index
    %c48 = arith.constant 48 : index
    %c0_20 = arith.constant 0 : index
    %15 = vector.load %arg1[%c0_19, %c48, %c0_20] : memref<1x256x128xbf16, #tpu.memory_space<vmem>>, vector<1x16x128xbf16>
    %16 = vector.shape_cast %15 : vector<1x16x128xbf16> to vector<16x128xbf16>
    %c92 = arith.constant 92 : index
    %c0_21 = arith.constant 0 : index
    %17 = vector.load %arg9[%c92, %c0_21] : memref<368x128xbf16, #tpu.memory_space<vmem>>, vector<16x128xbf16>
    tpu.vector_store %arg9[%c92, %c0_21], %16 {strides = array<i32>} : memref<368x128xbf16, #tpu.memory_space<vmem>>, vector<16x128xbf16>,
    %c0_22 = arith.constant 0 : index
    %c64 = arith.constant 64 : index
    %c0_23 = arith.constant 0 : index
    %18 = vector.load %arg1[%c0_22, %c64, %c0_23] : memref<1x256x128xbf16, #tpu.memory_space<vmem>>, vector<1x16x128xbf16>
    %19 = vector.shape_cast %18 : vector<1x16x128xbf16> to vector<16x128xbf16>
    %c110 = arith.constant 110 : index
    %c0_24 = arith.constant 0 : index
    %20 = vector.load %arg9[%c110, %c0_24] : memref<368x128xbf16, #tpu.memory_space<vmem>>, vector<16x128xbf16>
    tpu.vector_store %arg9[%c110, %c0_24], %19 {strides = array<i32>} : memref<368x128xbf16, #tpu.memory_space<vmem>>, vector<16x128xbf16>,
    %c0_25 = arith.constant 0 : index
    %c80 = arith.constant 80 : index
    %c0_26 = arith.constant 0 : index
    %21 = vector.load %arg1[%c0_25, %c80, %c0_26] : memref<1x256x128xbf16, #tpu.memory_space<vmem>>, vector<1x16x128xbf16>
    %22 = vector.shape_cast %21 : vector<1x16x128xbf16> to vector<16x128xbf16>
    %c128 = arith.constant 128 : index
    %c0_27 = arith.constant 0 : index
    %23 = vector.load %arg9[%c128, %c0_27] : memref<368x128xbf16, #tpu.memory_space<vmem>>, vector<16x128xbf16>
    tpu.vector_store %arg9[%c128, %c0_27], %22 {strides = array<i32>} : memref<368x128xbf16, #tpu.memory_space<vmem>>, vector<16x128xbf16>,
    %c0_28 = arith.constant 0 : index
    %c96 = arith.constant 96 : index
    %c0_29 = arith.constant 0 : index
    %24 = vector.load %arg1[%c0_28, %c96, %c0_29] : memref<1x256x128xbf16, #tpu.memory_space<vmem>>, vector<1x16x128xbf16>
    %25 = vector.shape_cast %24 : vector<1x16x128xbf16> to vector<16x128xbf16>
    %c146 = arith.constant 146 : index
    %c0_30 = arith.constant 0 : index
    %26 = vector.load %arg9[%c146, %c0_30] : memref<368x128xbf16, #tpu.memory_space<vmem>>, vector<16x128xbf16>
    tpu.vector_store %arg9[%c146, %c0_30], %25 {strides = array<i32>} : memref<368x128xbf16, #tpu.memory_space<vmem>>, vector<16x128xbf16>,
    %c0_31 = arith.constant 0 : index
    %c112 = arith.constant 112 : index
    %c0_32 = arith.constant 0 : index
    %27 = vector.load %arg1[%c0_31, %c112, %c0_32] : memref<1x256x128xbf16, #tpu.memory_space<vmem>>, vector<1x16x128xbf16>
    %28 = vector.shape_cast %27 : vector<1x16x128xbf16> to vector<16x128xbf16>
    %c164 = arith.constant 164 : index
    %c0_33 = arith.constant 0 : index
    %29 = vector.load %arg9[%c164, %c0_33] : memref<368x128xbf16, #tpu.memory_space<vmem>>, vector<16x128xbf16>
    tpu.vector_store %arg9[%c164, %c0_33], %28 {strides = array<i32>} : memref<368x128xbf16, #tpu.memory_space<vmem>>, vector<16x128xbf16>,
    %c0_34 = arith.constant 0 : index
    %c128_35 = arith.constant 128 : index
    %c0_36 = arith.constant 0 : index
    %30 = vector.load %arg1[%c0_34, %c128_35, %c0_36] : memref<1x256x128xbf16, #tpu.memory_space<vmem>>, vector<1x16x128xbf16>
    %31 = vector.shape_cast %30 : vector<1x16x128xbf16> to vector<16x128xbf16>
    %c182 = arith.constant 182 : index
    %c0_37 = arith.constant 0 : index
    %32 = vector.load %arg9[%c182, %c0_37] : memref<368x128xbf16, #tpu.memory_space<vmem>>, vector<16x128xbf16>
    tpu.vector_store %arg9[%c182, %c0_37], %31 {strides = array<i32>} : memref<368x128xbf16, #tpu.memory_space<vmem>>, vector<16x128xbf16>,
    %c0_38 = arith.constant 0 : index
    %c144 = arith.constant 144 : index
    %c0_39 = arith.constant 0 : index
    %33 = vector.load %arg1[%c0_38, %c144, %c0_39] : memref<1x256x128xbf16, #tpu.memory_space<vmem>>, vector<1x16x128xbf16>
    %34 = vector.shape_cast %33 : vector<1x16x128xbf16> to vector<16x128xbf16>
    %c200 = arith.constant 200 : index
    %c0_40 = arith.constant 0 : index
    %35 = vector.load %arg9[%c200, %c0_40] : memref<368x128xbf16, #tpu.memory_space<vmem>>, vector<16x128xbf16>
    tpu.vector_store %arg9[%c200, %c0_40], %34 {strides = array<i32>} : memref<368x128xbf16, #tpu.memory_space<vmem>>, vector<16x128xbf16>,
    %c0_41 = arith.constant 0 : index
    %c160 = arith.constant 160 : index
    %c0_42 = arith.constant 0 : index
    %36 = vector.load %arg1[%c0_41, %c160, %c0_42] : memref<1x256x128xbf16, #tpu.memory_space<vmem>>, vector<1x16x128xbf16>
    %37 = vector.shape_cast %36 : vector<1x16x128xbf16> to vector<16x128xbf16>
    %c218 = arith.constant 218 : index
    %c0_43 = arith.constant 0 : index
    %38 = vector.load %arg9[%c218, %c0_43] : memref<368x128xbf16, #tpu.memory_space<vmem>>, vector<16x128xbf16>
    tpu.vector_store %arg9[%c218, %c0_43], %37 {strides = array<i32>} : memref<368x128xbf16, #tpu.memory_space<vmem>>, vector<16x128xbf16>,
    %c0_44 = arith.constant 0 : index
    %c176 = arith.constant 176 : index
    %c0_45 = arith.constant 0 : index
    %39 = vector.load %arg1[%c0_44, %c176, %c0_45] : memref<1x256x128xbf16, #tpu.memory_space<vmem>>, vector<1x16x128xbf16>
    %40 = vector.shape_cast %39 : vector<1x16x128xbf16> to vector<16x128xbf16>
    %c236 = arith.constant 236 : index
    %c0_46 = arith.constant 0 : index
    %41 = vector.load %arg9[%c236, %c0_46] : memref<368x128xbf16, #tpu.memory_space<vmem>>, vector<16x128xbf16>
    tpu.vector_store %arg9[%c236, %c0_46], %40 {strides = array<i32>} : memref<368x128xbf16, #tpu.memory_space<vmem>>, vector<16x128xbf16>,
    %c0_47 = arith.constant 0 : index
    %c192 = arith.constant 192 : index
    %c0_48 = arith.constant 0 : index
    %42 = vector.load %arg1[%c0_47, %c192, %c0_48] : memref<1x256x128xbf16, #tpu.memory_space<vmem>>, vector<1x16x128xbf16>
    %43 = vector.shape_cast %42 : vector<1x16x128xbf16> to vector<16x128xbf16>
    %c254 = arith.constant 254 : index
    %c0_49 = arith.constant 0 : index
    %44 = vector.load %arg9[%c254, %c0_49] : memref<368x128xbf16, #tpu.memory_space<vmem>>, vector<16x128xbf16>
    tpu.vector_store %arg9[%c254, %c0_49], %43 {strides = array<i32>} : memref<368x128xbf16, #tpu.memory_space<vmem>>, vector<16x128xbf16>,
    %c0_50 = arith.constant 0 : index
    %c208 = arith.constant 208 : index
    %c0_51 = arith.constant 0 : index
    %45 = vector.load %arg1[%c0_50, %c208, %c0_51] : memref<1x256x128xbf16, #tpu.memory_space<vmem>>, vector<1x16x128xbf16>
    %46 = vector.shape_cast %45 : vector<1x16x128xbf16> to vector<16x128xbf16>
    %c272 = arith.constant 272 : index
    %c0_52 = arith.constant 0 : index
    %47 = vector.load %arg9[%c272, %c0_52] : memref<368x128xbf16, #tpu.memory_space<vmem>>, vector<16x128xbf16>
    tpu.vector_store %arg9[%c272, %c0_52], %46 {strides = array<i32>} : memref<368x128xbf16, #tpu.memory_space<vmem>>, vector<16x128xbf16>,
    %c0_53 = arith.constant 0 : index
    %c224 = arith.constant 224 : index
    %c0_54 = arith.constant 0 : index
    %48 = vector.load %arg1[%c0_53, %c224, %c0_54] : memref<1x256x128xbf16, #tpu.memory_space<vmem>>, vector<1x16x128xbf16>
    %49 = vector.shape_cast %48 : vector<1x16x128xbf16> to vector<16x128xbf16>
    %c290 = arith.constant 290 : index
    %c0_55 = arith.constant 0 : index
    %50 = vector.load %arg9[%c290, %c0_55] : memref<368x128xbf16, #tpu.memory_space<vmem>>, vector<16x128xbf16>
    tpu.vector_store %arg9[%c290, %c0_55], %49 {strides = array<i32>} : memref<368x128xbf16, #tpu.memory_space<vmem>>, vector<16x128xbf16>,
    %c0_56 = arith.constant 0 : index
    %c240 = arith.constant 240 : index
    %c0_57 = arith.constant 0 : index
    %51 = vector.load %arg1[%c0_56, %c240, %c0_57] : memref<1x256x128xbf16, #tpu.memory_space<vmem>>, vector<1x16x128xbf16>
    %52 = vector.shape_cast %51 : vector<1x16x128xbf16> to vector<16x128xbf16>
    %c308 = arith.constant 308 : index
    %c0_58 = arith.constant 0 : index
    %53 = vector.load %arg9[%c308, %c0_58] : memref<368x128xbf16, #tpu.memory_space<vmem>>, vector<16x128xbf16>
    tpu.vector_store %arg9[%c308, %c0_58], %52 {strides = array<i32>} : memref<368x128xbf16, #tpu.memory_space<vmem>>, vector<16x128xbf16>,
    %cst_59 = arith.constant 0.000000e+00 : f32
    %54 = vector.broadcast %cst_59 : f32 to vector<328x128xf32>
    %c0_60 = arith.constant 0 : index
    %c0_61 = arith.constant 0 : index
    %55 = vector.load %arg9[%c0_60, %c0_61] : memref<368x128xbf16, #tpu.memory_space<vmem>>, vector<328x128xbf16>
    %c0_62 = arith.constant 0 : index
    %c0_63 = arith.constant 0 : index
    %c0_64 = arith.constant 0 : index
    %56 = vector.load %arg2[%c0_62, %c0_63, %c0_64] : memref<9x128x128xbf16, #tpu.memory_space<vmem>>, vector<1x128x128xbf16>
    %57 = vector.shape_cast %56 : vector<1x128x128xbf16> to vector<128x128xbf16>
    %cst_65 = arith.constant dense<0.000000e+00> : vector<328x128xf32>
    %58 = tpu.matmul %55, %57, %cst_65 {dimension_numbers = #tpu.dot_dimension_numbers<[1], [0], [0], [1], [0, 0, 1, 1], [], []>} : vector<328x128xbf16>, vector<128x128xbf16>, vector<328x128xf32> -> vector<328x128xf32>
    %59 = arith.addf %54, %58 : vector<328x128xf32>
    %c1 = arith.constant 1 : index
    %c0_66 = arith.constant 0 : index
    %60 = vector.load %arg9[%c1, %c0_66] : memref<368x128xbf16, #tpu.memory_space<vmem>>, vector<328x128xbf16>
    %c1_67 = arith.constant 1 : index
    %c0_68 = arith.constant 0 : index
    %c0_69 = arith.constant 0 : index
    %61 = vector.load %arg2[%c1_67, %c0_68, %c0_69] : memref<9x128x128xbf16, #tpu.memory_space<vmem>>, vector<1x128x128xbf16>
    %62 = vector.shape_cast %61 : vector<1x128x128xbf16> to vector<128x128xbf16>
    %cst_70 = arith.constant dense<0.000000e+00> : vector<328x128xf32>
    %63 = tpu.matmul %60, %62, %cst_70 {dimension_numbers = #tpu.dot_dimension_numbers<[1], [0], [0], [1], [0, 0, 1, 1], [], []>} : vector<328x128xbf16>, vector<128x128xbf16>, vector<328x128xf32> -> vector<328x128xf32>
    %64 = arith.addf %59, %63 : vector<328x128xf32>
    %c2 = arith.constant 2 : index
    %c0_71 = arith.constant 0 : index
    %65 = vector.load %arg9[%c2, %c0_71] : memref<368x128xbf16, #tpu.memory_space<vmem>>, vector<328x128xbf16>
    %c2_72 = arith.constant 2 : index
    %c0_73 = arith.constant 0 : index
    %c0_74 = arith.constant 0 : index
    %66 = vector.load %arg2[%c2_72, %c0_73, %c0_74] : memref<9x128x128xbf16, #tpu.memory_space<vmem>>, vector<1x128x128xbf16>
    %67 = vector.shape_cast %66 : vector<1x128x128xbf16> to vector<128x128xbf16>
    %cst_75 = arith.constant dense<0.000000e+00> : vector<328x128xf32>
    %68 = tpu.matmul %65, %67, %cst_75 {dimension_numbers = #tpu.dot_dimension_numbers<[1], [0], [0], [1], [0, 0, 1, 1], [], []>} : vector<328x128xbf16>, vector<128x128xbf16>, vector<328x128xf32> -> vector<328x128xf32>
    %69 = arith.addf %64, %68 : vector<328x128xf32>
    %c18 = arith.constant 18 : index
    %c0_76 = arith.constant 0 : index
    %70 = vector.load %arg9[%c18, %c0_76] : memref<368x128xbf16, #tpu.memory_space<vmem>>, vector<328x128xbf16>
    %c3 = arith.constant 3 : index
    %c0_77 = arith.constant 0 : index
    %c0_78 = arith.constant 0 : index
    %71 = vector.load %arg2[%c3, %c0_77, %c0_78] : memref<9x128x128xbf16, #tpu.memory_space<vmem>>, vector<1x128x128xbf16>
    %72 = vector.shape_cast %71 : vector<1x128x128xbf16> to vector<128x128xbf16>
    %cst_79 = arith.constant dense<0.000000e+00> : vector<328x128xf32>
    %73 = tpu.matmul %70, %72, %cst_79 {dimension_numbers = #tpu.dot_dimension_numbers<[1], [0], [0], [1], [0, 0, 1, 1], [], []>} : vector<328x128xbf16>, vector<128x128xbf16>, vector<328x128xf32> -> vector<328x128xf32>
    %74 = arith.addf %69, %73 : vector<328x128xf32>
    %c19 = arith.constant 19 : index
    %c0_80 = arith.constant 0 : index
    %75 = vector.load %arg9[%c19, %c0_80] : memref<368x128xbf16, #tpu.memory_space<vmem>>, vector<328x128xbf16>
    %c4 = arith.constant 4 : index
    %c0_81 = arith.constant 0 : index
    %c0_82 = arith.constant 0 : index
    %76 = vector.load %arg2[%c4, %c0_81, %c0_82] : memref<9x128x128xbf16, #tpu.memory_space<vmem>>, vector<1x128x128xbf16>
    %77 = vector.shape_cast %76 : vector<1x128x128xbf16> to vector<128x128xbf16>
    %cst_83 = arith.constant dense<0.000000e+00> : vector<328x128xf32>
    %78 = tpu.matmul %75, %77, %cst_83 {dimension_numbers = #tpu.dot_dimension_numbers<[1], [0], [0], [1], [0, 0, 1, 1], [], []>} : vector<328x128xbf16>, vector<128x128xbf16>, vector<328x128xf32> -> vector<328x128xf32>
    %79 = arith.addf %74, %78 : vector<328x128xf32>
    %c20 = arith.constant 20 : index
    %c0_84 = arith.constant 0 : index
    %80 = vector.load %arg9[%c20, %c0_84] : memref<368x128xbf16, #tpu.memory_space<vmem>>, vector<328x128xbf16>
    %c5 = arith.constant 5 : index
    %c0_85 = arith.constant 0 : index
    %c0_86 = arith.constant 0 : index
    %81 = vector.load %arg2[%c5, %c0_85, %c0_86] : memref<9x128x128xbf16, #tpu.memory_space<vmem>>, vector<1x128x128xbf16>
    %82 = vector.shape_cast %81 : vector<1x128x128xbf16> to vector<128x128xbf16>
    %cst_87 = arith.constant dense<0.000000e+00> : vector<328x128xf32>
    %83 = tpu.matmul %80, %82, %cst_87 {dimension_numbers = #tpu.dot_dimension_numbers<[1], [0], [0], [1], [0, 0, 1, 1], [], []>} : vector<328x128xbf16>, vector<128x128xbf16>, vector<328x128xf32> -> vector<328x128xf32>
    %84 = arith.addf %79, %83 : vector<328x128xf32>
    %c36 = arith.constant 36 : index
    %c0_88 = arith.constant 0 : index
    %85 = vector.load %arg9[%c36, %c0_88] : memref<368x128xbf16, #tpu.memory_space<vmem>>, vector<328x128xbf16>
    %c6 = arith.constant 6 : index
    %c0_89 = arith.constant 0 : index
    %c0_90 = arith.constant 0 : index
    %86 = vector.load %arg2[%c6, %c0_89, %c0_90] : memref<9x128x128xbf16, #tpu.memory_space<vmem>>, vector<1x128x128xbf16>
    %87 = vector.shape_cast %86 : vector<1x128x128xbf16> to vector<128x128xbf16>
    %cst_91 = arith.constant dense<0.000000e+00> : vector<328x128xf32>
    %88 = tpu.matmul %85, %87, %cst_91 {dimension_numbers = #tpu.dot_dimension_numbers<[1], [0], [0], [1], [0, 0, 1, 1], [], []>} : vector<328x128xbf16>, vector<128x128xbf16>, vector<328x128xf32> -> vector<328x128xf32>
    %89 = arith.addf %84, %88 : vector<328x128xf32>
    %c37 = arith.constant 37 : index
    %c0_92 = arith.constant 0 : index
    %90 = vector.load %arg9[%c37, %c0_92] : memref<368x128xbf16, #tpu.memory_space<vmem>>, vector<328x128xbf16>
    %c7 = arith.constant 7 : index
    %c0_93 = arith.constant 0 : index
    %c0_94 = arith.constant 0 : index
    %91 = vector.load %arg2[%c7, %c0_93, %c0_94] : memref<9x128x128xbf16, #tpu.memory_space<vmem>>, vector<1x128x128xbf16>
    %92 = vector.shape_cast %91 : vector<1x128x128xbf16> to vector<128x128xbf16>
    %cst_95 = arith.constant dense<0.000000e+00> : vector<328x128xf32>
    %93 = tpu.matmul %90, %92, %cst_95 {dimension_numbers = #tpu.dot_dimension_numbers<[1], [0], [0], [1], [0, 0, 1, 1], [], []>} : vector<328x128xbf16>, vector<128x128xbf16>, vector<328x128xf32> -> vector<328x128xf32>
    %94 = arith.addf %89, %93 : vector<328x128xf32>
    %c38_96 = arith.constant 38 : index
    %c0_97 = arith.constant 0 : index
    %95 = vector.load %arg9[%c38_96, %c0_97] : memref<368x128xbf16, #tpu.memory_space<vmem>>, vector<328x128xbf16>
    %c8 = arith.constant 8 : index
    %c0_98 = arith.constant 0 : index
    %c0_99 = arith.constant 0 : index
    %96 = vector.load %arg2[%c8, %c0_98, %c0_99] : memref<9x128x128xbf16, #tpu.memory_space<vmem>>, vector<1x128x128xbf16>
    %97 = vector.shape_cast %96 : vector<1x128x128xbf16> to vector<128x128xbf16>
    %cst_100 = arith.constant dense<0.000000e+00> : vector<328x128xf32>
    %98 = tpu.matmul %95, %97, %cst_100 {dimension_numbers = #tpu.dot_dimension_numbers<[1], [0], [0], [1], [0, 0, 1, 1], [], []>} : vector<328x128xbf16>, vector<128x128xbf16>, vector<328x128xf32> -> vector<328x128xf32>
    %99 = arith.addf %94, %98 : vector<328x128xf32>
    %100 = vector.extract_strided_slice %99 {offsets = [19, 0], sizes = [16, 128], strides = [1, 1]} : vector<328x128xf32> to vector<16x128xf32>
    %101 = vector.broadcast %0 : vector<1x128xf32> to vector<16x128xf32>
    %102 = arith.mulf %100, %101 : vector<16x128xf32>
    %103 = vector.broadcast %1 : vector<1x128xf32> to vector<16x128xf32>
    %104 = arith.addf %102, %103 : vector<16x128xf32>
    %cst_101 = arith.constant 0.000000e+00 : f32
    %105 = vector.broadcast %cst_101 : f32 to vector<16x128xf32>
    %106 = arith.maximumf %104, %105 : vector<16x128xf32>
    %107 = arith.truncf %106 : vector<16x128xf32> to vector<16x128xbf16>
    %c38_102 = arith.constant 38 : index
    %c0_103 = arith.constant 0 : index
    %108 = vector.load %arg9[%c38_102, %c0_103] : memref<368x128xbf16, #tpu.memory_space<vmem>>, vector<16x128xbf16>
    tpu.vector_store %arg9[%c38_102, %c0_103], %107 {strides = array<i32>} : memref<368x128xbf16, #tpu.memory_space<vmem>>, vector<16x128xbf16>,
    %109 = vector.extract_strided_slice %99 {offsets = [37, 0], sizes = [16, 128], strides = [1, 1]} : vector<328x128xf32> to vector<16x128xf32>
    %110 = vector.broadcast %0 : vector<1x128xf32> to vector<16x128xf32>
    %111 = arith.mulf %109, %110 : vector<16x128xf32>
    %112 = vector.broadcast %1 : vector<1x128xf32> to vector<16x128xf32>
    %113 = arith.addf %111, %112 : vector<16x128xf32>
    %cst_104 = arith.constant 0.000000e+00 : f32
    %114 = vector.broadcast %cst_104 : f32 to vector<16x128xf32>
    %115 = arith.maximumf %113, %114 : vector<16x128xf32>
    %116 = arith.truncf %115 : vector<16x128xf32> to vector<16x128xbf16>
    %c56_105 = arith.constant 56 : index
    %c0_106 = arith.constant 0 : index
    %117 = vector.load %arg9[%c56_105, %c0_106] : memref<368x128xbf16, #tpu.memory_space<vmem>>, vector<16x128xbf16>
    tpu.vector_store %arg9[%c56_105, %c0_106], %116 {strides = array<i32>} : memref<368x128xbf16, #tpu.memory_space<vmem>>, vector<16x128xbf16>,
    %118 = vector.extract_strided_slice %99 {offsets = [55, 0], sizes = [16, 128], strides = [1, 1]} : vector<328x128xf32> to vector<16x128xf32>
    %119 = vector.broadcast %0 : vector<1x128xf32> to vector<16x128xf32>
    %120 = arith.mulf %118, %119 : vector<16x128xf32>
    %121 = vector.broadcast %1 : vector<1x128xf32> to vector<16x128xf32>
    %122 = arith.addf %120, %121 : vector<16x128xf32>
    %cst_107 = arith.constant 0.000000e+00 : f32
    %123 = vector.broadcast %cst_107 : f32 to vector<16x128xf32>
    %124 = arith.maximumf %122, %123 : vector<16x128xf32>
    %125 = arith.truncf %124 : vector<16x128xf32> to vector<16x128xbf16>
    %c74_108 = arith.constant 74 : index
    %c0_109 = arith.constant 0 : index
    %126 = vector.load %arg9[%c74_108, %c0_109] : memref<368x128xbf16, #tpu.memory_space<vmem>>, vector<16x128xbf16>
    tpu.vector_store %arg9[%c74_108, %c0_109], %125 {strides = array<i32>} : memref<368x128xbf16, #tpu.memory_space<vmem>>, vector<16x128xbf16>,
    %127 = vector.extract_strided_slice %99 {offsets = [73, 0], sizes = [16, 128], strides = [1, 1]} : vector<328x128xf32> to vector<16x128xf32>
    %128 = vector.broadcast %0 : vector<1x128xf32> to vector<16x128xf32>
    %129 = arith.mulf %127, %128 : vector<16x128xf32>
    %130 = vector.broadcast %1 : vector<1x128xf32> to vector<16x128xf32>
    %131 = arith.addf %129, %130 : vector<16x128xf32>
    %cst_110 = arith.constant 0.000000e+00 : f32
    %132 = vector.broadcast %cst_110 : f32 to vector<16x128xf32>
    %133 = arith.maximumf %131, %132 : vector<16x128xf32>
    %134 = arith.truncf %133 : vector<16x128xf32> to vector<16x128xbf16>
    %c92_111 = arith.constant 92 : index
    %c0_112 = arith.constant 0 : index
    %135 = vector.load %arg9[%c92_111, %c0_112] : memref<368x128xbf16, #tpu.memory_space<vmem>>, vector<16x128xbf16>
    tpu.vector_store %arg9[%c92_111, %c0_112], %134 {strides = array<i32>} : memref<368x128xbf16, #tpu.memory_space<vmem>>, vector<16x128xbf16>,
    %136 = vector.extract_strided_slice %99 {offsets = [91, 0], sizes = [16, 128], strides = [1, 1]} : vector<328x128xf32> to vector<16x128xf32>
    %137 = vector.broadcast %0 : vector<1x128xf32> to vector<16x128xf32>
    %138 = arith.mulf %136, %137 : vector<16x128xf32>
    %139 = vector.broadcast %1 : vector<1x128xf32> to vector<16x128xf32>
    %140 = arith.addf %138, %139 : vector<16x128xf32>
    %cst_113 = arith.constant 0.000000e+00 : f32
    %141 = vector.broadcast %cst_113 : f32 to vector<16x128xf32>
    %142 = arith.maximumf %140, %141 : vector<16x128xf32>
    %143 = arith.truncf %142 : vector<16x128xf32> to vector<16x128xbf16>
    %c110_114 = arith.constant 110 : index
    %c0_115 = arith.constant 0 : index
    %144 = vector.load %arg9[%c110_114, %c0_115] : memref<368x128xbf16, #tpu.memory_space<vmem>>, vector<16x128xbf16>
    tpu.vector_store %arg9[%c110_114, %c0_115], %143 {strides = array<i32>} : memref<368x128xbf16, #tpu.memory_space<vmem>>, vector<16x128xbf16>,
    %145 = vector.extract_strided_slice %99 {offsets = [109, 0], sizes = [16, 128], strides = [1, 1]} : vector<328x128xf32> to vector<16x128xf32>
    %146 = vector.broadcast %0 : vector<1x128xf32> to vector<16x128xf32>
    %147 = arith.mulf %145, %146 : vector<16x128xf32>
    %148 = vector.broadcast %1 : vector<1x128xf32> to vector<16x128xf32>
    %149 = arith.addf %147, %148 : vector<16x128xf32>
    %cst_116 = arith.constant 0.000000e+00 : f32
    %150 = vector.broadcast %cst_116 : f32 to vector<16x128xf32>
    %151 = arith.maximumf %149, %150 : vector<16x128xf32>
    %152 = arith.truncf %151 : vector<16x128xf32> to vector<16x128xbf16>
    %c128_117 = arith.constant 128 : index
    %c0_118 = arith.constant 0 : index
    %153 = vector.load %arg9[%c128_117, %c0_118] : memref<368x128xbf16, #tpu.memory_space<vmem>>, vector<16x128xbf16>
    tpu.vector_store %arg9[%c128_117, %c0_118], %152 {strides = array<i32>} : memref<368x128xbf16, #tpu.memory_space<vmem>>, vector<16x128xbf16>,
    %154 = vector.extract_strided_slice %99 {offsets = [127, 0], sizes = [16, 128], strides = [1, 1]} : vector<328x128xf32> to vector<16x128xf32>
    %155 = vector.broadcast %0 : vector<1x128xf32> to vector<16x128xf32>
    %156 = arith.mulf %154, %155 : vector<16x128xf32>
    %157 = vector.broadcast %1 : vector<1x128xf32> to vector<16x128xf32>
    %158 = arith.addf %156, %157 : vector<16x128xf32>
    %cst_119 = arith.constant 0.000000e+00 : f32
    %159 = vector.broadcast %cst_119 : f32 to vector<16x128xf32>
    %160 = arith.maximumf %158, %159 : vector<16x128xf32>
    %161 = arith.truncf %160 : vector<16x128xf32> to vector<16x128xbf16>
    %c146_120 = arith.constant 146 : index
    %c0_121 = arith.constant 0 : index
    %162 = vector.load %arg9[%c146_120, %c0_121] : memref<368x128xbf16, #tpu.memory_space<vmem>>, vector<16x128xbf16>
    tpu.vector_store %arg9[%c146_120, %c0_121], %161 {strides = array<i32>} : memref<368x128xbf16, #tpu.memory_space<vmem>>, vector<16x128xbf16>,
    %163 = vector.extract_strided_slice %99 {offsets = [145, 0], sizes = [16, 128], strides = [1, 1]} : vector<328x128xf32> to vector<16x128xf32>
    %164 = vector.broadcast %0 : vector<1x128xf32> to vector<16x128xf32>
    %165 = arith.mulf %163, %164 : vector<16x128xf32>
    %166 = vector.broadcast %1 : vector<1x128xf32> to vector<16x128xf32>
    %167 = arith.addf %165, %166 : vector<16x128xf32>
    %cst_122 = arith.constant 0.000000e+00 : f32
    %168 = vector.broadcast %cst_122 : f32 to vector<16x128xf32>
    %169 = arith.maximumf %167, %168 : vector<16x128xf32>
    %170 = arith.truncf %169 : vector<16x128xf32> to vector<16x128xbf16>
    %c164_123 = arith.constant 164 : index
    %c0_124 = arith.constant 0 : index
    %171 = vector.load %arg9[%c164_123, %c0_124] : memref<368x128xbf16, #tpu.memory_space<vmem>>, vector<16x128xbf16>
    tpu.vector_store %arg9[%c164_123, %c0_124], %170 {strides = array<i32>} : memref<368x128xbf16, #tpu.memory_space<vmem>>, vector<16x128xbf16>,
    %172 = vector.extract_strided_slice %99 {offsets = [163, 0], sizes = [16, 128], strides = [1, 1]} : vector<328x128xf32> to vector<16x128xf32>
    %173 = vector.broadcast %0 : vector<1x128xf32> to vector<16x128xf32>
    %174 = arith.mulf %172, %173 : vector<16x128xf32>
    %175 = vector.broadcast %1 : vector<1x128xf32> to vector<16x128xf32>
    %176 = arith.addf %174, %175 : vector<16x128xf32>
    %cst_125 = arith.constant 0.000000e+00 : f32
    %177 = vector.broadcast %cst_125 : f32 to vector<16x128xf32>
    %178 = arith.maximumf %176, %177 : vector<16x128xf32>
    %179 = arith.truncf %178 : vector<16x128xf32> to vector<16x128xbf16>
    %c182_126 = arith.constant 182 : index
    %c0_127 = arith.constant 0 : index
    %180 = vector.load %arg9[%c182_126, %c0_127] : memref<368x128xbf16, #tpu.memory_space<vmem>>, vector<16x128xbf16>
    tpu.vector_store %arg9[%c182_126, %c0_127], %179 {strides = array<i32>} : memref<368x128xbf16, #tpu.memory_space<vmem>>, vector<16x128xbf16>,
    %181 = vector.extract_strided_slice %99 {offsets = [181, 0], sizes = [16, 128], strides = [1, 1]} : vector<328x128xf32> to vector<16x128xf32>
    %182 = vector.broadcast %0 : vector<1x128xf32> to vector<16x128xf32>
    %183 = arith.mulf %181, %182 : vector<16x128xf32>
    %184 = vector.broadcast %1 : vector<1x128xf32> to vector<16x128xf32>
    %185 = arith.addf %183, %184 : vector<16x128xf32>
    %cst_128 = arith.constant 0.000000e+00 : f32
    %186 = vector.broadcast %cst_128 : f32 to vector<16x128xf32>
    %187 = arith.maximumf %185, %186 : vector<16x128xf32>
    %188 = arith.truncf %187 : vector<16x128xf32> to vector<16x128xbf16>
    %c200_129 = arith.constant 200 : index
    %c0_130 = arith.constant 0 : index
    %189 = vector.load %arg9[%c200_129, %c0_130] : memref<368x128xbf16, #tpu.memory_space<vmem>>, vector<16x128xbf16>
    tpu.vector_store %arg9[%c200_129, %c0_130], %188 {strides = array<i32>} : memref<368x128xbf16, #tpu.memory_space<vmem>>, vector<16x128xbf16>,
    %190 = vector.extract_strided_slice %99 {offsets = [199, 0], sizes = [16, 128], strides = [1, 1]} : vector<328x128xf32> to vector<16x128xf32>
    %191 = vector.broadcast %0 : vector<1x128xf32> to vector<16x128xf32>
    %192 = arith.mulf %190, %191 : vector<16x128xf32>
    %193 = vector.broadcast %1 : vector<1x128xf32> to vector<16x128xf32>
    %194 = arith.addf %192, %193 : vector<16x128xf32>
    %cst_131 = arith.constant 0.000000e+00 : f32
    %195 = vector.broadcast %cst_131 : f32 to vector<16x128xf32>
    %196 = arith.maximumf %194, %195 : vector<16x128xf32>
    %197 = arith.truncf %196 : vector<16x128xf32> to vector<16x128xbf16>
    %c218_132 = arith.constant 218 : index
    %c0_133 = arith.constant 0 : index
    %198 = vector.load %arg9[%c218_132, %c0_133] : memref<368x128xbf16, #tpu.memory_space<vmem>>, vector<16x128xbf16>
    tpu.vector_store %arg9[%c218_132, %c0_133], %197 {strides = array<i32>} : memref<368x128xbf16, #tpu.memory_space<vmem>>, vector<16x128xbf16>,
    %199 = vector.extract_strided_slice %99 {offsets = [217, 0], sizes = [16, 128], strides = [1, 1]} : vector<328x128xf32> to vector<16x128xf32>
    %200 = vector.broadcast %0 : vector<1x128xf32> to vector<16x128xf32>
    %201 = arith.mulf %199, %200 : vector<16x128xf32>
    %202 = vector.broadcast %1 : vector<1x128xf32> to vector<16x128xf32>
    %203 = arith.addf %201, %202 : vector<16x128xf32>
    %cst_134 = arith.constant 0.000000e+00 : f32
    %204 = vector.broadcast %cst_134 : f32 to vector<16x128xf32>
    %205 = arith.maximumf %203, %204 : vector<16x128xf32>
    %206 = arith.truncf %205 : vector<16x128xf32> to vector<16x128xbf16>
    %c236_135 = arith.constant 236 : index
    %c0_136 = arith.constant 0 : index
    %207 = vector.load %arg9[%c236_135, %c0_136] : memref<368x128xbf16, #tpu.memory_space<vmem>>, vector<16x128xbf16>
    tpu.vector_store %arg9[%c236_135, %c0_136], %206 {strides = array<i32>} : memref<368x128xbf16, #tpu.memory_space<vmem>>, vector<16x128xbf16>,
    %208 = vector.extract_strided_slice %99 {offsets = [235, 0], sizes = [16, 128], strides = [1, 1]} : vector<328x128xf32> to vector<16x128xf32>
    %209 = vector.broadcast %0 : vector<1x128xf32> to vector<16x128xf32>
    %210 = arith.mulf %208, %209 : vector<16x128xf32>
    %211 = vector.broadcast %1 : vector<1x128xf32> to vector<16x128xf32>
    %212 = arith.addf %210, %211 : vector<16x128xf32>
    %cst_137 = arith.constant 0.000000e+00 : f32
    %213 = vector.broadcast %cst_137 : f32 to vector<16x128xf32>
    %214 = arith.maximumf %212, %213 : vector<16x128xf32>
    %215 = arith.truncf %214 : vector<16x128xf32> to vector<16x128xbf16>
    %c254_138 = arith.constant 254 : index
    %c0_139 = arith.constant 0 : index
    %216 = vector.load %arg9[%c254_138, %c0_139] : memref<368x128xbf16, #tpu.memory_space<vmem>>, vector<16x128xbf16>
    tpu.vector_store %arg9[%c254_138, %c0_139], %215 {strides = array<i32>} : memref<368x128xbf16, #tpu.memory_space<vmem>>, vector<16x128xbf16>,
    %217 = vector.extract_strided_slice %99 {offsets = [253, 0], sizes = [16, 128], strides = [1, 1]} : vector<328x128xf32> to vector<16x128xf32>
    %218 = vector.broadcast %0 : vector<1x128xf32> to vector<16x128xf32>
    %219 = arith.mulf %217, %218 : vector<16x128xf32>
    %220 = vector.broadcast %1 : vector<1x128xf32> to vector<16x128xf32>
    %221 = arith.addf %219, %220 : vector<16x128xf32>
    %cst_140 = arith.constant 0.000000e+00 : f32
    %222 = vector.broadcast %cst_140 : f32 to vector<16x128xf32>
    %223 = arith.maximumf %221, %222 : vector<16x128xf32>
    %224 = arith.truncf %223 : vector<16x128xf32> to vector<16x128xbf16>
    %c272_141 = arith.constant 272 : index
    %c0_142 = arith.constant 0 : index
    %225 = vector.load %arg9[%c272_141, %c0_142] : memref<368x128xbf16, #tpu.memory_space<vmem>>, vector<16x128xbf16>
    tpu.vector_store %arg9[%c272_141, %c0_142], %224 {strides = array<i32>} : memref<368x128xbf16, #tpu.memory_space<vmem>>, vector<16x128xbf16>,
    %226 = vector.extract_strided_slice %99 {offsets = [271, 0], sizes = [16, 128], strides = [1, 1]} : vector<328x128xf32> to vector<16x128xf32>
    %227 = vector.broadcast %0 : vector<1x128xf32> to vector<16x128xf32>
    %228 = arith.mulf %226, %227 : vector<16x128xf32>
    %229 = vector.broadcast %1 : vector<1x128xf32> to vector<16x128xf32>
    %230 = arith.addf %228, %229 : vector<16x128xf32>
    %cst_143 = arith.constant 0.000000e+00 : f32
    %231 = vector.broadcast %cst_143 : f32 to vector<16x128xf32>
    %232 = arith.maximumf %230, %231 : vector<16x128xf32>
    %233 = arith.truncf %232 : vector<16x128xf32> to vector<16x128xbf16>
    %c290_144 = arith.constant 290 : index
    %c0_145 = arith.constant 0 : index
    %234 = vector.load %arg9[%c290_144, %c0_145] : memref<368x128xbf16, #tpu.memory_space<vmem>>, vector<16x128xbf16>
    tpu.vector_store %arg9[%c290_144, %c0_145], %233 {strides = array<i32>} : memref<368x128xbf16, #tpu.memory_space<vmem>>, vector<16x128xbf16>,
    %235 = vector.extract_strided_slice %99 {offsets = [289, 0], sizes = [16, 128], strides = [1, 1]} : vector<328x128xf32> to vector<16x128xf32>
    %236 = vector.broadcast %0 : vector<1x128xf32> to vector<16x128xf32>
    %237 = arith.mulf %235, %236 : vector<16x128xf32>
    %238 = vector.broadcast %1 : vector<1x128xf32> to vector<16x128xf32>
    %239 = arith.addf %237, %238 : vector<16x128xf32>
    %cst_146 = arith.constant 0.000000e+00 : f32
    %240 = vector.broadcast %cst_146 : f32 to vector<16x128xf32>
    %241 = arith.maximumf %239, %240 : vector<16x128xf32>
    %242 = arith.truncf %241 : vector<16x128xf32> to vector<16x128xbf16>
    %c308_147 = arith.constant 308 : index
    %c0_148 = arith.constant 0 : index
    %243 = vector.load %arg9[%c308_147, %c0_148] : memref<368x128xbf16, #tpu.memory_space<vmem>>, vector<16x128xbf16>
    tpu.vector_store %arg9[%c308_147, %c0_148], %242 {strides = array<i32>} : memref<368x128xbf16, #tpu.memory_space<vmem>>, vector<16x128xbf16>,
    %cst_149 = arith.constant 0.000000e+00 : f32
    %244 = vector.broadcast %cst_149 : f32 to vector<328x128xf32>
    %c0_150 = arith.constant 0 : index
    %c0_151 = arith.constant 0 : index
    %245 = vector.load %arg9[%c0_150, %c0_151] : memref<368x128xbf16, #tpu.memory_space<vmem>>, vector<328x128xbf16>
    %c0_152 = arith.constant 0 : index
    %c0_153 = arith.constant 0 : index
    %c0_154 = arith.constant 0 : index
    %246 = vector.load %arg3[%c0_152, %c0_153, %c0_154] : memref<9x128x128xbf16, #tpu.memory_space<vmem>>, vector<1x128x128xbf16>
    %247 = vector.shape_cast %246 : vector<1x128x128xbf16> to vector<128x128xbf16>
    %cst_155 = arith.constant dense<0.000000e+00> : vector<328x128xf32>
    %248 = tpu.matmul %245, %247, %cst_155 {dimension_numbers = #tpu.dot_dimension_numbers<[1], [0], [0], [1], [0, 0, 1, 1], [], []>} : vector<328x128xbf16>, vector<128x128xbf16>, vector<328x128xf32> -> vector<328x128xf32>
    %249 = arith.addf %244, %248 : vector<328x128xf32>
    %c1_156 = arith.constant 1 : index
    %c0_157 = arith.constant 0 : index
    %250 = vector.load %arg9[%c1_156, %c0_157] : memref<368x128xbf16, #tpu.memory_space<vmem>>, vector<328x128xbf16>
    %c1_158 = arith.constant 1 : index
    %c0_159 = arith.constant 0 : index
    %c0_160 = arith.constant 0 : index
    %251 = vector.load %arg3[%c1_158, %c0_159, %c0_160] : memref<9x128x128xbf16, #tpu.memory_space<vmem>>, vector<1x128x128xbf16>
    %252 = vector.shape_cast %251 : vector<1x128x128xbf16> to vector<128x128xbf16>
    %cst_161 = arith.constant dense<0.000000e+00> : vector<328x128xf32>
    %253 = tpu.matmul %250, %252, %cst_161 {dimension_numbers = #tpu.dot_dimension_numbers<[1], [0], [0], [1], [0, 0, 1, 1], [], []>} : vector<328x128xbf16>, vector<128x128xbf16>, vector<328x128xf32> -> vector<328x128xf32>
    %254 = arith.addf %249, %253 : vector<328x128xf32>
    %c2_162 = arith.constant 2 : index
    %c0_163 = arith.constant 0 : index
    %255 = vector.load %arg9[%c2_162, %c0_163] : memref<368x128xbf16, #tpu.memory_space<vmem>>, vector<328x128xbf16>
    %c2_164 = arith.constant 2 : index
    %c0_165 = arith.constant 0 : index
    %c0_166 = arith.constant 0 : index
    %256 = vector.load %arg3[%c2_164, %c0_165, %c0_166] : memref<9x128x128xbf16, #tpu.memory_space<vmem>>, vector<1x128x128xbf16>
    %257 = vector.shape_cast %256 : vector<1x128x128xbf16> to vector<128x128xbf16>
    %cst_167 = arith.constant dense<0.000000e+00> : vector<328x128xf32>
    %258 = tpu.matmul %255, %257, %cst_167 {dimension_numbers = #tpu.dot_dimension_numbers<[1], [0], [0], [1], [0, 0, 1, 1], [], []>} : vector<328x128xbf16>, vector<128x128xbf16>, vector<328x128xf32> -> vector<328x128xf32>
    %259 = arith.addf %254, %258 : vector<328x128xf32>
    %c18_168 = arith.constant 18 : index
    %c0_169 = arith.constant 0 : index
    %260 = vector.load %arg9[%c18_168, %c0_169] : memref<368x128xbf16, #tpu.memory_space<vmem>>, vector<328x128xbf16>
    %c3_170 = arith.constant 3 : index
    %c0_171 = arith.constant 0 : index
    %c0_172 = arith.constant 0 : index
    %261 = vector.load %arg3[%c3_170, %c0_171, %c0_172] : memref<9x128x128xbf16, #tpu.memory_space<vmem>>, vector<1x128x128xbf16>
    %262 = vector.shape_cast %261 : vector<1x128x128xbf16> to vector<128x128xbf16>
    %cst_173 = arith.constant dense<0.000000e+00> : vector<328x128xf32>
    %263 = tpu.matmul %260, %262, %cst_173 {dimension_numbers = #tpu.dot_dimension_numbers<[1], [0], [0], [1], [0, 0, 1, 1], [], []>} : vector<328x128xbf16>, vector<128x128xbf16>, vector<328x128xf32> -> vector<328x128xf32>
    %264 = arith.addf %259, %263 : vector<328x128xf32>
    %c19_174 = arith.constant 19 : index
    %c0_175 = arith.constant 0 : index
    %265 = vector.load %arg9[%c19_174, %c0_175] : memref<368x128xbf16, #tpu.memory_space<vmem>>, vector<328x128xbf16>
    %c4_176 = arith.constant 4 : index
    %c0_177 = arith.constant 0 : index
    %c0_178 = arith.constant 0 : index
    %266 = vector.load %arg3[%c4_176, %c0_177, %c0_178] : memref<9x128x128xbf16, #tpu.memory_space<vmem>>, vector<1x128x128xbf16>
    %267 = vector.shape_cast %266 : vector<1x128x128xbf16> to vector<128x128xbf16>
    %cst_179 = arith.constant dense<0.000000e+00> : vector<328x128xf32>
    %268 = tpu.matmul %265, %267, %cst_179 {dimension_numbers = #tpu.dot_dimension_numbers<[1], [0], [0], [1], [0, 0, 1, 1], [], []>} : vector<328x128xbf16>, vector<128x128xbf16>, vector<328x128xf32> -> vector<328x128xf32>
    %269 = arith.addf %264, %268 : vector<328x128xf32>
    %c20_180 = arith.constant 20 : index
    %c0_181 = arith.constant 0 : index
    %270 = vector.load %arg9[%c20_180, %c0_181] : memref<368x128xbf16, #tpu.memory_space<vmem>>, vector<328x128xbf16>
    %c5_182 = arith.constant 5 : index
    %c0_183 = arith.constant 0 : index
    %c0_184 = arith.constant 0 : index
    %271 = vector.load %arg3[%c5_182, %c0_183, %c0_184] : memref<9x128x128xbf16, #tpu.memory_space<vmem>>, vector<1x128x128xbf16>
    %272 = vector.shape_cast %271 : vector<1x128x128xbf16> to vector<128x128xbf16>
    %cst_185 = arith.constant dense<0.000000e+00> : vector<328x128xf32>
    %273 = tpu.matmul %270, %272, %cst_185 {dimension_numbers = #tpu.dot_dimension_numbers<[1], [0], [0], [1], [0, 0, 1, 1], [], []>} : vector<328x128xbf16>, vector<128x128xbf16>, vector<328x128xf32> -> vector<328x128xf32>
    %274 = arith.addf %269, %273 : vector<328x128xf32>
    %c36_186 = arith.constant 36 : index
    %c0_187 = arith.constant 0 : index
    %275 = vector.load %arg9[%c36_186, %c0_187] : memref<368x128xbf16, #tpu.memory_space<vmem>>, vector<328x128xbf16>
    %c6_188 = arith.constant 6 : index
    %c0_189 = arith.constant 0 : index
    %c0_190 = arith.constant 0 : index
    %276 = vector.load %arg3[%c6_188, %c0_189, %c0_190] : memref<9x128x128xbf16, #tpu.memory_space<vmem>>, vector<1x128x128xbf16>
    %277 = vector.shape_cast %276 : vector<1x128x128xbf16> to vector<128x128xbf16>
    %cst_191 = arith.constant dense<0.000000e+00> : vector<328x128xf32>
    %278 = tpu.matmul %275, %277, %cst_191 {dimension_numbers = #tpu.dot_dimension_numbers<[1], [0], [0], [1], [0, 0, 1, 1], [], []>} : vector<328x128xbf16>, vector<128x128xbf16>, vector<328x128xf32> -> vector<328x128xf32>
    %279 = arith.addf %274, %278 : vector<328x128xf32>
    %c37_192 = arith.constant 37 : index
    %c0_193 = arith.constant 0 : index
    %280 = vector.load %arg9[%c37_192, %c0_193] : memref<368x128xbf16, #tpu.memory_space<vmem>>, vector<328x128xbf16>
    %c7_194 = arith.constant 7 : index
    %c0_195 = arith.constant 0 : index
    %c0_196 = arith.constant 0 : index
    %281 = vector.load %arg3[%c7_194, %c0_195, %c0_196] : memref<9x128x128xbf16, #tpu.memory_space<vmem>>, vector<1x128x128xbf16>
    %282 = vector.shape_cast %281 : vector<1x128x128xbf16> to vector<128x128xbf16>
    %cst_197 = arith.constant dense<0.000000e+00> : vector<328x128xf32>
    %283 = tpu.matmul %280, %282, %cst_197 {dimension_numbers = #tpu.dot_dimension_numbers<[1], [0], [0], [1], [0, 0, 1, 1], [], []>} : vector<328x128xbf16>, vector<128x128xbf16>, vector<328x128xf32> -> vector<328x128xf32>
    %284 = arith.addf %279, %283 : vector<328x128xf32>
    %c38_198 = arith.constant 38 : index
    %c0_199 = arith.constant 0 : index
    %285 = vector.load %arg9[%c38_198, %c0_199] : memref<368x128xbf16, #tpu.memory_space<vmem>>, vector<328x128xbf16>
    %c8_200 = arith.constant 8 : index
    %c0_201 = arith.constant 0 : index
    %c0_202 = arith.constant 0 : index
    %286 = vector.load %arg3[%c8_200, %c0_201, %c0_202] : memref<9x128x128xbf16, #tpu.memory_space<vmem>>, vector<1x128x128xbf16>
    %287 = vector.shape_cast %286 : vector<1x128x128xbf16> to vector<128x128xbf16>
    %cst_203 = arith.constant dense<0.000000e+00> : vector<328x128xf32>
    %288 = tpu.matmul %285, %287, %cst_203 {dimension_numbers = #tpu.dot_dimension_numbers<[1], [0], [0], [1], [0, 0, 1, 1], [], []>} : vector<328x128xbf16>, vector<128x128xbf16>, vector<328x128xf32> -> vector<328x128xf32>
    %289 = arith.addf %284, %288 : vector<328x128xf32>
    %c0_204 = arith.constant 0 : index
    %c0_205 = arith.constant 0 : index
    %c0_206 = arith.constant 0 : index
    %290 = vector.load %arg1[%c0_204, %c0_205, %c0_206] : memref<1x256x128xbf16, #tpu.memory_space<vmem>>, vector<1x16x128xbf16>
    %291 = vector.shape_cast %290 : vector<1x16x128xbf16> to vector<16x128xbf16>
    %292 = arith.extf %291 : vector<16x128xbf16> to vector<16x128xf32>
    %293 = vector.extract_strided_slice %289 {offsets = [19, 0], sizes = [16, 128], strides = [1, 1]} : vector<328x128xf32> to vector<16x128xf32>
    %294 = vector.broadcast %2 : vector<1x128xf32> to vector<16x128xf32>
    %295 = arith.mulf %293, %294 : vector<16x128xf32>
    %296 = vector.broadcast %3 : vector<1x128xf32> to vector<16x128xf32>
    %297 = arith.addf %295, %296 : vector<16x128xf32>
    %298 = arith.addf %297, %292 : vector<16x128xf32>
    %cst_207 = arith.constant 0.000000e+00 : f32
    %299 = vector.broadcast %cst_207 : f32 to vector<16x128xf32>
    %300 = arith.maximumf %298, %299 : vector<16x128xf32>
    %c0_208 = arith.constant 0 : index
    %c0_209 = arith.constant 0 : index
    %c0_210 = arith.constant 0 : index
    %301 = vector.load %arg8[%c0_208, %c0_209, %c0_210] : memref<1x256x128xf32, #tpu.memory_space<vmem>>, vector<1x16x128xf32>
    %302 = vector.shape_cast %301 : vector<1x16x128xf32> to vector<16x128xf32>
    %303 = vector.shape_cast %300 : vector<16x128xf32> to vector<1x16x128xf32>
    tpu.vector_store %arg8[%c0_208, %c0_209, %c0_210], %303 {strides = array<i32>} : memref<1x256x128xf32, #tpu.memory_space<vmem>>, vector<1x16x128xf32>,
    %c0_211 = arith.constant 0 : index
    %c16_212 = arith.constant 16 : index
    %c0_213 = arith.constant 0 : index
    %304 = vector.load %arg1[%c0_211, %c16_212, %c0_213] : memref<1x256x128xbf16, #tpu.memory_space<vmem>>, vector<1x16x128xbf16>
    %305 = vector.shape_cast %304 : vector<1x16x128xbf16> to vector<16x128xbf16>
    %306 = arith.extf %305 : vector<16x128xbf16> to vector<16x128xf32>
    %307 = vector.extract_strided_slice %289 {offsets = [37, 0], sizes = [16, 128], strides = [1, 1]} : vector<328x128xf32> to vector<16x128xf32>
    %308 = vector.broadcast %2 : vector<1x128xf32> to vector<16x128xf32>
    %309 = arith.mulf %307, %308 : vector<16x128xf32>
    %310 = vector.broadcast %3 : vector<1x128xf32> to vector<16x128xf32>
    %311 = arith.addf %309, %310 : vector<16x128xf32>
    %312 = arith.addf %311, %306 : vector<16x128xf32>
    %cst_214 = arith.constant 0.000000e+00 : f32
    %313 = vector.broadcast %cst_214 : f32 to vector<16x128xf32>
    %314 = arith.maximumf %312, %313 : vector<16x128xf32>
    %c0_215 = arith.constant 0 : index
    %c16_216 = arith.constant 16 : index
    %c0_217 = arith.constant 0 : index
    %315 = vector.load %arg8[%c0_215, %c16_216, %c0_217] : memref<1x256x128xf32, #tpu.memory_space<vmem>>, vector<1x16x128xf32>
    %316 = vector.shape_cast %315 : vector<1x16x128xf32> to vector<16x128xf32>
    %317 = vector.shape_cast %314 : vector<16x128xf32> to vector<1x16x128xf32>
    tpu.vector_store %arg8[%c0_215, %c16_216, %c0_217], %317 {strides = array<i32>} : memref<1x256x128xf32, #tpu.memory_space<vmem>>, vector<1x16x128xf32>,
    %c0_218 = arith.constant 0 : index
    %c32_219 = arith.constant 32 : index
    %c0_220 = arith.constant 0 : index
    %318 = vector.load %arg1[%c0_218, %c32_219, %c0_220] : memref<1x256x128xbf16, #tpu.memory_space<vmem>>, vector<1x16x128xbf16>
    %319 = vector.shape_cast %318 : vector<1x16x128xbf16> to vector<16x128xbf16>
    %320 = arith.extf %319 : vector<16x128xbf16> to vector<16x128xf32>
    %321 = vector.extract_strided_slice %289 {offsets = [55, 0], sizes = [16, 128], strides = [1, 1]} : vector<328x128xf32> to vector<16x128xf32>
    %322 = vector.broadcast %2 : vector<1x128xf32> to vector<16x128xf32>
    %323 = arith.mulf %321, %322 : vector<16x128xf32>
    %324 = vector.broadcast %3 : vector<1x128xf32> to vector<16x128xf32>
    %325 = arith.addf %323, %324 : vector<16x128xf32>
    %326 = arith.addf %325, %320 : vector<16x128xf32>
    %cst_221 = arith.constant 0.000000e+00 : f32
    %327 = vector.broadcast %cst_221 : f32 to vector<16x128xf32>
    %328 = arith.maximumf %326, %327 : vector<16x128xf32>
    %c0_222 = arith.constant 0 : index
    %c32_223 = arith.constant 32 : index
    %c0_224 = arith.constant 0 : index
    %329 = vector.load %arg8[%c0_222, %c32_223, %c0_224] : memref<1x256x128xf32, #tpu.memory_space<vmem>>, vector<1x16x128xf32>
    %330 = vector.shape_cast %329 : vector<1x16x128xf32> to vector<16x128xf32>
    %331 = vector.shape_cast %328 : vector<16x128xf32> to vector<1x16x128xf32>
    tpu.vector_store %arg8[%c0_222, %c32_223, %c0_224], %331 {strides = array<i32>} : memref<1x256x128xf32, #tpu.memory_space<vmem>>, vector<1x16x128xf32>,
    %c0_225 = arith.constant 0 : index
    %c48_226 = arith.constant 48 : index
    %c0_227 = arith.constant 0 : index
    %332 = vector.load %arg1[%c0_225, %c48_226, %c0_227] : memref<1x256x128xbf16, #tpu.memory_space<vmem>>, vector<1x16x128xbf16>
    %333 = vector.shape_cast %332 : vector<1x16x128xbf16> to vector<16x128xbf16>
    %334 = arith.extf %333 : vector<16x128xbf16> to vector<16x128xf32>
    %335 = vector.extract_strided_slice %289 {offsets = [73, 0], sizes = [16, 128], strides = [1, 1]} : vector<328x128xf32> to vector<16x128xf32>
    %336 = vector.broadcast %2 : vector<1x128xf32> to vector<16x128xf32>
    %337 = arith.mulf %335, %336 : vector<16x128xf32>
    %338 = vector.broadcast %3 : vector<1x128xf32> to vector<16x128xf32>
    %339 = arith.addf %337, %338 : vector<16x128xf32>
    %340 = arith.addf %339, %334 : vector<16x128xf32>
    %cst_228 = arith.constant 0.000000e+00 : f32
    %341 = vector.broadcast %cst_228 : f32 to vector<16x128xf32>
    %342 = arith.maximumf %340, %341 : vector<16x128xf32>
    %c0_229 = arith.constant 0 : index
    %c48_230 = arith.constant 48 : index
    %c0_231 = arith.constant 0 : index
    %343 = vector.load %arg8[%c0_229, %c48_230, %c0_231] : memref<1x256x128xf32, #tpu.memory_space<vmem>>, vector<1x16x128xf32>
    %344 = vector.shape_cast %343 : vector<1x16x128xf32> to vector<16x128xf32>
    %345 = vector.shape_cast %342 : vector<16x128xf32> to vector<1x16x128xf32>
    tpu.vector_store %arg8[%c0_229, %c48_230, %c0_231], %345 {strides = array<i32>} : memref<1x256x128xf32, #tpu.memory_space<vmem>>, vector<1x16x128xf32>,
    %c0_232 = arith.constant 0 : index
    %c64_233 = arith.constant 64 : index
    %c0_234 = arith.constant 0 : index
    %346 = vector.load %arg1[%c0_232, %c64_233, %c0_234] : memref<1x256x128xbf16, #tpu.memory_space<vmem>>, vector<1x16x128xbf16>
    %347 = vector.shape_cast %346 : vector<1x16x128xbf16> to vector<16x128xbf16>
    %348 = arith.extf %347 : vector<16x128xbf16> to vector<16x128xf32>
    %349 = vector.extract_strided_slice %289 {offsets = [91, 0], sizes = [16, 128], strides = [1, 1]} : vector<328x128xf32> to vector<16x128xf32>
    %350 = vector.broadcast %2 : vector<1x128xf32> to vector<16x128xf32>
    %351 = arith.mulf %349, %350 : vector<16x128xf32>
    %352 = vector.broadcast %3 : vector<1x128xf32> to vector<16x128xf32>
    %353 = arith.addf %351, %352 : vector<16x128xf32>
    %354 = arith.addf %353, %348 : vector<16x128xf32>
    %cst_235 = arith.constant 0.000000e+00 : f32
    %355 = vector.broadcast %cst_235 : f32 to vector<16x128xf32>
    %356 = arith.maximumf %354, %355 : vector<16x128xf32>
    %c0_236 = arith.constant 0 : index
    %c64_237 = arith.constant 64 : index
    %c0_238 = arith.constant 0 : index
    %357 = vector.load %arg8[%c0_236, %c64_237, %c0_238] : memref<1x256x128xf32, #tpu.memory_space<vmem>>, vector<1x16x128xf32>
    %358 = vector.shape_cast %357 : vector<1x16x128xf32> to vector<16x128xf32>
    %359 = vector.shape_cast %356 : vector<16x128xf32> to vector<1x16x128xf32>
    tpu.vector_store %arg8[%c0_236, %c64_237, %c0_238], %359 {strides = array<i32>} : memref<1x256x128xf32, #tpu.memory_space<vmem>>, vector<1x16x128xf32>,
    %c0_239 = arith.constant 0 : index
    %c80_240 = arith.constant 80 : index
    %c0_241 = arith.constant 0 : index
    %360 = vector.load %arg1[%c0_239, %c80_240, %c0_241] : memref<1x256x128xbf16, #tpu.memory_space<vmem>>, vector<1x16x128xbf16>
    %361 = vector.shape_cast %360 : vector<1x16x128xbf16> to vector<16x128xbf16>
    %362 = arith.extf %361 : vector<16x128xbf16> to vector<16x128xf32>
    %363 = vector.extract_strided_slice %289 {offsets = [109, 0], sizes = [16, 128], strides = [1, 1]} : vector<328x128xf32> to vector<16x128xf32>
    %364 = vector.broadcast %2 : vector<1x128xf32> to vector<16x128xf32>
    %365 = arith.mulf %363, %364 : vector<16x128xf32>
    %366 = vector.broadcast %3 : vector<1x128xf32> to vector<16x128xf32>
    %367 = arith.addf %365, %366 : vector<16x128xf32>
    %368 = arith.addf %367, %362 : vector<16x128xf32>
    %cst_242 = arith.constant 0.000000e+00 : f32
    %369 = vector.broadcast %cst_242 : f32 to vector<16x128xf32>
    %370 = arith.maximumf %368, %369 : vector<16x128xf32>
    %c0_243 = arith.constant 0 : index
    %c80_244 = arith.constant 80 : index
    %c0_245 = arith.constant 0 : index
    %371 = vector.load %arg8[%c0_243, %c80_244, %c0_245] : memref<1x256x128xf32, #tpu.memory_space<vmem>>, vector<1x16x128xf32>
    %372 = vector.shape_cast %371 : vector<1x16x128xf32> to vector<16x128xf32>
    %373 = vector.shape_cast %370 : vector<16x128xf32> to vector<1x16x128xf32>
    tpu.vector_store %arg8[%c0_243, %c80_244, %c0_245], %373 {strides = array<i32>} : memref<1x256x128xf32, #tpu.memory_space<vmem>>, vector<1x16x128xf32>,
    %c0_246 = arith.constant 0 : index
    %c96_247 = arith.constant 96 : index
    %c0_248 = arith.constant 0 : index
    %374 = vector.load %arg1[%c0_246, %c96_247, %c0_248] : memref<1x256x128xbf16, #tpu.memory_space<vmem>>, vector<1x16x128xbf16>
    %375 = vector.shape_cast %374 : vector<1x16x128xbf16> to vector<16x128xbf16>
    %376 = arith.extf %375 : vector<16x128xbf16> to vector<16x128xf32>
    %377 = vector.extract_strided_slice %289 {offsets = [127, 0], sizes = [16, 128], strides = [1, 1]} : vector<328x128xf32> to vector<16x128xf32>
    %378 = vector.broadcast %2 : vector<1x128xf32> to vector<16x128xf32>
    %379 = arith.mulf %377, %378 : vector<16x128xf32>
    %380 = vector.broadcast %3 : vector<1x128xf32> to vector<16x128xf32>
    %381 = arith.addf %379, %380 : vector<16x128xf32>
    %382 = arith.addf %381, %376 : vector<16x128xf32>
    %cst_249 = arith.constant 0.000000e+00 : f32
    %383 = vector.broadcast %cst_249 : f32 to vector<16x128xf32>
    %384 = arith.maximumf %382, %383 : vector<16x128xf32>
    %c0_250 = arith.constant 0 : index
    %c96_251 = arith.constant 96 : index
    %c0_252 = arith.constant 0 : index
    %385 = vector.load %arg8[%c0_250, %c96_251, %c0_252] : memref<1x256x128xf32, #tpu.memory_space<vmem>>, vector<1x16x128xf32>
    %386 = vector.shape_cast %385 : vector<1x16x128xf32> to vector<16x128xf32>
    %387 = vector.shape_cast %384 : vector<16x128xf32> to vector<1x16x128xf32>
    tpu.vector_store %arg8[%c0_250, %c96_251, %c0_252], %387 {strides = array<i32>} : memref<1x256x128xf32, #tpu.memory_space<vmem>>, vector<1x16x128xf32>,
    %c0_253 = arith.constant 0 : index
    %c112_254 = arith.constant 112 : index
    %c0_255 = arith.constant 0 : index
    %388 = vector.load %arg1[%c0_253, %c112_254, %c0_255] : memref<1x256x128xbf16, #tpu.memory_space<vmem>>, vector<1x16x128xbf16>
    %389 = vector.shape_cast %388 : vector<1x16x128xbf16> to vector<16x128xbf16>
    %390 = arith.extf %389 : vector<16x128xbf16> to vector<16x128xf32>
    %391 = vector.extract_strided_slice %289 {offsets = [145, 0], sizes = [16, 128], strides = [1, 1]} : vector<328x128xf32> to vector<16x128xf32>
    %392 = vector.broadcast %2 : vector<1x128xf32> to vector<16x128xf32>
    %393 = arith.mulf %391, %392 : vector<16x128xf32>
    %394 = vector.broadcast %3 : vector<1x128xf32> to vector<16x128xf32>
    %395 = arith.addf %393, %394 : vector<16x128xf32>
    %396 = arith.addf %395, %390 : vector<16x128xf32>
    %cst_256 = arith.constant 0.000000e+00 : f32
    %397 = vector.broadcast %cst_256 : f32 to vector<16x128xf32>
    %398 = arith.maximumf %396, %397 : vector<16x128xf32>
    %c0_257 = arith.constant 0 : index
    %c112_258 = arith.constant 112 : index
    %c0_259 = arith.constant 0 : index
    %399 = vector.load %arg8[%c0_257, %c112_258, %c0_259] : memref<1x256x128xf32, #tpu.memory_space<vmem>>, vector<1x16x128xf32>
    %400 = vector.shape_cast %399 : vector<1x16x128xf32> to vector<16x128xf32>
    %401 = vector.shape_cast %398 : vector<16x128xf32> to vector<1x16x128xf32>
    tpu.vector_store %arg8[%c0_257, %c112_258, %c0_259], %401 {strides = array<i32>} : memref<1x256x128xf32, #tpu.memory_space<vmem>>, vector<1x16x128xf32>,
    %c0_260 = arith.constant 0 : index
    %c128_261 = arith.constant 128 : index
    %c0_262 = arith.constant 0 : index
    %402 = vector.load %arg1[%c0_260, %c128_261, %c0_262] : memref<1x256x128xbf16, #tpu.memory_space<vmem>>, vector<1x16x128xbf16>
    %403 = vector.shape_cast %402 : vector<1x16x128xbf16> to vector<16x128xbf16>
    %404 = arith.extf %403 : vector<16x128xbf16> to vector<16x128xf32>
    %405 = vector.extract_strided_slice %289 {offsets = [163, 0], sizes = [16, 128], strides = [1, 1]} : vector<328x128xf32> to vector<16x128xf32>
    %406 = vector.broadcast %2 : vector<1x128xf32> to vector<16x128xf32>
    %407 = arith.mulf %405, %406 : vector<16x128xf32>
    %408 = vector.broadcast %3 : vector<1x128xf32> to vector<16x128xf32>
    %409 = arith.addf %407, %408 : vector<16x128xf32>
    %410 = arith.addf %409, %404 : vector<16x128xf32>
    %cst_263 = arith.constant 0.000000e+00 : f32
    %411 = vector.broadcast %cst_263 : f32 to vector<16x128xf32>
    %412 = arith.maximumf %410, %411 : vector<16x128xf32>
    %c0_264 = arith.constant 0 : index
    %c128_265 = arith.constant 128 : index
    %c0_266 = arith.constant 0 : index
    %413 = vector.load %arg8[%c0_264, %c128_265, %c0_266] : memref<1x256x128xf32, #tpu.memory_space<vmem>>, vector<1x16x128xf32>
    %414 = vector.shape_cast %413 : vector<1x16x128xf32> to vector<16x128xf32>
    %415 = vector.shape_cast %412 : vector<16x128xf32> to vector<1x16x128xf32>
    tpu.vector_store %arg8[%c0_264, %c128_265, %c0_266], %415 {strides = array<i32>} : memref<1x256x128xf32, #tpu.memory_space<vmem>>, vector<1x16x128xf32>,
    %c0_267 = arith.constant 0 : index
    %c144_268 = arith.constant 144 : index
    %c0_269 = arith.constant 0 : index
    %416 = vector.load %arg1[%c0_267, %c144_268, %c0_269] : memref<1x256x128xbf16, #tpu.memory_space<vmem>>, vector<1x16x128xbf16>
    %417 = vector.shape_cast %416 : vector<1x16x128xbf16> to vector<16x128xbf16>
    %418 = arith.extf %417 : vector<16x128xbf16> to vector<16x128xf32>
    %419 = vector.extract_strided_slice %289 {offsets = [181, 0], sizes = [16, 128], strides = [1, 1]} : vector<328x128xf32> to vector<16x128xf32>
    %420 = vector.broadcast %2 : vector<1x128xf32> to vector<16x128xf32>
    %421 = arith.mulf %419, %420 : vector<16x128xf32>
    %422 = vector.broadcast %3 : vector<1x128xf32> to vector<16x128xf32>
    %423 = arith.addf %421, %422 : vector<16x128xf32>
    %424 = arith.addf %423, %418 : vector<16x128xf32>
    %cst_270 = arith.constant 0.000000e+00 : f32
    %425 = vector.broadcast %cst_270 : f32 to vector<16x128xf32>
    %426 = arith.maximumf %424, %425 : vector<16x128xf32>
    %c0_271 = arith.constant 0 : index
    %c144_272 = arith.constant 144 : index
    %c0_273 = arith.constant 0 : index
    %427 = vector.load %arg8[%c0_271, %c144_272, %c0_273] : memref<1x256x128xf32, #tpu.memory_space<vmem>>, vector<1x16x128xf32>
    %428 = vector.shape_cast %427 : vector<1x16x128xf32> to vector<16x128xf32>
    %429 = vector.shape_cast %426 : vector<16x128xf32> to vector<1x16x128xf32>
    tpu.vector_store %arg8[%c0_271, %c144_272, %c0_273], %429 {strides = array<i32>} : memref<1x256x128xf32, #tpu.memory_space<vmem>>, vector<1x16x128xf32>,
    %c0_274 = arith.constant 0 : index
    %c160_275 = arith.constant 160 : index
    %c0_276 = arith.constant 0 : index
    %430 = vector.load %arg1[%c0_274, %c160_275, %c0_276] : memref<1x256x128xbf16, #tpu.memory_space<vmem>>, vector<1x16x128xbf16>
    %431 = vector.shape_cast %430 : vector<1x16x128xbf16> to vector<16x128xbf16>
    %432 = arith.extf %431 : vector<16x128xbf16> to vector<16x128xf32>
    %433 = vector.extract_strided_slice %289 {offsets = [199, 0], sizes = [16, 128], strides = [1, 1]} : vector<328x128xf32> to vector<16x128xf32>
    %434 = vector.broadcast %2 : vector<1x128xf32> to vector<16x128xf32>
    %435 = arith.mulf %433, %434 : vector<16x128xf32>
    %436 = vector.broadcast %3 : vector<1x128xf32> to vector<16x128xf32>
    %437 = arith.addf %435, %436 : vector<16x128xf32>
    %438 = arith.addf %437, %432 : vector<16x128xf32>
    %cst_277 = arith.constant 0.000000e+00 : f32
    %439 = vector.broadcast %cst_277 : f32 to vector<16x128xf32>
    %440 = arith.maximumf %438, %439 : vector<16x128xf32>
    %c0_278 = arith.constant 0 : index
    %c160_279 = arith.constant 160 : index
    %c0_280 = arith.constant 0 : index
    %441 = vector.load %arg8[%c0_278, %c160_279, %c0_280] : memref<1x256x128xf32, #tpu.memory_space<vmem>>, vector<1x16x128xf32>
    %442 = vector.shape_cast %441 : vector<1x16x128xf32> to vector<16x128xf32>
    %443 = vector.shape_cast %440 : vector<16x128xf32> to vector<1x16x128xf32>
    tpu.vector_store %arg8[%c0_278, %c160_279, %c0_280], %443 {strides = array<i32>} : memref<1x256x128xf32, #tpu.memory_space<vmem>>, vector<1x16x128xf32>,
    %c0_281 = arith.constant 0 : index
    %c176_282 = arith.constant 176 : index
    %c0_283 = arith.constant 0 : index
    %444 = vector.load %arg1[%c0_281, %c176_282, %c0_283] : memref<1x256x128xbf16, #tpu.memory_space<vmem>>, vector<1x16x128xbf16>
    %445 = vector.shape_cast %444 : vector<1x16x128xbf16> to vector<16x128xbf16>
    %446 = arith.extf %445 : vector<16x128xbf16> to vector<16x128xf32>
    %447 = vector.extract_strided_slice %289 {offsets = [217, 0], sizes = [16, 128], strides = [1, 1]} : vector<328x128xf32> to vector<16x128xf32>
    %448 = vector.broadcast %2 : vector<1x128xf32> to vector<16x128xf32>
    %449 = arith.mulf %447, %448 : vector<16x128xf32>
    %450 = vector.broadcast %3 : vector<1x128xf32> to vector<16x128xf32>
    %451 = arith.addf %449, %450 : vector<16x128xf32>
    %452 = arith.addf %451, %446 : vector<16x128xf32>
    %cst_284 = arith.constant 0.000000e+00 : f32
    %453 = vector.broadcast %cst_284 : f32 to vector<16x128xf32>
    %454 = arith.maximumf %452, %453 : vector<16x128xf32>
    %c0_285 = arith.constant 0 : index
    %c176_286 = arith.constant 176 : index
    %c0_287 = arith.constant 0 : index
    %455 = vector.load %arg8[%c0_285, %c176_286, %c0_287] : memref<1x256x128xf32, #tpu.memory_space<vmem>>, vector<1x16x128xf32>
    %456 = vector.shape_cast %455 : vector<1x16x128xf32> to vector<16x128xf32>
    %457 = vector.shape_cast %454 : vector<16x128xf32> to vector<1x16x128xf32>
    tpu.vector_store %arg8[%c0_285, %c176_286, %c0_287], %457 {strides = array<i32>} : memref<1x256x128xf32, #tpu.memory_space<vmem>>, vector<1x16x128xf32>,
    %c0_288 = arith.constant 0 : index
    %c192_289 = arith.constant 192 : index
    %c0_290 = arith.constant 0 : index
    %458 = vector.load %arg1[%c0_288, %c192_289, %c0_290] : memref<1x256x128xbf16, #tpu.memory_space<vmem>>, vector<1x16x128xbf16>
    %459 = vector.shape_cast %458 : vector<1x16x128xbf16> to vector<16x128xbf16>
    %460 = arith.extf %459 : vector<16x128xbf16> to vector<16x128xf32>
    %461 = vector.extract_strided_slice %289 {offsets = [235, 0], sizes = [16, 128], strides = [1, 1]} : vector<328x128xf32> to vector<16x128xf32>
    %462 = vector.broadcast %2 : vector<1x128xf32> to vector<16x128xf32>
    %463 = arith.mulf %461, %462 : vector<16x128xf32>
    %464 = vector.broadcast %3 : vector<1x128xf32> to vector<16x128xf32>
    %465 = arith.addf %463, %464 : vector<16x128xf32>
    %466 = arith.addf %465, %460 : vector<16x128xf32>
    %cst_291 = arith.constant 0.000000e+00 : f32
    %467 = vector.broadcast %cst_291 : f32 to vector<16x128xf32>
    %468 = arith.maximumf %466, %467 : vector<16x128xf32>
    %c0_292 = arith.constant 0 : index
    %c192_293 = arith.constant 192 : index
    %c0_294 = arith.constant 0 : index
    %469 = vector.load %arg8[%c0_292, %c192_293, %c0_294] : memref<1x256x128xf32, #tpu.memory_space<vmem>>, vector<1x16x128xf32>
    %470 = vector.shape_cast %469 : vector<1x16x128xf32> to vector<16x128xf32>
    %471 = vector.shape_cast %468 : vector<16x128xf32> to vector<1x16x128xf32>
    tpu.vector_store %arg8[%c0_292, %c192_293, %c0_294], %471 {strides = array<i32>} : memref<1x256x128xf32, #tpu.memory_space<vmem>>, vector<1x16x128xf32>,
    %c0_295 = arith.constant 0 : index
    %c208_296 = arith.constant 208 : index
    %c0_297 = arith.constant 0 : index
    %472 = vector.load %arg1[%c0_295, %c208_296, %c0_297] : memref<1x256x128xbf16, #tpu.memory_space<vmem>>, vector<1x16x128xbf16>
    %473 = vector.shape_cast %472 : vector<1x16x128xbf16> to vector<16x128xbf16>
    %474 = arith.extf %473 : vector<16x128xbf16> to vector<16x128xf32>
    %475 = vector.extract_strided_slice %289 {offsets = [253, 0], sizes = [16, 128], strides = [1, 1]} : vector<328x128xf32> to vector<16x128xf32>
    %476 = vector.broadcast %2 : vector<1x128xf32> to vector<16x128xf32>
    %477 = arith.mulf %475, %476 : vector<16x128xf32>
    %478 = vector.broadcast %3 : vector<1x128xf32> to vector<16x128xf32>
    %479 = arith.addf %477, %478 : vector<16x128xf32>
    %480 = arith.addf %479, %474 : vector<16x128xf32>
    %cst_298 = arith.constant 0.000000e+00 : f32
    %481 = vector.broadcast %cst_298 : f32 to vector<16x128xf32>
    %482 = arith.maximumf %480, %481 : vector<16x128xf32>
    %c0_299 = arith.constant 0 : index
    %c208_300 = arith.constant 208 : index
    %c0_301 = arith.constant 0 : index
    %483 = vector.load %arg8[%c0_299, %c208_300, %c0_301] : memref<1x256x128xf32, #tpu.memory_space<vmem>>, vector<1x16x128xf32>
    %484 = vector.shape_cast %483 : vector<1x16x128xf32> to vector<16x128xf32>
    %485 = vector.shape_cast %482 : vector<16x128xf32> to vector<1x16x128xf32>
    tpu.vector_store %arg8[%c0_299, %c208_300, %c0_301], %485 {strides = array<i32>} : memref<1x256x128xf32, #tpu.memory_space<vmem>>, vector<1x16x128xf32>,
    %c0_302 = arith.constant 0 : index
    %c224_303 = arith.constant 224 : index
    %c0_304 = arith.constant 0 : index
    %486 = vector.load %arg1[%c0_302, %c224_303, %c0_304] : memref<1x256x128xbf16, #tpu.memory_space<vmem>>, vector<1x16x128xbf16>
    %487 = vector.shape_cast %486 : vector<1x16x128xbf16> to vector<16x128xbf16>
    %488 = arith.extf %487 : vector<16x128xbf16> to vector<16x128xf32>
    %489 = vector.extract_strided_slice %289 {offsets = [271, 0], sizes = [16, 128], strides = [1, 1]} : vector<328x128xf32> to vector<16x128xf32>
    %490 = vector.broadcast %2 : vector<1x128xf32> to vector<16x128xf32>
    %491 = arith.mulf %489, %490 : vector<16x128xf32>
    %492 = vector.broadcast %3 : vector<1x128xf32> to vector<16x128xf32>
    %493 = arith.addf %491, %492 : vector<16x128xf32>
    %494 = arith.addf %493, %488 : vector<16x128xf32>
    %cst_305 = arith.constant 0.000000e+00 : f32
    %495 = vector.broadcast %cst_305 : f32 to vector<16x128xf32>
    %496 = arith.maximumf %494, %495 : vector<16x128xf32>
    %c0_306 = arith.constant 0 : index
    %c224_307 = arith.constant 224 : index
    %c0_308 = arith.constant 0 : index
    %497 = vector.load %arg8[%c0_306, %c224_307, %c0_308] : memref<1x256x128xf32, #tpu.memory_space<vmem>>, vector<1x16x128xf32>
    %498 = vector.shape_cast %497 : vector<1x16x128xf32> to vector<16x128xf32>
    %499 = vector.shape_cast %496 : vector<16x128xf32> to vector<1x16x128xf32>
    tpu.vector_store %arg8[%c0_306, %c224_307, %c0_308], %499 {strides = array<i32>} : memref<1x256x128xf32, #tpu.memory_space<vmem>>, vector<1x16x128xf32>,
    %c0_309 = arith.constant 0 : index
    %c240_310 = arith.constant 240 : index
    %c0_311 = arith.constant 0 : index
    %500 = vector.load %arg1[%c0_309, %c240_310, %c0_311] : memref<1x256x128xbf16, #tpu.memory_space<vmem>>, vector<1x16x128xbf16>
    %501 = vector.shape_cast %500 : vector<1x16x128xbf16> to vector<16x128xbf16>
    %502 = arith.extf %501 : vector<16x128xbf16> to vector<16x128xf32>
    %503 = vector.extract_strided_slice %289 {offsets = [289, 0], sizes = [16, 128], strides = [1, 1]} : vector<328x128xf32> to vector<16x128xf32>
    %504 = vector.broadcast %2 : vector<1x128xf32> to vector<16x128xf32>
    %505 = arith.mulf %503, %504 : vector<16x128xf32>
    %506 = vector.broadcast %3 : vector<1x128xf32> to vector<16x128xf32>
    %507 = arith.addf %505, %506 : vector<16x128xf32>
    %508 = arith.addf %507, %502 : vector<16x128xf32>
    %cst_312 = arith.constant 0.000000e+00 : f32
    %509 = vector.broadcast %cst_312 : f32 to vector<16x128xf32>
    %510 = arith.maximumf %508, %509 : vector<16x128xf32>
    %c0_313 = arith.constant 0 : index
    %c240_314 = arith.constant 240 : index
    %c0_315 = arith.constant 0 : index
    %511 = vector.load %arg8[%c0_313, %c240_314, %c0_315] : memref<1x256x128xf32, #tpu.memory_space<vmem>>, vector<1x16x128xf32>
    %512 = vector.shape_cast %511 : vector<1x16x128xf32> to vector<16x128xf32>
    %513 = vector.shape_cast %510 : vector<16x128xf32> to vector<1x16x128xf32>
    tpu.vector_store %arg8[%c0_313, %c240_314, %c0_315], %513 {strides = array<i32>} : memref<1x256x128xf32, #tpu.memory_space<vmem>>, vector<1x16x128xf32>,
    return
  }
  func.func @transform_0(%arg0: i32) -> (i32, i32, i32) {
    %c0_i32 = arith.constant 0 : i32
    %c0_i32_0 = arith.constant 0 : i32
    %c0_i32_1 = arith.constant 0 : i32
    return %arg0, %c0_i32, %c0_i32_0 : i32, i32, i32
  }
  func.func @transform_1(%arg0: i32) -> (i32, i32, i32) {
    %c0_i32 = arith.constant 0 : i32
    %c0_i32_0 = arith.constant 0 : i32
    %c0_i32_1 = arith.constant 0 : i32
    %c0_i32_2 = arith.constant 0 : i32
    return %c0_i32, %c0_i32_0, %c0_i32_1 : i32, i32, i32
  }
  func.func @transform_2(%arg0: i32) -> (i32, i32, i32) {
    %c0_i32 = arith.constant 0 : i32
    %c0_i32_0 = arith.constant 0 : i32
    %c0_i32_1 = arith.constant 0 : i32
    %c0_i32_2 = arith.constant 0 : i32
    return %c0_i32, %c0_i32_0, %c0_i32_1 : i32, i32, i32
  }
  func.func @transform_3(%arg0: i32) -> (i32, i32) {
    %c0_i32 = arith.constant 0 : i32
    %c0_i32_0 = arith.constant 0 : i32
    %c0_i32_1 = arith.constant 0 : i32
    return %c0_i32, %c0_i32_0 : i32, i32
  }
  func.func @transform_4(%arg0: i32) -> (i32, i32) {
    %c0_i32 = arith.constant 0 : i32
    %c0_i32_0 = arith.constant 0 : i32
    %c0_i32_1 = arith.constant 0 : i32
    return %c0_i32, %c0_i32_0 : i32, i32
  }
  func.func @transform_5(%arg0: i32) -> (i32, i32) {
    %c0_i32 = arith.constant 0 : i32
    %c0_i32_0 = arith.constant 0 : i32
    %c0_i32_1 = arith.constant 0 : i32
    return %c0_i32, %c0_i32_0 : i32, i32
  }
  func.func @transform_6(%arg0: i32) -> (i32, i32) {
    %c0_i32 = arith.constant 0 : i32
    %c0_i32_0 = arith.constant 0 : i32
    %c0_i32_1 = arith.constant 0 : i32
    return %c0_i32, %c0_i32_0 : i32, i32
  }
  func.func @transform_7(%arg0: i32) -> (i32, i32, i32) {
    %c0_i32 = arith.constant 0 : i32
    %c0_i32_0 = arith.constant 0 : i32
    %c0_i32_1 = arith.constant 0 : i32
    return %arg0, %c0_i32, %c0_i32_0 : i32, i32, i32
  }
}

</mosaic_0001>

<bundles_post_ra>
// kernel: basic_block_forward.1
= control target key start
LH: loop header
LB: loop body
LE: loop exit
PB: predicated region body
PF: predicated region fallthrough
CT: control target
= control target key end

     0   :  { %s13096_s24 = smov 0   ;;  %s16023_s0 = inlined_call_operand.vmem [shape: bf16[2,256,128], index: 0, kind: input, shape index: {}]   ;;  %s16024_s1 = inlined_call_operand.vmem [shape: bf16[9,128,128], index: 1, kind: input, shape index: {}]   ;;  %s16025_s2 = inlined_call_operand.vmem [shape: bf16[9,128,128], index: 2, kind: input, shape index: {}]   ;;  %s16026_s3 = inlined_call_operand.vmem [shape: f32[1,128], index: 3, kind: input, shape index: {}]   ;;  %s16027_s4 = inlined_call_operand.vmem [shape: f32[1,128], index: 4, kind: input, shape index: {}]   ;;  %s16028_s5 = inlined_call_operand.vmem [shape: f32[1,128], index: 5, kind: input, shape index: {}]   ;;  %s16029_s6 = inlined_call_operand.vmem [shape: f32[1,128], index: 6, kind: input, shape index: {}]   ;;  %s16030_s7 = inlined_call_operand.vmem [shape: f32[2,256,128], index: 7, kind: output, shape index: {}]  }
   0x1 LB: > { %s8758_s25 = sadd.s32 4294967295, %s13051_s24   ;;  %p8762_p0 = scmp.ge.s32.totalorder %s13051_s24, 1  ;;  %s13051_s24 = sphi %s13096_s24, %s17_s24  }
   0x2   : > { %p237_p1 = scmp.lt.s32.totalorder %s13051_s24, 3 }
   0x4   : > { %p238_p2 = pnand %p8762_p0, %p237_p1 }
   0x5   : > { %v12821_v0 = vld [vmem:[%s16024_s1 + $0x40] sm:$0xff] (!%p238_p2)   ;;  %v13053_v1 = vmov (!%p238_p2), 0.0   ;;  %v12822_v2 = vld [vmem:[%s16024_s1 + $0x48] sm:$0xff] (!%p238_p2)   ;;  %vm13054_vm0 = vmmov (!%p238_p2), 0   ;;  %v13055_v3 = vmov (!%p238_p2), 0   ;;  %p269_p3 = scmp.lt.s32.totalorder (!%p238_p2), %s8758_s25, 1 }
   0x6   : > { %241 = sbr.rel (%p238_p2) target bundleno = 3349 (0xd15), region = 48  ;;  %9794 = vmatprep.subr.bf16.mxu0 (!%p238_p2), %v13053_v1  ;;  %10694 = vmatprep.subr.bf16.mxu1 (!%p238_p2), %v13053_v1  ;;  %284 = vst [vmem:[#allocation2] sm:$0xff] (!%p238_p2), %v13055_v3  ;;  %285 = vst [vmem:[#allocation2 + $0x8] sm:$0xff] (!%p238_p2), %v13055_v3  ;;  %v12823_v4 = vld [vmem:[%s16024_s1 + $0x50] sm:$0xff] (!%p238_p2)   ;;  %v12824_v5 = vld [vmem:[%s16024_s1 + $0x58] sm:$0xff] (!%p238_p2)   ;;  %v542_v25 = vrot.slane (!%p238_p2), %v13055_v3, 1 }
   0x7   : > { %9795 = vmatpush3.bf16.msra.mxu0 (!%p238_p2), %v12821_v0  ;;  %9810 = vmatprep.mubr.msk.bf16.mxu0 (!%p238_p2), %vm13054_vm0, %v13053_v1  ;;  %286 = vst [vmem:[#allocation2 + $0x10] sm:$0xff] (!%p238_p2), %v13055_v3  ;;  %287 = vst [vmem:[#allocation2 + $0x18] sm:$0xff] (!%p238_p2), %v13055_v3  ;;  %v12825_v7 = vld [vmem:[%s16024_s1 + $0x60] sm:$0xff] (!%p238_p2)   ;;  %v12826_v14 = vld [vmem:[%s16024_s1 + $0x68] sm:$0xff] (!%p238_p2)   ;;  %vm536_vm1 = vsmask.f32 (!%p238_p2), 7424 }
   0x8   : > { %9796 = vmatprep.subr.bf16.mxu0 (!%p238_p2), %v13053_v1  ;;  %288 = vst [vmem:[#allocation2 + $0x20] sm:$0xff] (!%p238_p2), %v13055_v3  ;;  %289 = vst [vmem:[#allocation2 + $0x28] sm:$0xff] (!%p238_p2), %v13055_v3  ;;  %10710 = vmatprep.mubr.msk.bf16.mxu1 (!%p238_p2), %vm13054_vm0, %v13053_v1  ;;  %v12827_v24 = vld [vmem:[%s16024_s1 + $0x70] sm:$0xff] (!%p238_p2)   ;;  %v12828_v28 = vld [vmem:[%s16024_s1 + $0x78] sm:$0xff] (!%p238_p2)   ;;  %vm1252_vm2 = vcmask (!%p238_p2), 1046528   ;;  %vm2527_vm4 = vcmask (!%p238_p2), 1045504  }
   0x9   : > { %290 = vst [vmem:[#allocation2 + $0x30] sm:$0xff] (!%p238_p2), %v13055_v3  ;;  %291 = vst [vmem:[#allocation2 + $0x38] sm:$0xff] (!%p238_p2), %v13055_v3  ;;  %v12829_v31 = vld [vmem:[%s16024_s1] sm:$0xff] (!%p238_p2)   ;;  %v12832_v37 = vld [vmem:[%s16024_s1 + $0x8] sm:$0xff] (!%p238_p2)   ;;  %vm2016_vm3 = vsmask.f32 (!%p238_p2), 6400 }
   0xa   : > { %293 = vst [vmem:[#allocation2 + $0x48] sm:$0xff] (!%p238_p2), %v13055_v3  ;;  %294 = vst [vmem:[#allocation2 + $0x50] sm:$0xff] (!%p238_p2), %v13055_v3  ;;  %v12837_v47 = vld [vmem:[%s16024_s1 + $0x10] sm:$0xff] (!%p238_p2)   ;;  %v12840_v52 = vld [vmem:[%s16024_s1 + $0x18] sm:$0xff] (!%p238_p2)   ;;  %vm3291_vm5 = vsmask.f32 (!%p238_p2), 5376 }
   0xb   : > { %295 = vst [vmem:[#allocation2 + $0x58] sm:$0xff] (!%p238_p2), %v13055_v3  ;;  %296 = vst [vmem:[#allocation2 + $0x60] sm:$0xff] (!%p238_p2), %v13055_v3  ;;  %9797 = vmatpush3.bf16.msra.mxu0 (!%p238_p2), %v12822_v2  ;;  %vm3802_vm6 = vcmask (!%p238_p2), 1044480   ;;  %vm4169_vm7 = vsmask.f32 (!%p238_p2), 1280  ;;  %vm8301_vm8 = vcmask (!%p238_p2), 1042432  }
   0xc   : > { %297 = vst [vmem:[#allocation2 + $0x68] sm:$0xff] (!%p238_p2), %v13055_v3  ;;  %298 = vst [vmem:[#allocation2 + $0x70] sm:$0xff] (!%p238_p2), %v13055_v3  ;;  %9798 = vmatprep.subr.bf16.mxu0 (!%p238_p2), %v13053_v1  ;;  %vm8381_vm9 = vcmask (!%p238_p2), 1040384  }
   0xd   : > { %299 = vst [vmem:[#allocation2 + $0x78] sm:$0xff] %v13055_v3  ;;  %300 = vst [vmem:[#allocation2 + $0x80] sm:$0xff] %v13055_v3  ;;  %s16054_s25 = smov (!%p269_p3, %s8758_s25), 1 }
   0xe   : > { %302 = vst [vmem:[#allocation2 + $0x90] sm:$0xff] %v13055_v3  ;;  %303 = vst [vmem:[#allocation2 + $0x98] sm:$0xff] %v13055_v3  ;;  %s9191_s9 = sshll.u32 %s16054_s25, 7  ;;  %s9192_s29 = sshll.u32 %s16054_s25, 8 }
   0xf   : > { %304 = vst [vmem:[#allocation2 + $0xa0] sm:$0xff] %v13055_v3  ;;  %305 = vst [vmem:[#allocation2 + $0xa8] sm:$0xff] %v13055_v3  ;;  %9799 = vmatpush3.bf16.msra.mxu0 %v12823_v4  ;;  %s13155_s14 = scalar_lea.vmem %s16023_s0, %s9191_s9  ;;  %s15871_s9 = scalar_lea.vmem %s16030_s7, %s9192_s29 }
  0x10   : > { %306 = vst [vmem:[#allocation2 + $0xb0] sm:$0xff] %v13055_v3  ;;  %9800 = vmatprep.subr.bf16.mxu0 %v13053_v1  ;;  %v12830_v6 = vld [vmem:[%s13155_s14] sm:$0xff]   ;;  %v12831_v8 = vld [vmem:[%s13155_s14 + $0x8] ss:$0 sps:$4 sm:$0xff]   ;;  %v12833_v10 = vld [vmem:[%s13155_s14 + $0xc] ss:$0 sps:$4 sm:$0xff]  }
  0x11   : > { %v314_v9 = vrot.slane %v12830_v6, 5  ;;  %v12834_v11 = vld [vmem:[%s13155_s14 + $0x10] sm:$0xff]   ;;  %328 = vst [vmem:[#allocation2 + $0x18] sm:$0xf0] %v12831_v8  ;;  %329 = vst [vmem:[#allocation2 + $0x20] sm:$0xf] %v12833_v10 }
  0x12   : > { %v337_v12 = vrot.slane %v12834_v11, 3  ;;  %v12835_v13 = vld [vmem:[%s13155_s14 + $0x18] sm:$0xff]   ;;  %v12836_v15 = vld [vmem:[%s13155_s14 + $0x20] sm:$0xff]   ;;  %v13172_v17 = vld [vmem:[%s13155_s14 + $0x28] sm:$0xff]  }
  0x13   : > { %9801 = vmatpush3.bf16.msra.mxu0 %v12824_v5  ;;  %316 = vst [vmem:[#allocation2 + $0x10] sm:$0xf8] %v314_v9  ;;  %317 = vst [vmem:[#allocation2 + $0x18] sm:$0x7] %v314_v9  ;;  %v348_v16 = vrot.slane %v12835_v13, 2  ;;  %v359_v18 = vrot.slane %v12836_v15, 1 }
  0x14   : > { %9802 = vmatprep.subr.bf16.mxu0 %v13053_v1  ;;  %339 = vst [vmem:[#allocation2 + $0x20] sm:$0xe0] %v337_v12  ;;  %340 = vst [vmem:[#allocation2 + $0x28] sm:$0x1f] %v337_v12  ;;  %v12839_v19 = vld [vmem:[%s13155_s14 + $0x30] sm:$0xff]   ;;  %v12841_v20 = vld [vmem:[%s13155_s14 + $0x38] sm:$0xff]  }
  0x15   : > { %350 = vst [vmem:[#allocation2 + $0x28] sm:$0xc0] %v348_v16  ;;  %351 = vst [vmem:[#allocation2 + $0x30] sm:$0x3f] %v348_v16  ;;  %v379_v21 = vrot.slane %v12839_v19, 7  ;;  %v12842_v22 = vld [vmem:[%s13155_s14 + $0x40] sm:$0xff]  }
  0x16   : > { %371 = vst [vmem:[#allocation2 + $0x40] sm:$0xff] %v13172_v17  ;;  %361 = vst [vmem:[#allocation2 + $0x30] sm:$0x80] %v359_v18  ;;  %v390_v23 = vrot.slane %v12841_v20, 6  ;;  %v401_v26 = vrot.slane %v12842_v22, 5  ;;  %v12846_v33 = vld [vmem:[%s13155_s14 + $0x50] sm:$0xff]  }
  0x17   : > { %9803 = vmatpush3.bf16.msra.mxu0 %v12825_v7  ;;  %362 = vst [vmem:[#allocation2 + $0x38] sm:$0x7f] %v359_v18  ;;  %381 = vst [vmem:[#allocation2 + $0x48] sm:$0xfe] %v379_v21  ;;  %v12844_v27 = vld [vmem:[%s13155_s14 + $0x48] ss:$0 sps:$4 sm:$0xff]  }
  0x18   : > { %9804 = vmatprep.subr.bf16.mxu0 %v13053_v1  ;;  %382 = vst [vmem:[#allocation2 + $0x50] sm:$0x1] %v379_v21  ;;  %392 = vst [vmem:[#allocation2 + $0x50] sm:$0xfc] %v390_v23  ;;  %v12845_v29 = vld [vmem:[%s13155_s14 + $0x4c] ss:$0 sps:$4 sm:$0xff]  }
  0x19   : > { %393 = vst [vmem:[#allocation2 + $0x58] sm:$0x3] %v390_v23  ;;  %403 = vst [vmem:[#allocation2 + $0x58] sm:$0xf8] %v401_v26  ;;  %v12847_v35 = vld [vmem:[%s13155_s14 + $0x58] sm:$0xff]   ;;  %v12849_v36 = vld [vmem:[%s13155_s14 + $0x60] sm:$0xff]  }
  0x1a   : > { %404 = vst [vmem:[#allocation2 + $0x60] sm:$0x7] %v401_v26  ;;  %v13190_v30 = vld [vmem:[#allocation2 + $0x10] sm:$0xff]  ;;  %415 = vst [vmem:[#allocation2 + $0x60] sm:$0xf0] %v12844_v27  ;;  %v13198_v34 = vld [vmem:[#allocation2 + $0x18] sm:$0xff] }
  0x1b   : > { %9805 = vmatpush3.bf16.msra.mxu0 %v12826_v14  ;;  %416 = vst [vmem:[#allocation2 + $0x68] sm:$0xf] %v12845_v29  ;;  %v553_v32 = vshll.u32 %v13190_v30, 16  ;;  %v424_v39 = vrot.slane %v12846_v33, 3  ;;  %v561_v40 = vshll.u32 %v13198_v34, 16  ;;  %v13210_v41 = vld [vmem:[%s13155_s14 + $0x68] sm:$0xff]  }
  0x1c   : > { %9806 = vmatprep.subr.bf16.mxu0 %v13053_v1  ;;  %v435_v42 = vrot.slane %v12847_v35, 2  ;;  %v446_v43 = vrot.slane %v12849_v36, 1  ;;  %458 = vst [vmem:[#allocation2 + $0x88] sm:$0xff] %v13210_v41  ;;  %v12852_v44 = vld [vmem:[%s13155_s14 + $0x70] sm:$0xff]   ;;  %v557_v46 = vshrl.u32 %v13190_v30, 16  ;;  %v12853_v50 = vld [vmem:[%s13155_s14 + $0x78] sm:$0xff]  }
  0x1d   : > { %v555_v38 = vrot.slane %v553_v32, 1  ;;  %426 = vst [vmem:[#allocation2 + $0x68] sm:$0xe0] %v424_v39  ;;  %427 = vst [vmem:[#allocation2 + $0x70] sm:$0x1f] %v424_v39  ;;  %v563_v48 = vrot.slane %v561_v40, 1 }
  0x1e   : > { %437 = vst [vmem:[#allocation2 + $0x70] sm:$0xc0] %v435_v42  ;;  %438 = vst [vmem:[#allocation2 + $0x78] sm:$0x3f] %v435_v42  ;;  %v466_v49 = vrot.slane %v12852_v44, 7  ;;  %v13221_v51 = vld [vmem:[#allocation2 + $0x20] sm:$0xff] }
  0x1f   : > { %9807 = vmatpush3.bf16.msra.mxu0 %v12827_v24  ;;  %v556_v45 = vsel %vm536_vm1, %v542_v25, %v555_v38  ;;  %448 = vst [vmem:[#allocation2 + $0x78] sm:$0x80] %v446_v43  ;;  %449 = vst [vmem:[#allocation2 + $0x80] sm:$0x7f] %v446_v43  ;;  %v13226_v53 = vld [vmem:[#allocation2 + $0x28] sm:$0xff]  ;;  %v477_v54 = vrot.slane %v12853_v50, 6  ;;  %v559_v55 = vor.u32 %v557_v46, %v555_v38 }
  0x20   : > { %9808 = vmatprep.subr.bf16.mxu0 %v13053_v1  ;;  %468 = vst [vmem:[#allocation2 + $0x90] sm:$0xfe] %v466_v49  ;;  %469 = vst [vmem:[#allocation2 + $0x98] sm:$0x1] %v466_v49  ;;  %v13230_v56 = vld [vmem:[#allocation2 + $0x30] sm:$0xff]  ;;  %v13233_v57 = vld [vmem:[#allocation2 + $0x38] sm:$0xff] }
  0x21   : > { %479 = vst [vmem:[#allocation2 + $0x98] sm:$0xfc] %v477_v54  ;;  %480 = vst [vmem:[#allocation2 + $0xa0] sm:$0x3] %v477_v54  ;;  %v601_v58 = vshll.u32 %v13172_v17, 16  ;;  %v569_v59 = vshll.u32 %v13221_v51, 16  ;;  %v564_v63 = vsel %vm536_vm1, %v559_v55, %v563_v48 }
  0x22   : > { %v577_v60 = vshll.u32 %v13226_v53, 16  ;;  %v13238_v61 = vld [vmem:[#allocation2 + $0x48] sm:$0xff]  ;;  %v13240_v62 = vld [vmem:[#allocation2 + $0x50] sm:$0xff]  ;;  %v565_v0 = vshrl.u32 %v13198_v34, 16  ;;  %v585_v2 = vshll.u32 %v13230_v56, 16  ;;  %v12843_v3 = vld [vmem:[%s16024_s1 + $0x20] sm:$0xff]  }
  0x23   : > { %9809 = vmatpush3.bf16.msra.mxu0 %v12828_v28  ;;  %v593_v4 = vshll.u32 %v13233_v57, 16  ;;  %v605_v5 = vshrl.u32 %v13172_v17, 16  ;;  %v13250_v6 = vld [vmem:[#allocation2 + $0x58] sm:$0xff]  ;;  %v573_v7 = vshrl.u32 %v13221_v51, 16  ;;  %v603_v8 = vrot.slane %v601_v58, 1  ;;  %v12848_v20 = vld [vmem:[%s16024_s1 + $0x28] sm:$0xff]  }
  0x24   : > { %9894 = vmatprep.subr.bf16.mxu0 %v13053_v1  ;;  %v609_v9 = vshll.u32 %v13238_v61, 16  ;;  %v617_v10 = vshll.u32 %v13240_v62, 16  ;;  %v571_v11 = vrot.slane %v569_v59, 1  ;;  %v579_v12 = vrot.slane %v577_v60, 1  ;;  %v13267_v24 = vld [vmem:[#allocation2 + $0x60] sm:$0xff]  ;;  %v12850_v28 = vld [vmem:[%s16024_s1 + $0x30] sm:$0xff]  }
  0x25   : > { %v581_v13 = vshrl.u32 %v13226_v53, 16  ;;  %v589_v14 = vshrl.u32 %v13230_v56, 16  ;;  %v567_v15 = vor.u32 %v565_v0, %v563_v48  ;;  %v587_v16 = vrot.slane %v585_v2, 1  ;;  %v12854_v36 = vld [vmem:[%s16024_s1 + $0x38] sm:$0xff]   ;;  %v13288_v39 = vld [vmem:[#allocation2 + $0x68] sm:$0xff] }
  0x26   : > { %9811 = vmatmul.mubr.bf16.vlgmr.msra.gmra.mrb[0].mxu0 %v542_v25  ;;  %v597_v18 = vshrl.u32 %v13233_v57, 16  ;;  %v625_v19 = vshll.u32 %v13250_v6, 16  ;;  %v595_v21 = vrot.slane %v593_v4, 1  ;;  %v613_v22 = vshrl.u32 %v13238_v61, 16 }
  0x27   : > { %9895 = vmatpush3.bf16.msra.mxu0 %v12829_v31  ;;  %9814 = vmatprep.mubr.msk.bf16.mxu0 %vm13054_vm0, %v13053_v1  ;;  %v621_v23 = vshrl.u32 %v13240_v62, 16  ;;  %v611_v25 = vrot.slane %v609_v9, 1  ;;  %v619_v26 = vrot.slane %v617_v10, 1  ;;  %v629_v27 = vshrl.u32 %v13250_v6, 16 }
  0x28   : > { %9896 = vmatprep.subr.bf16.mxu0 %v13053_v1  ;;  %v572_v29 = vsel %vm536_vm1, %v567_v15, %v571_v11  ;;  %v627_v31 = vrot.slane %v625_v19, 1  ;;  %v633_v32 = vshll.u32 %v13267_v24, 16  ;;  %v575_v33 = vor.u32 %v573_v7, %v571_v11 }
  0x29   : > { %v637_v35 = vshrl.u32 %v13267_v24, 16  ;;  %v583_v38 = vor.u32 %v581_v13, %v579_v12  ;;  %v641_v43 = vshll.u32 %v13288_v39, 16  ;;  %v591_v44 = vor.u32 %v589_v14, %v587_v16  ;;  %v13330_v13 = vld [vmem:[#allocation2 + $0x80] sm:$0xff] }
  0x2a   : > { %v635_v42 = vrot.slane %v633_v32, 1  ;;  %v599_v46 = vor.u32 %v597_v18, %v595_v21  ;;  %v645_v49 = vshrl.u32 %v13288_v39, 16  ;;  %v615_v55 = vor.u32 %v613_v22, %v611_v25 }
  0x2b   : > { %9897 = vmatpush3.bf16.msra.mxu0 %v12832_v37  ;;  %v580_v37 = vsel %vm536_vm1, %v575_v33, %v579_v12  ;;  %v588_v40 = vsel %vm536_vm1, %v583_v38, %v587_v16  ;;  %v623_v59 = vor.u32 %v621_v23, %v619_v26  ;;  %v631_v17 = vor.u32 %v629_v27, %v627_v31  ;;  %v13357_v33 = vld [vmem:[#allocation2 + $0x98] sm:$0xff] }
  0x2c   : > { %9898 = vmatprep.subr.bf16.mxu0 %v13053_v1  ;;  %v604_v48 = vsel %vm536_vm1, %v599_v46, %v603_v8  ;;  %v620_v58 = vsel %vm536_vm1, %v615_v55, %v619_v26  ;;  %v665_v16 = vshll.u32 %v13330_v13, 16  ;;  %v673_v22 = vshll.u32 %v13210_v41, 16  ;;  %v13348_v26 = vld [vmem:[#allocation2 + $0x90] sm:$0xff]  ;;  %v13386_v55 = vld [vmem:[#allocation2] sm:$0xff] }
  0x2d   : > { %v628_v60 = vsel %vm536_vm1, %v623_v59, %v627_v31  ;;  %v636_v2 = vsel %vm536_vm1, %v631_v17, %v635_v42  ;;  %v12857_v59 = vld [vmem:[%s16024_s1 + $0x90] sm:$0xff]   ;;  %v12859_v17 = vld [vmem:[%s16024_s1 + $0xa0] sm:$0xff]  }
  0x2e   : > { %9815 = vmatmul.mubr.bf16.gmra.mrb[4].mxu0 %v556_v45  ;;  %v596_v45 = vsel %vm536_vm1, %v591_v44, %v595_v21  ;;  %v667_v19 = vrot.slane %v665_v16, 1  ;;  %v669_v21 = vshrl.u32 %v13330_v13, 16  ;;  %v693_v44 = vshrl.u32 %v13357_v33, 16 }
  0x2f   : > { %9818 = vmatprep.mubr.msk.bf16.mxu0 %vm13054_vm0, %v13053_v1  ;;  %9899 = vmatpush3.bf16.msra.mxu0 %v12837_v47  ;;  %v13297_v47 = vld [vmem:[#allocation2 + $0x70] sm:$0xff] }
  0x30   : > { %9900 = vmatprep.subr.bf16.mxu0 %v13053_v1  ;;  %v649_v50 = vshll.u32 %v13297_v47, 16  ;;  %v653_v9 = vshrl.u32 %v13297_v47, 16  ;;  %v671_v23 = vor.u32 %v669_v21, %v667_v19 }
  0x32   : > { %v651_v0 = vrot.slane %v649_v50, 1 }
  0x33   : > { %9901 = vmatpush3.bf16.msra.mxu0 %v12840_v52  ;;  %v607_v52 = vor.u32 %v605_v5, %v603_v8  ;;  %v13319_v5 = vld [vmem:[#allocation2 + $0x78] sm:$0xff] }
  0x34   : > { %9902 = vmatprep.subr.bf16.mxu0 %v13053_v1  ;;  %v657_v10 = vshll.u32 %v13319_v5, 16  ;;  %v655_v11 = vor.u32 %v653_v9, %v651_v0  ;;  %v661_v15 = vshrl.u32 %v13319_v5, 16 }
  0x35   : > { %v612_v54 = vsel %vm536_vm1, %v607_v52, %v611_v25  ;;  %v675_v25 = vrot.slane %v673_v22, 1  ;;  %v13523_v22 = vld [vmem:[#allocation2 + $0x20] sm:$0xff] }
  0x36   : > { %9819 = vmatmul.mubr.bf16.gmra.mrb[8].mxu0 %v564_v63  ;;  %v643_v63 = vrot.slane %v641_v43, 1  ;;  %v659_v12 = vrot.slane %v657_v10, 1 }
  0x37   : > { %9822 = vmatprep.mubr.msk.bf16.mxu0 %vm13054_vm0, %v13053_v1  ;;  %9903 = vmatpush3.bf16.msra.mxu0 %v12843_v3  ;;  %v639_v3 = vor.u32 %v637_v35, %v635_v42  ;;  %v676_v27 = vsel %vm536_vm1, %v671_v23, %v675_v25  ;;  %v13368_v42 = vld [vmem:[#allocation2 + $0xa0] sm:$0x1f]  ;;  %v1260_v23 = vrot.slane %v13523_v22, 1 }
  0x38   : > { %9904 = vmatprep.subr.bf16.mxu0 %v13053_v1  ;;  %v647_v7 = vor.u32 %v645_v49, %v643_v63  ;;  %v660_v14 = vsel %vm536_vm1, %v655_v11, %v659_v12  ;;  %v663_v18 = vor.u32 %v661_v15, %v659_v12  ;;  %v701_v50 = vshrl.u32 %v13368_v42, 16  ;;  %v12865_v11 = vld [vmem:[%s16024_s1 + $0xd0] sm:$0xff]   ;;  %v13505_v12 = vld [vmem:[#allocation2 + $0x18] sm:$0xff] }
  0x39   : > { %v644_v4 = vsel %vm536_vm1, %v639_v3, %v643_v63  ;;  %v12860_v63 = vld [vmem:[%s16024_s1 + $0xa8] sm:$0xff]  }
  0x3a   : > { %v652_v8 = vsel %vm536_vm1, %v647_v7, %v651_v0  ;;  %v12861_v0 = vld [vmem:[%s16024_s1 + $0xb0] sm:$0xff]  }
  0x3b   : > { %9905 = vmatpush3.bf16.msra.mxu0 %v12848_v20  ;;  %v668_v20 = vsel %vm536_vm1, %v663_v18, %v667_v19  ;;  %v12866_v18 = vld [vmem:[%s16024_s1 + $0xd8] sm:$0xff]  }
  0x3c   : > { %9906 = vmatprep.subr.bf16.mxu0 %v13053_v1 }
  0x3e   : > { %9823 = vmatmul.mubr.bf16.gmra.mrb[12].mxu0 %v572_v29  ;;  %v681_v29 = vshll.u32 %v13348_v26, 16 }
  0x3f   : > { %9826 = vmatprep.mubr.msk.bf16.mxu0 %vm13054_vm0, %v13053_v1  ;;  %9907 = vmatpush3.bf16.msra.mxu0 %v12850_v28  ;;  %v677_v28 = vshrl.u32 %v13210_v41, 16 }
  0x40   : > { %9908 = vmatprep.subr.bf16.mxu0 %v13053_v1  ;;  %v683_v32 = vrot.slane %v681_v29, 1 }
  0x41   : > { %v679_v31 = vor.u32 %v677_v28, %v675_v25  ;;  %v12868_v25 = vld [vmem:[%s16024_s1 + $0xe8] sm:$0xff]   ;;  %v12869_v28 = vld [vmem:[%s16024_s1 + $0xf0] sm:$0xff]  }
  0x43   : > { %9909 = vmatpush3.bf16.msra.mxu0 %v12854_v36  ;;  %v684_v35 = vsel %vm536_vm1, %v679_v31, %v683_v32  ;;  %v685_v36 = vshrl.u32 %v13348_v26, 16  ;;  %v13540_v31 = vld [vmem:[#allocation2 + $0x28] sm:$0xff] }
  0x44   : > { %9994 = vmatprep.subr.bf16.mxu0 %v13053_v1 }
  0x45   : > { %v687_v38 = vor.u32 %v685_v36, %v683_v32  ;;  %v1262_v32 = vrot.slane %v13540_v31, 1 }
  0x46   : > { %9827 = vmatmul.mubr.bf16.gmra.mrb[16].mxu0 %v580_v37  ;;  %v689_v37 = vshll.u32 %v13357_v33, 16 }
  0x47   : > { %9830 = vmatprep.mubr.msk.bf16.mxu0 %vm13054_vm0, %v13053_v1 }
  0x4e   : > { %9831 = vmatmul.mubr.bf16.gmra.mrb[20].mxu0 %v588_v40  ;;  %v691_v40 = vrot.slane %v689_v37, 1 }
  0x4f   : > { %9834 = vmatprep.mubr.msk.bf16.mxu0 %vm13054_vm0, %v13053_v1 }
  0x50   : > { %v692_v43 = vsel %vm536_vm1, %v687_v38, %v691_v40  ;;  %v695_v46 = vor.u32 %v693_v44, %v691_v40  ;;  %v13548_v38 = vsel %vm1252_vm2, %v1260_v23, %v1262_v32  ;;  %v13554_v40 = vld [vmem:[#allocation2 + $0x30] sm:$0xff] }
  0x56   : > { %9835 = vmatmul.mubr.bf16.gmra.mrb[24].mxu0 %v596_v45  ;;  %v697_v45 = vshll.u32 %v13368_v42, 16 }
  0x57   : > { %9838 = vmatprep.mubr.msk.bf16.mxu0 %vm13054_vm0, %v13053_v1 }
  0x5e   : > { %9839 = vmatmul.mubr.bf16.gmra.mrb[28].mxu0 %v604_v48  ;;  %v699_v48 = vrot.slane %v697_v45, 1 }
  0x5f   : > { %9842 = vmatprep.mubr.msk.bf16.mxu0 %vm13054_vm0, %v13053_v1 }
  0x60   : > { %v700_v49 = vsel %vm536_vm1, %v695_v46, %v699_v48  ;;  %v703_v52 = vor.u32 %v701_v50, %v699_v48 }
  0x66   : > { %9843 = vmatmul.mubr.bf16.gmra.mrb[32].mxu0 %v612_v54  ;;  %v12855_v54 = vld [vmem:[%s16024_s1 + $0x80] sm:$0xff]  }
  0x67   : > { %9846 = vmatprep.mubr.msk.bf16.mxu0 %vm13054_vm0, %v13053_v1 }
  0x6e   : > { %9847 = vmatmul.mubr.bf16.gmra.mrb[36].mxu0 %v620_v58  ;;  %v12856_v58 = vld [vmem:[%s16024_s1 + $0x88] sm:$0xff]  }
  0x6f   : > { %9850 = vmatprep.mubr.msk.bf16.mxu0 %vm13054_vm0, %v13053_v1 }
  0x76   : > { %9851 = vmatmul.mubr.bf16.gmra.mrb[40].mxu0 %v628_v60  ;;  %v12858_v60 = vld [vmem:[%s16024_s1 + $0x98] sm:$0xff]  }
  0x77   : > { %9854 = vmatprep.mubr.msk.bf16.mxu0 %vm13054_vm0, %v13053_v1 }
  0x7e   : > { %9855 = vmatmul.mubr.bf16.gmra.mrb[44].mxu0 %v636_v2 }
  0x7f   : > { %9858 = vmatprep.mubr.msk.bf16.mxu0 %vm13054_vm0, %v13053_v1 }
  0x86   : > { %9859 = vmatmul.mubr.bf16.gmra.mrb[48].mxu0 %v644_v4 }
  0x87   : > { %9862 = vmatprep.mubr.msk.bf16.mxu0 %vm13054_vm0, %v13053_v1 }
  0x8e   : > { %9863 = vmatmul.mubr.bf16.gmra.mrb[52].mxu0 %v652_v8  ;;  %v12864_v8 = vld [vmem:[%s16024_s1 + $0xc8] sm:$0xff]  }
  0x8f   : > { %9866 = vmatprep.mubr.msk.bf16.mxu0 %vm13054_vm0, %v13053_v1 }
  0x96   : > { %9867 = vmatmul.mubr.bf16.gmra.mrb[56].mxu0 %v660_v14  ;;  %v1258_v14 = vrot.slane %v13505_v12, 1 }
  0x97   : > { %9870 = vmatprep.mubr.msk.bf16.mxu0 %vm13054_vm0, %v13053_v1 }
  0x9e   : > { %9871 = vmatmul.mubr.bf16.gmra.mrb[60].mxu0 %v668_v20  ;;  %v12867_v20 = vld [vmem:[%s16024_s1 + $0xe0] sm:$0xff]  }
  0x9f   : > { %9874 = vmatprep.mubr.msk.bf16.mxu0 %vm13054_vm0, %v13053_v1 }
  0xa6   : > { %9875 = vmatmul.mubr.bf16.gmra.mrb[64].mxu0 %v676_v27  ;;  %v13531_v27 = vsel %vm1252_vm2, %v1258_v14, %v1260_v23 }
  0xa7   : > { %9878 = vmatprep.mubr.msk.bf16.mxu0 %vm13054_vm0, %v13053_v1 }
  0xae   : > { %9879 = vmatmul.mubr.bf16.gmra.mrb[68].mxu0 %v684_v35  ;;  %v12870_v35 = vld [vmem:[%s16024_s1 + $0xf8] sm:$0xff]  }
  0xaf   : > { %9882 = vmatprep.mubr.msk.bf16.mxu0 %vm13054_vm0, %v13053_v1 }
  0xb6   : > { %9883 = vmatmul.mubr.bf16.gmra.mrb[72].mxu0 %v692_v43  ;;  %v1264_v43 = vrot.slane %v13554_v40, 1 }
  0xb7   : > { %9886 = vmatprep.mubr.msk.bf16.mxu0 %vm13054_vm0, %v13053_v1 }
  0xbe   : > { %9887 = vmatmul.mubr.bf16.gmra.mrb[76].mxu0 %v700_v49  ;;  %v13558_v49 = vsel %vm1252_vm2, %v1262_v32, %v1264_v43 }
  0xbf   : > { %9890 = vmatprep.mubr.msk.bf16.mxu0 %vm13054_vm0, %v13053_v1 }
  0xc6   : > { %9891 = vmatmul.mubr.bf16.gmra.mrb[80].mxu0 %v703_v52  ;;  %v13563_v52 = vld [vmem:[#allocation2 + $0x38] sm:$0xff] }
  0xc7   : > { %9910 = vmatprep.mubr.msk.bf16.mxu0 %vm13054_vm0, %v13053_v1 }
  0xce   : > { %9911 = vmatmul.mubr.bf16.vlgmr.msra.gmra.mrb[84].mxu0 %v13386_v55 }
  0xcf   : > { %9995 = vmatpush3.bf16.msra.mxu0 %v12855_v54  ;;  %9914 = vmatprep.mubr.msk.bf16.mxu0 %vm13054_vm0, %v13053_v1  ;;  %v1266_v54 = vrot.slane %v13563_v52, 1 }
  0xd0   : > { %9996 = vmatprep.subr.bf16.mxu0 %v13053_v1 }
  0xd3   : > { %9997 = vmatpush3.bf16.msra.mxu0 %v12856_v58 }
  0xd4   : > { %9998 = vmatprep.subr.bf16.mxu0 %v13053_v1 }
  0xd6   : > { %9915 = vmatmul.mubr.bf16.gmra.mrb[4].mxu0 %v13386_v55 }
  0xd7   : > { %9918 = vmatprep.mubr.msk.bf16.mxu0 %vm13054_vm0, %v13053_v1  ;;  %9999 = vmatpush3.bf16.msra.mxu0 %v12857_v59 }
  0xd8   : > { %10000 = vmatprep.subr.bf16.mxu0 %v13053_v1 }
  0xdb   : > { %10001 = vmatpush3.bf16.msra.mxu0 %v12858_v60  ;;  %v13567_v60 = vsel %vm1252_vm2, %v1264_v43, %v1266_v54 }
  0xdc   : > { %10002 = vmatprep.subr.bf16.mxu0 %v13053_v1 }
  0xde   : > { %9919 = vmatmul.mubr.bf16.gmra.mrb[8].mxu0 %v13190_v30  ;;  %v12862_v30 = vld [vmem:[%s16024_s1 + $0xb8] sm:$0xff]  }
  0xdf   : > { %9922 = vmatprep.mubr.msk.bf16.mxu0 %vm13054_vm0, %v13053_v1  ;;  %10003 = vmatpush3.bf16.msra.mxu0 %v12859_v17 }
  0xe0   : > { %10004 = vmatprep.subr.bf16.mxu0 %v13053_v1 }
  0xe3   : > { %10005 = vmatpush3.bf16.msra.mxu0 %v12860_v63 }
  0xe4   : > { %10006 = vmatprep.subr.bf16.mxu0 %v13053_v1 }
  0xe6   : > { %9923 = vmatmul.mubr.bf16.gmra.mrb[12].mxu0 %v13198_v34 }
  0xe7   : > { %9926 = vmatprep.mubr.msk.bf16.mxu0 %vm13054_vm0, %v13053_v1  ;;  %10007 = vmatpush3.bf16.msra.mxu0 %v12861_v0 }
  0xe8   : > { %10008 = vmatprep.subr.bf16.mxu0 %v13053_v1 }
  0xeb   : > { %10009 = vmatpush3.bf16.msra.mxu0 %v12862_v30  ;;  %v13579_v30 = vld [vmem:[#allocation2 + $0x48] sm:$0xff] }
  0xec   : > { %10094 = vmatprep.subr.bf16.mxu0 %v13053_v1 }
  0xee   : > { %9927 = vmatmul.mubr.bf16.gmra.mrb[16].mxu0 %v13221_v51  ;;  %v13441_v51 = vld [vmem:[#allocation2 + $0x40] sm:$0xff] }
  0xef   : > { %9930 = vmatprep.mubr.msk.bf16.mxu0 %vm13054_vm0, %v13053_v1  ;;  %v1268_v63 = vrot.slane %v13441_v51, 1 }
  0xf1   : > { %v13574_v0 = vsel %vm1252_vm2, %v1266_v54, %v1268_v63 }
  0xf6   : > { %9931 = vmatmul.mubr.bf16.gmra.mrb[20].mxu0 %v13226_v53  ;;  %v501_v53 = vld [vmem:[#allocation2 + $0xa0] sm:$0xf] }
  0xf7   : > { %9934 = vmatprep.mubr.msk.bf16.mxu0 %vm13054_vm0, %v13053_v1 }
  0xf9   : > { %v807_v34 = vpop.f32.mrb[0].mxu0 }
  0xfa   : > { %v9812_v2 = vpop.f32.mrb[1].mxu0  ;;  %v1270_v34 = vrot.slane %v13579_v30, 1 }
  0xfb   : > { %v809_v3 = vpop.f32.mrb[2].mxu0 }
  0xfc   : > { %v9813_v4 = vpop.f32.mrb[3].mxu0  ;;  %v13583_v2 = vsel %vm1252_vm2, %v1268_v63, %v1270_v34  ;;  %v13588_v3 = vld [vmem:[#allocation2 + $0x50] sm:$0xff] }
  0xfd   : > { %v1272_v4 = vrot.slane %v13588_v3, 1 }
  0xfe   : > { %9935 = vmatmul.mubr.bf16.gmra.mrb[24].mxu0 %v13230_v56  ;;  %v1213_v56 = vld [vmem:[#allocation2] sm:$0xfe] }
  0xff   : > { %9938 = vmatprep.mubr.msk.bf16.mxu0 %vm13054_vm0, %v13053_v1 }
 0x106   : > { %9939 = vmatmul.mubr.bf16.gmra.mrb[28].mxu0 %v13233_v57  ;;  %v1254_v57 = vrot.slane %v13386_v55, 1 }
 0x107   : > { %9942 = vmatprep.mubr.msk.bf16.mxu0 %vm13054_vm0, %v13053_v1 }
 0x10e   : > { %9943 = vmatmul.mubr.bf16.gmra.mrb[32].mxu0 %v13441_v51 }
 0x10f   : > { %9946 = vmatprep.mubr.msk.bf16.mxu0 %vm13054_vm0, %v13053_v1 }
 0x116   : > { %9947 = vmatmul.mubr.bf16.gmra.mrb[36].mxu0 %v13238_v61 }
 0x117   : > { %9950 = vmatprep.mubr.msk.bf16.mxu0 %vm13054_vm0, %v13053_v1 }
 0x11e   : > { %9951 = vmatmul.mubr.bf16.gmra.mrb[40].mxu0 %v13240_v62  ;;  %v12863_v62 = vld [vmem:[%s16024_s1 + $0xc0] sm:$0xff]  }
 0x11f   : > { %9954 = vmatprep.mubr.msk.bf16.mxu0 %vm13054_vm0, %v13053_v1 }
 0x126   : > { %9955 = vmatmul.mubr.bf16.gmra.mrb[44].mxu0 %v13250_v6  ;;  %v13488_v6 = vld [vmem:[#allocation2 + $0x10] sm:$0xff] }
 0x127   : > { %9958 = vmatprep.mubr.msk.bf16.mxu0 %vm13054_vm0, %v13053_v1  ;;  %v13491_v7 = vrot.slane %v13488_v6, 1 }
 0x129   : > { %v1257_v9 = vsel %vm1252_vm2, %v1254_v57, %v13491_v7  ;;  %v13514_v19 = vsel %vm1252_vm2, %v13491_v7, %v1258_v14 }
 0x12e   : > { %9959 = vmatmul.mubr.bf16.gmra.mrb[48].mxu0 %v13267_v24 }
 0x12f   : > { %9962 = vmatprep.mubr.msk.bf16.mxu0 %vm13054_vm0, %v13053_v1 }
 0x136   : > { %9963 = vmatmul.mubr.bf16.gmra.mrb[52].mxu0 %v13288_v39 }
 0x137   : > { %9966 = vmatprep.mubr.msk.bf16.mxu0 %vm13054_vm0, %v13053_v1 }
 0x13e   : > { %9967 = vmatmul.mubr.bf16.gmra.mrb[56].mxu0 %v13297_v47 }
 0x13f   : > { %9970 = vmatprep.mubr.msk.bf16.mxu0 %vm13054_vm0, %v13053_v1 }
 0x146   : > { %9971 = vmatmul.mubr.bf16.gmra.mrb[60].mxu0 %v13319_v5 }
 0x147   : > { %9974 = vmatprep.mubr.msk.bf16.mxu0 %vm13054_vm0, %v13053_v1 }
 0x14e   : > { %9975 = vmatmul.mubr.bf16.gmra.mrb[64].mxu0 %v13330_v13 }
 0x14f   : > { %9978 = vmatprep.mubr.msk.bf16.mxu0 %vm13054_vm0, %v13053_v1 }
 0x156   : > { %9979 = vmatmul.mubr.bf16.gmra.mrb[68].mxu0 %v13210_v41  ;;  %v1253_v41 = vrot.slane %v1213_v56, 1  ;;  %v13597_v56 = vld [vmem:[#allocation2 + $0x58] sm:$0xff] }
 0x157   : > { %9982 = vmatprep.mubr.msk.bf16.mxu0 %vm13054_vm0, %v13053_v1 }
 0x158   : > { %v1255_v61 = vsel %vm1252_vm2, %v1253_v41, %v1254_v57  ;;  %v1274_v41 = vrot.slane %v13597_v56, 1 }
 0x15a   : > { %v13601_v57 = vsel %vm1252_vm2, %v1272_v4, %v1274_v41 }
 0x15e   : > { %9983 = vmatmul.mubr.bf16.gmra.mrb[72].mxu0 %v13348_v26 }
 0x15f   : > { %9986 = vmatprep.mubr.msk.bf16.mxu0 %vm13054_vm0, %v13053_v1 }
 0x166   : > { %9987 = vmatmul.mubr.bf16.gmra.mrb[76].mxu0 %v13357_v33 }
 0x167   : > { %9990 = vmatprep.mubr.msk.bf16.mxu0 %vm13054_vm0, %v13053_v1 }
 0x16e   : > { %9991 = vmatmul.mubr.bf16.gmra.mrb[88].mxu0 %v501_v53  ;;  %v13592_v53 = vsel %vm1252_vm2, %v1270_v34, %v1272_v4 }
 0x16f   : > { %10010 = vmatprep.mubr.msk.bf16.mxu0 %vm13054_vm0, %v13053_v1 }
 0x176   : > { %10011 = vmatmul.mubr.bf16.vlgmr.msra.gmra.mrb[92].mxu0 %v1255_v61  ;;  %v1276_v61 = vrot.slane %v13267_v24, 1  ;;  %v1280_v24 = vrot.slane %v13297_v47, 1  ;;  %v1284_v47 = vrot.slane %v13330_v13, 1 }
 0x177   : > { %10095 = vmatpush3.bf16.msra.mxu0 %v12863_v62  ;;  %10014 = vmatprep.mubr.msk.bf16.mxu0 %vm13054_vm0, %v13053_v1 }
 0x178   : > { %10096 = vmatprep.subr.bf16.mxu0 %v13053_v1  ;;  %v13608_v62 = vsel %vm1252_vm2, %v1274_v41, %v1276_v61 }
 0x17b   : > { %10097 = vmatpush3.bf16.msra.mxu0 %v12864_v8  ;;  %v1278_v8 = vrot.slane %v13288_v39, 1  ;;  %v1282_v39 = vrot.slane %v13319_v5, 1 }
 0x17c   : > { %10098 = vmatprep.subr.bf16.mxu0 %v13053_v1 }
 0x17d   : > { %v13629_v14 = vsel %vm1252_vm2, %v1280_v24, %v1282_v39 }
 0x17e   : > { %10015 = vmatmul.mubr.bf16.gmra.mrb[4].mxu0 %v1257_v9  ;;  %v13615_v9 = vsel %vm1252_vm2, %v1276_v61, %v1278_v8 }
 0x17f   : > { %10018 = vmatprep.mubr.msk.bf16.mxu0 %vm13054_vm0, %v13053_v1  ;;  %10099 = vmatpush3.bf16.msra.mxu0 %v12865_v11  ;;  %v13622_v11 = vsel %vm1252_vm2, %v1278_v8, %v1280_v24 }
 0x180   : > { %10100 = vmatprep.subr.bf16.mxu0 %v13053_v1 }
 0x183   : > { %10101 = vmatpush3.bf16.msra.mxu0 %v12866_v18  ;;  %v13636_v18 = vsel %vm1252_vm2, %v1282_v39, %v1284_v47  ;;  %v2029_v39 = vshll.u32 %v13488_v6, 16 }
 0x184   : > { %10102 = vmatprep.subr.bf16.mxu0 %v13053_v1 }
 0x186   : > { %10019 = vmatmul.mubr.bf16.gmra.mrb[8].mxu0 %v13514_v19 }
 0x187   : > { %10022 = vmatprep.mubr.msk.bf16.mxu0 %vm13054_vm0, %v13053_v1  ;;  %10103 = vmatpush3.bf16.msra.mxu0 %v12867_v20  ;;  %v13641_v20 = vld [vmem:[#allocation2 + $0x88] sm:$0xff] }
 0x188   : > { %10104 = vmatprep.subr.bf16.mxu0 %v13053_v1  ;;  %v1286_v23 = vrot.slane %v13641_v20, 1  ;;  %v2161_v5 = vshrl.u32 %v13641_v20, 16 }
 0x18b   : > { %10105 = vmatpush3.bf16.msra.mxu0 %v12868_v25  ;;  %v13645_v25 = vsel %vm1252_vm2, %v1284_v47, %v1286_v23 }
 0x18c   : > { %10106 = vmatprep.subr.bf16.mxu0 %v13053_v1 }
 0x18e   : > { %10023 = vmatmul.mubr.bf16.gmra.mrb[12].mxu0 %v13531_v27 }
 0x18f   : > { %10026 = vmatprep.mubr.msk.bf16.mxu0 %vm13054_vm0, %v13053_v1  ;;  %10107 = vmatpush3.bf16.msra.mxu0 %v12869_v28  ;;  %v1288_v28 = vrot.slane %v13348_v26, 1 }
 0x190   : > { %10108 = vmatprep.subr.bf16.mxu0 %v13053_v1 }
 0x191   : > { %v13652_v32 = vsel %vm1252_vm2, %v1286_v23, %v1288_v28  ;;  %v2031_v23 = vrot.slane %v2029_v39, 2  ;;  %v2074_v39 = vshll.u32 %v13563_v52, 16 }
 0x193   : > { %10109 = vmatpush3.bf16.msra.mxu0 %v12870_v35  ;;  %v13658_v35 = vrot.slane %v13357_v33, 1 }
 0x194   : > { %10194 = vmatprep.subr.bf16.mxu0 %v13053_v1 }
 0x195   : > { %v13662_v43 = vsel %vm1252_vm2, %v1288_v28, %v13658_v35 }
 0x196   : > { %10027 = vmatmul.mubr.bf16.gmra.mrb[16].mxu0 %v13548_v38 }
 0x197   : > { %10030 = vmatprep.mubr.msk.bf16.mxu0 %vm13054_vm0, %v13053_v1 }
 0x199   : > { %v964_v45 = vpop.f32.mrb[80].mxu0 }
 0x19a   : > { %v9892_v46 = vpop.f32.mrb[81].mxu0  ;;  %v1292_v45 = vrot.slane %v13368_v42, 1  ;;  %v12871_v42 = vld [vmem:[%s16024_s1 + $0x100] sm:$0xff]  }
 0x19b   : > { %v966_v48 = vpop.f32.mrb[82].mxu0 }
 0x19c   : > { %v9893_v50 = vpop.f32.mrb[83].mxu0  ;;  %v1293_v46 = vsel %vm1252_vm2, %v13658_v35, %v1292_v45  ;;  %v13672_v48 = vld [vmem:[#allocation2 + $0x8] sm:$0xfe] }
 0x19d   : > { %v1655_v50 = vrot.slane %v13672_v48, 1 }
 0x19e   : > { %10031 = vmatmul.mubr.bf16.gmra.mrb[20].mxu0 %v13558_v49 }
 0x19f   : > { %10034 = vmatprep.mubr.msk.bf16.mxu0 %vm13054_vm0, %v13053_v1  ;;  %v1657_v54 = vsel %vm1252_vm2, %v1655_v50, %v13491_v7  ;;  %v12873_v7 = vld [vmem:[%s16024_s1 + $0x110] sm:$0xff]  }
 0x1a1   : > { %v1051_v55 = vpop.f32.mrb[84].mxu0 }
 0x1a2   : > { %v9912_v58 = vpop.f32.mrb[85].mxu0  ;;  %v12872_v55 = vld [vmem:[%s16024_s1 + $0x108] sm:$0xff]  }
 0x1a3   : > { %v1053_v59 = vpop.f32.mrb[86].mxu0  ;;  %v12874_v58 = vld [vmem:[%s16024_s1 + $0x118] sm:$0xff]  }
 0x1a4   : > { %v9913_v17 = vpop.f32.mrb[87].mxu0  ;;  %v12875_v59 = vld [vmem:[%s16024_s1 + $0x120] sm:$0xff]  }
 0x1a5   : > { %v12877_v17 = vld [vmem:[%s16024_s1 + $0x130] sm:$0xff]  }
 0x1a6   : > { %10035 = vmatmul.mubr.bf16.gmra.mrb[24].mxu0 %v13567_v60 }
 0x1a7   : > { %10038 = vmatprep.mubr.msk.bf16.mxu0 %vm13054_vm0, %v13053_v1 }
 0x1ae   : > { %10039 = vmatmul.mubr.bf16.gmra.mrb[28].mxu0 %v13574_v0 }
 0x1af   : > { %10042 = vmatprep.mubr.msk.bf16.mxu0 %vm13054_vm0, %v13053_v1 }
 0x1b6   : > { %10043 = vmatmul.mubr.bf16.gmra.mrb[32].mxu0 %v13583_v2 }
 0x1b7   : > { %10046 = vmatprep.mubr.msk.bf16.mxu0 %vm13054_vm0, %v13053_v1 }
 0x1be   : > { %10047 = vmatmul.mubr.bf16.gmra.mrb[36].mxu0 %v13592_v53 }
 0x1bf   : > { %10050 = vmatprep.mubr.msk.bf16.mxu0 %vm13054_vm0, %v13053_v1 }
 0x1c6   : > { %10051 = vmatmul.mubr.bf16.gmra.mrb[40].mxu0 %v13601_v57 }
 0x1c7   : > { %10054 = vmatprep.mubr.msk.bf16.mxu0 %vm13054_vm0, %v13053_v1 }
 0x1ce   : > { %10055 = vmatmul.mubr.bf16.gmra.mrb[44].mxu0 %v13608_v62 }
 0x1cf   : > { %10058 = vmatprep.mubr.msk.bf16.mxu0 %vm13054_vm0, %v13053_v1 }
 0x1d6   : > { %10059 = vmatmul.mubr.bf16.gmra.mrb[48].mxu0 %v13615_v9 }
 0x1d7   : > { %10062 = vmatprep.mubr.msk.bf16.mxu0 %vm13054_vm0, %v13053_v1 }
 0x1de   : > { %10063 = vmatmul.mubr.bf16.gmra.mrb[52].mxu0 %v13622_v11 }
 0x1df   : > { %10066 = vmatprep.mubr.msk.bf16.mxu0 %vm13054_vm0, %v13053_v1 }
 0x1e6   : > { %10067 = vmatmul.mubr.bf16.gmra.mrb[56].mxu0 %v13629_v14 }
 0x1e7   : > { %10070 = vmatprep.mubr.msk.bf16.mxu0 %vm13054_vm0, %v13053_v1 }
 0x1ee   : > { %10071 = vmatmul.mubr.bf16.gmra.mrb[60].mxu0 %v13636_v18 }
 0x1ef   : > { %10074 = vmatprep.mubr.msk.bf16.mxu0 %vm13054_vm0, %v13053_v1 }
 0x1f6   : > { %10075 = vmatmul.mubr.bf16.gmra.mrb[64].mxu0 %v13645_v25 }
 0x1f7   : > { %10078 = vmatprep.mubr.msk.bf16.mxu0 %vm13054_vm0, %v13053_v1 }
 0x1fe   : > { %10079 = vmatmul.mubr.bf16.gmra.mrb[68].mxu0 %v13652_v32 }
 0x1ff   : > { %10082 = vmatprep.mubr.msk.bf16.mxu0 %vm13054_vm0, %v13053_v1 }
 0x206   : > { %10083 = vmatmul.mubr.bf16.gmra.mrb[72].mxu0 %v13662_v43 }
 0x207   : > { %10086 = vmatprep.mubr.msk.bf16.mxu0 %vm13054_vm0, %v13053_v1 }
 0x20e   : > { %10087 = vmatmul.mubr.bf16.gmra.mrb[76].mxu0 %v1293_v46 }
 0x20f   : > { %10090 = vmatprep.mubr.msk.bf16.mxu0 %vm13054_vm0, %v13053_v1 }
 0x216   : > { %10091 = vmatmul.mubr.bf16.gmra.mrb[96].mxu0 %v1292_v45  ;;  %v12879_v45 = vld [vmem:[%s16024_s1 + $0x140] sm:$0xff]  }
 0x217   : > { %10110 = vmatprep.mubr.msk.bf16.mxu0 %vm13054_vm0, %v13053_v1 }
 0x21e   : > { %10111 = vmatmul.mubr.bf16.vlgmr.msra.gmra.mrb[100].mxu0 %v1657_v54  ;;  %v2044_v54 = vshrl.u32 %v13523_v22, 16 }
 0x21f   : > { %10195 = vmatpush3.bf16.msra.mxu0 %v12871_v42  ;;  %10114 = vmatprep.mubr.msk.bf16.mxu0 %vm13054_vm0, %v13053_v1  ;;  %v2047_v42 = vshll.u32 %v13523_v22, 16 }
 0x220   : > { %10196 = vmatprep.subr.bf16.mxu0 %v13053_v1 }
 0x223   : > { %10197 = vmatpush3.bf16.msra.mxu0 %v12872_v55  ;;  %v12880_v55 = vld [vmem:[%s16024_s1 + $0x148] sm:$0xff]  }
 0x224   : > { %10198 = vmatprep.subr.bf16.mxu0 %v13053_v1 }
 0x226   : > { %10115 = vmatmul.mubr.bf16.gmra.mrb[4].mxu0 %v13514_v19  ;;  %v12876_v19 = vld [vmem:[%s16024_s1 + $0x128] sm:$0xff]  }
 0x227   : > { %10118 = vmatprep.mubr.msk.bf16.mxu0 %vm13054_vm0, %v13053_v1  ;;  %10199 = vmatpush3.bf16.msra.mxu0 %v12873_v7 }
 0x228   : > { %10200 = vmatprep.subr.bf16.mxu0 %v13053_v1 }
 0x22b   : > { %10201 = vmatpush3.bf16.msra.mxu0 %v12874_v58  ;;  %v2046_v58 = vrot.slane %v2044_v54, 1 }
 0x22c   : > { %10202 = vmatprep.subr.bf16.mxu0 %v13053_v1 }
 0x22e   : > { %10119 = vmatmul.mubr.bf16.gmra.mrb[8].mxu0 %v13531_v27  ;;  %v12878_v27 = vld [vmem:[%s16024_s1 + $0x138] sm:$0xff]  }
 0x22f   : > { %10122 = vmatprep.mubr.msk.bf16.mxu0 %vm13054_vm0, %v13053_v1  ;;  %10203 = vmatpush3.bf16.msra.mxu0 %v12875_v59  ;;  %v2049_v59 = vrot.slane %v2047_v42, 2 }
 0x230   : > { %10204 = vmatprep.subr.bf16.mxu0 %v13053_v1 }
 0x233   : > { %10205 = vmatpush3.bf16.msra.mxu0 %v12876_v19  ;;  %v12881_v19 = vld [vmem:[%s16024_s1 + $0x150] sm:$0xff]  }
 0x234   : > { %10206 = vmatprep.subr.bf16.mxu0 %v13053_v1 }
 0x236   : > { %10123 = vmatmul.mubr.bf16.gmra.mrb[12].mxu0 %v13548_v38 }
 0x237   : > { %10126 = vmatprep.mubr.msk.bf16.mxu0 %vm13054_vm0, %v13053_v1  ;;  %10207 = vmatpush3.bf16.msra.mxu0 %v12877_v17  ;;  %v2050_v17 = vor.u32 %v2049_v59, %v2046_v58 }
 0x238   : > { %10208 = vmatprep.subr.bf16.mxu0 %v13053_v1 }
 0x23b   : > { %10209 = vmatpush3.bf16.msra.mxu0 %v12878_v27  ;;  %v2053_v27 = vshrl.u32 %v13540_v31, 16 }
 0x23c   : > { %10294 = vmatprep.subr.bf16.mxu0 %v13053_v1 }
 0x23e   : > { %10127 = vmatmul.mubr.bf16.gmra.mrb[16].mxu0 %v13558_v49  ;;  %v13761_v49 = vld [vmem:[#allocation2 + $0xa0] sm:$0xff] }
 0x23f   : > { %10130 = vmatprep.mubr.msk.bf16.mxu0 %vm13054_vm0, %v13053_v1  ;;  %v2188_v26 = vshrl.u32 %v13761_v49, 16 }
 0x241   : > { %v1208_v63 = vpop.f32.mrb[88].mxu0 }
 0x242   : > { %v9992_v38 = vpop.f32.mrb[89].mxu0  ;;  %v2056_v63 = vshll.u32 %v13540_v31, 16 }
 0x243   : > { %v1210_v34 = vpop.f32.mrb[90].mxu0  ;;  %v12882_v38 = vld [vmem:[%s16024_s1 + $0x158] sm:$0xff]  }
 0x244   : > { %v9993_v4 = vpop.f32.mrb[91].mxu0 }
 0x245   : > { %v2055_v4 = vrot.slane %v2053_v27, 1 }
 0x246   : > { %10131 = vmatmul.mubr.bf16.gmra.mrb[20].mxu0 %v13567_v60  ;;  %v1692_v60 = vrot.slane %v13761_v49, 1 }
 0x247   : > { %10134 = vmatprep.mubr.msk.bf16.mxu0 %vm13054_vm0, %v13053_v1 }
 0x249   : > { %v1397_v41 = vpop.f32.mrb[92].mxu0 }
 0x24a   : > { %v10012_v61 = vpop.f32.mrb[93].mxu0  ;;  %v2058_v41 = vrot.slane %v2056_v63, 2 }
 0x24b   : > { %v1399_v8 = vpop.f32.mrb[94].mxu0  ;;  %v12883_v61 = vld [vmem:[%s16024_s1 + $0x160] sm:$0xff]  }
 0x24c   : > { %v10013_v24 = vpop.f32.mrb[95].mxu0  ;;  %v2059_v8 = vor.u32 %v2058_v41, %v2055_v4  ;;  %v2098_v4 = vshrl.u32 %v13588_v3, 16  ;;  %v2101_v41 = vshll.u32 %v13588_v3, 16 }
 0x24d   : > { %v2062_v24 = vshrl.u32 %v13554_v40, 16 }
 0x24e   : > { %10135 = vmatmul.mubr.bf16.gmra.mrb[24].mxu0 %v13574_v0  ;;  %v1693_v0 = vsel %vm1252_vm2, %v13658_v35, %v1692_v60  ;;  %v2038_v35 = vshll.u32 %v13505_v12, 16 }
 0x24f   : > { %10138 = vmatprep.mubr.msk.bf16.mxu0 %vm13054_vm0, %v13053_v1 }
 0x256   : > { %10139 = vmatmul.mubr.bf16.gmra.mrb[28].mxu0 %v13583_v2  ;;  %v1616_v2 = vld [vmem:[#allocation2 + $0xa8] sm:$0x1f] }
 0x257   : > { %10142 = vmatprep.mubr.msk.bf16.mxu0 %vm13054_vm0, %v13053_v1 }
 0x25e   : > { %10143 = vmatmul.mubr.bf16.gmra.mrb[32].mxu0 %v13592_v53  ;;  %v1694_v53 = vrot.slane %v1616_v2, 1  ;;  %v2060_v2 = vsel %vm2016_vm3, %v2050_v17, %v2059_v8 }
 0x25f   : > { %10146 = vmatprep.mubr.msk.bf16.mxu0 %vm13054_vm0, %v13053_v1 }
 0x266   : > { %10147 = vmatmul.mubr.bf16.gmra.mrb[36].mxu0 %v13601_v57  ;;  %v1695_v57 = vsel %vm1252_vm2, %v1692_v60, %v1694_v53  ;;  %v2065_v60 = vshll.u32 %v13554_v40, 16 }
 0x267   : > { %10150 = vmatprep.mubr.msk.bf16.mxu0 %vm13054_vm0, %v13053_v1 }
 0x26e   : > { %10151 = vmatmul.mubr.bf16.gmra.mrb[40].mxu0 %v13608_v62  ;;  %v2018_v62 = vshrl.u32 %v13672_v48, 16 }
 0x26f   : > { %10154 = vmatprep.mubr.msk.bf16.mxu0 %vm13054_vm0, %v13053_v1 }
 0x276   : > { %10155 = vmatmul.mubr.bf16.gmra.mrb[44].mxu0 %v13615_v9  ;;  %v2021_v9 = vshll.u32 %v13672_v48, 16  ;;  %v2040_v48 = vrot.slane %v2038_v35, 2 }
 0x277   : > { %10158 = vmatprep.mubr.msk.bf16.mxu0 %vm13054_vm0, %v13053_v1 }
 0x278   : > { %v2023_v47 = vrot.slane %v2021_v9, 2 }
 0x27e   : > { %10159 = vmatmul.mubr.bf16.gmra.mrb[48].mxu0 %v13622_v11  ;;  %v2026_v11 = vshrl.u32 %v13488_v6, 16 }
 0x27f   : > { %10162 = vmatprep.mubr.msk.bf16.mxu0 %vm13054_vm0, %v13053_v1 }
 0x286   : > { %10163 = vmatmul.mubr.bf16.gmra.mrb[52].mxu0 %v13629_v14  ;;  %v2020_v14 = vrot.slane %v2018_v62, 1  ;;  %v12885_v62 = vld [vmem:[%s16024_s1 + $0x170] sm:$0xff]  }
 0x287   : > { %10166 = vmatprep.mubr.msk.bf16.mxu0 %vm13054_vm0, %v13053_v1 }
 0x28e   : > { %10167 = vmatmul.mubr.bf16.gmra.mrb[56].mxu0 %v13636_v18  ;;  %v2028_v18 = vrot.slane %v2026_v11, 1  ;;  %v2071_v11 = vshrl.u32 %v13563_v52, 16 }
 0x28f   : > { %10170 = vmatprep.mubr.msk.bf16.mxu0 %vm13054_vm0, %v13053_v1 }
 0x290   : > { %v2032_v28 = vor.u32 %v2031_v23, %v2028_v18  ;;  %v2073_v18 = vrot.slane %v2071_v11, 1  ;;  %v2076_v23 = vrot.slane %v2074_v39, 2  ;;  %v13857_v11 = vld [vmem:[#allocation2 + $0x60] sm:$0xff] }
 0x291   : > { %v2116_v39 = vshrl.u32 %v13857_v11, 16 }
 0x296   : > { %10171 = vmatmul.mubr.bf16.gmra.mrb[60].mxu0 %v13645_v25  ;;  %v2024_v25 = vor.u32 %v2023_v47, %v2020_v14  ;;  %v12886_v14 = vld [vmem:[%s16024_s1 + $0x178] sm:$0xff]  }
 0x297   : > { %10174 = vmatprep.mubr.msk.bf16.mxu0 %vm13054_vm0, %v13053_v1 }
 0x29e   : > { %10175 = vmatmul.mubr.bf16.gmra.mrb[64].mxu0 %v13652_v32  ;;  %v2035_v32 = vshrl.u32 %v13505_v12, 16 }
 0x29f   : > { %10178 = vmatprep.mubr.msk.bf16.mxu0 %vm13054_vm0, %v13053_v1 }
 0x2a0   : > { %v2037_v46 = vrot.slane %v2035_v32, 1  ;;  %v2083_v32 = vshll.u32 %v13441_v51, 16 }
 0x2a2   : > { %v2041_v50 = vor.u32 %v2040_v48, %v2037_v46 }
 0x2a4   : > { %v2042_v7 = vsel %vm2016_vm3, %v2032_v28, %v2041_v50  ;;  %v2051_v34 = vsel %vm2016_vm3, %v2041_v50, %v2050_v17  ;;  %v2085_v50 = vrot.slane %v2083_v32, 2 }
 0x2a6   : > { %10179 = vmatmul.mubr.bf16.gmra.mrb[68].mxu0 %v13662_v43  ;;  %v2033_v43 = vsel %vm2016_vm3, %v2024_v25, %v2032_v28  ;;  %v2077_v25 = vor.u32 %v2076_v23, %v2073_v18  ;;  %v2080_v28 = vshrl.u32 %v13441_v51, 16  ;;  %v2118_v18 = vrot.slane %v2116_v39, 1 }
 0x2a7   : > { %10182 = vmatprep.mubr.msk.bf16.mxu0 %vm13054_vm0, %v13053_v1 }
 0x2a8   : > { %v2082_v48 = vrot.slane %v2080_v28, 1  ;;  %v13864_v28 = vld [vmem:[#allocation2 + $0x68] sm:$0xff] }
 0x2a9   : > { %v2125_v32 = vshrl.u32 %v13864_v28, 16 }
 0x2aa   : > { %v2086_v42 = vor.u32 %v2085_v50, %v2082_v48  ;;  %v13871_v50 = vld [vmem:[#allocation2 + $0x70] sm:$0xff] }
 0x2ac   : > { %v2087_v17 = vsel %vm2016_vm3, %v2077_v25, %v2086_v42 }
 0x2ae   : > { %10183 = vmatmul.mubr.bf16.gmra.mrb[72].mxu0 %v1693_v0  ;;  %v12884_v0 = vld [vmem:[%s16024_s1 + $0x168] sm:$0xff]  }
 0x2af   : > { %10186 = vmatprep.mubr.msk.bf16.mxu0 %vm13054_vm0, %v13053_v1 }
 0x2b6   : > { %10187 = vmatmul.mubr.bf16.gmra.mrb[76].mxu0 %v1695_v57  ;;  %v2067_v57 = vrot.slane %v2065_v60, 2 }
 0x2b7   : > { %10190 = vmatprep.mubr.msk.bf16.mxu0 %vm13054_vm0, %v13053_v1 }
 0x2be   : > { %10191 = vmatmul.mubr.bf16.gmra.mrb[104].mxu0 %v1694_v53  ;;  %v2064_v53 = vrot.slane %v2062_v24, 1  ;;  %v2103_v24 = vrot.slane %v2101_v41, 2 }
 0x2bf   : > { %10210 = vmatprep.mubr.msk.bf16.mxu0 %vm13054_vm0, %v13053_v1 }
 0x2c0   : > { %v2068_v9 = vor.u32 %v2067_v57, %v2064_v53 }
 0x2c2   : > { %v2069_v47 = vsel %vm2016_vm3, %v2059_v8, %v2068_v9  ;;  %v2078_v46 = vsel %vm2016_vm3, %v2068_v9, %v2077_v25  ;;  %v2100_v8 = vrot.slane %v2098_v4, 1  ;;  %v2157_v4 = vrot.slane %v665_v16, 2 }
 0x2c3   : > { %v2172_v16 = vrot.slane %v685_v36, 1 }
 0x2c4   : > { %v2104_v60 = vor.u32 %v2103_v24, %v2100_v8  ;;  %v2175_v24 = vrot.slane %v681_v29, 2  ;;  %v2191_v29 = vshll.u32 %v13761_v49, 16 }
 0x2c6   : > { %10211 = vmatmul.mubr.bf16.vlgmr.msra.gmra.mrb[108].mxu0 %v2033_v43 }
 0x2c7   : > { %10295 = vmatpush3.bf16.msra.mxu0 %v12879_v45  ;;  %10214 = vmatprep.mubr.msk.bf16.mxu0 %vm13054_vm0, %v13053_v1 }
 0x2c8   : > { %10296 = vmatprep.subr.bf16.mxu0 %v13053_v1 }
 0x2cb   : > { %10297 = vmatpush3.bf16.msra.mxu0 %v12880_v55  ;;  %v2089_v55 = vshrl.u32 %v13579_v30, 16 }
 0x2cc   : > { %10298 = vmatprep.subr.bf16.mxu0 %v13053_v1 }
 0x2cd   : > { %v2091_v27 = vrot.slane %v2089_v55, 1 }
 0x2ce   : > { %10215 = vmatmul.mubr.bf16.gmra.mrb[4].mxu0 %v2042_v7  ;;  %v2092_v7 = vshll.u32 %v13579_v30, 16 }
 0x2cf   : > { %10218 = vmatprep.mubr.msk.bf16.mxu0 %vm13054_vm0, %v13053_v1  ;;  %10299 = vmatpush3.bf16.msra.mxu0 %v12881_v19 }
 0x2d0   : > { %10300 = vmatprep.subr.bf16.mxu0 %v13053_v1  ;;  %v2094_v63 = vrot.slane %v2092_v7, 2 }
 0x2d3   : > { %10301 = vmatpush3.bf16.msra.mxu0 %v12882_v38 }
 0x2d4   : > { %10302 = vmatprep.subr.bf16.mxu0 %v13053_v1 }
 0x2d6   : > { %10219 = vmatmul.mubr.bf16.gmra.mrb[8].mxu0 %v2051_v34  ;;  %v2095_v34 = vor.u32 %v2094_v63, %v2091_v27  ;;  %v2148_v27 = vrot.slane %v657_v10, 2  ;;  %v2164_v10 = vshll.u32 %v13641_v20, 16 }
 0x2d7   : > { %10222 = vmatprep.mubr.msk.bf16.mxu0 %vm13054_vm0, %v13053_v1  ;;  %10303 = vmatpush3.bf16.msra.mxu0 %v12883_v61 }
 0x2d8   : > { %10304 = vmatprep.subr.bf16.mxu0 %v13053_v1  ;;  %v2096_v61 = vsel %vm2016_vm3, %v2086_v42, %v2095_v34  ;;  %v2105_v53 = vsel %vm2016_vm3, %v2095_v34, %v2104_v60  ;;  %v2137_v42 = vshll.u32 %v13871_v50, 16  ;;  %v2154_v34 = vrot.slane %v669_v21, 1 }
 0x2d9   : > { %v2166_v8 = vrot.slane %v2164_v10, 2  ;;  %v2541_v10 = vrot.slane %v13441_v51, 2  ;;  %v2545_v51 = vrot.slane %v13588_v3, 2  ;;  %v2551_v3 = vrot.slane %v13864_v28, 2 }
 0x2db   : > { %10305 = vmatpush3.bf16.msra.mxu0 %v12884_v0  ;;  %v2107_v0 = vshrl.u32 %v13597_v56, 16 }
 0x2dc   : > { %10306 = vmatprep.subr.bf16.mxu0 %v13053_v1 }
 0x2dd   : > { %v2109_v57 = vrot.slane %v2107_v0, 1 }
 0x2de   : > { %10223 = vmatmul.mubr.bf16.gmra.mrb[12].mxu0 %v2060_v2  ;;  %v2110_v2 = vshll.u32 %v13597_v56, 16 }
 0x2df   : > { %10226 = vmatprep.mubr.msk.bf16.mxu0 %vm13054_vm0, %v13053_v1  ;;  %10307 = vmatpush3.bf16.msra.mxu0 %v12885_v62 }
 0x2e0   : > { %10308 = vmatprep.subr.bf16.mxu0 %v13053_v1  ;;  %v2112_v62 = vrot.slane %v2110_v2, 2  ;;  %v2181_v2 = vrot.slane %v693_v44, 1  ;;  %v2193_v44 = vrot.slane %v2191_v29, 2 }
 0x2e2   : > { %v2113_v9 = vor.u32 %v2112_v62, %v2109_v57  ;;  %v2190_v62 = vrot.slane %v2188_v26, 1 }
 0x2e3   : > { %10309 = vmatpush3.bf16.msra.mxu0 %v12886_v14  ;;  %v2119_v14 = vshll.u32 %v13857_v11, 16 }
 0x2e4   : > { %10394 = vmatprep.subr.bf16.mxu0 %v13053_v1  ;;  %v2194_v33 = vor.u32 %v2193_v44, %v2190_v62 }
 0x2e5   : > { %v2121_v23 = vrot.slane %v2119_v14, 2 }
 0x2e6   : > { %10227 = vmatmul.mubr.bf16.gmra.mrb[16].mxu0 %v2069_v47  ;;  %v2114_v47 = vsel %vm2016_vm3, %v2104_v60, %v2113_v9  ;;  %v2176_v60 = vor.u32 %v2175_v24, %v2172_v16 }
 0x2e7   : > { %10230 = vmatprep.mubr.msk.bf16.mxu0 %vm13054_vm0, %v13053_v1  ;;  %v2122_v25 = vor.u32 %v2121_v23, %v2118_v18 }
 0x2e9   : > { %v1554_v35 = vpop.f32.mrb[96].mxu0 }
 0x2ea   : > { %v10092_v43 = vpop.f32.mrb[97].mxu0  ;;  %v2128_v35 = vshll.u32 %v13864_v28, 16  ;;  %v12999_v28 = vld [vmem:[#allocation2 + $0x80] sm:$0xff] }
 0x2eb   : > { %v1556_v45 = vpop.f32.mrb[98].mxu0  ;;  %v2123_v43 = vsel %vm2016_vm3, %v2113_v9, %v2122_v25  ;;  %v13918_v9 = vld [vmem:[#allocation2 + $0xa8] sm:$0x3f]  ;;  %v2557_v44 = vrot.slane %v12999_v28, 2  ;;  %v14133_v28 = vld [vmem:[#allocation2 + $0x60] sm:$0xff] }
 0x2ec   : > { %v10093_v54 = vpop.f32.mrb[99].mxu0  ;;  %v2127_v45 = vrot.slane %v2125_v32, 1  ;;  %v2200_v39 = vshll.u32 %v13918_v9, 16  ;;  %v2507_v32 = vld [vmem:[#allocation2 + $0x8] sm:$0xfc] }
 0x2ed   : > { %v2134_v54 = vshrl.u32 %v13871_v50, 16 }
 0x2ee   : > { %10231 = vmatmul.mubr.bf16.gmra.mrb[20].mxu0 %v2078_v46  ;;  %v2130_v46 = vrot.slane %v2128_v35, 2  ;;  %v2202_v18 = vrot.slane %v2200_v39, 2  ;;  %v2528_v35 = vrot.slane %v2507_v32, 2  ;;  %v13000_v39 = vld [vmem:[#allocation2 + $0x90] sm:$0xff] }
 0x2ef   : > { %10234 = vmatprep.mubr.msk.bf16.mxu0 %vm13054_vm0, %v13053_v1  ;;  %v2136_v7 = vrot.slane %v2134_v54, 1  ;;  %v12888_v54 = vld [vmem:[%s16024_s1 + $0x188] sm:$0xff]  }
 0x2f0   : > { %v2131_v48 = vor.u32 %v2130_v46, %v2127_v45  ;;  %v12887_v46 = vld [vmem:[%s16024_s1 + $0x180] sm:$0xff]  }
 0x2f1   : > { %v1799_v58 = vpop.f32.mrb[100].mxu0 }
 0x2f2   : > { %v10112_v59 = vpop.f32.mrb[101].mxu0  ;;  %v2132_v55 = vsel %vm2016_vm3, %v2122_v25, %v2131_v48  ;;  %v2139_v58 = vrot.slane %v2137_v42, 2  ;;  %v12889_v42 = vld [vmem:[%s16024_s1 + $0x190] sm:$0xff]  }
 0x2f3   : > { %v1801_v19 = vpop.f32.mrb[102].mxu0 }
 0x2f4   : > { %v10113_v38 = vpop.f32.mrb[103].mxu0  ;;  %v2140_v59 = vor.u32 %v2139_v58, %v2136_v7  ;;  %v12891_v58 = vld [vmem:[%s16024_s1 + $0x1a0] sm:$0xff]  }
 0x2f6   : > { %10235 = vmatmul.mubr.bf16.gmra.mrb[24].mxu0 %v2087_v17  ;;  %v2141_v19 = vsel %vm2016_vm3, %v2131_v48, %v2140_v59  ;;  %v2145_v17 = vrot.slane %v661_v15, 1  ;;  %v2158_v15 = vor.u32 %v2157_v4, %v2154_v34  ;;  %v2531_v48 = vrot.slane %v13505_v12, 2 }
 0x2f7   : > { %10238 = vmatprep.mubr.msk.bf16.mxu0 %vm13054_vm0, %v13053_v1  ;;  %v2533_v12 = vrot.slane %v13523_v22, 2  ;;  %v2535_v22 = vrot.slane %v13540_v31, 2  ;;  %v2537_v31 = vrot.slane %v13554_v40, 2 }
 0x2f8   : > { %v2149_v63 = vor.u32 %v2148_v27, %v2145_v17  ;;  %v12893_v17 = vld [vmem:[%s16024_s1 + $0x1b0] sm:$0xff]   ;;  %v12894_v27 = vld [vmem:[%s16024_s1 + $0x1b8] sm:$0xff]  }
 0x2f9   : > { %v2534_v7 = vsel %vm2527_vm4, %v2531_v48, %v2533_v12 }
 0x2fa   : > { %v2150_v38 = vsel %vm2016_vm3, %v2140_v59, %v2149_v63  ;;  %v2159_v41 = vsel %vm2016_vm3, %v2149_v63, %v2158_v15  ;;  %v12892_v59 = vld [vmem:[%s16024_s1 + $0x1a8] sm:$0xff]   ;;  %v2538_v63 = vsel %vm2527_vm4, %v2535_v22, %v2537_v31 }
 0x2fe   : > { %10239 = vmatmul.mubr.bf16.gmra.mrb[28].mxu0 %v2096_v61  ;;  %v2163_v61 = vrot.slane %v2161_v5, 1 }
 0x2ff   : > { %10242 = vmatprep.mubr.msk.bf16.mxu0 %vm13054_vm0, %v13053_v1 }
 0x300   : > { %v2167_v21 = vor.u32 %v2166_v8, %v2163_v61 }
 0x302   : > { %v2168_v13 = vsel %vm2016_vm3, %v2158_v15, %v2167_v21  ;;  %v2177_v0 = vsel %vm2016_vm3, %v2167_v21, %v2176_v60 }
 0x306   : > { %10243 = vmatmul.mubr.bf16.gmra.mrb[32].mxu0 %v2105_v53  ;;  %v2184_v53 = vrot.slane %v689_v37, 2  ;;  %v2197_v37 = vshrl.u32 %v13918_v9, 16 }
 0x307   : > { %10246 = vmatprep.mubr.msk.bf16.mxu0 %vm13054_vm0, %v13053_v1 }
 0x308   : > { %v2185_v36 = vor.u32 %v2184_v53, %v2181_v2 }
 0x30a   : > { %v2186_v57 = vsel %vm2016_vm3, %v2176_v60, %v2185_v36  ;;  %v2195_v14 = vsel %vm2016_vm3, %v2185_v36, %v2194_v33  ;;  %v2547_v60 = vrot.slane %v13597_v56, 2  ;;  %v2553_v56 = vrot.slane %v13871_v50, 2 }
 0x30b   : > { %v2559_v50 = vrot.slane %v13641_v20, 2  ;;  %v14033_v20 = vrot.slane %v13761_v49, 2 }
 0x30c   : > { %v2554_v36 = vsel %vm2527_vm4, %v2551_v3, %v2553_v56 }
 0x30e   : > { %10247 = vmatmul.mubr.bf16.gmra.mrb[36].mxu0 %v2114_v47  ;;  %v2199_v47 = vrot.slane %v2197_v37, 1  ;;  %v2560_v37 = vsel %vm2527_vm4, %v2557_v44, %v2559_v50 }
 0x30f   : > { %10250 = vmatprep.mubr.msk.bf16.mxu0 %vm13054_vm0, %v13053_v1 }
 0x310   : > { %v2203_v23 = vor.u32 %v2202_v18, %v2199_v47  ;;  %v13001_v18 = vld [vmem:[#allocation2 + $0x98] sm:$0xff] }
 0x312   : > { %v2204_v25 = vsel %vm2016_vm3, %v2194_v33, %v2203_v23 }
 0x316   : > { %10251 = vmatmul.mubr.bf16.gmra.mrb[40].mxu0 %v2123_v43  ;;  %v2529_v43 = vrot.slane %v13488_v6, 2 }
 0x317   : > { %10254 = vmatprep.mubr.msk.bf16.mxu0 %vm13054_vm0, %v13053_v1 }
 0x318   : > { %v2530_v45 = vsel %vm2527_vm4, %v2528_v35, %v2529_v43  ;;  %v2532_v6 = vsel %vm2527_vm4, %v2529_v43, %v2531_v48  ;;  %v2567_v35 = vrot.slane %v13918_v9, 2 }
 0x31a   : > { %v2568_v43 = vsel %vm2527_vm4, %v14033_v20, %v2567_v35 }
 0x31e   : > { %10255 = vmatmul.mubr.bf16.gmra.mrb[44].mxu0 %v2132_v55  ;;  %v12890_v55 = vld [vmem:[%s16024_s1 + $0x198] sm:$0xff]  }
 0x31f   : > { %10258 = vmatprep.mubr.msk.bf16.mxu0 %vm13054_vm0, %v13053_v1 }
 0x326   : > { %10259 = vmatmul.mubr.bf16.gmra.mrb[48].mxu0 %v2141_v19  ;;  %v2536_v19 = vsel %vm2527_vm4, %v2533_v12, %v2535_v22  ;;  %v14069_v22 = vld [vmem:[#allocation2 + $0x28] sm:$0xff] }
 0x327   : > { %10262 = vmatprep.mubr.msk.bf16.mxu0 %vm13054_vm0, %v13053_v1 }
 0x32e   : > { %10263 = vmatmul.mubr.bf16.gmra.mrb[52].mxu0 %v2150_v38  ;;  %v2539_v38 = vrot.slane %v13563_v52, 2  ;;  %v2543_v52 = vrot.slane %v13579_v30, 2  ;;  %v2549_v30 = vrot.slane %v13857_v11, 2  ;;  %v12998_v11 = vld [vmem:[#allocation2 + $0x78] sm:$0xff] }
 0x32f   : > { %10266 = vmatprep.mubr.msk.bf16.mxu0 %vm13054_vm0, %v13053_v1 }
 0x330   : > { %v2540_v15 = vsel %vm2527_vm4, %v2537_v31, %v2539_v38  ;;  %v2542_v21 = vsel %vm2527_vm4, %v2539_v38, %v2541_v10  ;;  %v2544_v16 = vsel %vm2527_vm4, %v2541_v10, %v2543_v52  ;;  %v2546_v24 = vsel %vm2527_vm4, %v2543_v52, %v2545_v51  ;;  %v12899_v31 = vld [vmem:[%s16024_s1 + $0x1e0] sm:$0xff]   ;;  %v12900_v38 = vld [vmem:[%s16024_s1 + $0x1e8] sm:$0xff]  }
 0x331   : > { %v2550_v2 = vsel %vm2527_vm4, %v2547_v60, %v2549_v30  ;;  %v2552_v53 = vsel %vm2527_vm4, %v2549_v30, %v2551_v3 }
 0x336   : > { %10267 = vmatmul.mubr.bf16.gmra.mrb[56].mxu0 %v2159_v41 }
 0x337   : > { %10270 = vmatprep.mubr.msk.bf16.mxu0 %vm13054_vm0, %v13053_v1 }
 0x33e   : > { %10271 = vmatmul.mubr.bf16.gmra.mrb[60].mxu0 %v2168_v13 }
 0x33f   : > { %10274 = vmatprep.mubr.msk.bf16.mxu0 %vm13054_vm0, %v13053_v1 }
 0x346   : > { %10275 = vmatmul.mubr.bf16.gmra.mrb[64].mxu0 %v2177_v0  ;;  %v2548_v0 = vsel %vm2527_vm4, %v2545_v51, %v2547_v60  ;;  %v14115_v51 = vld [vmem:[#allocation2 + $0x48] sm:$0xff] }
 0x347   : > { %10278 = vmatprep.mubr.msk.bf16.mxu0 %vm13054_vm0, %v13053_v1 }
 0x34e   : > { %10279 = vmatmul.mubr.bf16.gmra.mrb[68].mxu0 %v2186_v57  ;;  %v2555_v57 = vrot.slane %v12998_v11, 2  ;;  %v14127_v11 = vld [vmem:[#allocation2 + $0x58] sm:$0xff] }
 0x34f   : > { %10282 = vmatprep.mubr.msk.bf16.mxu0 %vm13054_vm0, %v13053_v1 }
 0x350   : > { %v2556_v62 = vsel %vm2527_vm4, %v2553_v56, %v2555_v57  ;;  %v2558_v33 = vsel %vm2527_vm4, %v2555_v57, %v2557_v44  ;;  %v2947_v57 = vrot.slane %v14127_v11, 2  ;;  %v2949_v44 = vrot.slane %v14133_v28, 2 }
 0x356   : > { %10283 = vmatmul.mubr.bf16.gmra.mrb[72].mxu0 %v2195_v14  ;;  %v2561_v14 = vrot.slane %v13000_v39, 2 }
 0x357   : > { %10286 = vmatprep.mubr.msk.bf16.mxu0 %vm13054_vm0, %v13053_v1 }
 0x358   : > { %v2562_v47 = vsel %vm2527_vm4, %v2559_v50, %v2561_v14  ;;  %v14139_v50 = vld [vmem:[#allocation2 + $0x68] sm:$0xff] }
 0x35e   : > { %10287 = vmatmul.mubr.bf16.gmra.mrb[76].mxu0 %v2204_v25 }
 0x35f   : > { %10290 = vmatprep.mubr.msk.bf16.mxu0 %vm13054_vm0, %v13053_v1 }
 0x366   : > { %10291 = vmatmul.mubr.bf16.gmra.mrb[112].mxu0 %v2203_v23  ;;  %v2563_v23 = vrot.slane %v13001_v18, 2 }
 0x367   : > { %10310 = vmatprep.mubr.msk.bf16.mxu0 %vm13054_vm0, %v13053_v1 }
 0x368   : > { %v2564_v25 = vsel %vm2527_vm4, %v2561_v14, %v2563_v23  ;;  %v2566_v32 = vsel %vm2527_vm4, %v2563_v23, %v14033_v20  ;;  %v14145_v14 = vld [vmem:[#allocation2 + $0x70] sm:$0xff]  ;;  %v14151_v23 = vld [vmem:[#allocation2 + $0x78] sm:$0xff] }
 0x36e   : > { %10311 = vmatmul.mubr.bf16.vlgmr.msra.gmra.mrb[116].mxu0 %v2530_v45  ;;  %v14044_v45 = vld [vmem:[#allocation2 + $0x10] sm:$0xfc] }
 0x36f   : > { %10395 = vmatpush3.bf16.msra.mxu0 %v12887_v46  ;;  %10314 = vmatprep.mubr.msk.bf16.mxu0 %vm13054_vm0, %v13053_v1  ;;  %v14046_v46 = vld [vmem:[#allocation2 + $0x18] sm:$0xff]  ;;  %v2930_v48 = vrot.slane %v14044_v45, 2 }
 0x370   : > { %10396 = vmatprep.subr.bf16.mxu0 %v13053_v1 }
 0x373   : > { %10397 = vmatpush3.bf16.msra.mxu0 %v12888_v54  ;;  %v2931_v54 = vrot.slane %v14046_v46, 2 }
 0x374   : > { %10398 = vmatprep.subr.bf16.mxu0 %v13053_v1 }
 0x375   : > { %v2932_v9 = vsel %vm2527_vm4, %v2930_v48, %v2931_v54 }
 0x376   : > { %10315 = vmatmul.mubr.bf16.gmra.mrb[4].mxu0 %v2532_v6  ;;  %v12895_v6 = vld [vmem:[%s16024_s1 + $0x1c0] sm:$0xff]  }
 0x377   : > { %10318 = vmatprep.mubr.msk.bf16.mxu0 %vm13054_vm0, %v13053_v1  ;;  %10399 = vmatpush3.bf16.msra.mxu0 %v12889_v42  ;;  %v14056_v42 = vld [vmem:[#allocation2 + $0x20] sm:$0xff] }
 0x378   : > { %10400 = vmatprep.subr.bf16.mxu0 %v13053_v1  ;;  %v2933_v12 = vrot.slane %v14056_v42, 2 }
 0x37b   : > { %10401 = vmatpush3.bf16.msra.mxu0 %v12890_v55  ;;  %v12896_v55 = vld [vmem:[%s16024_s1 + $0x1c8] sm:$0xff]  }
 0x37c   : > { %10402 = vmatprep.subr.bf16.mxu0 %v13053_v1 }
 0x37e   : > { %10319 = vmatmul.mubr.bf16.gmra.mrb[8].mxu0 %v2534_v7  ;;  %v2934_v7 = vsel %vm2527_vm4, %v2931_v54, %v2933_v12  ;;  %v14163_v54 = vld [vmem:[#allocation2 + $0x88] sm:$0xff] }
 0x37f   : > { %10322 = vmatprep.mubr.msk.bf16.mxu0 %vm13054_vm0, %v13053_v1  ;;  %10403 = vmatpush3.bf16.msra.mxu0 %v12891_v58  ;;  %v12897_v58 = vld [vmem:[%s16024_s1 + $0x1d0] sm:$0xff]  }
 0x380   : > { %10404 = vmatprep.subr.bf16.mxu0 %v13053_v1 }
 0x383   : > { %10405 = vmatpush3.bf16.msra.mxu0 %v12892_v59  ;;  %v2935_v59 = vrot.slane %v14069_v22, 2 }
 0x384   : > { %10406 = vmatprep.subr.bf16.mxu0 %v13053_v1 }
 0x386   : > { %10323 = vmatmul.mubr.bf16.gmra.mrb[12].mxu0 %v2536_v19  ;;  %v12898_v19 = vld [vmem:[%s16024_s1 + $0x1d8] sm:$0xff]  }
 0x387   : > { %10326 = vmatprep.mubr.msk.bf16.mxu0 %vm13054_vm0, %v13053_v1  ;;  %10407 = vmatpush3.bf16.msra.mxu0 %v12893_v17  ;;  %v2936_v17 = vsel %vm2527_vm4, %v2933_v12, %v2935_v59  ;;  %v14169_v12 = vld [vmem:[#allocation2 + $0x90] sm:$0xff] }
 0x388   : > { %10408 = vmatprep.subr.bf16.mxu0 %v13053_v1 }
 0x38b   : > { %10409 = vmatpush3.bf16.msra.mxu0 %v12894_v27  ;;  %v14083_v27 = vld [vmem:[#allocation2 + $0x30] sm:$0xff] }
 0x38c   : > { %10494 = vmatprep.subr.bf16.mxu0 %v13053_v1 }
 0x38e   : > { %10327 = vmatmul.mubr.bf16.gmra.mrb[16].mxu0 %v2538_v63  ;;  %v2937_v63 = vrot.slane %v14083_v27, 2 }
 0x38f   : > { %10330 = vmatprep.mubr.msk.bf16.mxu0 %vm13054_vm0, %v13053_v1 }
 0x391   : > { %v1956_v34 = vpop.f32.mrb[104].mxu0 }
 0x392   : > { %v10192_v40 = vpop.f32.mrb[105].mxu0  ;;  %v2938_v34 = vsel %vm2527_vm4, %v2935_v59, %v2937_v63 }
 0x393   : > { %v1958_v4 = vpop.f32.mrb[106].mxu0  ;;  %v12901_v40 = vld [vmem:[%s16024_s1 + $0x1f0] sm:$0xff]  }
 0x394   : > { %v10193_v5 = vpop.f32.mrb[107].mxu0  ;;  %v14097_v4 = vld [vmem:[#allocation2 + $0x38] sm:$0xff] }
 0x395   : > { %v12902_v5 = vld [vmem:[%s16024_s1 + $0x1f8] sm:$0xff]  }
 0x396   : > { %10331 = vmatmul.mubr.bf16.gmra.mrb[20].mxu0 %v2540_v15  ;;  %v2939_v15 = vrot.slane %v14097_v4, 2 }
 0x397   : > { %10334 = vmatprep.mubr.msk.bf16.mxu0 %vm13054_vm0, %v13053_v1 }
 0x398   : > { %v2940_v10 = vsel %vm2527_vm4, %v2937_v63, %v2939_v15 }
 0x399   : > { %v2308_v41 = vpop.f32.mrb[108].mxu0 }
 0x39a   : > { %v10212_v61 = vpop.f32.mrb[109].mxu0  ;;  %v14108_v41 = vld [vmem:[#allocation2 + $0x40] sm:$0xff] }
 0x39b   : > { %v2310_v8 = vpop.f32.mrb[110].mxu0  ;;  %v2941_v61 = vrot.slane %v14108_v41, 2 }
 0x39c   : > { %v10213_v13 = vpop.f32.mrb[111].mxu0 }
 0x39d   : > { %v2942_v52 = vsel %vm2527_vm4, %v2939_v15, %v2941_v61 }
 0x39e   : > { %10335 = vmatmul.mubr.bf16.gmra.mrb[24].mxu0 %v2542_v21 }
 0x39f   : > { %10338 = vmatprep.mubr.msk.bf16.mxu0 %vm13054_vm0, %v13053_v1 }
 0x3a6   : > { %10339 = vmatmul.mubr.bf16.gmra.mrb[28].mxu0 %v2544_v16 }
 0x3a7   : > { %10342 = vmatprep.mubr.msk.bf16.mxu0 %vm13054_vm0, %v13053_v1 }
 0x3ae   : > { %10343 = vmatmul.mubr.bf16.gmra.mrb[32].mxu0 %v2546_v24  ;;  %v2943_v24 = vrot.slane %v14115_v51, 2 }
 0x3af   : > { %10346 = vmatprep.mubr.msk.bf16.mxu0 %vm13054_vm0, %v13053_v1 }
 0x3b6   : > { %10347 = vmatmul.mubr.bf16.gmra.mrb[36].mxu0 %v2548_v0 }
 0x3b7   : > { %10350 = vmatprep.mubr.msk.bf16.mxu0 %vm13054_vm0, %v13053_v1 }
 0x3be   : > { %10351 = vmatmul.mubr.bf16.gmra.mrb[40].mxu0 %v2550_v2  ;;  %v2944_v2 = vsel %vm2527_vm4, %v2941_v61, %v2943_v24  ;;  %v3301_v61 = vshrl.u32 %v14046_v46, 16 }
 0x3bf   : > { %10354 = vmatprep.mubr.msk.bf16.mxu0 %vm13054_vm0, %v13053_v1 }
 0x3c6   : > { %10355 = vmatmul.mubr.bf16.gmra.mrb[44].mxu0 %v2552_v53  ;;  %v14121_v53 = vld [vmem:[#allocation2 + $0x50] sm:$0xff] }
 0x3c7   : > { %10358 = vmatprep.mubr.msk.bf16.mxu0 %vm13054_vm0, %v13053_v1  ;;  %v2945_v56 = vrot.slane %v14121_v53, 2 }
 0x3ce   : > { %10359 = vmatmul.mubr.bf16.gmra.mrb[48].mxu0 %v2554_v36  ;;  %v2946_v36 = vsel %vm2527_vm4, %v2943_v24, %v2945_v56 }
 0x3cf   : > { %10362 = vmatprep.mubr.msk.bf16.mxu0 %vm13054_vm0, %v13053_v1 }
 0x3d6   : > { %10363 = vmatmul.mubr.bf16.gmra.mrb[52].mxu0 %v2556_v62  ;;  %v2948_v62 = vsel %vm2527_vm4, %v2945_v56, %v2947_v57 }
 0x3d7   : > { %10366 = vmatprep.mubr.msk.bf16.mxu0 %vm13054_vm0, %v13053_v1 }
 0x3de   : > { %10367 = vmatmul.mubr.bf16.gmra.mrb[56].mxu0 %v2558_v33  ;;  %v2950_v33 = vsel %vm2527_vm4, %v2947_v57, %v2949_v44  ;;  %v3322_v57 = vshll.u32 %v14069_v22, 16 }
 0x3df   : > { %10370 = vmatprep.mubr.msk.bf16.mxu0 %vm13054_vm0, %v13053_v1 }
 0x3e6   : > { %10371 = vmatmul.mubr.bf16.gmra.mrb[60].mxu0 %v2560_v37  ;;  %v2951_v37 = vrot.slane %v14139_v50, 2 }
 0x3e7   : > { %10374 = vmatprep.mubr.msk.bf16.mxu0 %vm13054_vm0, %v13053_v1 }
 0x3e8   : > { %v2952_v39 = vsel %vm2527_vm4, %v2949_v44, %v2951_v37 }
 0x3ee   : > { %10375 = vmatmul.mubr.bf16.gmra.mrb[64].mxu0 %v2562_v47  ;;  %v2953_v47 = vrot.slane %v14145_v14, 2 }
 0x3ef   : > { %10378 = vmatprep.mubr.msk.bf16.mxu0 %vm13054_vm0, %v13053_v1 }
 0x3f0   : > { %v2954_v18 = vsel %vm2527_vm4, %v2951_v37, %v2953_v47  ;;  %v3324_v37 = vrot.slane %v3322_v57, 3 }
 0x3f6   : > { %10379 = vmatmul.mubr.bf16.gmra.mrb[68].mxu0 %v2564_v25  ;;  %v2955_v25 = vrot.slane %v14151_v23, 2 }
 0x3f7   : > { %10382 = vmatprep.mubr.msk.bf16.mxu0 %vm13054_vm0, %v13053_v1 }
 0x3fe   : > { %10383 = vmatmul.mubr.bf16.gmra.mrb[72].mxu0 %v2566_v32  ;;  %v2956_v32 = vsel %vm2527_vm4, %v2953_v47, %v2955_v25 }
 0x3ff   : > { %10386 = vmatprep.mubr.msk.bf16.mxu0 %vm13054_vm0, %v13053_v1 }
 0x406   : > { %10387 = vmatmul.mubr.bf16.gmra.mrb[76].mxu0 %v2568_v43 }
 0x407   : > { %10390 = vmatprep.mubr.msk.bf16.mxu0 %vm13054_vm0, %v13053_v1 }
 0x40e   : > { %10391 = vmatmul.mubr.bf16.gmra.mrb[120].mxu0 %v2567_v35  ;;  %v14157_v35 = vld [vmem:[#allocation2 + $0x80] sm:$0xff] }
 0x40f   : > { %10410 = vmatprep.mubr.msk.bf16.mxu0 %vm13054_vm0, %v13053_v1  ;;  %v2957_v43 = vrot.slane %v14157_v35, 2 }
 0x411   : > { %v2958_v48 = vsel %vm2527_vm4, %v2955_v25, %v2957_v43  ;;  %v3331_v25 = vshll.u32 %v14083_v27, 16 }
 0x416   : > { %10411 = vmatmul.mubr.bf16.vlgmr.msra.gmra.mrb[124].mxu0 %v2932_v9  ;;  %v2959_v9 = vrot.slane %v14163_v54, 2 }
 0x417   : > { %10495 = vmatpush3.bf16.msra.mxu0 %v12895_v6  ;;  %10414 = vmatprep.mubr.msk.bf16.mxu0 %vm13054_vm0, %v13053_v1 }
 0x418   : > { %10496 = vmatprep.subr.bf16.mxu0 %v13053_v1  ;;  %v2960_v6 = vsel %vm2527_vm4, %v2957_v43, %v2959_v9 }
 0x41b   : > { %10497 = vmatpush3.bf16.msra.mxu0 %v12896_v55  ;;  %v2961_v55 = vrot.slane %v14169_v12, 2 }
 0x41c   : > { %10498 = vmatprep.subr.bf16.mxu0 %v13053_v1 }
 0x41e   : > { %10415 = vmatmul.mubr.bf16.gmra.mrb[4].mxu0 %v2934_v7  ;;  %v2962_v7 = vsel %vm2527_vm4, %v2959_v9, %v2961_v55  ;;  %v3333_v9 = vrot.slane %v3331_v25, 3  ;;  %v3373_v25 = vshrl.u32 %v14127_v11, 16 }
 0x41f   : > { %10418 = vmatprep.mubr.msk.bf16.mxu0 %vm13054_vm0, %v13053_v1  ;;  %10499 = vmatpush3.bf16.msra.mxu0 %v12897_v58  ;;  %v14175_v58 = vld [vmem:[#allocation2 + $0x98] sm:$0xff] }
 0x420   : > { %10500 = vmatprep.subr.bf16.mxu0 %v13053_v1  ;;  %v2963_v59 = vrot.slane %v14175_v58, 2 }
 0x423   : > { %10501 = vmatpush3.bf16.msra.mxu0 %v12898_v19  ;;  %v2964_v19 = vsel %vm2527_vm4, %v2961_v55, %v2963_v59 }
 0x424   : > { %10502 = vmatprep.subr.bf16.mxu0 %v13053_v1 }
 0x426   : > { %10419 = vmatmul.mubr.bf16.gmra.mrb[8].mxu0 %v2936_v17  ;;  %v2966_v17 = vsel %vm2527_vm4, %v2963_v59, %v14033_v20  ;;  %v3340_v59 = vshll.u32 %v14097_v4, 16 }
 0x427   : > { %10422 = vmatprep.mubr.msk.bf16.mxu0 %vm13054_vm0, %v13053_v1  ;;  %10503 = vmatpush3.bf16.msra.mxu0 %v12899_v31  ;;  %v14187_v31 = vld [vmem:[#allocation2] sm:$0xff] }
 0x428   : > { %10504 = vmatprep.subr.bf16.mxu0 %v13053_v1  ;;  %v2967_v63 = vrot.slane %v14187_v31, 2 }
 0x42b   : > { %10505 = vmatpush3.bf16.msra.mxu0 %v12900_v38  ;;  %v2968_v38 = vsel %vm2527_vm4, %v14033_v20, %v2967_v63  ;;  %v3304_v20 = vshll.u32 %v14046_v46, 16 }
 0x42c   : > { %10506 = vmatprep.subr.bf16.mxu0 %v13053_v1 }
 0x42e   : > { %10423 = vmatmul.mubr.bf16.gmra.mrb[12].mxu0 %v2938_v34  ;;  %v2891_v34 = vld [vmem:[#allocation2 + $0xb0] sm:$0x3f] }
 0x42f   : > { %10426 = vmatprep.mubr.msk.bf16.mxu0 %vm13054_vm0, %v13053_v1  ;;  %10507 = vmatpush3.bf16.msra.mxu0 %v12901_v40  ;;  %v2969_v40 = vrot.slane %v2891_v34, 2  ;;  %v12909_v34 = vld [vmem:[%s16024_s1 + $0x230] sm:$0xff]  }
 0x430   : > { %10508 = vmatprep.subr.bf16.mxu0 %v13053_v1 }
 0x431   : > { %v2970_v15 = vsel %vm2527_vm4, %v2967_v63, %v2969_v40 }
 0x433   : > { %10509 = vmatpush3.bf16.msra.mxu0 %v12902_v5  ;;  %v3293_v5 = vshrl.u32 %v14044_v45, 16 }
 0x434   : > { %10594 = vmatprep.subr.bf16.mxu0 %v13053_v1 }
 0x436   : > { %10427 = vmatmul.mubr.bf16.gmra.mrb[16].mxu0 %v2940_v10  ;;  %v3296_v10 = vshll.u32 %v14044_v45, 16 }
 0x437   : > { %10430 = vmatprep.mubr.msk.bf16.mxu0 %vm13054_vm0, %v13053_v1 }
 0x439   : > { %v2465_v8 = vpop.f32.mrb[112].mxu0 }
 0x43a   : > { %v10292_v21 = vpop.f32.mrb[113].mxu0  ;;  %v3295_v8 = vrot.slane %v3293_v5, 2  ;;  %v3349_v5 = vshll.u32 %v14108_v41, 16 }
 0x43b   : > { %v2467_v13 = vpop.f32.mrb[114].mxu0  ;;  %v3298_v21 = vrot.slane %v3296_v10, 3  ;;  %v12910_v10 = vld [vmem:[%s16024_s1 + $0x238] sm:$0xff]  }
 0x43c   : > { %v10293_v16 = vpop.f32.mrb[115].mxu0  ;;  %v3303_v13 = vrot.slane %v3301_v61, 2 }
 0x43d   : > { %v3299_v16 = vor.u32 %v3298_v21, %v3295_v8  ;;  %v3351_v8 = vrot.slane %v3349_v5, 3 }
 0x43e   : > { %10431 = vmatmul.mubr.bf16.gmra.mrb[20].mxu0 %v2942_v52  ;;  %v3306_v52 = vrot.slane %v3304_v20, 3 }
 0x43f   : > { %10434 = vmatprep.mubr.msk.bf16.mxu0 %vm13054_vm0, %v13053_v1 }
 0x440   : > { %v3307_v24 = vor.u32 %v3306_v52, %v3303_v13  ;;  %v3355_v13 = vshrl.u32 %v14115_v51, 16  ;;  %v3358_v52 = vshll.u32 %v14115_v51, 16 }
 0x441   : > { %v2672_v60 = vpop.f32.mrb[116].mxu0 }
 0x442   : > { %v10312_v0 = vpop.f32.mrb[117].mxu0  ;;  %v3310_v60 = vshrl.u32 %v14056_v42, 16  ;;  %v3308_v45 = vsel %vm3291_vm5, %v3299_v16, %v3307_v24 }
 0x443   : > { %v2674_v30 = vpop.f32.mrb[118].mxu0  ;;  %v3313_v0 = vshll.u32 %v14056_v42, 16 }
 0x444   : > { %v10313_v3 = vpop.f32.mrb[119].mxu0  ;;  %v12903_v30 = vld [vmem:[%s16024_s1 + $0x200] sm:$0xff]  }
 0x445   : > { %v3315_v3 = vrot.slane %v3313_v0, 3 }
 0x446   : > { %10435 = vmatmul.mubr.bf16.gmra.mrb[24].mxu0 %v2944_v2  ;;  %v3312_v2 = vrot.slane %v3310_v60, 2 }
 0x447   : > { %10438 = vmatprep.mubr.msk.bf16.mxu0 %vm13054_vm0, %v13053_v1 }
 0x448   : > { %v3316_v56 = vor.u32 %v3315_v3, %v3312_v2 }
 0x44a   : > { %v3317_v44 = vsel %vm3291_vm5, %v3307_v24, %v3316_v56 }
 0x44e   : > { %10439 = vmatmul.mubr.bf16.gmra.mrb[28].mxu0 %v2946_v36  ;;  %v3319_v36 = vshrl.u32 %v14069_v22, 16 }
 0x44f   : > { %10442 = vmatprep.mubr.msk.bf16.mxu0 %vm13054_vm0, %v13053_v1 }
 0x456   : > { %10443 = vmatmul.mubr.bf16.gmra.mrb[32].mxu0 %v2948_v62  ;;  %v12904_v62 = vld [vmem:[%s16024_s1 + $0x208] sm:$0xff]  }
 0x457   : > { %10446 = vmatprep.mubr.msk.bf16.mxu0 %vm13054_vm0, %v13053_v1 }
 0x45e   : > { %10447 = vmatmul.mubr.bf16.gmra.mrb[36].mxu0 %v2950_v33  ;;  %v3321_v33 = vrot.slane %v3319_v36, 2  ;;  %v3367_v36 = vshll.u32 %v14121_v53, 16 }
 0x45f   : > { %10450 = vmatprep.mubr.msk.bf16.mxu0 %vm13054_vm0, %v13053_v1 }
 0x460   : > { %v3325_v47 = vor.u32 %v3324_v37, %v3321_v33 }
 0x462   : > { %v3326_v43 = vsel %vm3291_vm5, %v3316_v56, %v3325_v47  ;;  %v3364_v56 = vshrl.u32 %v14121_v53, 16 }
 0x464   : > { %v3366_v37 = vrot.slane %v3364_v56, 2 }
 0x466   : > { %10451 = vmatmul.mubr.bf16.gmra.mrb[40].mxu0 %v2952_v39  ;;  %v12905_v39 = vld [vmem:[%s16024_s1 + $0x210] sm:$0xff]  }
 0x467   : > { %10454 = vmatprep.mubr.msk.bf16.mxu0 %vm13054_vm0, %v13053_v1 }
 0x46e   : > { %10455 = vmatmul.mubr.bf16.gmra.mrb[44].mxu0 %v2954_v18  ;;  %v3328_v18 = vshrl.u32 %v14083_v27, 16 }
 0x46f   : > { %10458 = vmatprep.mubr.msk.bf16.mxu0 %vm13054_vm0, %v13053_v1 }
 0x476   : > { %10459 = vmatmul.mubr.bf16.gmra.mrb[48].mxu0 %v2956_v32  ;;  %v12906_v32 = vld [vmem:[%s16024_s1 + $0x218] sm:$0xff]  }
 0x477   : > { %10462 = vmatprep.mubr.msk.bf16.mxu0 %vm13054_vm0, %v13053_v1 }
 0x47e   : > { %10463 = vmatmul.mubr.bf16.gmra.mrb[52].mxu0 %v2958_v48  ;;  %v3330_v48 = vrot.slane %v3328_v18, 2 }
 0x47f   : > { %10466 = vmatprep.mubr.msk.bf16.mxu0 %vm13054_vm0, %v13053_v1 }
 0x480   : > { %v3334_v55 = vor.u32 %v3333_v9, %v3330_v48  ;;  %v3375_v48 = vrot.slane %v3373_v25, 2  ;;  %v3436_v25 = vshrl.u32 %v14169_v12, 16 }
 0x486   : > { %10467 = vmatmul.mubr.bf16.gmra.mrb[56].mxu0 %v2960_v6  ;;  %v12907_v6 = vld [vmem:[%s16024_s1 + $0x220] sm:$0xff]  }
 0x487   : > { %10470 = vmatprep.mubr.msk.bf16.mxu0 %vm13054_vm0, %v13053_v1 }
 0x48e   : > { %10471 = vmatmul.mubr.bf16.gmra.mrb[60].mxu0 %v2962_v7  ;;  %v3337_v7 = vshrl.u32 %v14097_v4, 16 }
 0x48f   : > { %10474 = vmatprep.mubr.msk.bf16.mxu0 %vm13054_vm0, %v13053_v1 }
 0x490   : > { %v3339_v63 = vrot.slane %v3337_v7, 2  ;;  %v3385_v7 = vshll.u32 %v14133_v28, 16 }
 0x496   : > { %10475 = vmatmul.mubr.bf16.gmra.mrb[64].mxu0 %v2964_v19  ;;  %v12908_v19 = vld [vmem:[%s16024_s1 + $0x228] sm:$0xff]  }
 0x497   : > { %10478 = vmatprep.mubr.msk.bf16.mxu0 %vm13054_vm0, %v13053_v1 }
 0x49e   : > { %10479 = vmatmul.mubr.bf16.gmra.mrb[68].mxu0 %v2966_v17  ;;  %v3335_v17 = vsel %vm3291_vm5, %v3325_v47, %v3334_v55 }
 0x49f   : > { %10482 = vmatprep.mubr.msk.bf16.mxu0 %vm13054_vm0, %v13053_v1 }
 0x4a6   : > { %10483 = vmatmul.mubr.bf16.gmra.mrb[72].mxu0 %v2968_v38  ;;  %v3342_v38 = vrot.slane %v3340_v59, 3 }
 0x4a7   : > { %10486 = vmatprep.mubr.msk.bf16.mxu0 %vm13054_vm0, %v13053_v1 }
 0x4ae   : > { %10487 = vmatmul.mubr.bf16.gmra.mrb[76].mxu0 %v2970_v15  ;;  %v3346_v15 = vshrl.u32 %v14108_v41, 16 }
 0x4af   : > { %10490 = vmatprep.mubr.msk.bf16.mxu0 %vm13054_vm0, %v13053_v1 }
 0x4b0   : > { %v3348_v20 = vrot.slane %v3346_v15, 2 }
 0x4b2   : > { %v3352_v21 = vor.u32 %v3351_v8, %v3348_v20  ;;  %v3403_v20 = vshll.u32 %v14145_v14, 16 }
 0x4b6   : > { %10491 = vmatmul.mubr.bf16.gmra.mrb[128].mxu0 %v2969_v40  ;;  %v3343_v40 = vor.u32 %v3342_v38, %v3339_v63  ;;  %v3391_v38 = vshrl.u32 %v14139_v50, 16 }
 0x4b7   : > { %10510 = vmatprep.mubr.msk.bf16.mxu0 %vm13054_vm0, %v13053_v1 }
 0x4b8   : > { %v3344_v61 = vsel %vm3291_vm5, %v3334_v55, %v3343_v40  ;;  %v3353_v0 = vsel %vm3291_vm5, %v3343_v40, %v3352_v21  ;;  %v3382_v55 = vshrl.u32 %v14133_v28, 16  ;;  %v3393_v15 = vrot.slane %v3391_v38, 2 }
 0x4be   : > { %10511 = vmatmul.mubr.bf16.vlgmr.msra.gmra.mrb[132].mxu0 %v3308_v45  ;;  %v3357_v45 = vrot.slane %v3355_v13, 2  ;;  %v3405_v13 = vrot.slane %v3403_v20, 3 }
 0x4bf   : > { %10595 = vmatpush3.bf16.msra.mxu0 %v12903_v30  ;;  %10514 = vmatprep.mubr.msk.bf16.mxu0 %vm13054_vm0, %v13053_v1  ;;  %v3360_v30 = vrot.slane %v3358_v52, 3 }
 0x4c0   : > { %10596 = vmatprep.subr.bf16.mxu0 %v13053_v1 }
 0x4c1   : > { %v3361_v3 = vor.u32 %v3360_v30, %v3357_v45 }
 0x4c3   : > { %10597 = vmatpush3.bf16.msra.mxu0 %v12904_v62  ;;  %v3362_v33 = vsel %vm3291_vm5, %v3352_v21, %v3361_v3 }
 0x4c4   : > { %10598 = vmatprep.subr.bf16.mxu0 %v13053_v1 }
 0x4c6   : > { %10515 = vmatmul.mubr.bf16.gmra.mrb[4].mxu0 %v3317_v44 }
 0x4c7   : > { %10518 = vmatprep.mubr.msk.bf16.mxu0 %vm13054_vm0, %v13053_v1  ;;  %10599 = vmatpush3.bf16.msra.mxu0 %v12905_v39  ;;  %v3369_v39 = vrot.slane %v3367_v36, 3 }
 0x4c8   : > { %10600 = vmatprep.subr.bf16.mxu0 %v13053_v1 }
 0x4c9   : > { %v3370_v18 = vor.u32 %v3369_v39, %v3366_v37 }
 0x4cb   : > { %10601 = vmatpush3.bf16.msra.mxu0 %v12906_v32  ;;  %v3376_v32 = vshll.u32 %v14127_v11, 16 }
 0x4cc   : > { %10602 = vmatprep.subr.bf16.mxu0 %v13053_v1 }
 0x4cd   : > { %v3378_v9 = vrot.slane %v3376_v32, 3  ;;  %v3439_v32 = vshll.u32 %v14169_v12, 16 }
 0x4ce   : > { %10519 = vmatmul.mubr.bf16.gmra.mrb[8].mxu0 %v3326_v43  ;;  %v3371_v43 = vsel %vm3291_vm5, %v3361_v3, %v3370_v18  ;;  %v3421_v3 = vshll.u32 %v14157_v35, 16 }
 0x4cf   : > { %10522 = vmatprep.mubr.msk.bf16.mxu0 %vm13054_vm0, %v13053_v1  ;;  %10603 = vmatpush3.bf16.msra.mxu0 %v12907_v6  ;;  %v3379_v6 = vor.u32 %v3378_v9, %v3375_v48  ;;  %v3438_v48 = vrot.slane %v3436_v25, 2  ;;  %v3441_v9 = vrot.slane %v3439_v32, 3 }
 0x4d0   : > { %10604 = vmatprep.subr.bf16.mxu0 %v13053_v1 }
 0x4d1   : > { %v3380_v59 = vsel %vm3291_vm5, %v3370_v18, %v3379_v6 }
 0x4d3   : > { %10605 = vmatpush3.bf16.msra.mxu0 %v12908_v19  ;;  %v3384_v19 = vrot.slane %v3382_v55, 2  ;;  %v3445_v55 = vshrl.u32 %v14175_v58, 16 }
 0x4d4   : > { %10606 = vmatprep.subr.bf16.mxu0 %v13053_v1 }
 0x4d6   : > { %10523 = vmatmul.mubr.bf16.gmra.mrb[12].mxu0 %v3335_v17  ;;  %v3387_v17 = vrot.slane %v3385_v7, 3  ;;  %v3448_v7 = vshll.u32 %v14175_v58, 16 }
 0x4d7   : > { %10526 = vmatprep.mubr.msk.bf16.mxu0 %vm13054_vm0, %v13053_v1  ;;  %10607 = vmatpush3.bf16.msra.mxu0 %v12909_v34  ;;  %v3394_v34 = vshll.u32 %v14139_v50, 16 }
 0x4d8   : > { %10608 = vmatprep.subr.bf16.mxu0 %v13053_v1  ;;  %v3388_v63 = vor.u32 %v3387_v17, %v3384_v19  ;;  %v3447_v19 = vrot.slane %v3445_v55, 2  ;;  %v3450_v17 = vrot.slane %v3448_v7, 3  ;;  %v3822_v55 = vrot.slane %v14133_v28, 3 }
 0x4d9   : > { %v3396_v5 = vrot.slane %v3394_v34, 3  ;;  %v3456_v34 = vrot.slane %v2188_v26, 2  ;;  %v3826_v28 = vrot.slane %v14145_v14, 3 }
 0x4da   : > { %v3389_v40 = vsel %vm3291_vm5, %v3379_v6, %v3388_v63  ;;  %v3442_v6 = vor.u32 %v3441_v9, %v3438_v48 }
 0x4db   : > { %10609 = vmatpush3.bf16.msra.mxu0 %v12910_v10  ;;  %v3397_v10 = vor.u32 %v3396_v5, %v3393_v15  ;;  %v3463_v5 = vshrl.u32 %v14187_v31, 16 }
 0x4dd   : > { %v3398_v8 = vsel %vm3291_vm5, %v3388_v63, %v3397_v10  ;;  %v3451_v63 = vor.u32 %v3450_v17, %v3447_v19  ;;  %v3465_v20 = vrot.slane %v3463_v5, 2  ;;  %v12912_v19 = vld [vmem:[%s16025_s2 + $0x48] sm:$0xff]   ;;  %v12913_v17 = vld [vmem:[%s16025_s2 + $0x50] sm:$0xff]  }
 0x4de   : > { %10527 = vmatmul.mubr.bf16.gmra.mrb[16].mxu0 %v3344_v61  ;;  %v3400_v61 = vshrl.u32 %v14145_v14, 16  ;;  %v3828_v14 = vrot.slane %v14151_v23, 3 }
 0x4df   : > { %10530 = vmatprep.mubr.msk.bf16.mxu0 %vm13054_vm0, %v13053_v1  ;;  %v3452_v38 = vsel %vm3291_vm5, %v3442_v6, %v3451_v63 }
 0x4e0   : > { %v3402_v21 = vrot.slane %v3400_v61, 2 }
 0x4e1   : > { %v2829_v16 = vpop.f32.mrb[120].mxu0 }
 0x4e2   : > { %v10392_v24 = vpop.f32.mrb[121].mxu0  ;;  %v3406_v52 = vor.u32 %v3405_v13, %v3402_v21  ;;  %v3409_v16 = vshrl.u32 %v14151_v23, 16 }
 0x4e3   : > { %v2831_v60 = vpop.f32.mrb[122].mxu0  ;;  %v3412_v24 = vshll.u32 %v14151_v23, 16  ;;  %v3830_v23 = vrot.slane %v14157_v35, 3 }
 0x4e4   : > { %v10393_v2 = vpop.f32.mrb[123].mxu0  ;;  %v3407_v60 = vsel %vm3291_vm5, %v3397_v10, %v3406_v52  ;;  %v3466_v10 = vshll.u32 %v14187_v31, 16 }
 0x4e5   : > { %v3414_v45 = vrot.slane %v3412_v24, 3  ;;  %v3418_v2 = vshrl.u32 %v14157_v35, 16  ;;  %v3832_v35 = vrot.slane %v14163_v54, 3 }
 0x4e6   : > { %10531 = vmatmul.mubr.bf16.gmra.mrb[20].mxu0 %v3353_v0  ;;  %v3411_v0 = vrot.slane %v3409_v16, 2  ;;  %v3468_v26 = vrot.slane %v3466_v10, 3 }
 0x4e7   : > { %10534 = vmatprep.mubr.msk.bf16.mxu0 %vm13054_vm0, %v13053_v1  ;;  %v3420_v36 = vrot.slane %v3418_v2, 2 }
 0x4e8   : > { %v3415_v30 = vor.u32 %v3414_v45, %v3411_v0  ;;  %v3469_v49 = vor.u32 %v3468_v26, %v3465_v20  ;;  %v3782_v0 = vld [vmem:[#allocation2 + $0x10] sm:$0xf8]  ;;  %v3833_v20 = vsel %vm3802_vm6, %v3830_v23, %v3832_v35  ;;  %v12918_v26 = vld [vmem:[%s16025_s2 + $0x78] sm:$0xff]  }
 0x4e9   : > { %v3074_v57 = vpop.f32.mrb[124].mxu0  ;;  %v3803_v45 = vrot.slane %v3782_v0, 3 }
 0x4ea   : > { %v10412_v62 = vpop.f32.mrb[125].mxu0  ;;  %v3416_v56 = vsel %vm3291_vm5, %v3406_v52, %v3415_v30  ;;  %v3423_v57 = vrot.slane %v3421_v3, 3  ;;  %v3806_v3 = vrot.slane %v14056_v42, 3  ;;  %v3812_v42 = vrot.slane %v14097_v4, 3 }
 0x4eb   : > { %v3076_v44 = vpop.f32.mrb[126].mxu0  ;;  %v3816_v4 = vrot.slane %v14115_v51, 3  ;;  %v3820_v51 = vrot.slane %v14127_v11, 3  ;;  %v12911_v11 = vld [vmem:[%s16025_s2 + $0x40] sm:$0xff]  }
 0x4ec   : > { %v10413_v47 = vpop.f32.mrb[127].mxu0  ;;  %v3424_v62 = vor.u32 %v3423_v57, %v3420_v36  ;;  %v3427_v44 = vshrl.u32 %v14163_v54, 16  ;;  %v3808_v36 = vrot.slane %v14069_v22, 3  ;;  %v3814_v22 = vrot.slane %v14108_v41, 3  ;;  %10695 = vmatpush3.bf16.msra.mxu1 %v12911_v11 }
 0x4ed   : > { %v3818_v41 = vrot.slane %v14121_v53, 3  ;;  %v3823_v7 = vsel %vm3802_vm6, %v3820_v51, %v3822_v55  ;;  %v3824_v53 = vrot.slane %v14139_v50, 3  ;;  %10696 = vmatprep.subr.bf16.mxu1 %v13053_v1 }
 0x4ee   : > { %10535 = vmatmul.mubr.bf16.gmra.mrb[24].mxu0 %v3362_v33  ;;  %v3430_v33 = vshll.u32 %v14163_v54, 16  ;;  %v3425_v37 = vsel %vm3291_vm5, %v3415_v30, %v3424_v62  ;;  %v3429_v39 = vrot.slane %v3427_v44, 2  ;;  %v3804_v30 = vrot.slane %v14046_v46, 3 }
 0x4ef   : > { %10538 = vmatprep.mubr.msk.bf16.mxu0 %vm13054_vm0, %v13053_v1  ;;  %v3809_v57 = vsel %vm3802_vm6, %v3806_v3, %v3808_v36  ;;  %v3810_v46 = vrot.slane %v14083_v27, 3  ;;  %v3815_v27 = vsel %vm3802_vm6, %v3812_v42, %v3814_v22  ;;  %v3819_v9 = vsel %vm3802_vm6, %v3816_v4, %v3818_v41 }
 0x4f0   : > { %v3432_v47 = vrot.slane %v3430_v33, 3  ;;  %v3805_v2 = vsel %vm3802_vm6, %v3803_v45, %v3804_v30  ;;  %v3827_v50 = vsel %vm3802_vm6, %v3824_v53, %v3826_v28  ;;  %10697 = vmatpush3.bf16.msra.mxu1 %v12912_v19  ;;  %v3834_v54 = vrot.slane %v14169_v12, 3  ;;  %v13003_v12 = vld [vmem:[#allocation2 + $0xa0] sm:$0xff] }
 0x4f1   : > { %v3813_v44 = vsel %vm3802_vm6, %v3810_v46, %v3812_v42  ;;  %10698 = vmatprep.subr.bf16.mxu1 %v13053_v1 }
 0x4f2   : > { %v3433_v18 = vor.u32 %v3432_v47, %v3429_v39 }
 0x4f4   : > { %10699 = vmatpush3.bf16.msra.mxu1 %v12913_v17 }
 0x4f5   : > { %10700 = vmatprep.subr.bf16.mxu1 %v13053_v1 }
 0x4f6   : > { %10539 = vmatmul.mubr.bf16.gmra.mrb[28].mxu0 %v3371_v43  ;;  %v3434_v43 = vsel %vm3291_vm5, %v3424_v62, %v3433_v18  ;;  %v3811_v62 = vsel %vm3802_vm6, %v3808_v36, %v3810_v46 }
 0x4f7   : > { %10542 = vmatprep.mubr.msk.bf16.mxu0 %vm13054_vm0, %v13053_v1 }
 0x4fe   : > { %10543 = vmatmul.mubr.bf16.gmra.mrb[32].mxu0 %v3380_v59  ;;  %v3443_v59 = vsel %vm3291_vm5, %v3433_v18, %v3442_v6  ;;  %v3821_v6 = vsel %vm3802_vm6, %v3818_v41, %v3820_v51 }
 0x4ff   : > { %10546 = vmatprep.mubr.msk.bf16.mxu0 %vm13054_vm0, %v13053_v1 }
 0x506   : > { %10547 = vmatmul.mubr.bf16.gmra.mrb[36].mxu0 %v3389_v40  ;;  %v3459_v40 = vrot.slane %v2191_v29, 3 }
 0x507   : > { %10550 = vmatprep.mubr.msk.bf16.mxu0 %vm13054_vm0, %v13053_v1 }
 0x508   : > { %v3460_v15 = vor.u32 %v3459_v40, %v3456_v34  ;;  %v12915_v34 = vld [vmem:[%s16025_s2 + $0x60] sm:$0xff]   ;;  %v12916_v40 = vld [vmem:[%s16025_s2 + $0x68] sm:$0xff]  }
 0x50a   : > { %v3461_v61 = vsel %vm3291_vm5, %v3451_v63, %v3460_v15  ;;  %v3470_v13 = vsel %vm3291_vm5, %v3460_v15, %v3469_v49  ;;  %v12914_v63 = vld [vmem:[%s16025_s2 + $0x58] sm:$0xff]   ;;  %v3831_v15 = vsel %vm3802_vm6, %v3828_v14, %v3830_v23 }
 0x50b   : > { %10701 = vmatpush3.bf16.msra.mxu1 %v12914_v63 }
 0x50c   : > { %10702 = vmatprep.subr.bf16.mxu1 %v13053_v1 }
 0x50e   : > { %10551 = vmatmul.mubr.bf16.gmra.mrb[40].mxu0 %v3398_v8  ;;  %v14328_v8 = vld [vmem:[#allocation2 + $0xb0] sm:$0x7f] }
 0x50f   : > { %10554 = vmatprep.mubr.msk.bf16.mxu0 %vm13054_vm0, %v13053_v1  ;;  %v3472_v29 = vshrl.u32 %v14328_v8, 16  ;;  %v3475_v21 = vshll.u32 %v14328_v8, 16  ;;  %10703 = vmatpush3.bf16.msra.mxu1 %v12915_v34  ;;  %v3842_v0 = vrot.slane %v14328_v8, 3  ;;  %v12922_v8 = vld [vmem:[%s16025_s2 + $0x18] sm:$0xff]  }
 0x510   : > { %10704 = vmatprep.subr.bf16.mxu1 %v13053_v1 }
 0x511   : > { %v3474_v52 = vrot.slane %v3472_v29, 2  ;;  %v3477_v16 = vrot.slane %v3475_v21, 3 }
 0x513   : > { %v3478_v24 = vor.u32 %v3477_v16, %v3474_v52  ;;  %10705 = vmatpush3.bf16.msra.mxu1 %v12916_v40  ;;  %v3838_v52 = vrot.slane %v13003_v12, 3  ;;  %v12919_v16 = vld [vmem:[%s16025_s2] sm:$0xff]  }
 0x514   : > { %10706 = vmatprep.subr.bf16.mxu1 %v13053_v1 }
 0x516   : > { %10555 = vmatmul.mubr.bf16.gmra.mrb[44].mxu0 %v3407_v60  ;;  %v3479_v60 = vsel %vm3291_vm5, %v3469_v49, %v3478_v24  ;;  %v4678_v49 = vrot.slane %v3466_v10, 1  ;;  %v3835_v10 = vsel %vm3802_vm6, %v3832_v35, %v3834_v54 }
 0x517   : > { %10558 = vmatprep.mubr.msk.bf16.mxu0 %vm13054_vm0, %v13053_v1 }
 0x518   : > { %v14435_v29 = vor.u32 %v4678_v49, %v3463_v5  ;;  %v3836_v5 = vrot.slane %v14175_v58, 3  ;;  %v3840_v58 = vrot.slane %v14187_v31, 3  ;;  %v12921_v31 = vld [vmem:[%s16025_s2 + $0x10] sm:$0xff]  }
 0x51a   : > { %v4684_v21 = vsel %vm536_vm1, %v14435_v29, %v4678_v49  ;;  %v3843_v45 = vsel %vm3802_vm6, %v3840_v58, %v3842_v0 }
 0x51e   : > { %10559 = vmatmul.mubr.bf16.gmra.mrb[48].mxu0 %v3416_v56  ;;  %v3807_v56 = vsel %vm3802_vm6, %v3804_v30, %v3806_v3  ;;  %v12920_v30 = vld [vmem:[%s16025_s2 + $0x8] sm:$0xff]  }
 0x51f   : > { %10562 = vmatprep.mubr.msk.bf16.mxu0 %vm13054_vm0, %v13053_v1 }
 0x526   : > { %10563 = vmatmul.mubr.bf16.gmra.mrb[52].mxu0 %v3425_v37 }
 0x527   : > { %10566 = vmatprep.mubr.msk.bf16.mxu0 %vm13054_vm0, %v13053_v1 }
 0x52e   : > { %10567 = vmatmul.mubr.bf16.gmra.mrb[56].mxu0 %v3434_v43  ;;  %v3817_v43 = vsel %vm3802_vm6, %v3814_v22, %v3816_v4  ;;  %v12923_v22 = vld [vmem:[%s16025_s2 + $0x20] sm:$0xff]  }
 0x52f   : > { %10570 = vmatprep.mubr.msk.bf16.mxu0 %vm13054_vm0, %v13053_v1 }
 0x536   : > { %10571 = vmatmul.mubr.bf16.gmra.mrb[60].mxu0 %v3443_v59  ;;  %v3825_v59 = vsel %vm3802_vm6, %v3822_v55, %v3824_v53 }
 0x537   : > { %10574 = vmatprep.mubr.msk.bf16.mxu0 %vm13054_vm0, %v13053_v1 }
 0x53e   : > { %10575 = vmatmul.mubr.bf16.gmra.mrb[64].mxu0 %v3452_v38  ;;  %v3829_v38 = vsel %vm3802_vm6, %v3826_v28, %v3828_v14 }
 0x53f   : > { %10578 = vmatprep.mubr.msk.bf16.mxu0 %vm13054_vm0, %v13053_v1 }
 0x546   : > { %10579 = vmatmul.mubr.bf16.gmra.mrb[68].mxu0 %v3461_v61  ;;  %v12917_v61 = vld [vmem:[%s16025_s2 + $0x70] sm:$0xff]  }
 0x547   : > { %10582 = vmatprep.mubr.msk.bf16.mxu0 %vm13054_vm0, %v13053_v1  ;;  %10707 = vmatpush3.bf16.msra.mxu1 %v12917_v61 }
 0x548   : > { %10708 = vmatprep.subr.bf16.mxu1 %v13053_v1 }
 0x54b   : > { %10709 = vmatpush3.bf16.msra.mxu1 %v12918_v26 }
 0x54c   : > { %10794 = vmatprep.subr.bf16.mxu1 %v13053_v1 }
 0x54e   : > { %10583 = vmatmul.mubr.bf16.gmra.mrb[72].mxu0 %v3470_v13  ;;  %10711 = vmatmul.mubr.bf16.vlgmr.msra.gmra.mrb[0].mxu1 %v4684_v21  ;;  %v3837_v13 = vsel %vm3802_vm6, %v3834_v54, %v3836_v5 }
 0x54f   : > { %10586 = vmatprep.mubr.msk.bf16.mxu0 %vm13054_vm0, %v13053_v1  ;;  %10714 = vmatprep.mubr.msk.bf16.mxu1 %vm13054_vm0, %v13053_v1 }
 0x550   : > { %10795 = vmatpush3.bf16.msra.mxu1 %v12919_v16 }
 0x551   : > { %10796 = vmatprep.subr.bf16.mxu1 %v13053_v1 }
 0x554   : > { %10797 = vmatpush3.bf16.msra.mxu1 %v12920_v30 }
 0x555   : > { %10798 = vmatprep.subr.bf16.mxu1 %v13053_v1 }
 0x556   : > { %10587 = vmatmul.mubr.bf16.gmra.mrb[76].mxu0 %v3479_v60  ;;  %v3841_v60 = vsel %vm3802_vm6, %v3838_v52, %v3840_v58 }
 0x557   : > { %10590 = vmatprep.mubr.msk.bf16.mxu0 %vm13054_vm0, %v13053_v1 }
 0x558   : > { %10799 = vmatpush3.bf16.msra.mxu1 %v12921_v31  ;;  %v5731_v31 = vld [vmem:[#allocation2 + $0x8] sm:$0xfe] }
 0x559   : > { %10800 = vmatprep.subr.bf16.mxu1 %v13053_v1 }
 0x55c   : > { %10801 = vmatpush3.bf16.msra.mxu1 %v12922_v8 }
 0x55d   : > { %10802 = vmatprep.subr.bf16.mxu1 %v13053_v1 }
 0x55e   : > { %10591 = vmatmul.mubr.bf16.gmra.mrb[136].mxu0 %v3478_v24  ;;  %v3839_v24 = vsel %vm3802_vm6, %v3836_v5, %v3838_v52 }
 0x55f   : > { %10610 = vmatprep.mubr.msk.bf16.mxu0 %vm13054_vm0, %v13053_v1 }
 0x560   : > { %10803 = vmatpush3.bf16.msra.mxu1 %v12923_v22 }
 0x561   : > { %10804 = vmatprep.subr.bf16.mxu1 %v13053_v1 }
 0x566   : > { %10611 = vmatmul.mubr.bf16.vlgmr.msra.gmra.mrb[140].mxu0 %v3805_v2 }
 0x567   : > { %10614 = vmatprep.mubr.msk.bf16.mxu0 %vm13054_vm0, %v13053_v1 }
 0x56e   : > { %10615 = vmatmul.mubr.bf16.gmra.mrb[4].mxu0 %v3807_v56 }
 0x56f   : > { %10618 = vmatprep.mubr.msk.bf16.mxu0 %vm13054_vm0, %v13053_v1 }
 0x576   : > { %10619 = vmatmul.mubr.bf16.gmra.mrb[8].mxu0 %v3809_v57 }
 0x577   : > { %10622 = vmatprep.mubr.msk.bf16.mxu0 %vm13054_vm0, %v13053_v1 }
 0x57e   : > { %10623 = vmatmul.mubr.bf16.gmra.mrb[12].mxu0 %v3811_v62 }
 0x57f   : > { %10626 = vmatprep.mubr.msk.bf16.mxu0 %vm13054_vm0, %v13053_v1 }
 0x586   : > { %10627 = vmatmul.mubr.bf16.gmra.mrb[16].mxu0 %v3813_v44  ;;  %v14482_v44 = vld [vmem:[%s16026_s3] ss:$0 sm:$0xff] }
 0x587   : > { %10630 = vmatprep.mubr.msk.bf16.mxu0 %vm13054_vm0, %v13053_v1 }
 0x589   : > { %v3231_v33 = vpop.f32.mrb[128].mxu0 }
 0x58a   : > { %v10492_v37 = vpop.f32.mrb[129].mxu0  ;;  %v14490_v33 = vld [vmem:[%s16027_s4] ss:$0 sm:$0xff] }
 0x58b   : > { %v3233_v39 = vpop.f32.mrb[130].mxu0 }
 0x58c   : > { %v10493_v47 = vpop.f32.mrb[131].mxu0 }
 0x58e   : > { %10631 = vmatmul.mubr.bf16.gmra.mrb[20].mxu0 %v3815_v27 }
 0x58f   : > { %10634 = vmatprep.mubr.msk.bf16.mxu0 %vm13054_vm0, %v13053_v1 }
 0x591   : > { %v3583_v18 = vpop.f32.mrb[132].mxu0 }
 0x592   : > { %v10512_v25 = vpop.f32.mrb[133].mxu0 }
 0x593   : > { %v3585_v32 = vpop.f32.mrb[134].mxu0 }
 0x594   : > { %v10513_v48 = vpop.f32.mrb[135].mxu0 }
 0x596   : > { %10635 = vmatmul.mubr.bf16.gmra.mrb[24].mxu0 %v3817_v43 }
 0x597   : > { %10638 = vmatprep.mubr.msk.bf16.mxu0 %vm13054_vm0, %v13053_v1 }
 0x59e   : > { %10639 = vmatmul.mubr.bf16.gmra.mrb[28].mxu0 %v3819_v9 }
 0x59f   : > { %10642 = vmatprep.mubr.msk.bf16.mxu0 %vm13054_vm0, %v13053_v1 }
 0x5a6   : > { %10643 = vmatmul.mubr.bf16.gmra.mrb[32].mxu0 %v3821_v6 }
 0x5a7   : > { %10646 = vmatprep.mubr.msk.bf16.mxu0 %vm13054_vm0, %v13053_v1 }
 0x5ae   : > { %10647 = vmatmul.mubr.bf16.gmra.mrb[36].mxu0 %v3823_v7 }
 0x5af   : > { %10650 = vmatprep.mubr.msk.bf16.mxu0 %vm13054_vm0, %v13053_v1 }
 0x5b6   : > { %10651 = vmatmul.mubr.bf16.gmra.mrb[40].mxu0 %v3825_v59 }
 0x5b7   : > { %10654 = vmatprep.mubr.msk.bf16.mxu0 %vm13054_vm0, %v13053_v1 }
 0x5be   : > { %10655 = vmatmul.mubr.bf16.gmra.mrb[44].mxu0 %v3827_v50 }
 0x5bf   : > { %10658 = vmatprep.mubr.msk.bf16.mxu0 %vm13054_vm0, %v13053_v1 }
 0x5c6   : > { %10659 = vmatmul.mubr.bf16.gmra.mrb[48].mxu0 %v3829_v38 }
 0x5c7   : > { %10662 = vmatprep.mubr.msk.bf16.mxu0 %vm13054_vm0, %v13053_v1 }
 0x5ce   : > { %10663 = vmatmul.mubr.bf16.gmra.mrb[52].mxu0 %v3831_v15 }
 0x5cf   : > { %10666 = vmatprep.mubr.msk.bf16.mxu0 %vm13054_vm0, %v13053_v1 }
 0x5d6   : > { %10667 = vmatmul.mubr.bf16.gmra.mrb[56].mxu0 %v3833_v20 }
 0x5d7   : > { %10670 = vmatprep.mubr.msk.bf16.mxu0 %vm13054_vm0, %v13053_v1 }
 0x5de   : > { %10671 = vmatmul.mubr.bf16.gmra.mrb[60].mxu0 %v3835_v10 }
 0x5df   : > { %10674 = vmatprep.mubr.msk.bf16.mxu0 %vm13054_vm0, %v13053_v1 }
 0x5e6   : > { %10675 = vmatmul.mubr.bf16.gmra.mrb[64].mxu0 %v3837_v13  ;;  %v12924_v13 = vld [vmem:[%s16025_s2 + $0x28] sm:$0xff]  }
 0x5e7   : > { %10678 = vmatprep.mubr.msk.bf16.mxu0 %vm13054_vm0, %v13053_v1  ;;  %10805 = vmatpush3.bf16.msra.mxu1 %v12924_v13 }
 0x5e8   : > { %10806 = vmatprep.subr.bf16.mxu1 %v13053_v1 }
 0x5ee   : > { %10679 = vmatmul.mubr.bf16.gmra.mrb[68].mxu0 %v3839_v24 }
 0x5ef   : > { %10682 = vmatprep.mubr.msk.bf16.mxu0 %vm13054_vm0, %v13053_v1 }
 0x5f6   : > { %10683 = vmatmul.mubr.bf16.gmra.mrb[72].mxu0 %v3841_v60 }
 0x5f7   : > { %10686 = vmatprep.mubr.msk.bf16.mxu0 %vm13054_vm0, %v13053_v1 }
 0x5fe   : > { %10687 = vmatmul.mubr.bf16.gmra.mrb[76].mxu0 %v3843_v45 }
 0x5ff   : > { %10690 = vmatprep.mubr.msk.bf16.mxu0 %vm13054_vm0, %v13053_v1 }
 0x606   : > { %10691 = vmatmul.mubr.bf16.gmra.mrb[144].mxu0 %v3842_v0 }
 0x631   : > { %v3740_v2 = vpop.f32.mrb[136].mxu0 }
 0x632   : > { %v10592_v3 = vpop.f32.mrb[137].mxu0 }
 0x633   : > { %v3742_v56 = vpop.f32.mrb[138].mxu0 }
 0x634   : > { %v10593_v36 = vpop.f32.mrb[139].mxu0 }
 0x639   : > { %v3947_v57 = vpop.f32.mrb[140].mxu0 }
 0x63a   : > { %v10612_v46 = vpop.f32.mrb[141].mxu0 }
 0x63b   : > { %v3949_v62 = vpop.f32.mrb[142].mxu0 }
 0x63c   : > { %v10613_v42 = vpop.f32.mrb[143].mxu0 }
 0x641   : > { %v3953_v37 = vpop.f32.mrb[4].mxu0 }
 0x642   : > { %v4152_v39 = vmul.f32 %v14482_v44, %v3953_v37  ;;  %v10616_v27 = vpop.f32.mrb[5].mxu0 }
 0x643   : > { %v3956_v47 = vpop.f32.mrb[6].mxu0 }
 0x644   : > { %v4161_v4 = vadd.f32 %v14490_v33, %v4152_v39  ;;  %v4153_v18 = vmul.f32 %v14482_v44, %v3956_v47  ;;  %v10617_v25 = vpop.f32.mrb[7].mxu0  ;;  %v6152_v39 = vshrl.u32 %v5731_v31, 16 }
 0x645   : > { %v6155_v25 = vshll.u32 %v5731_v31, 16 }
 0x646   : > { %v4162_v32 = vadd.f32 %v14490_v33, %v4153_v18  ;;  %v4164_v43 = vmax.f32 %v4161_v4, 0.0 }
 0x648   : > { %v4165_v48 = vmax.f32 %v4162_v32, 0.0 }
 0x649   : > { %v3961_v41 = vpop.f32.mrb[8].mxu0 }
 0x64a   : > { %v4167_v9 = vpack.c.bf16 %v4165_v48, %v4164_v43  ;;  %v4154_v51 = vmul.f32 %v14482_v44, %v3961_v41  ;;  %v10620_v6 = vpop.f32.mrb[9].mxu0 }
 0x64b   : > { %v3964_v55 = vpop.f32.mrb[10].mxu0 }
 0x64c   : > { %v4171_v7 = vshrl.u32 %v4167_v9, 16  ;;  %v4174_v53 = vshll.u32 %v4167_v9, 16  ;;  %v4163_v59 = vadd.f32 %v14490_v33, %v4154_v51  ;;  %v4191_v11 = vmul.f32 %v14482_v44, %v3964_v55  ;;  %v10621_v28 = vpop.f32.mrb[11].mxu0 }
 0x64d   : > { %v6154_v28 = vrot.slane %v6152_v39, 1 }
 0x64e   : > { %v4173_v19 = vrot.slane %v4171_v7, 6  ;;  %v4176_v50 = vrot.slane %v4174_v53, 7  ;;  %v4166_v17 = vmax.f32 %v4163_v59, 0.0  ;;  %v4193_v14 = vadd.f32 %v14490_v33, %v4191_v11  ;;  %v12925_v59 = vld [vmem:[%s16025_s2 + $0x30] sm:$0xff]  }
 0x64f   : > { %10807 = vmatpush3.bf16.msra.mxu1 %v12925_v59 }
 0x650   : > { %v4177_v63 = vor.u32 %v4176_v50, %v4173_v19  ;;  %v4168_v38 = vpack.c.bf16 %v4166_v17, %v4166_v17  ;;  %v4195_v34 = vmax.f32 %v4193_v14, 0.0  ;;  %v6157_v19 = vrot.slane %v6155_v25, 2  ;;  %10808 = vmatprep.subr.bf16.mxu1 %v13053_v1 }
 0x651   : > { %v3969_v23 = vpop.f32.mrb[12].mxu0 }
 0x652   : > { %4189 = vst [vmem:[#allocation2 + $0x10] sm:$0xf8] %v4177_v63  ;;  %v4179_v40 = vshrl.u32 %v4168_v38, 16  ;;  %v4182_v15 = vshll.u32 %v4168_v38, 16  ;;  %v4197_v61 = vpack.c.bf16 %v4195_v34, %v4166_v17  ;;  %v4192_v35 = vmul.f32 %v14482_v44, %v3969_v23  ;;  %v10624_v20 = vpop.f32.mrb[13].mxu0 }
 0x653   : > { %v3972_v26 = vpop.f32.mrb[14].mxu0 }
 0x654   : > { %v4181_v49 = vrot.slane %v4179_v40, 6  ;;  %v4184_v54 = vrot.slane %v4182_v15, 7  ;;  %v4200_v21 = vshrl.u32 %v4197_v61, 16  ;;  %v4203_v10 = vshll.u32 %v4197_v61, 16  ;;  %v10625_v5 = vpop.f32.mrb[15].mxu0 }
 0x655   : > { %v4194_v12 = vadd.f32 %v14490_v33, %v4192_v35  ;;  %v4220_v52 = vmul.f32 %v14482_v44, %v3972_v26 }
 0x656   : > { %v4185_v16 = vor.u32 %v4184_v54, %v4181_v49  ;;  %v4202_v24 = vrot.slane %v4200_v21, 6  ;;  %v4205_v58 = vrot.slane %v4203_v10, 7 }
 0x657   : > { %v4196_v60 = vmax.f32 %v4194_v12, 0.0  ;;  %v4222_v0 = vadd.f32 %v14490_v33, %v4220_v52 }
 0x658   : > { %v4186_v45 = vsel %vm4169_vm7, %v4177_v63, %v4185_v16  ;;  %v4206_v30 = vor.u32 %v4205_v58, %v4202_v24  ;;  %v6158_v16 = vor.u32 %v6157_v19, %v6154_v28 }
 0x659   : > { %4190 = vst [vmem:[#allocation2 + $0x18] sm:$0x7] %v4186_v45  ;;  %v4198_v8 = vpack.c.bf16 %v4196_v60, %v4196_v60  ;;  %v4224_v2 = vmax.f32 %v4222_v0, 0.0  ;;  %v3977_v3 = vpop.f32.mrb[16].mxu0  ;;  %v4620_v56 = vld [vmem:[#allocation2 + $0x10] sm:$0xff] }
 0x65a   : > { %4218 = vst [vmem:[#allocation2 + $0x18] sm:$0xf0] %v4206_v30  ;;  %v4221_v36 = vmul.f32 %v14482_v44, %v3977_v3  ;;  %v10628_v57 = vpop.f32.mrb[17].mxu0  ;;  %v4689_v46 = vshll.u32 %v4620_v56, 16  ;;  %v5732_v9 = vld [vmem:[#allocation2 + $0x10] sm:$0xff]  ;;  %v4693_v26 = vshrl.u32 %v4620_v56, 16 }
 0x65b   : > { %v4208_v62 = vshrl.u32 %v4198_v8, 16  ;;  %v4211_v42 = vshll.u32 %v4198_v8, 16  ;;  %v4226_v22 = vpack.c.bf16 %v4224_v2, %v4196_v60  ;;  %v3980_v37 = vpop.f32.mrb[18].mxu0  ;;  %v6160_v50 = vshrl.u32 %v5732_v9, 16 }
 0x65c   : > { %v4223_v27 = vadd.f32 %v14490_v33, %v4221_v36  ;;  %v4249_v47 = vmul.f32 %v14482_v44, %v3980_v37  ;;  %v10629_v4 = vpop.f32.mrb[19].mxu0  ;;  %v4691_v18 = vrot.slane %v4689_v46, 1  ;;  %v6163_v34 = vshll.u32 %v5732_v9, 16 }
 0x65d   : > { %v4210_v32 = vrot.slane %v4208_v62, 6  ;;  %v4213_v43 = vrot.slane %v4211_v42, 7  ;;  %v4229_v48 = vshrl.u32 %v4226_v22, 16  ;;  %v4232_v41 = vshll.u32 %v4226_v22, 16 }
 0x65e   : > { %v4225_v51 = vmax.f32 %v4223_v27, 0.0  ;;  %v4692_v6 = vsel %vm536_vm1, %v14435_v29, %v4691_v18  ;;  %v4252_v29 = vadd.f32 %v14490_v33, %v4249_v47  ;;  %v6162_v49 = vrot.slane %v6160_v50, 1 }
 0x65f   : > { %v4214_v55 = vor.u32 %v4213_v43, %v4210_v32  ;;  %v4231_v7 = vrot.slane %v4229_v48, 6  ;;  %v4234_v53 = vrot.slane %v4232_v41, 7  ;;  %10715 = vmatmul.mubr.bf16.gmra.mrb[4].mxu1 %v4692_v6  ;;  %v4695_v12 = vor.u32 %v4693_v26, %v4691_v18 }
 0x660   : > { %v4227_v11 = vpack.c.bf16 %v4225_v51, %v4225_v51  ;;  %10718 = vmatprep.mubr.msk.bf16.mxu1 %vm13054_vm0, %v13053_v1  ;;  %v6165_v24 = vrot.slane %v6163_v34, 2  ;;  %v4255_v60 = vmax.f32 %v4252_v29, 0.0 }
 0x661   : > { %v4215_v17 = vsel %vm4169_vm7, %v4206_v30, %v4214_v55  ;;  %v4235_v14 = vor.u32 %v4234_v53, %v4231_v7  ;;  %v3985_v63 = vpop.f32.mrb[20].mxu0  ;;  %v4621_v38 = vld [vmem:[#allocation2 + $0x18] sm:$0xff] }
 0x662   : > { %4219 = vst [vmem:[#allocation2 + $0x20] sm:$0xf] %v4215_v17  ;;  %v4237_v23 = vshrl.u32 %v4227_v11, 16  ;;  %v4240_v40 = vshll.u32 %v4227_v11, 16  ;;  %v4250_v15 = vmul.f32 %v14482_v44, %v3985_v63  ;;  %v10632_v61 = vpop.f32.mrb[21].mxu0  ;;  %v4697_v35 = vshll.u32 %v4621_v38, 16 }
 0x663   : > { %4247 = vst [vmem:[#allocation2 + $0x20] sm:$0xe0] %v4235_v14  ;;  %v3988_v20 = vpop.f32.mrb[22].mxu0  ;;  %v14528_v31 = vor.u32 %v6165_v24, %v6162_v49  ;;  %v4701_v27 = vshrl.u32 %v4621_v38, 16  ;;  %v12926_v7 = vld [vmem:[%s16025_s2 + $0x38] sm:$0xff]  }
 0x664   : > { %v4239_v54 = vrot.slane %v4237_v23, 6  ;;  %v4242_v21 = vrot.slane %v4240_v40, 7  ;;  %v4253_v10 = vadd.f32 %v14490_v33, %v4250_v15  ;;  %v4251_v5 = vmul.f32 %v14482_v44, %v3988_v20  ;;  %v10633_v13 = vpop.f32.mrb[23].mxu0  ;;  %10809 = vmatpush3.bf16.msra.mxu1 %v12926_v7 }
 0x665   : > { %v4699_v52 = vrot.slane %v4697_v35, 1  ;;  %v14535_v36 = vsel %vm2016_vm3, %v6158_v16, %v14528_v31  ;;  %10894 = vmatprep.subr.bf16.mxu1 %v13053_v1 }
 0x666   : > { %v4243_v58 = vor.u32 %v4242_v21, %v4239_v54  ;;  %v4256_v0 = vmax.f32 %v4253_v10, 0.0  ;;  %v4254_v45 = vadd.f32 %v14490_v33, %v4251_v5 }
 0x667   : > { %v4700_v30 = vsel %vm536_vm1, %v4695_v12, %v4699_v52  ;;  %v4703_v41 = vor.u32 %v4701_v27, %v4699_v52 }
 0x668   : > { %v4244_v8 = vsel %vm4169_vm7, %v4235_v14, %v4243_v58  ;;  %v4258_v2 = vpack.c.bf16 %v4256_v0, %v4255_v60  ;;  %v4257_v3 = vmax.f32 %v4254_v45, 0.0  ;;  %10719 = vmatmul.mubr.bf16.gmra.mrb[8].mxu1 %v4700_v30 }
 0x669   : > { %4248 = vst [vmem:[#allocation2 + $0x28] sm:$0x1f] %v4244_v8  ;;  %v3993_v56 = vpop.f32.mrb[24].mxu0  ;;  %10722 = vmatprep.mubr.msk.bf16.mxu1 %vm13054_vm0, %v13053_v1 }
 0x66a   : > { %v4261_v57 = vshrl.u32 %v4258_v2, 16  ;;  %v4264_v46 = vshll.u32 %v4258_v2, 16  ;;  %v4259_v62 = vpack.c.bf16 %v4257_v3, %v4257_v3  ;;  %v4277_v42 = vmul.f32 %v14482_v44, %v3993_v56  ;;  %v10636_v22 = vpop.f32.mrb[25].mxu0  ;;  %v4622_v37 = vld [vmem:[#allocation2 + $0x20] sm:$0xff] }
 0x66b   : > { %v3996_v39 = vpop.f32.mrb[26].mxu0  ;;  %v4705_v47 = vshll.u32 %v4622_v37, 16  ;;  %v4709_v60 = vshrl.u32 %v4622_v37, 16 }
 0x66c   : > { %v4263_v4 = vrot.slane %v4261_v57, 2  ;;  %v4266_v18 = vrot.slane %v4264_v46, 3  ;;  %v4269_v25 = vshll.u32 %v4259_v62, 16  ;;  %v4279_v32 = vadd.f32 %v14490_v33, %v4277_v42  ;;  %v10637_v43 = vpop.f32.mrb[27].mxu0 }
 0x66d   : > { %v4278_v48 = vmul.f32 %v14482_v44, %v3996_v39  ;;  %v4707_v9 = vrot.slane %v4705_v47, 1 }
 0x66e   : > { %v4267_v51 = vor.u32 %v4266_v18, %v4263_v4  ;;  %v4271_v6 = vrot.slane %v4269_v25, 3  ;;  %v4281_v55 = vmax.f32 %v4279_v32, 0.0 }
 0x66f   : > { %v4280_v53 = vadd.f32 %v14490_v33, %v4278_v48  ;;  %v4708_v59 = vsel %vm536_vm1, %v4703_v41, %v4707_v9  ;;  %v4711_v57 = vor.u32 %v4709_v60, %v4707_v9 }
 0x670   : > { %4275 = vst [vmem:[#allocation2 + $0x28] sm:$0xc0] %v4267_v51  ;;  %v4272_v11 = vsel %vm3291_vm5, %v4267_v51, %v4271_v6  ;;  %v4283_v28 = vpack.c.bf16 %v4281_v55, %v4257_v3  ;;  %10723 = vmatmul.mubr.bf16.gmra.mrb[12].mxu1 %v4708_v59 }
 0x671   : > { %4276 = vst [vmem:[#allocation2 + $0x30] sm:$0x3f] %v4272_v11  ;;  %v4282_v19 = vmax.f32 %v4280_v53, 0.0  ;;  %v4001_v50 = vpop.f32.mrb[28].mxu0  ;;  %10726 = vmatprep.mubr.msk.bf16.mxu1 %vm13054_vm0, %v13053_v1 }
 0x672   : > { %v4286_v17 = vshrl.u32 %v4283_v28, 16  ;;  %v4289_v14 = vshll.u32 %v4283_v28, 16  ;;  %v4306_v29 = vmul.f32 %v14482_v44, %v4001_v50  ;;  %v10640_v63 = vpop.f32.mrb[29].mxu0 }
 0x673   : > { %v4284_v38 = vpack.c.bf16 %v4282_v19, %v4282_v19  ;;  %v4004_v34 = vpop.f32.mrb[30].mxu0 }
 0x674   : > { %v4288_v23 = vrot.slane %v4286_v17, 2  ;;  %v4291_v40 = vrot.slane %v4289_v14, 3  ;;  %v4308_v15 = vadd.f32 %v14490_v33, %v4306_v29  ;;  %v4307_v61 = vmul.f32 %v14482_v44, %v4004_v34  ;;  %v10641_v35 = vpop.f32.mrb[31].mxu0 }
 0x675   : > { %v4294_v20 = vshrl.u32 %v4284_v38, 16  ;;  %v4297_v26 = vshll.u32 %v4284_v38, 16 }
 0x676   : > { %v4292_v49 = vor.u32 %v4291_v40, %v4288_v23  ;;  %v4310_v54 = vmax.f32 %v4308_v15, 0.0  ;;  %v4309_v21 = vadd.f32 %v14490_v33, %v4307_v61 }
 0x677   : > { %v4296_v10 = vrot.slane %v4294_v20, 2  ;;  %v4299_v5 = vrot.slane %v4297_v26, 3  ;;  %v4623_v13 = vld [vmem:[#allocation2 + $0x28] sm:$0xff] }
 0x678   : > { %4304 = vst [vmem:[#allocation2 + $0x30] sm:$0x80] %v4292_v49  ;;  %v4312_v12 = vpack.c.bf16 %v4310_v54, %v4282_v19  ;;  %v4311_v52 = vmax.f32 %v4309_v21, 0.0  ;;  %v4713_v16 = vshll.u32 %v4623_v13, 16  ;;  %v4717_v51 = vshrl.u32 %v4623_v13, 16 }
 0x679   : > { %v4300_v24 = vor.u32 %v4299_v5, %v4296_v10  ;;  %v4009_v58 = vpop.f32.mrb[32].mxu0 }
 0x67a   : > { %v4315_v0 = vshrl.u32 %v4312_v12, 16  ;;  %v4318_v45 = vshll.u32 %v4312_v12, 16  ;;  %v4313_v30 = vpack.c.bf16 %v4311_v52, %v4311_v52  ;;  %v4333_v8 = vmul.f32 %v14482_v44, %v4009_v58  ;;  %v10644_v2 = vpop.f32.mrb[33].mxu0 }
 0x67b   : > { %v4301_v3 = vsel %vm3291_vm5, %v4292_v49, %v4300_v24  ;;  %v4012_v56 = vpop.f32.mrb[34].mxu0  ;;  %v4715_v46 = vrot.slane %v4713_v16, 1 }
 0x67c   : > { %4305 = vst [vmem:[#allocation2 + $0x38] sm:$0x7f] %v4301_v3  ;;  %v4317_v62 = vrot.slane %v4315_v0, 2  ;;  %v4320_v42 = vrot.slane %v4318_v45, 3  ;;  %v4323_v22 = vshrl.u32 %v4313_v30, 16  ;;  %v4326_v39 = vshll.u32 %v4313_v30, 16 }
 0x67d   : > { %v10645_v27 = vpop.f32.mrb[35].mxu0  ;;  %v4335_v47 = vadd.f32 %v14490_v33, %v4333_v8  ;;  %v4334_v37 = vmul.f32 %v14482_v44, %v4012_v56  ;;  %v4716_v4 = vsel %vm536_vm1, %v4711_v57, %v4715_v46  ;;  %v4719_v19 = vor.u32 %v4717_v51, %v4715_v46 }
 0x67e   : > { %v4325_v18 = vrot.slane %v4323_v22, 2  ;;  %v4328_v25 = vrot.slane %v4326_v39, 3  ;;  %10727 = vmatmul.mubr.bf16.gmra.mrb[16].mxu1 %v4716_v4  ;;  %v4321_v41 = vor.u32 %v4320_v42, %v4317_v62 }
 0x67f   : > { %v4337_v32 = vmax.f32 %v4335_v47, 0.0  ;;  %v4336_v43 = vadd.f32 %v14490_v33, %v4334_v37  ;;  %10730 = vmatprep.mubr.msk.bf16.mxu1 %vm13054_vm0, %v13053_v1  ;;  %v14561_v48 = vld [vmem:[#allocation2 + $0x30] sm:$0xff] }
 0x680   : > { %v4329_v9 = vor.u32 %v4328_v25, %v4325_v18  ;;  %v4721_v6 = vshll.u32 %v14561_v48, 16  ;;  %v4725_v5 = vshrl.u32 %v14561_v48, 16 }
 0x681   : > { %v4339_v55 = vpack.c.bf16 %v4337_v32, %v4311_v52  ;;  %v4338_v7 = vmax.f32 %v4336_v43, 0.0  ;;  %v4017_v53 = vpop.f32.mrb[36].mxu0 }
 0x682   : > { %v14565_v59 = vsel %vm3291_vm5, %v4321_v41, %v4329_v9  ;;  %v4362_v11 = vmul.f32 %v14482_v44, %v4017_v53  ;;  %v10648_v28 = vpop.f32.mrb[37].mxu0  ;;  %v4723_v50 = vrot.slane %v4721_v6, 1 }
 0x683   : > { %4332 = vst [vmem:[#allocation2 + $0x40] sm:$0xff] %v14565_v59  ;;  %v4342_v17 = vshrl.u32 %v4339_v55, 16  ;;  %v4345_v14 = vshll.u32 %v4339_v55, 16  ;;  %v4340_v29 = vpack.c.bf16 %v4338_v7, %v4338_v7  ;;  %v4020_v63 = vpop.f32.mrb[38].mxu0  ;;  %v14569_v38 = vld [vmem:[#allocation2 + $0x38] sm:$0xff]  ;;  %v4737_v4 = vshll.u32 %v14565_v59, 16 }
 0x684   : > { %v4365_v34 = vadd.f32 %v14490_v33, %v4362_v11  ;;  %v4363_v23 = vmul.f32 %v14482_v44, %v4020_v63  ;;  %v10649_v40 = vpop.f32.mrb[39].mxu0  ;;  %v4724_v15 = vsel %vm536_vm1, %v4719_v19, %v4723_v50  ;;  %v4729_v54 = vshll.u32 %v14569_v38, 16 }
 0x685   : > { %v4344_v61 = vrot.slane %v4342_v17, 2  ;;  %v4347_v35 = vrot.slane %v4345_v14, 3  ;;  %v4350_v20 = vshrl.u32 %v4340_v29, 16  ;;  %v4353_v26 = vshll.u32 %v4340_v29, 16 }
 0x686   : > { %v4366_v49 = vadd.f32 %v14490_v33, %v4363_v23  ;;  %10731 = vmatmul.mubr.bf16.gmra.mrb[20].mxu1 %v4724_v15  ;;  %v4368_v13 = vmax.f32 %v4365_v34, 0.0  ;;  %v4727_v58 = vor.u32 %v4725_v5, %v4723_v50  ;;  %v4731_v60 = vrot.slane %v4729_v54, 1 }
 0x687   : > { %v4352_v21 = vrot.slane %v4350_v20, 2  ;;  %v4355_v10 = vrot.slane %v4353_v26, 3  ;;  %10734 = vmatprep.mubr.msk.bf16.mxu1 %vm13054_vm0, %v13053_v1  ;;  %v4348_v52 = vor.u32 %v4347_v35, %v4344_v61  ;;  %v4733_v37 = vshrl.u32 %v14569_v38, 16 }
 0x688   : > { %v4369_v12 = vmax.f32 %v4366_v49, 0.0  ;;  %v4732_v42 = vsel %vm536_vm1, %v4727_v58, %v4731_v60  ;;  %v4739_v53 = vrot.slane %v4737_v4, 1 }
 0x689   : > { %v4356_v16 = vor.u32 %v4355_v10, %v4352_v21  ;;  %v4025_v24 = vpop.f32.mrb[40].mxu0  ;;  %v4735_v41 = vor.u32 %v4733_v37, %v4731_v60  ;;  %v4741_v21 = vshrl.u32 %v14565_v59, 16 }
 0x68a   : > { %v4371_v0 = vpack.c.bf16 %v4369_v12, %v4368_v13  ;;  %v4364_v45 = vmul.f32 %v14482_v44, %v4025_v24  ;;  %v10652_v30 = vpop.f32.mrb[41].mxu0 }
 0x68b   : > { %v4357_v8 = vsel %vm3291_vm5, %v4348_v52, %v4356_v16  ;;  %4361 = vst [vmem:[#allocation2 + $0x50] sm:$0x1] %v4356_v16  ;;  %v4028_v2 = vpop.f32.mrb[42].mxu0  ;;  %v4740_v63 = vsel %vm536_vm1, %v4735_v41, %v4739_v53  ;;  %v4743_v60 = vor.u32 %v4741_v21, %v4739_v53 }
 0x68c   : > { %4360 = vst [vmem:[#allocation2 + $0x48] sm:$0xfe] %v4357_v8  ;;  %v4374_v3 = vshrl.u32 %v4371_v0, 16  ;;  %v4377_v56 = vshll.u32 %v4371_v0, 16  ;;  %v4367_v57 = vadd.f32 %v14490_v33, %v4364_v45  ;;  %v4390_v46 = vmul.f32 %v14482_v44, %v4028_v2  ;;  %v10653_v62 = vpop.f32.mrb[43].mxu0 }
 0x68e   : > { %v4376_v22 = vrot.slane %v4374_v3, 6  ;;  %v4379_v39 = vrot.slane %v4377_v56, 7  ;;  %v4370_v27 = vmax.f32 %v4367_v57, 0.0  ;;  %v4392_v47 = vadd.f32 %v14490_v33, %v4390_v46  ;;  %10735 = vmatmul.mubr.bf16.gmra.mrb[24].mxu1 %v4732_v42 }
 0x68f   : > { %10738 = vmatprep.mubr.msk.bf16.mxu1 %vm13054_vm0, %v13053_v1 }
 0x690   : > { %v4380_v18 = vor.u32 %v4379_v39, %v4376_v22  ;;  %v4372_v25 = vpack.c.bf16 %v4370_v27, %v4370_v27  ;;  %v4394_v32 = vmax.f32 %v4392_v47, 0.0 }
 0x691   : > { %v4033_v43 = vpop.f32.mrb[44].mxu0 }
 0x692   : > { %4388 = vst [vmem:[#allocation2 + $0x50] sm:$0xfc] %v4380_v18  ;;  %v4382_v9 = vshll.u32 %v4372_v25, 16  ;;  %v4396_v51 = vpack.c.bf16 %v4394_v32, %v4370_v27  ;;  %v4391_v6 = vmul.f32 %v14482_v44, %v4033_v43  ;;  %v10656_v55 = vpop.f32.mrb[45].mxu0 }
 0x693   : > { %v4036_v7 = vpop.f32.mrb[46].mxu0  ;;  %v14590_v11 = vld [vmem:[#allocation2 + $0x48] sm:$0xff] }
 0x694   : > { %v4384_v28 = vrot.slane %v4382_v9, 7  ;;  %v4399_v19 = vshrl.u32 %v4396_v51, 16  ;;  %v4402_v50 = vshll.u32 %v4396_v51, 16  ;;  %v4393_v17 = vadd.f32 %v14490_v33, %v4391_v6  ;;  %v10657_v14 = vpop.f32.mrb[47].mxu0 }
 0x695   : > { %v4419_v29 = vmul.f32 %v14482_v44, %v4036_v7  ;;  %v4745_v34 = vshll.u32 %v14590_v11, 16  ;;  %v4749_v32 = vshrl.u32 %v14590_v11, 16 }
 0x696   : > { %v4385_v23 = vsel %vm4169_vm7, %v4380_v18, %v4384_v28  ;;  %v4401_v40 = vrot.slane %v4399_v19, 6  ;;  %v4404_v15 = vrot.slane %v4402_v50, 7  ;;  %v4395_v61 = vmax.f32 %v4393_v17, 0.0  ;;  %10739 = vmatmul.mubr.bf16.gmra.mrb[28].mxu1 %v4740_v63 }
 0x697   : > { %4389 = vst [vmem:[#allocation2 + $0x58] sm:$0x3] %v4385_v23  ;;  %v4421_v35 = vadd.f32 %v14490_v33, %v4419_v29  ;;  %10742 = vmatprep.mubr.msk.bf16.mxu1 %vm13054_vm0, %v13053_v1  ;;  %v4747_v10 = vrot.slane %v4745_v34, 1 }
 0x698   : > { %v4405_v20 = vor.u32 %v4404_v15, %v4401_v40  ;;  %v4397_v26 = vpack.c.bf16 %v4395_v61, %v4395_v61 }
 0x699   : > { %v4423_v49 = vmax.f32 %v4421_v35, 0.0  ;;  %v4041_v54 = vpop.f32.mrb[48].mxu0  ;;  %v14602_v16 = vld [vmem:[#allocation2 + $0x50] sm:$0xff]  ;;  %v4748_v57 = vsel %vm536_vm1, %v4743_v60, %v4747_v10  ;;  %v4751_v28 = vor.u32 %v4749_v32, %v4747_v10 }
 0x69a   : > { %4417 = vst [vmem:[#allocation2 + $0x58] sm:$0xf8] %v4405_v20  ;;  %v4407_v5 = vshrl.u32 %v4397_v26, 16  ;;  %v4410_v13 = vshll.u32 %v4397_v26, 16  ;;  %v4420_v12 = vmul.f32 %v14482_v44, %v4041_v54  ;;  %v10660_v52 = vpop.f32.mrb[49].mxu0  ;;  %v4753_v46 = vshll.u32 %v14602_v16, 16 }
 0x69b   : > { %v4425_v24 = vpack.c.bf16 %v4423_v49, %v4395_v61  ;;  %v4044_v58 = vpop.f32.mrb[50].mxu0  ;;  %v4757_v10 = vshrl.u32 %v14602_v16, 16 }
 0x69c   : > { %v4409_v0 = vrot.slane %v4407_v5, 6  ;;  %v4412_v45 = vrot.slane %v4410_v13, 7  ;;  %v4422_v30 = vadd.f32 %v14490_v33, %v4420_v12  ;;  %v4448_v8 = vmul.f32 %v14482_v44, %v4044_v58  ;;  %v10661_v2 = vpop.f32.mrb[51].mxu0 }
 0x69d   : > { %v4428_v3 = vshrl.u32 %v4425_v24, 16  ;;  %v4431_v56 = vshll.u32 %v4425_v24, 16  ;;  %v4755_v43 = vrot.slane %v4753_v46, 1 }
 0x69e   : > { %v4413_v62 = vor.u32 %v4412_v45, %v4409_v0  ;;  %v4424_v42 = vmax.f32 %v4422_v30, 0.0  ;;  %v4450_v22 = vadd.f32 %v14490_v33, %v4448_v8  ;;  %10743 = vmatmul.mubr.bf16.gmra.mrb[32].mxu1 %v4748_v57  ;;  %v4943_v30 = vpop.f32.mrb[0].mxu1 }
 0x69f   : > { %v4430_v39 = vrot.slane %v4428_v3, 6  ;;  %v4433_v27 = vrot.slane %v4431_v56, 7  ;;  %10746 = vmatprep.mubr.msk.bf16.mxu1 %vm13054_vm0, %v13053_v1  ;;  %v4756_v34 = vsel %vm536_vm1, %v4751_v28, %v4755_v43  ;;  %v4759_v45 = vor.u32 %v4757_v10, %v4755_v43  ;;  %v10712_v56 = vpop.f32.mrb[1].mxu1 }
 0x6a0   : > { %v4414_v47 = vsel %vm4169_vm7, %v4405_v20, %v4413_v62  ;;  %v4426_v37 = vpack.c.bf16 %v4424_v42, %v4424_v42  ;;  %v4452_v4 = vmax.f32 %v4450_v22, 0.0  ;;  %v4945_v22 = vpop.f32.mrb[2].mxu1 }
 0x6a1   : > { %4418 = vst [vmem:[#allocation2 + $0x60] sm:$0x7] %v4414_v47  ;;  %v4434_v18 = vor.u32 %v4433_v27, %v4430_v39  ;;  %v4049_v25 = vpop.f32.mrb[52].mxu0  ;;  %v14614_v7 = vld [vmem:[#allocation2 + $0x58] sm:$0xff] }
 0x6a2   : > { %v4436_v41 = vshrl.u32 %v4426_v37, 16  ;;  %v4439_v9 = vshll.u32 %v4426_v37, 16  ;;  %v4454_v51 = vpack.c.bf16 %v4452_v4, %v4424_v42  ;;  %v4449_v6 = vmul.f32 %v14482_v44, %v4049_v25  ;;  %v10664_v55 = vpop.f32.mrb[53].mxu0  ;;  %v10713_v37 = vpop.f32.mrb[3].mxu1 }
 0x6a3   : > { %4446 = vst [vmem:[#allocation2 + $0x60] sm:$0xf0] %v4434_v18  ;;  %v4052_v53 = vpop.f32.mrb[54].mxu0  ;;  %v4761_v23 = vshll.u32 %v14614_v7, 16 }
 0x6a4   : > { %v4438_v19 = vrot.slane %v4436_v41, 6  ;;  %v4441_v50 = vrot.slane %v4439_v9, 7  ;;  %v4457_v17 = vshrl.u32 %v4454_v51, 16  ;;  %v4460_v14 = vshll.u32 %v4454_v51, 16  ;;  %v10665_v29 = vpop.f32.mrb[55].mxu0 }
 0x6a5   : > { %v4451_v63 = vadd.f32 %v14490_v33, %v4449_v6  ;;  %v4477_v35 = vmul.f32 %v14482_v44, %v4052_v53  ;;  %v4763_v5 = vrot.slane %v4761_v23, 1  ;;  %v4765_v41 = vshrl.u32 %v14614_v7, 16 }
 0x6a6   : > { %v4442_v40 = vor.u32 %v4441_v50, %v4438_v19  ;;  %v4459_v15 = vrot.slane %v4457_v17, 6  ;;  %v4462_v61 = vrot.slane %v4460_v14, 7  ;;  %10747 = vmatmul.mubr.bf16.gmra.mrb[36].mxu1 %v4756_v34 }
 0x6a7   : > { %v4453_v20 = vmax.f32 %v4451_v63, 0.0  ;;  %10750 = vmatprep.mubr.msk.bf16.mxu1 %vm13054_vm0, %v13053_v1  ;;  %v4480_v13 = vadd.f32 %v14490_v33, %v4477_v35  ;;  %v4764_v62 = vsel %vm536_vm1, %v4759_v45, %v4763_v5  ;;  %v4767_v17 = vor.u32 %v4765_v41, %v4763_v5 }
 0x6a8   : > { %v4443_v26 = vsel %vm4169_vm7, %v4434_v18, %v4442_v40  ;;  %v4463_v49 = vor.u32 %v4462_v61, %v4459_v15 }
 0x6a9   : > { %4447 = vst [vmem:[#allocation2 + $0x68] sm:$0xf] %v4443_v26  ;;  %v4455_v54 = vpack.c.bf16 %v4453_v20, %v4453_v20  ;;  %v4057_v21 = vpop.f32.mrb[56].mxu0  ;;  %v4483_v39 = vmax.f32 %v4480_v13, 0.0 }
 0x6aa   : > { %4475 = vst [vmem:[#allocation2 + $0x68] sm:$0xe0] %v4463_v49  ;;  %v4478_v12 = vmul.f32 %v14482_v44, %v4057_v21  ;;  %v10668_v52 = vpop.f32.mrb[57].mxu0  ;;  %v14626_v24 = vld [vmem:[#allocation2 + $0x60] sm:$0xff] }
 0x6ab   : > { %v4465_v58 = vshrl.u32 %v4455_v54, 16  ;;  %v4468_v60 = vshll.u32 %v4455_v54, 16  ;;  %v4060_v0 = vpop.f32.mrb[58].mxu0  ;;  %v4769_v42 = vshll.u32 %v14626_v24, 16  ;;  %v4773_v13 = vshrl.u32 %v14626_v24, 16 }
 0x6ac   : > { %v4481_v8 = vadd.f32 %v14490_v33, %v4478_v12  ;;  %v4479_v2 = vmul.f32 %v14482_v44, %v4060_v0  ;;  %v10669_v3 = vpop.f32.mrb[59].mxu0 }
 0x6ad   : > { %v4467_v57 = vrot.slane %v4465_v58, 6  ;;  %v4470_v46 = vrot.slane %v4468_v60, 7  ;;  %v4771_v9 = vrot.slane %v4769_v42, 1 }
 0x6ae   : > { %v4484_v27 = vmax.f32 %v4481_v8, 0.0  ;;  %v4482_v47 = vadd.f32 %v14490_v33, %v4479_v2  ;;  %10751 = vmatmul.mubr.bf16.gmra.mrb[40].mxu1 %v4764_v62 }
 0x6af   : > { %v4471_v4 = vor.u32 %v4470_v46, %v4467_v57  ;;  %10754 = vmatprep.mubr.msk.bf16.mxu1 %vm13054_vm0, %v13053_v1  ;;  %v4772_v15 = vsel %vm536_vm1, %v4767_v17, %v4771_v9  ;;  %v4775_v8 = vor.u32 %v4773_v13, %v4771_v9 }
 0x6b0   : > { %v4486_v18 = vpack.c.bf16 %v4484_v27, %v4483_v39  ;;  %v4485_v25 = vmax.f32 %v4482_v47, 0.0 }
 0x6b1   : > { %v4472_v32 = vsel %vm4169_vm7, %v4463_v49, %v4471_v4  ;;  %v4065_v43 = vpop.f32.mrb[60].mxu0  ;;  %v14638_v19 = vld [vmem:[#allocation2 + $0x68] sm:$0xff] }
 0x6b2   : > { %4476 = vst [vmem:[#allocation2 + $0x70] sm:$0x1f] %v4472_v32  ;;  %v4489_v51 = vshrl.u32 %v4486_v18, 16  ;;  %v4492_v6 = vshll.u32 %v4486_v18, 16  ;;  %v4487_v55 = vpack.c.bf16 %v4485_v25, %v4485_v25  ;;  %v4505_v53 = vmul.f32 %v14482_v44, %v4065_v43  ;;  %v10672_v28 = vpop.f32.mrb[61].mxu0 }
 0x6b3   : > { %v4068_v50 = vpop.f32.mrb[62].mxu0  ;;  %v4777_v61 = vshll.u32 %v14638_v19, 16 }
 0x6b4   : > { %v4491_v14 = vrot.slane %v4489_v51, 2  ;;  %v4494_v29 = vrot.slane %v4492_v6, 3  ;;  %v4497_v63 = vshll.u32 %v4487_v55, 16  ;;  %v4507_v34 = vadd.f32 %v14490_v33, %v4505_v53  ;;  %v10673_v23 = vpop.f32.mrb[63].mxu0 }
 0x6b5   : > { %v4506_v40 = vmul.f32 %v14482_v44, %v4068_v50  ;;  %v4779_v12 = vrot.slane %v4777_v61, 1  ;;  %v4781_v51 = vshrl.u32 %v14638_v19, 16 }
 0x6b6   : > { %v4495_v35 = vor.u32 %v4494_v29, %v4491_v14  ;;  %v4499_v20 = vrot.slane %v4497_v63, 3  ;;  %v4509_v26 = vmax.f32 %v4507_v34, 0.0  ;;  %10755 = vmatmul.mubr.bf16.gmra.mrb[44].mxu1 %v4772_v15 }
 0x6b7   : > { %v4508_v49 = vadd.f32 %v14490_v33, %v4506_v40  ;;  %10758 = vmatprep.mubr.msk.bf16.mxu1 %vm13054_vm0, %v13053_v1  ;;  %v4780_v22 = vsel %vm536_vm1, %v4775_v8, %v4779_v12  ;;  %v4783_v29 = vor.u32 %v4781_v51, %v4779_v12 }
 0x6b8   : > { %4503 = vst [vmem:[#allocation2 + $0x70] sm:$0xc0] %v4495_v35  ;;  %v4500_v54 = vsel %vm3291_vm5, %v4495_v35, %v4499_v20  ;;  %v4511_v21 = vpack.c.bf16 %v4509_v26, %v4485_v25 }
 0x6b9   : > { %4504 = vst [vmem:[#allocation2 + $0x78] sm:$0x3f] %v4500_v54  ;;  %v4510_v10 = vmax.f32 %v4508_v49, 0.0  ;;  %v4073_v5 = vpop.f32.mrb[64].mxu0 }
 0x6ba   : > { %v4514_v52 = vshrl.u32 %v4511_v21, 16  ;;  %v4517_v58 = vshll.u32 %v4511_v21, 16  ;;  %v4534_v60 = vmul.f32 %v14482_v44, %v4073_v5  ;;  %v10676_v0 = vpop.f32.mrb[65].mxu0 }
 0x6bb   : > { %v4512_v45 = vpack.c.bf16 %v4510_v10, %v4510_v10  ;;  %v4076_v30 = vpop.f32.mrb[66].mxu0 }
 0x6bc   : > { %v4516_v2 = vrot.slane %v4514_v52, 2  ;;  %v4519_v3 = vrot.slane %v4517_v58, 3  ;;  %v4536_v56 = vadd.f32 %v14490_v33, %v4534_v60  ;;  %v4535_v57 = vmul.f32 %v14482_v44, %v4076_v30  ;;  %v10677_v46 = vpop.f32.mrb[67].mxu0 }
 0x6bd   : > { %v4522_v62 = vshrl.u32 %v4512_v45, 16  ;;  %v4525_v42 = vshll.u32 %v4512_v45, 16 }
 0x6be   : > { %v4520_v39 = vor.u32 %v4519_v3, %v4516_v2  ;;  %v4538_v27 = vmax.f32 %v4536_v56, 0.0  ;;  %v4537_v47 = vadd.f32 %v14490_v33, %v4535_v57  ;;  %10759 = vmatmul.mubr.bf16.gmra.mrb[48].mxu1 %v4780_v22  ;;  %v13004_v22 = vld [vmem:[%s16027_s4] ss:$0 sm:$0xff] }
 0x6bf   : > { %v4524_v37 = vrot.slane %v4522_v62, 2  ;;  %v4527_v4 = vrot.slane %v4525_v42, 3  ;;  %10762 = vmatprep.mubr.msk.bf16.mxu1 %vm13054_vm0, %v13053_v1  ;;  %v14656_v18 = vld [vmem:[#allocation2 + $0x70] sm:$0xff] }
 0x6c0   : > { %4532 = vst [vmem:[#allocation2 + $0x78] sm:$0x80] %v4520_v39  ;;  %v4540_v25 = vpack.c.bf16 %v4538_v27, %v4510_v10  ;;  %v4539_v32 = vmax.f32 %v4537_v47, 0.0  ;;  %v4785_v43 = vshll.u32 %v14656_v18, 16  ;;  %v4789_v52 = vshrl.u32 %v14656_v18, 16 }
 0x6c1   : > { %v4528_v41 = vor.u32 %v4527_v4, %v4524_v37  ;;  %v4081_v9 = vpop.f32.mrb[68].mxu0 }
 0x6c2   : > { %v4543_v6 = vshrl.u32 %v4540_v25, 16  ;;  %v4546_v55 = vshll.u32 %v4540_v25, 16  ;;  %v4541_v53 = vpack.c.bf16 %v4539_v32, %v4539_v32  ;;  %v4561_v28 = vmul.f32 %v14482_v44, %v4081_v9  ;;  %v10680_v50 = vpop.f32.mrb[69].mxu0 }
 0x6c3   : > { %v4529_v17 = vsel %vm3291_vm5, %v4520_v39, %v4528_v41  ;;  %v4084_v14 = vpop.f32.mrb[70].mxu0  ;;  %v4787_v63 = vrot.slane %v4785_v43, 1 }
 0x6c4   : > { %4533 = vst [vmem:[#allocation2 + $0x80] sm:$0x7f] %v4529_v17  ;;  %v4545_v34 = vrot.slane %v4543_v6, 2  ;;  %v4548_v23 = vrot.slane %v4546_v55, 3  ;;  %v4551_v40 = vshrl.u32 %v4541_v53, 16  ;;  %v4554_v15 = vshll.u32 %v4541_v53, 16 }
 0x6c5   : > { %v10681_v61 = vpop.f32.mrb[71].mxu0  ;;  %v4563_v35 = vadd.f32 %v14490_v33, %v4561_v28  ;;  %v4562_v20 = vmul.f32 %v14482_v44, %v4084_v14  ;;  %v4788_v26 = vsel %vm536_vm1, %v4783_v29, %v4787_v63  ;;  %v4791_v2 = vor.u32 %v4789_v52, %v4787_v63 }
 0x6c6   : > { %v4553_v49 = vrot.slane %v4551_v40, 2  ;;  %v4556_v54 = vrot.slane %v4554_v15, 3  ;;  %10763 = vmatmul.mubr.bf16.gmra.mrb[52].mxu1 %v4788_v26  ;;  %v4549_v13 = vor.u32 %v4548_v23, %v4545_v34 }
 0x6c7   : > { %v4565_v21 = vmax.f32 %v4563_v35, 0.0  ;;  %v4564_v10 = vadd.f32 %v14490_v33, %v4562_v20  ;;  %10766 = vmatprep.mubr.msk.bf16.mxu1 %vm13054_vm0, %v13053_v1  ;;  %v14668_v5 = vld [vmem:[#allocation2 + $0x78] sm:$0xff] }
 0x6c8   : > { %v4557_v12 = vor.u32 %v4556_v54, %v4553_v49  ;;  %v4793_v58 = vshll.u32 %v14668_v5, 16  ;;  %v4797_v55 = vshrl.u32 %v14668_v5, 16 }
 0x6c9   : > { %v4567_v60 = vpack.c.bf16 %v4565_v21, %v4539_v32  ;;  %v4566_v0 = vmax.f32 %v4564_v10, 0.0  ;;  %v4089_v45 = vpop.f32.mrb[72].mxu0 }
 0x6ca   : > { %v14673_v30 = vsel %vm3291_vm5, %v4549_v13, %v4557_v12  ;;  %v4590_v8 = vmul.f32 %v14482_v44, %v4089_v45  ;;  %v10684_v33 = vpop.f32.mrb[73].mxu0  ;;  %v4795_v3 = vrot.slane %v4793_v58, 1  ;;  %v13005_v44 = vld [vmem:[%s16026_s3] ss:$0 sm:$0xff] }
 0x6cb   : > { %4560 = vst [vmem:[#allocation2 + $0x88] sm:$0xff] %v14673_v30  ;;  %v4570_v56 = vshrl.u32 %v4567_v60, 16  ;;  %v4573_v57 = vshll.u32 %v4567_v60, 16  ;;  %v4568_v46 = vpack.c.bf16 %v4566_v0, %v4566_v0  ;;  %v4092_v62 = vpop.f32.mrb[74].mxu0  ;;  %v14677_v42 = vld [vmem:[#allocation2 + $0x80] sm:$0xff]  ;;  %v4809_v52 = vshll.u32 %v14673_v30, 16 }
 0x6cc   : > { %v4593_v39 = vadd.f32 %v13004_v22, %v4590_v8  ;;  %v4591_v27 = vmul.f32 %v13005_v44, %v4092_v62  ;;  %v10685_v47 = vpop.f32.mrb[75].mxu0  ;;  %v4796_v37 = vsel %vm536_vm1, %v4791_v2, %v4795_v3  ;;  %v4801_v9 = vshll.u32 %v14677_v42, 16 }
 0x6cd   : > { %v4572_v4 = vrot.slane %v4570_v56, 2  ;;  %v4575_v25 = vrot.slane %v4573_v57, 3  ;;  %v4578_v32 = vshrl.u32 %v4568_v46, 16  ;;  %v4581_v43 = vshll.u32 %v4568_v46, 16 }
 0x6ce   : > { %v4594_v41 = vadd.f32 %v13004_v22, %v4591_v27  ;;  %10767 = vmatmul.mubr.bf16.gmra.mrb[56].mxu1 %v4796_v37  ;;  %v4596_v53 = vmax.f32 %v4593_v39, 0.0  ;;  %v4799_v29 = vor.u32 %v4797_v55, %v4795_v3  ;;  %v4803_v63 = vrot.slane %v4801_v9, 1 }
 0x6cf   : > { %v4580_v51 = vrot.slane %v4578_v32, 2  ;;  %v4583_v6 = vrot.slane %v4581_v43, 3  ;;  %10770 = vmatprep.mubr.msk.bf16.mxu1 %vm13054_vm0, %v13053_v1  ;;  %v4576_v50 = vor.u32 %v4575_v25, %v4572_v4  ;;  %v4805_v12 = vshrl.u32 %v14677_v42, 16 }
 0x6d0   : > { %v4597_v28 = vmax.f32 %v4594_v41, 0.0  ;;  %v4804_v54 = vsel %vm536_vm1, %v4799_v29, %v4803_v63  ;;  %v4811_v2 = vrot.slane %v4809_v52, 1  ;;  %v14725_v29 = vld [vmem:[#allocation2 + $0x68] sm:$0xff] }
 0x6d1   : > { %v4584_v17 = vor.u32 %v4583_v6, %v4580_v51  ;;  %v4097_v14 = vpop.f32.mrb[76].mxu0  ;;  %v4807_v0 = vor.u32 %v4805_v12, %v4803_v63 }
 0x6d2   : > { %v4599_v34 = vpack.c.bf16 %v4597_v28, %v4596_v53  ;;  %v4592_v23 = vmul.f32 %v13005_v44, %v4097_v14  ;;  %v10688_v40 = vpop.f32.mrb[77].mxu0  ;;  %v4813_v44 = vshrl.u32 %v14673_v30, 16  ;;  %v14723_v14 = vld [vmem:[#allocation2 + $0x60] sm:$0xff] }
 0x6d3   : > { %v4585_v15 = vsel %vm3291_vm5, %v4576_v50, %v4584_v17  ;;  %4589 = vst [vmem:[#allocation2 + $0x98] sm:$0x1] %v4584_v17  ;;  %v4100_v61 = vpop.f32.mrb[78].mxu0  ;;  %v4812_v62 = vsel %vm536_vm1, %v4807_v0, %v4811_v2  ;;  %v14721_v17 = vld [vmem:[#allocation2 + $0x58] sm:$0xff] }
 0x6d4   : > { %4588 = vst [vmem:[#allocation2 + $0x90] sm:$0xfe] %v4585_v15  ;;  %v4602_v35 = vshrl.u32 %v4599_v34, 16  ;;  %v4605_v20 = vshll.u32 %v4599_v34, 16  ;;  %v4595_v26 = vadd.f32 %v13004_v22, %v4592_v23  ;;  %v10689_v49 = vpop.f32.mrb[79].mxu0  ;;  %v4815_v37 = vor.u32 %v4813_v44, %v4811_v2  ;;  %v14732_v15 = vld [vmem:[#allocation2 + $0x70] sm:$0xff] }
 0x6d5   : > { %v7505_v23 = vshrl.u32 %v14721_v17, 16  ;;  %v7508_v40 = vshll.u32 %v14721_v17, 16  ;;  %v7514_v61 = vshrl.u32 %v14723_v14, 16 }
 0x6d6   : > { %v4604_v21 = vrot.slane %v4602_v35, 6  ;;  %v4607_v10 = vrot.slane %v4605_v20, 7  ;;  %v4598_v13 = vmax.f32 %v4595_v26, 0.0  ;;  %10771 = vmatmul.mubr.bf16.gmra.mrb[60].mxu1 %v4804_v54  ;;  %v7517_v35 = vshll.u32 %v14723_v14, 16  ;;  %v14736_v26 = vld [vmem:[#allocation2 + $0x78] sm:$0xff] }
 0x6d7   : > { %10774 = vmatprep.mubr.msk.bf16.mxu1 %vm13054_vm0, %v13053_v1  ;;  %v7507_v49 = vrot.slane %v7505_v23, 2  ;;  %v7510_v54 = vrot.slane %v7508_v40, 3  ;;  %v7516_v12 = vrot.slane %v7514_v61, 2 }
 0x6d8   : > { %v4608_v58 = vor.u32 %v4607_v10, %v4604_v21  ;;  %v4600_v60 = vpack.c.bf16 %v4598_v13, %v4598_v13  ;;  %v7523_v21 = vshrl.u32 %v14725_v29, 16  ;;  %v14740_v13 = vld [vmem:[#allocation2 + $0x80] sm:$0xff]  ;;  %v7519_v52 = vrot.slane %v7517_v35, 3 }
 0x6d9   : > { %v4104_v45 = vpop.f32.mrb[144].mxu0 }
 0x6da   : > { %4616 = vst [vmem:[#allocation2 + $0x98] sm:$0xfc] %v4608_v58  ;;  %v4610_v8 = vshll.u32 %v4600_v60, 16  ;;  %v10692_v33 = vpop.f32.mrb[145].mxu0  ;;  %v14743_v60 = vor.u32 %v7510_v54, %v7507_v49  ;;  %v7525_v0 = vrot.slane %v7523_v21, 2  ;;  %v7532_v45 = vshrl.u32 %v14732_v15, 16 }
 0x6db   : > { %v14696_v3 = vld [vmem:[#allocation2 + $0x90] sm:$0xff]  ;;  %v4106_v56 = vpop.f32.mrb[146].mxu0  ;;  %v14749_v33 = vld [vmem:[#allocation2 + $0x88] sm:$0xff]  ;;  %v7520_v2 = vor.u32 %v7519_v52, %v7516_v12  ;;  %v14781_v52 = vld [vmem:[#allocation2] sm:$0xff] }
 0x6dc   : > { %v4612_v57 = vrot.slane %v4610_v8, 7  ;;  %v10693_v46 = vpop.f32.mrb[147].mxu0  ;;  %v4817_v22 = vshll.u32 %v14696_v3, 16  ;;  %v4821_v32 = vshrl.u32 %v14696_v3, 16  ;;  %v7535_v8 = vshll.u32 %v14732_v15, 16 }
 0x6dd   : > { %v7544_v46 = vshll.u32 %v14736_v26, 16 }
 0x6de   : > { %v4613_v39 = vsel %vm4169_vm7, %v4608_v58, %v4612_v57  ;;  %10775 = vmatmul.mubr.bf16.gmra.mrb[64].mxu1 %v4812_v62  ;;  %v4819_v27 = vrot.slane %v4817_v22, 1  ;;  %v7526_v58 = vshll.u32 %v14725_v29, 16  ;;  %v7541_v57 = vshrl.u32 %v14736_v26, 16  ;;  %v14754_v22 = vld [vmem:[#allocation2 + $0x90] sm:$0xff] }
 0x6df   : > { %4617 = vst [vmem:[#allocation2 + $0xa0] sm:$0x3] %v4613_v39  ;;  %10778 = vmatprep.mubr.msk.bf16.mxu1 %vm13054_vm0, %v13053_v1  ;;  %v7534_v39 = vrot.slane %v7532_v45, 2  ;;  %v7537_v44 = vrot.slane %v7535_v8, 3  ;;  %v7568_v23 = vshrl.u32 %v14754_v22, 16 }
 0x6e0   : > { %v4820_v4 = vsel %vm536_vm1, %v4815_v37, %v4819_v27  ;;  %v4823_v9 = vor.u32 %v4821_v32, %v4819_v27  ;;  %v7528_v56 = vrot.slane %v7526_v58, 3  ;;  %v7550_v27 = vshrl.u32 %v14740_v13, 16 }
 0x6e1   : > { %v14704_v47 = vld [vmem:[#allocation2 + $0x98] sm:$0xff]  ;;  %v14759_v37 = vsel %vm3291_vm5, %v14743_v60, %v7520_v2  ;;  %v7546_v32 = vrot.slane %v7544_v46, 3  ;;  %v7570_v21 = vrot.slane %v7568_v23, 2  ;;  %v7955_v23 = vrot.slane %v14725_v29, 3 }
 0x6e2   : > { %v4825_v25 = vshll.u32 %v14704_v47, 16  ;;  %v4829_v55 = vshrl.u32 %v14704_v47, 16  ;;  %v7961_v29 = vrot.slane %v14740_v13, 3 }
 0x6e4   : > { %v4827_v43 = vrot.slane %v4825_v25, 1  ;;  %v7543_v25 = vrot.slane %v7541_v57, 2 }
 0x6e6   : > { %10779 = vmatmul.mubr.bf16.gmra.mrb[68].mxu1 %v4820_v4  ;;  %v14711_v41 = vld [vmem:[#allocation2 + $0xa0] sm:$0x1f]  ;;  %v4828_v51 = vsel %vm536_vm1, %v4823_v9, %v4827_v43  ;;  %v4831_v28 = vor.u32 %v4829_v55, %v4827_v43  ;;  %v7529_v4 = vor.u32 %v7528_v56, %v7525_v0  ;;  %v14761_v43 = vld [vmem:[#allocation2 + $0x98] sm:$0xff]  ;;  %v7538_v9 = vor.u32 %v7537_v44, %v7534_v39 }
 0x6e7   : > { %10782 = vmatprep.mubr.msk.bf16.mxu1 %vm13054_vm0, %v13053_v1  ;;  %v4833_v6 = vshll.u32 %v14711_v41, 16  ;;  %v4837_v63 = vshrl.u32 %v14711_v41, 16  ;;  %v14728_v34 = vld [vmem:[#allocation2 + $0xa0] sm:$0xff]  ;;  %v7559_v55 = vshrl.u32 %v14749_v33, 16  ;;  %v7577_v12 = vshrl.u32 %v14761_v43, 16 }
 0x6e8   : > { %v6322_v10 = vshrl.u32 %v14728_v34, 16  ;;  %v6325_v62 = vshll.u32 %v14728_v34, 16  ;;  %v14774_v40 = vsel %vm3291_vm5, %v7529_v4, %v7538_v9  ;;  %v7580_v45 = vshll.u32 %v14761_v43, 16 }
 0x6e9   : > { %v4835_v53 = vrot.slane %v4833_v6, 1  ;;  %v7553_v6 = vshll.u32 %v14740_v13, 16  ;;  %v7561_v35 = vrot.slane %v7559_v55, 2  ;;  %v7579_v57 = vrot.slane %v7577_v12, 2  ;;  %v12931_v12 = vld [vmem:[%s16025_s2 + $0xa0] sm:$0xff]  }
 0x6ea   : > { %v7588_v8 = vrot.slane %v6322_v10, 2  ;;  %v7591_v46 = vrot.slane %v6325_v62, 3 }
 0x6eb   : > { %v4836_v50 = vsel %vm536_vm1, %v4831_v28, %v4835_v53  ;;  %v4839_v20 = vor.u32 %v4837_v63, %v4835_v53  ;;  %v12927_v53 = vld [vmem:[%s16025_s2 + $0x80] sm:$0xff]   ;;  %v14769_v28 = vsel %vm3291_vm5, %v7520_v2, %v7529_v4  ;;  %v7562_v63 = vshll.u32 %v14749_v33, 16  ;;  %v12928_v2 = vld [vmem:[%s16025_s2 + $0x88] sm:$0xff]  }
 0x6ec   : > { %v7555_v61 = vrot.slane %v7553_v6, 3 }
 0x6ed   : > { %v7564_v54 = vrot.slane %v7562_v63, 3  ;;  %v7953_v63 = vrot.slane %v14723_v14, 3 }
 0x6ee   : > { %10783 = vmatmul.mubr.bf16.gmra.mrb[72].mxu1 %v4828_v51  ;;  %v7552_v51 = vrot.slane %v7550_v27, 2  ;;  %v7582_v27 = vrot.slane %v7580_v45, 3 }
 0x6ef   : > { %10786 = vmatprep.mubr.msk.bf16.mxu1 %vm13054_vm0, %v13053_v1  ;;  %v7565_v56 = vor.u32 %v7564_v54, %v7561_v35  ;;  %v7959_v35 = vrot.slane %v14736_v26, 3  ;;  %v14835_v54 = vsel %vm3802_vm6, %v7953_v63, %v7955_v23  ;;  %v7965_v26 = vrot.slane %v14754_v22, 3 }
 0x6f0   : > { %v7556_v58 = vor.u32 %v7555_v61, %v7552_v51  ;;  %v12929_v51 = vld [vmem:[%s16025_s2 + $0x90] sm:$0xff]   ;;  %v7957_v61 = vrot.slane %v14732_v15, 3  ;;  %v7963_v15 = vrot.slane %v14749_v33, 3 }
 0x6f2   : > { %v14799_v4 = vsel %vm3291_vm5, %v7556_v58, %v7565_v56  ;;  %v14841_v14 = vsel %vm3802_vm6, %v7957_v61, %v7959_v35  ;;  %v14855_v45 = vsel %vm3802_vm6, %v7961_v29, %v7963_v15  ;;  %v14858_v13 = vsel %vm3802_vm6, %v7963_v15, %v7965_v26 }
 0x6f6   : > { %10787 = vmatmul.mubr.bf16.gmra.mrb[76].mxu1 %v4836_v50  ;;  %v7547_v50 = vor.u32 %v7546_v32, %v7543_v25  ;;  %v14801_v25 = vor.u32 %v7591_v46, %v7588_v8  ;;  %v12932_v8 = vld [vmem:[%s16025_s2 + $0xa8] sm:$0xff]   ;;  %v12934_v46 = vld [vmem:[%s16025_s2 + $0xb8] sm:$0xff]  }
 0x6f7   : > { %10790 = vmatprep.mubr.msk.bf16.mxu1 %vm13054_vm0, %v13053_v1 }
 0x6f8   : > { %v14778_v49 = vsel %vm3291_vm5, %v7538_v9, %v7547_v50  ;;  %v14796_v39 = vsel %vm3291_vm5, %v7547_v50, %v7556_v58  ;;  %v7583_v9 = vor.u32 %v7582_v27, %v7579_v57  ;;  %v16032_v50 = vrot.slane %v14721_v17, 3  ;;  %v14882_v57 = vld [vmem:[#allocation2 + $0x18] sm:$0xff]  ;;  %v14897_v27 = vld [vmem:[#allocation2 + $0x28] sm:$0xff] }
 0x6f9   : > { %v7967_v58 = vrot.slane %v14761_v43, 3  ;;  %v16031_v43 = vrot.slane %v14728_v34, 3 }
 0x6fa   : > { %v14815_v55 = vsel %vm3291_vm5, %v7583_v9, %v14801_v25 }
 0x6fb   : > { %v14861_v33 = vsel %vm3802_vm6, %v7965_v26, %v7967_v58  ;;  %v12940_v26 = vld [vmem:[%s16025_s2 + $0xe8] sm:$0xff]  }
 0x6fe   : > { %10791 = vmatmul.mubr.bf16.gmra.mrb[80].mxu1 %v4839_v20  ;;  %v7571_v20 = vshll.u32 %v14754_v22, 16  ;;  %v14863_v22 = vld [vmem:[#allocation2 + $0x10] sm:$0xff] }
 0x6ff   : > { %10810 = vmatprep.mubr.msk.bf16.mxu1 %vm13054_vm0, %v13053_v1 }
 0x700   : > { %v7573_v0 = vrot.slane %v7571_v20, 3  ;;  %v14832_v20 = vsel %vm3802_vm6, %v16032_v50, %v7953_v63  ;;  %v5391_v63 = vrot.slane %v14863_v22, 1 }
 0x702   : > { %v7574_v44 = vor.u32 %v7573_v0, %v7570_v21  ;;  %v14838_v21 = vsel %vm3802_vm6, %v7955_v23, %v7957_v61  ;;  %v14852_v0 = vsel %vm3802_vm6, %v7959_v35, %v7961_v29  ;;  %v12938_v61 = vld [vmem:[%s16025_s2 + $0xd8] sm:$0xff]   ;;  %v5393_v35 = vrot.slane %v14882_v57, 1  ;;  %v12939_v29 = vld [vmem:[%s16025_s2 + $0xe0] sm:$0xff]  }
 0x704   : > { %v14804_v32 = vsel %vm3291_vm5, %v7565_v56, %v7574_v44  ;;  %v14811_v6 = vsel %vm3291_vm5, %v7574_v44, %v7583_v9  ;;  %v12933_v56 = vld [vmem:[%s16025_s2 + $0xb0] sm:$0xff]   ;;  %v14892_v44 = vld [vmem:[#allocation2 + $0x20] sm:$0xff]  ;;  %v5394_v15 = vsel %vm1252_vm2, %v5391_v63, %v5393_v35 }
 0x706   : > { %10811 = vmatmul.mubr.bf16.vlgmr.msra.gmra.mrb[84].mxu1 %v14781_v52 }
 0x707   : > { %10895 = vmatpush3.bf16.msra.mxu1 %v12927_v53  ;;  %10814 = vmatprep.mubr.msk.bf16.mxu1 %vm13054_vm0, %v13053_v1  ;;  %v12930_v53 = vld [vmem:[%s16025_s2 + $0x98] sm:$0xff]  }
 0x708   : > { %10896 = vmatprep.subr.bf16.mxu1 %v13053_v1 }
 0x70b   : > { %10897 = vmatpush3.bf16.msra.mxu1 %v12928_v2  ;;  %v14876_v2 = vsel %vm3802_vm6, %v7967_v58, %v16031_v43  ;;  %v12941_v58 = vld [vmem:[%s16025_s2 + $0xf0] sm:$0xff]  }
 0x70c   : > { %10898 = vmatprep.subr.bf16.mxu1 %v13053_v1 }
 0x70e   : > { %10815 = vmatmul.mubr.bf16.gmra.mrb[4].mxu1 %v14781_v52 }
 0x70f   : > { %10818 = vmatprep.mubr.msk.bf16.mxu1 %vm13054_vm0, %v13053_v1  ;;  %10899 = vmatpush3.bf16.msra.mxu1 %v12929_v51  ;;  %v12935_v51 = vld [vmem:[%s16025_s2 + $0xc0] sm:$0xff]  }
 0x710   : > { %10900 = vmatprep.subr.bf16.mxu1 %v13053_v1 }
 0x713   : > { %10901 = vmatpush3.bf16.msra.mxu1 %v12930_v53  ;;  %v12936_v53 = vld [vmem:[%s16025_s2 + $0xc8] sm:$0xff]  }
 0x714   : > { %10902 = vmatprep.subr.bf16.mxu1 %v13053_v1 }
 0x716   : > { %10819 = vmatmul.mubr.bf16.gmra.mrb[8].mxu1 %v14863_v22 }
 0x717   : > { %10822 = vmatprep.mubr.msk.bf16.mxu1 %vm13054_vm0, %v13053_v1  ;;  %10903 = vmatpush3.bf16.msra.mxu1 %v12931_v12  ;;  %v5395_v12 = vrot.slane %v14892_v44, 1 }
 0x718   : > { %10904 = vmatprep.subr.bf16.mxu1 %v13053_v1 }
 0x719   : > { %v5396_v22 = vsel %vm1252_vm2, %v5393_v35, %v5395_v12  ;;  %v13013_v35 = vld [vmem:[#allocation2 + $0x40] sm:$0xff] }
 0x71b   : > { %10905 = vmatpush3.bf16.msra.mxu1 %v12932_v8  ;;  %v12942_v8 = vld [vmem:[%s16025_s2 + $0xf8] sm:$0xff]  }
 0x71c   : > { %10906 = vmatprep.subr.bf16.mxu1 %v13053_v1 }
 0x71e   : > { %10823 = vmatmul.mubr.bf16.gmra.mrb[12].mxu1 %v14882_v57 }
 0x71f   : > { %10826 = vmatprep.mubr.msk.bf16.mxu1 %vm13054_vm0, %v13053_v1  ;;  %10907 = vmatpush3.bf16.msra.mxu1 %v12933_v56  ;;  %v5397_v56 = vrot.slane %v14897_v27, 1 }
 0x720   : > { %10908 = vmatprep.subr.bf16.mxu1 %v13053_v1 }
 0x721   : > { %v5398_v57 = vsel %vm1252_vm2, %v5395_v12, %v5397_v56 }
 0x723   : > { %10909 = vmatpush3.bf16.msra.mxu1 %v12934_v46 }
 0x724   : > { %10994 = vmatprep.subr.bf16.mxu1 %v13053_v1 }
 0x726   : > { %10827 = vmatmul.mubr.bf16.gmra.mrb[16].mxu1 %v14892_v44  ;;  %v13011_v44 = vld [vmem:[#allocation2 + $0x30] sm:$0xff] }
 0x727   : > { %10830 = vmatprep.mubr.msk.bf16.mxu1 %vm13054_vm0, %v13053_v1 }
 0x72e   : > { %10831 = vmatmul.mubr.bf16.gmra.mrb[20].mxu1 %v14897_v27 }
 0x72f   : > { %10834 = vmatprep.mubr.msk.bf16.mxu1 %vm13054_vm0, %v13053_v1 }
 0x736   : > { %10835 = vmatmul.mubr.bf16.gmra.mrb[24].mxu1 %v14561_v48  ;;  %v5349_v48 = vld [vmem:[#allocation2] sm:$0xfe] }
 0x737   : > { %10838 = vmatprep.mubr.msk.bf16.mxu1 %vm13054_vm0, %v13053_v1 }
 0x73e   : > { %10839 = vmatmul.mubr.bf16.gmra.mrb[28].mxu1 %v14569_v38  ;;  %v5388_v38 = vrot.slane %v5349_v48, 1  ;;  %v5399_v48 = vrot.slane %v13011_v44, 1 }
 0x73f   : > { %10842 = vmatprep.mubr.msk.bf16.mxu1 %vm13054_vm0, %v13053_v1 }
 0x746   : > { %10843 = vmatmul.mubr.bf16.gmra.mrb[32].mxu1 %v14565_v59  ;;  %v4638_v59 = vld [vmem:[#allocation2 + $0xa0] sm:$0xf] }
 0x747   : > { %10846 = vmatprep.mubr.msk.bf16.mxu1 %vm13054_vm0, %v13053_v1 }
 0x74e   : > { %10847 = vmatmul.mubr.bf16.gmra.mrb[36].mxu1 %v14590_v11  ;;  %v5389_v11 = vrot.slane %v14781_v52, 1  ;;  %v12937_v52 = vld [vmem:[%s16025_s2 + $0xd0] sm:$0xff]  }
 0x74f   : > { %10850 = vmatprep.mubr.msk.bf16.mxu1 %vm13054_vm0, %v13053_v1 }
 0x750   : > { %v5390_v9 = vsel %vm1252_vm2, %v5388_v38, %v5389_v11  ;;  %v5392_v23 = vsel %vm1252_vm2, %v5389_v11, %v5391_v63 }
 0x756   : > { %10851 = vmatmul.mubr.bf16.gmra.mrb[40].mxu1 %v14602_v16 }
 0x757   : > { %10854 = vmatprep.mubr.msk.bf16.mxu1 %vm13054_vm0, %v13053_v1 }
 0x75e   : > { %10855 = vmatmul.mubr.bf16.gmra.mrb[44].mxu1 %v14614_v7 }
 0x75f   : > { %10858 = vmatprep.mubr.msk.bf16.mxu1 %vm13054_vm0, %v13053_v1 }
 0x766   : > { %10859 = vmatmul.mubr.bf16.gmra.mrb[48].mxu1 %v14626_v24 }
 0x767   : > { %10862 = vmatprep.mubr.msk.bf16.mxu1 %vm13054_vm0, %v13053_v1 }
 0x76e   : > { %10863 = vmatmul.mubr.bf16.gmra.mrb[52].mxu1 %v14638_v19 }
 0x76f   : > { %10866 = vmatprep.mubr.msk.bf16.mxu1 %vm13054_vm0, %v13053_v1 }
 0x776   : > { %10867 = vmatmul.mubr.bf16.gmra.mrb[56].mxu1 %v14656_v18 }
 0x777   : > { %10870 = vmatprep.mubr.msk.bf16.mxu1 %vm13054_vm0, %v13053_v1 }
 0x77e   : > { %10871 = vmatmul.mubr.bf16.gmra.mrb[60].mxu1 %v14668_v5 }
 0x77f   : > { %10874 = vmatprep.mubr.msk.bf16.mxu1 %vm13054_vm0, %v13053_v1 }
 0x786   : > { %10875 = vmatmul.mubr.bf16.gmra.mrb[64].mxu1 %v14677_v42 }
 0x787   : > { %10878 = vmatprep.mubr.msk.bf16.mxu1 %vm13054_vm0, %v13053_v1 }
 0x78e   : > { %10879 = vmatmul.mubr.bf16.gmra.mrb[68].mxu1 %v14673_v30 }
 0x78f   : > { %10882 = vmatprep.mubr.msk.bf16.mxu1 %vm13054_vm0, %v13053_v1 }
 0x796   : > { %10883 = vmatmul.mubr.bf16.gmra.mrb[72].mxu1 %v14696_v3 }
 0x797   : > { %10886 = vmatprep.mubr.msk.bf16.mxu1 %vm13054_vm0, %v13053_v1 }
 0x79e   : > { %10887 = vmatmul.mubr.bf16.gmra.mrb[76].mxu1 %v14704_v47 }
 0x79f   : > { %10890 = vmatprep.mubr.msk.bf16.mxu1 %vm13054_vm0, %v13053_v1 }
 0x7a6   : > { %10891 = vmatmul.mubr.bf16.gmra.mrb[88].mxu1 %v4638_v59 }
 0x7a7   : > { %10910 = vmatprep.mubr.msk.bf16.mxu1 %vm13054_vm0, %v13053_v1 }
 0x7ae   : > { %10911 = vmatmul.mubr.bf16.vlgmr.msra.gmra.mrb[92].mxu1 %v5390_v9  ;;  %v5400_v9 = vsel %vm1252_vm2, %v5397_v56, %v5399_v48  ;;  %v15015_v56 = vrot.slane %v14614_v7, 1  ;;  %v5413_v7 = vrot.slane %v14638_v19, 1  ;;  %v5417_v19 = vrot.slane %v14668_v5, 1 }
 0x7af   : > { %10995 = vmatpush3.bf16.msra.mxu1 %v12935_v51  ;;  %10914 = vmatprep.mubr.msk.bf16.mxu1 %vm13054_vm0, %v13053_v1  ;;  %v13012_v51 = vld [vmem:[#allocation2 + $0x38] sm:$0xff]  ;;  %v5421_v5 = vrot.slane %v14673_v30, 1  ;;  %v15072_v30 = vrot.slane %v14704_v47, 1  ;;  %v13015_v47 = vld [vmem:[#allocation2 + $0x8] sm:$0xfe] }
 0x7b0   : > { %10996 = vmatprep.subr.bf16.mxu1 %v13053_v1 }
 0x7b3   : > { %10997 = vmatpush3.bf16.msra.mxu1 %v12936_v53  ;;  %v5401_v53 = vrot.slane %v13012_v51, 1 }
 0x7b4   : > { %10998 = vmatprep.subr.bf16.mxu1 %v13053_v1 }
 0x7b6   : > { %10915 = vmatmul.mubr.bf16.gmra.mrb[4].mxu1 %v5392_v23 }
 0x7b7   : > { %10918 = vmatprep.mubr.msk.bf16.mxu1 %vm13054_vm0, %v13053_v1  ;;  %10999 = vmatpush3.bf16.msra.mxu1 %v12937_v52 }
 0x7b8   : > { %11000 = vmatprep.subr.bf16.mxu1 %v13053_v1 }
 0x7bb   : > { %11001 = vmatpush3.bf16.msra.mxu1 %v12938_v61  ;;  %v5402_v61 = vsel %vm1252_vm2, %v5399_v48, %v5401_v53 }
 0x7bc   : > { %11002 = vmatprep.subr.bf16.mxu1 %v13053_v1 }
 0x7be   : > { %10919 = vmatmul.mubr.bf16.gmra.mrb[8].mxu1 %v5394_v15 }
 0x7bf   : > { %10922 = vmatprep.mubr.msk.bf16.mxu1 %vm13054_vm0, %v13053_v1  ;;  %11003 = vmatpush3.bf16.msra.mxu1 %v12939_v29  ;;  %v5403_v29 = vrot.slane %v13013_v35, 1  ;;  %v12944_v35 = vld [vmem:[%s16025_s2 + $0x108] sm:$0xff]  }
 0x7c0   : > { %11004 = vmatprep.subr.bf16.mxu1 %v13053_v1 }
 0x7c1   : > { %v5404_v15 = vsel %vm1252_vm2, %v5401_v53, %v5403_v29  ;;  %v5790_v53 = vrot.slane %v13015_v47, 1  ;;  %v15148_v47 = vld [vmem:[#allocation2 + $0x38] sm:$0xff] }
 0x7c3   : > { %11005 = vmatpush3.bf16.msra.mxu1 %v12940_v26  ;;  %v13014_v26 = vld [vmem:[#allocation2 + $0x48] sm:$0xff] }
 0x7c4   : > { %11006 = vmatprep.subr.bf16.mxu1 %v13053_v1  ;;  %v5405_v12 = vrot.slane %v13014_v26, 1 }
 0x7c6   : > { %10923 = vmatmul.mubr.bf16.gmra.mrb[12].mxu1 %v5396_v22  ;;  %v5407_v22 = vrot.slane %v14602_v16, 1 }
 0x7c7   : > { %10926 = vmatprep.mubr.msk.bf16.mxu1 %vm13054_vm0, %v13053_v1  ;;  %11007 = vmatpush3.bf16.msra.mxu1 %v12941_v58  ;;  %v5406_v58 = vsel %vm1252_vm2, %v5403_v29, %v5405_v12 }
 0x7c8   : > { %11008 = vmatprep.subr.bf16.mxu1 %v13053_v1 }
 0x7cb   : > { %11009 = vmatpush3.bf16.msra.mxu1 %v12942_v8  ;;  %v5408_v8 = vsel %vm1252_vm2, %v5405_v12, %v5407_v22  ;;  %v15109_v12 = vld [vmem:[#allocation2 + $0x20] sm:$0xff] }
 0x7cc   : > { %11094 = vmatprep.subr.bf16.mxu1 %v13053_v1 }
 0x7ce   : > { %10927 = vmatmul.mubr.bf16.gmra.mrb[16].mxu1 %v5398_v57  ;;  %v5410_v57 = vsel %vm1252_vm2, %v5407_v22, %v15015_v56  ;;  %v5795_v22 = vrot.slane %v15109_v12, 1 }
 0x7cf   : > { %10930 = vmatprep.mubr.msk.bf16.mxu1 %vm13054_vm0, %v13053_v1 }
 0x7d1   : > { %v5100_v46 = vpop.f32.mrb[80].mxu1 }
 0x7d2   : > { %v10792_v59 = vpop.f32.mrb[81].mxu1  ;;  %v5411_v46 = vrot.slane %v14626_v24, 1  ;;  %v5415_v24 = vrot.slane %v14656_v18, 1  ;;  %v5419_v18 = vrot.slane %v14677_v42, 1  ;;  %v5423_v42 = vrot.slane %v14696_v3, 1 }
 0x7d3   : > { %v5102_v38 = vpop.f32.mrb[82].mxu1  ;;  %v5427_v3 = vrot.slane %v14711_v41, 1  ;;  %v12943_v41 = vld [vmem:[%s16025_s2 + $0x100] sm:$0xff]  }
 0x7d4   : > { %v10793_v11 = vpop.f32.mrb[83].mxu1  ;;  %v15024_v16 = vsel %vm1252_vm2, %v15015_v56, %v5411_v46  ;;  %v15031_v44 = vsel %vm1252_vm2, %v5411_v46, %v5413_v7  ;;  %v15038_v48 = vsel %vm1252_vm2, %v5413_v7, %v5415_v24  ;;  %v15045_v59 = vsel %vm1252_vm2, %v5415_v24, %v5417_v19  ;;  %v15123_v46 = vld [vmem:[#allocation2 + $0x28] sm:$0xff] }
 0x7d5   : > { %v15052_v38 = vsel %vm1252_vm2, %v5417_v19, %v5419_v18  ;;  %v15059_v11 = vsel %vm1252_vm2, %v5419_v18, %v5421_v5  ;;  %v5428_v51 = vsel %vm1252_vm2, %v15072_v30, %v5427_v3  ;;  %v12948_v7 = vld [vmem:[%s16025_s2 + $0x128] sm:$0xff]   ;;  %v5797_v24 = vrot.slane %v15123_v46, 1  ;;  %v12949_v19 = vld [vmem:[%s16025_s2 + $0x130] sm:$0xff]  }
 0x7d6   : > { %10931 = vmatmul.mubr.bf16.gmra.mrb[20].mxu1 %v5400_v9  ;;  %v15066_v9 = vsel %vm1252_vm2, %v5421_v5, %v5423_v42  ;;  %v15137_v5 = vld [vmem:[#allocation2 + $0x30] sm:$0xff] }
 0x7d7   : > { %10934 = vmatprep.mubr.msk.bf16.mxu1 %vm13054_vm0, %v13053_v1  ;;  %v5798_v18 = vsel %vm1252_vm2, %v5795_v22, %v5797_v24 }
 0x7d9   : > { %v5187_v27 = vpop.f32.mrb[84].mxu1 }
 0x7da   : > { %v10812_v63 = vpop.f32.mrb[85].mxu1  ;;  %v15076_v27 = vsel %vm1252_vm2, %v5423_v42, %v15072_v30  ;;  %v12950_v42 = vld [vmem:[%s16025_s2 + $0x138] sm:$0xff]  }
 0x7db   : > { %v5189_v52 = vpop.f32.mrb[86].mxu1  ;;  %v15088_v63 = vld [vmem:[#allocation2 + $0x10] sm:$0xff] }
 0x7dc   : > { %v10813_v23 = vpop.f32.mrb[87].mxu1  ;;  %v5791_v52 = vrot.slane %v15088_v63, 1 }
 0x7de   : > { %10935 = vmatmul.mubr.bf16.gmra.mrb[24].mxu1 %v5402_v61  ;;  %v5792_v23 = vsel %vm1252_vm2, %v5790_v53, %v5791_v52  ;;  %v15095_v61 = vld [vmem:[#allocation2 + $0x18] sm:$0xff] }
 0x7df   : > { %10938 = vmatprep.mubr.msk.bf16.mxu1 %vm13054_vm0, %v13053_v1  ;;  %v5793_v29 = vrot.slane %v15095_v61, 1 }
 0x7e1   : > { %v5794_v26 = vsel %vm1252_vm2, %v5791_v52, %v5793_v29  ;;  %v5801_v52 = vrot.slane %v15148_v47, 1 }
 0x7e6   : > { %10939 = vmatmul.mubr.bf16.gmra.mrb[28].mxu1 %v5404_v15  ;;  %v12945_v15 = vld [vmem:[%s16025_s2 + $0x110] sm:$0xff]  }
 0x7e7   : > { %10942 = vmatprep.mubr.msk.bf16.mxu1 %vm13054_vm0, %v13053_v1 }
 0x7ee   : > { %10943 = vmatmul.mubr.bf16.gmra.mrb[32].mxu1 %v5406_v58  ;;  %v12946_v58 = vld [vmem:[%s16025_s2 + $0x118] sm:$0xff]  }
 0x7ef   : > { %10946 = vmatprep.mubr.msk.bf16.mxu1 %vm13054_vm0, %v13053_v1 }
 0x7f6   : > { %10947 = vmatmul.mubr.bf16.gmra.mrb[36].mxu1 %v5408_v8  ;;  %v12947_v8 = vld [vmem:[%s16025_s2 + $0x120] sm:$0xff]  }
 0x7f7   : > { %10950 = vmatprep.mubr.msk.bf16.mxu1 %vm13054_vm0, %v13053_v1 }
 0x7fe   : > { %10951 = vmatmul.mubr.bf16.gmra.mrb[40].mxu1 %v5410_v57  ;;  %v5796_v57 = vsel %vm1252_vm2, %v5793_v29, %v5795_v22 }
 0x7ff   : > { %10954 = vmatprep.mubr.msk.bf16.mxu1 %vm13054_vm0, %v13053_v1 }
 0x806   : > { %10955 = vmatmul.mubr.bf16.gmra.mrb[44].mxu1 %v15024_v16 }
 0x807   : > { %10958 = vmatprep.mubr.msk.bf16.mxu1 %vm13054_vm0, %v13053_v1 }
 0x80e   : > { %10959 = vmatmul.mubr.bf16.gmra.mrb[48].mxu1 %v15031_v44 }
 0x80f   : > { %10962 = vmatprep.mubr.msk.bf16.mxu1 %vm13054_vm0, %v13053_v1 }
 0x816   : > { %10963 = vmatmul.mubr.bf16.gmra.mrb[52].mxu1 %v15038_v48 }
 0x817   : > { %10966 = vmatprep.mubr.msk.bf16.mxu1 %vm13054_vm0, %v13053_v1 }
 0x81e   : > { %10967 = vmatmul.mubr.bf16.gmra.mrb[56].mxu1 %v15045_v59 }
 0x81f   : > { %10970 = vmatprep.mubr.msk.bf16.mxu1 %vm13054_vm0, %v13053_v1 }
 0x826   : > { %10971 = vmatmul.mubr.bf16.gmra.mrb[60].mxu1 %v15052_v38 }
 0x827   : > { %10974 = vmatprep.mubr.msk.bf16.mxu1 %vm13054_vm0, %v13053_v1 }
 0x82e   : > { %10975 = vmatmul.mubr.bf16.gmra.mrb[64].mxu1 %v15059_v11 }
 0x82f   : > { %10978 = vmatprep.mubr.msk.bf16.mxu1 %vm13054_vm0, %v13053_v1 }
 0x836   : > { %10979 = vmatmul.mubr.bf16.gmra.mrb[68].mxu1 %v15066_v9 }
 0x837   : > { %10982 = vmatprep.mubr.msk.bf16.mxu1 %vm13054_vm0, %v13053_v1 }
 0x83e   : > { %10983 = vmatmul.mubr.bf16.gmra.mrb[72].mxu1 %v15076_v27 }
 0x83f   : > { %10986 = vmatprep.mubr.msk.bf16.mxu1 %vm13054_vm0, %v13053_v1 }
 0x846   : > { %10987 = vmatmul.mubr.bf16.gmra.mrb[76].mxu1 %v5428_v51 }
 0x847   : > { %10990 = vmatprep.mubr.msk.bf16.mxu1 %vm13054_vm0, %v13053_v1 }
 0x84e   : > { %10991 = vmatmul.mubr.bf16.gmra.mrb[96].mxu1 %v5427_v3  ;;  %v5799_v3 = vrot.slane %v15137_v5, 1 }
 0x84f   : > { %11010 = vmatprep.mubr.msk.bf16.mxu1 %vm13054_vm0, %v13053_v1 }
 0x850   : > { %v5800_v51 = vsel %vm1252_vm2, %v5797_v24, %v5799_v3  ;;  %v5802_v29 = vsel %vm1252_vm2, %v5799_v3, %v5801_v52  ;;  %v15160_v24 = vld [vmem:[#allocation2 + $0x48] sm:$0xff] }
 0x856   : > { %11011 = vmatmul.mubr.bf16.vlgmr.msra.gmra.mrb[100].mxu1 %v5792_v23 }
 0x857   : > { %11095 = vmatpush3.bf16.msra.mxu1 %v12943_v41  ;;  %11014 = vmatprep.mubr.msk.bf16.mxu1 %vm13054_vm0, %v13053_v1 }
 0x858   : > { %11096 = vmatprep.subr.bf16.mxu1 %v13053_v1 }
 0x85b   : > { %11097 = vmatpush3.bf16.msra.mxu1 %v12944_v35 }
 0x85c   : > { %11098 = vmatprep.subr.bf16.mxu1 %v13053_v1 }
 0x85e   : > { %11015 = vmatmul.mubr.bf16.gmra.mrb[4].mxu1 %v5794_v26 }
 0x85f   : > { %11018 = vmatprep.mubr.msk.bf16.mxu1 %vm13054_vm0, %v13053_v1  ;;  %11099 = vmatpush3.bf16.msra.mxu1 %v12945_v15  ;;  %v15154_v15 = vld [vmem:[#allocation2 + $0x40] sm:$0xff] }
 0x860   : > { %11100 = vmatprep.subr.bf16.mxu1 %v13053_v1 }
 0x863   : > { %11101 = vmatpush3.bf16.msra.mxu1 %v12946_v58  ;;  %v5803_v58 = vrot.slane %v15154_v15, 1 }
 0x864   : > { %11102 = vmatprep.subr.bf16.mxu1 %v13053_v1 }
 0x866   : > { %11019 = vmatmul.mubr.bf16.gmra.mrb[8].mxu1 %v5796_v57 }
 0x867   : > { %11022 = vmatprep.mubr.msk.bf16.mxu1 %vm13054_vm0, %v13053_v1  ;;  %11103 = vmatpush3.bf16.msra.mxu1 %v12947_v8 }
 0x868   : > { %11104 = vmatprep.subr.bf16.mxu1 %v13053_v1 }
 0x86b   : > { %11105 = vmatpush3.bf16.msra.mxu1 %v12948_v7  ;;  %v5804_v7 = vsel %vm1252_vm2, %v5801_v52, %v5803_v58  ;;  %v12952_v52 = vld [vmem:[%s16025_s2 + $0x148] sm:$0xff]  }
 0x86c   : > { %11106 = vmatprep.subr.bf16.mxu1 %v13053_v1 }
 0x86e   : > { %11023 = vmatmul.mubr.bf16.gmra.mrb[12].mxu1 %v5798_v18 }
 0x86f   : > { %11026 = vmatprep.mubr.msk.bf16.mxu1 %vm13054_vm0, %v13053_v1  ;;  %11107 = vmatpush3.bf16.msra.mxu1 %v12949_v19  ;;  %v5805_v19 = vrot.slane %v15160_v24, 1 }
 0x870   : > { %11108 = vmatprep.subr.bf16.mxu1 %v13053_v1 }
 0x871   : > { %v5806_v18 = vsel %vm1252_vm2, %v5803_v58, %v5805_v19 }
 0x873   : > { %11109 = vmatpush3.bf16.msra.mxu1 %v12950_v42  ;;  %v15166_v42 = vld [vmem:[#allocation2 + $0x50] sm:$0xff] }
 0x874   : > { %11194 = vmatprep.subr.bf16.mxu1 %v13053_v1  ;;  %v5807_v3 = vrot.slane %v15166_v42, 1 }
 0x876   : > { %11027 = vmatmul.mubr.bf16.gmra.mrb[16].mxu1 %v5800_v51  ;;  %v5808_v51 = vsel %vm1252_vm2, %v5805_v19, %v5807_v3 }
 0x877   : > { %11030 = vmatprep.mubr.msk.bf16.mxu1 %vm13054_vm0, %v13053_v1 }
 0x879   : > { %v5344_v53 = vpop.f32.mrb[88].mxu1 }
 0x87a   : > { %v10892_v41 = vpop.f32.mrb[89].mxu1  ;;  %v5810_v53 = vsel %vm1252_vm2, %v5807_v3, %v15015_v56  ;;  %v5827_v56 = vrot.slane %v14728_v34, 1 }
 0x87b   : > { %v5346_v23 = vpop.f32.mrb[90].mxu1 }
 0x87c   : > { %v10893_v35 = vpop.f32.mrb[91].mxu1  ;;  %v6178_v23 = vshrl.u32 %v15109_v12, 16 }
 0x87d   : > { %v6181_v35 = vshll.u32 %v15109_v12, 16 }
 0x87e   : > { %11031 = vmatmul.mubr.bf16.gmra.mrb[20].mxu1 %v5802_v29 }
 0x87f   : > { %11034 = vmatprep.mubr.msk.bf16.mxu1 %vm13054_vm0, %v13053_v1  ;;  %v6183_v58 = vrot.slane %v6181_v35, 2 }
 0x881   : > { %v5532_v26 = vpop.f32.mrb[92].mxu1 }
 0x882   : > { %v10912_v22 = vpop.f32.mrb[93].mxu1  ;;  %v6180_v26 = vrot.slane %v6178_v23, 1 }
 0x883   : > { %v5534_v8 = vpop.f32.mrb[94].mxu1  ;;  %v12954_v22 = vld [vmem:[%s16025_s2 + $0x158] sm:$0xff]  }
 0x884   : > { %v10913_v57 = vpop.f32.mrb[95].mxu1  ;;  %v6184_v8 = vor.u32 %v6183_v58, %v6180_v26 }
 0x885   : > { %v6190_v57 = vshll.u32 %v15123_v46, 16 }
 0x886   : > { %11035 = vmatmul.mubr.bf16.gmra.mrb[24].mxu1 %v5804_v7  ;;  %v12955_v7 = vld [vmem:[%s16025_s2 + $0x160] sm:$0xff]  }
 0x887   : > { %11038 = vmatprep.mubr.msk.bf16.mxu1 %vm13054_vm0, %v13053_v1  ;;  %v6192_v3 = vrot.slane %v6190_v57, 2 }
 0x88e   : > { %11039 = vmatmul.mubr.bf16.gmra.mrb[28].mxu1 %v5806_v18 }
 0x88f   : > { %11042 = vmatprep.mubr.msk.bf16.mxu1 %vm13054_vm0, %v13053_v1 }
 0x896   : > { %11043 = vmatmul.mubr.bf16.gmra.mrb[32].mxu1 %v5808_v51  ;;  %v12956_v51 = vld [vmem:[%s16025_s2 + $0x168] sm:$0xff]  }
 0x897   : > { %11046 = vmatprep.mubr.msk.bf16.mxu1 %vm13054_vm0, %v13053_v1 }
 0x89e   : > { %11047 = vmatmul.mubr.bf16.gmra.mrb[36].mxu1 %v5810_v53 }
 0x89f   : > { %11050 = vmatprep.mubr.msk.bf16.mxu1 %vm13054_vm0, %v13053_v1 }
 0x8a6   : > { %11051 = vmatmul.mubr.bf16.gmra.mrb[40].mxu1 %v15024_v16  ;;  %v5828_v16 = vsel %vm1252_vm2, %v15072_v30, %v5827_v56 }
 0x8a7   : > { %11054 = vmatprep.mubr.msk.bf16.mxu1 %vm13054_vm0, %v13053_v1 }
 0x8ae   : > { %11055 = vmatmul.mubr.bf16.gmra.mrb[44].mxu1 %v15031_v44  ;;  %v5751_v44 = vld [vmem:[#allocation2 + $0xa8] sm:$0x1f] }
 0x8af   : > { %11058 = vmatprep.mubr.msk.bf16.mxu1 %vm13054_vm0, %v13053_v1 }
 0x8b6   : > { %11059 = vmatmul.mubr.bf16.gmra.mrb[48].mxu1 %v15038_v48  ;;  %v5829_v48 = vrot.slane %v5751_v44, 1  ;;  %v12957_v44 = vld [vmem:[%s16025_s2 + $0x170] sm:$0xff]  }
 0x8b7   : > { %11062 = vmatprep.mubr.msk.bf16.mxu1 %vm13054_vm0, %v13053_v1 }
 0x8be   : > { %11063 = vmatmul.mubr.bf16.gmra.mrb[52].mxu1 %v15045_v59  ;;  %v5830_v59 = vsel %vm1252_vm2, %v5827_v56, %v5829_v48  ;;  %v6196_v56 = vshrl.u32 %v15137_v5, 16 }
 0x8bf   : > { %11066 = vmatprep.mubr.msk.bf16.mxu1 %vm13054_vm0, %v13053_v1 }
 0x8c6   : > { %11067 = vmatmul.mubr.bf16.gmra.mrb[56].mxu1 %v15052_v38  ;;  %v6169_v38 = vshrl.u32 %v15095_v61, 16 }
 0x8c7   : > { %11070 = vmatprep.mubr.msk.bf16.mxu1 %vm13054_vm0, %v13053_v1 }
 0x8c8   : > { %v6171_v30 = vrot.slane %v6169_v38, 1 }
 0x8ce   : > { %11071 = vmatmul.mubr.bf16.gmra.mrb[60].mxu1 %v15059_v11  ;;  %v6172_v11 = vshll.u32 %v15095_v61, 16 }
 0x8cf   : > { %11074 = vmatprep.mubr.msk.bf16.mxu1 %vm13054_vm0, %v13053_v1 }
 0x8d6   : > { %11075 = vmatmul.mubr.bf16.gmra.mrb[64].mxu1 %v15066_v9  ;;  %v12951_v9 = vld [vmem:[%s16025_s2 + $0x140] sm:$0xff]  }
 0x8d7   : > { %11078 = vmatprep.mubr.msk.bf16.mxu1 %vm13054_vm0, %v13053_v1 }
 0x8de   : > { %11079 = vmatmul.mubr.bf16.gmra.mrb[68].mxu1 %v15076_v27  ;;  %v6174_v27 = vrot.slane %v6172_v11, 2 }
 0x8df   : > { %11082 = vmatprep.mubr.msk.bf16.mxu1 %vm13054_vm0, %v13053_v1 }
 0x8e0   : > { %v6175_v41 = vor.u32 %v6174_v27, %v6171_v30  ;;  %v12958_v30 = vld [vmem:[%s16025_s2 + $0x178] sm:$0xff]  }
 0x8e2   : > { %v6176_v29 = vsel %vm2016_vm3, %v14528_v31, %v6175_v41  ;;  %v6187_v31 = vshrl.u32 %v15123_v46, 16  ;;  %v6185_v19 = vsel %vm2016_vm3, %v6175_v41, %v6184_v8  ;;  %v16039_v41 = vshll.u32 %v15148_v47, 16 }
 0x8e4   : > { %v6189_v18 = vrot.slane %v6187_v31, 1  ;;  %v6210_v26 = vrot.slane %v16039_v41, 2 }
 0x8e6   : > { %11083 = vmatmul.mubr.bf16.gmra.mrb[72].mxu1 %v5828_v16  ;;  %v6193_v53 = vor.u32 %v6192_v3, %v6189_v18  ;;  %v16041_v16 = vshll.u32 %v15137_v5, 16 }
 0x8e7   : > { %11086 = vmatprep.mubr.msk.bf16.mxu1 %vm13054_vm0, %v13053_v1 }
 0x8ee   : > { %11087 = vmatmul.mubr.bf16.gmra.mrb[76].mxu1 %v5830_v59  ;;  %v6198_v59 = vrot.slane %v6196_v56, 1 }
 0x8ef   : > { %11090 = vmatprep.mubr.msk.bf16.mxu1 %vm13054_vm0, %v13053_v1 }
 0x8f6   : > { %11091 = vmatmul.mubr.bf16.gmra.mrb[104].mxu1 %v5829_v48  ;;  %v6194_v48 = vsel %vm2016_vm3, %v6184_v8, %v6193_v53  ;;  %v16038_v8 = vshrl.u32 %v15154_v15, 16 }
 0x8f7   : > { %11110 = vmatprep.mubr.msk.bf16.mxu1 %vm13054_vm0, %v13053_v1 }
 0x8fe   : > { %11111 = vmatmul.mubr.bf16.vlgmr.msra.gmra.mrb[108].mxu1 %v14535_v36  ;;  %v12953_v36 = vld [vmem:[%s16025_s2 + $0x150] sm:$0xff]  }
 0x8ff   : > { %11195 = vmatpush3.bf16.msra.mxu1 %v12951_v9  ;;  %11114 = vmatprep.mubr.msk.bf16.mxu1 %vm13054_vm0, %v13053_v1  ;;  %v6201_v9 = vrot.slane %v16041_v16, 2 }
 0x900   : > { %11196 = vmatprep.subr.bf16.mxu1 %v13053_v1 }
 0x901   : > { %v6202_v27 = vor.u32 %v6201_v9, %v6198_v59  ;;  %v16036_v9 = vshrl.u32 %v15160_v24, 16 }
 0x903   : > { %11197 = vmatpush3.bf16.msra.mxu1 %v12952_v52  ;;  %v16040_v52 = vshrl.u32 %v15148_v47, 16 }
 0x904   : > { %11198 = vmatprep.subr.bf16.mxu1 %v13053_v1 }
 0x906   : > { %11115 = vmatmul.mubr.bf16.gmra.mrb[4].mxu1 %v6176_v29  ;;  %v6207_v29 = vrot.slane %v16040_v52, 1 }
 0x907   : > { %11118 = vmatprep.mubr.msk.bf16.mxu1 %vm13054_vm0, %v13053_v1  ;;  %11199 = vmatpush3.bf16.msra.mxu1 %v12953_v36  ;;  %v6203_v36 = vsel %vm2016_vm3, %v6193_v53, %v6202_v27  ;;  %v6216_v53 = vrot.slane %v16038_v8, 1 }
 0x908   : > { %11200 = vmatprep.subr.bf16.mxu1 %v13053_v1 }
 0x90b   : > { %11201 = vmatpush3.bf16.msra.mxu1 %v12954_v22  ;;  %v6211_v22 = vor.u32 %v6210_v26, %v6207_v29 }
 0x90c   : > { %11202 = vmatprep.subr.bf16.mxu1 %v13053_v1 }
 0x90e   : > { %11119 = vmatmul.mubr.bf16.gmra.mrb[8].mxu1 %v6185_v19 }
 0x90f   : > { %11122 = vmatprep.mubr.msk.bf16.mxu1 %vm13054_vm0, %v13053_v1  ;;  %11203 = vmatpush3.bf16.msra.mxu1 %v12955_v7  ;;  %v16037_v7 = vshll.u32 %v15154_v15, 16 }
 0x910   : > { %11204 = vmatprep.subr.bf16.mxu1 %v13053_v1 }
 0x913   : > { %11205 = vmatpush3.bf16.msra.mxu1 %v12956_v51  ;;  %v6212_v51 = vsel %vm2016_vm3, %v6202_v27, %v6211_v22 }
 0x914   : > { %11206 = vmatprep.subr.bf16.mxu1 %v13053_v1 }
 0x916   : > { %11123 = vmatmul.mubr.bf16.gmra.mrb[12].mxu1 %v6194_v48 }
 0x917   : > { %11126 = vmatprep.mubr.msk.bf16.mxu1 %vm13054_vm0, %v13053_v1  ;;  %11207 = vmatpush3.bf16.msra.mxu1 %v12957_v44  ;;  %v6219_v44 = vrot.slane %v16037_v7, 2 }
 0x918   : > { %11208 = vmatprep.subr.bf16.mxu1 %v13053_v1 }
 0x919   : > { %v6220_v59 = vor.u32 %v6219_v44, %v6216_v53 }
 0x91b   : > { %11209 = vmatpush3.bf16.msra.mxu1 %v12958_v30  ;;  %v16035_v30 = vshll.u32 %v15160_v24, 16  ;;  %v6221_v27 = vsel %vm2016_vm3, %v6211_v22, %v6220_v59 }
 0x91c   : > { %11294 = vmatprep.subr.bf16.mxu1 %v13053_v1 }
 0x91e   : > { %11127 = vmatmul.mubr.bf16.gmra.mrb[16].mxu1 %v6203_v36 }
 0x91f   : > { %11130 = vmatprep.mubr.msk.bf16.mxu1 %vm13054_vm0, %v13053_v1 }
 0x921   : > { %v5689_v58 = vpop.f32.mrb[96].mxu1 }
 0x922   : > { %v10992_v19 = vpop.f32.mrb[97].mxu1  ;;  %v6225_v58 = vrot.slane %v16036_v9, 1 }
 0x923   : > { %v5691_v18 = vpop.f32.mrb[98].mxu1  ;;  %v6228_v19 = vrot.slane %v16035_v30, 2 }
 0x924   : > { %v10993_v3 = vpop.f32.mrb[99].mxu1 }
 0x925   : > { %v6229_v18 = vor.u32 %v6228_v19, %v6225_v58  ;;  %v16034_v3 = vshrl.u32 %v15166_v42, 16 }
 0x926   : > { %11131 = vmatmul.mubr.bf16.gmra.mrb[20].mxu1 %v6212_v51  ;;  %v16033_v51 = vshll.u32 %v15166_v42, 16 }
 0x927   : > { %11134 = vmatprep.mubr.msk.bf16.mxu1 %vm13054_vm0, %v13053_v1  ;;  %v6230_v53 = vsel %vm2016_vm3, %v6220_v59, %v6229_v18  ;;  %v6234_v22 = vrot.slane %v16034_v3, 1 }
 0x928   : > { %v6237_v44 = vrot.slane %v16033_v51, 2 }
 0x929   : > { %v5934_v48 = vpop.f32.mrb[100].mxu1 }
 0x92a   : > { %v11012_v36 = vpop.f32.mrb[101].mxu1  ;;  %v6238_v48 = vor.u32 %v6237_v44, %v6234_v22 }
 0x92b   : > { %v5936_v29 = vpop.f32.mrb[102].mxu1  ;;  %v15317_v36 = vld [vmem:[#allocation2 + $0x58] sm:$0xff] }
 0x92c   : > { %v11013_v26 = vpop.f32.mrb[103].mxu1  ;;  %v6241_v29 = vshrl.u32 %v15317_v36, 16 }
 0x92d   : > { %v6244_v26 = vshll.u32 %v15317_v36, 16 }
 0x92e   : > { %11135 = vmatmul.mubr.bf16.gmra.mrb[24].mxu1 %v6221_v27  ;;  %v6239_v27 = vsel %vm2016_vm3, %v6229_v18, %v6238_v48  ;;  %v6243_v59 = vrot.slane %v6241_v29, 1  ;;  %v15331_v29 = vld [vmem:[#allocation2 + $0x68] sm:$0xff] }
 0x92f   : > { %11138 = vmatprep.mubr.msk.bf16.mxu1 %vm13054_vm0, %v13053_v1  ;;  %v6246_v58 = vrot.slane %v6244_v26, 2  ;;  %v6259_v26 = vshrl.u32 %v15331_v29, 16 }
 0x931   : > { %v6247_v19 = vor.u32 %v6246_v58, %v6243_v59  ;;  %v6261_v58 = vrot.slane %v6259_v26, 1  ;;  %v15345_v26 = vld [vmem:[#allocation2 + $0x78] sm:$0xff] }
 0x933   : > { %v6248_v44 = vsel %vm2016_vm3, %v6238_v48, %v6247_v19  ;;  %v15338_v48 = vld [vmem:[#allocation2 + $0x70] sm:$0xff] }
 0x936   : > { %11139 = vmatmul.mubr.bf16.gmra.mrb[28].mxu1 %v6230_v53  ;;  %v15324_v53 = vld [vmem:[#allocation2 + $0x60] sm:$0xff] }
 0x937   : > { %11142 = vmatprep.mubr.msk.bf16.mxu1 %vm13054_vm0, %v13053_v1  ;;  %v6250_v43 = vshrl.u32 %v15324_v53, 16  ;;  %v6253_v22 = vshll.u32 %v15324_v53, 16 }
 0x939   : > { %v6252_v50 = vrot.slane %v6250_v43, 1  ;;  %v6255_v51 = vrot.slane %v6253_v22, 2  ;;  %v6268_v22 = vshrl.u32 %v15338_v48, 16 }
 0x93b   : > { %v6256_v18 = vor.u32 %v6255_v51, %v6252_v50  ;;  %v6271_v50 = vshll.u32 %v15338_v48, 16 }
 0x93d   : > { %v6257_v59 = vsel %vm2016_vm3, %v6247_v19, %v6256_v18  ;;  %v6273_v30 = vrot.slane %v6271_v50, 2 }
 0x93e   : > { %11143 = vmatmul.mubr.bf16.gmra.mrb[32].mxu1 %v6239_v27  ;;  %v6262_v27 = vshll.u32 %v15331_v29, 16 }
 0x93f   : > { %11146 = vmatprep.mubr.msk.bf16.mxu1 %vm13054_vm0, %v13053_v1 }
 0x940   : > { %v6264_v3 = vrot.slane %v6262_v27, 2  ;;  %v6277_v27 = vshrl.u32 %v15345_v26, 16 }
 0x942   : > { %v6265_v43 = vor.u32 %v6264_v3, %v6261_v58  ;;  %v6280_v3 = vshll.u32 %v15345_v26, 16  ;;  %v6279_v58 = vrot.slane %v6277_v27, 1  ;;  %v15359_v27 = vld [vmem:[#allocation2 + $0x88] sm:$0xff] }
 0x944   : > { %v6266_v51 = vsel %vm2016_vm3, %v6256_v18, %v6265_v43  ;;  %v6282_v9 = vrot.slane %v6280_v3, 2  ;;  %v6295_v3 = vshrl.u32 %v15359_v27, 16 }
 0x946   : > { %11147 = vmatmul.mubr.bf16.gmra.mrb[36].mxu1 %v6248_v44  ;;  %v6270_v44 = vrot.slane %v6268_v22, 1  ;;  %v6283_v18 = vor.u32 %v6282_v9, %v6279_v58  ;;  %v15352_v22 = vld [vmem:[#allocation2 + $0x80] sm:$0xff]  ;;  %v6298_v9 = vshll.u32 %v15359_v27, 16  ;;  %v6297_v58 = vrot.slane %v6295_v3, 1  ;;  %v15373_v3 = vld [vmem:[#allocation2 + $0x98] sm:$0xff] }
 0x947   : > { %11150 = vmatprep.mubr.msk.bf16.mxu1 %vm13054_vm0, %v13053_v1  ;;  %v6286_v50 = vshrl.u32 %v15352_v22, 16 }
 0x948   : > { %v6274_v19 = vor.u32 %v6273_v30, %v6270_v44  ;;  %v6289_v30 = vshll.u32 %v15352_v22, 16  ;;  %v6300_v8 = vrot.slane %v6298_v9, 2  ;;  %v6313_v9 = vshrl.u32 %v15373_v3, 16 }
 0x949   : > { %v6288_v44 = vrot.slane %v6286_v50, 1  ;;  %v15366_v50 = vld [vmem:[#allocation2 + $0x90] sm:$0xff] }
 0x94a   : > { %v6291_v7 = vrot.slane %v6289_v30, 2  ;;  %v6304_v30 = vshrl.u32 %v15366_v50, 16 }
 0x94e   : > { %11151 = vmatmul.mubr.bf16.gmra.mrb[40].mxu1 %v6257_v59  ;;  %v6275_v59 = vsel %vm2016_vm3, %v6265_v43, %v6274_v19  ;;  %v6292_v43 = vor.u32 %v6291_v7, %v6288_v44  ;;  %v6307_v7 = vshll.u32 %v15366_v50, 16  ;;  %v6306_v44 = vrot.slane %v6304_v30, 1 }
 0x94f   : > { %11154 = vmatprep.mubr.msk.bf16.mxu1 %vm13054_vm0, %v13053_v1 }
 0x950   : > { %v6309_v41 = vrot.slane %v6307_v7, 2  ;;  %v6327_v7 = vrot.slane %v6325_v62, 2 }
 0x956   : > { %11155 = vmatmul.mubr.bf16.gmra.mrb[44].mxu1 %v6266_v51  ;;  %v6284_v51 = vsel %vm2016_vm3, %v6274_v19, %v6283_v18  ;;  %v6301_v19 = vor.u32 %v6300_v8, %v6297_v58  ;;  %v6316_v8 = vshll.u32 %v15373_v3, 16  ;;  %v6315_v58 = vrot.slane %v6313_v9, 1 }
 0x957   : > { %11158 = vmatprep.mubr.msk.bf16.mxu1 %vm13054_vm0, %v13053_v1 }
 0x958   : > { %v6318_v52 = vrot.slane %v6316_v8, 2 }
 0x95e   : > { %11159 = vmatmul.mubr.bf16.gmra.mrb[48].mxu1 %v6275_v59  ;;  %v6293_v59 = vsel %vm2016_vm3, %v6283_v18, %v6292_v43  ;;  %v6310_v18 = vor.u32 %v6309_v41, %v6306_v44  ;;  %v6324_v41 = vrot.slane %v6322_v10, 1 }
 0x95f   : > { %11162 = vmatprep.mubr.msk.bf16.mxu1 %vm13054_vm0, %v13053_v1 }
 0x966   : > { %11163 = vmatmul.mubr.bf16.gmra.mrb[52].mxu1 %v6284_v51  ;;  %v6302_v51 = vsel %vm2016_vm3, %v6292_v43, %v6301_v19  ;;  %v6319_v43 = vor.u32 %v6318_v52, %v6315_v58 }
 0x967   : > { %11166 = vmatprep.mubr.msk.bf16.mxu1 %vm13054_vm0, %v13053_v1 }
 0x968   : > { %v6320_v30 = vsel %vm2016_vm3, %v6310_v18, %v6319_v43 }
 0x96e   : > { %11167 = vmatmul.mubr.bf16.gmra.mrb[56].mxu1 %v6293_v59  ;;  %v6311_v59 = vsel %vm2016_vm3, %v6301_v19, %v6310_v18  ;;  %v6328_v19 = vor.u32 %v6327_v7, %v6324_v41  ;;  %v12960_v7 = vld [vmem:[%s16025_s2 + $0x188] sm:$0xff]  }
 0x96f   : > { %11170 = vmatprep.mubr.msk.bf16.mxu1 %vm13054_vm0, %v13053_v1 }
 0x970   : > { %v6329_v52 = vsel %vm2016_vm3, %v6319_v43, %v6328_v19  ;;  %v6662_v43 = vrot.slane %v15088_v63, 2  ;;  %v12961_v63 = vld [vmem:[%s16025_s2 + $0x190] sm:$0xff]  }
 0x976   : > { %11171 = vmatmul.mubr.bf16.gmra.mrb[60].mxu1 %v6302_v51  ;;  %v15385_v51 = vld [vmem:[#allocation2 + $0xa8] sm:$0x3f] }
 0x977   : > { %11174 = vmatprep.mubr.msk.bf16.mxu1 %vm13054_vm0, %v13053_v1  ;;  %v6331_v44 = vshrl.u32 %v15385_v51, 16  ;;  %v6334_v9 = vshll.u32 %v15385_v51, 16 }
 0x979   : > { %v6333_v18 = vrot.slane %v6331_v44, 1  ;;  %v6336_v8 = vrot.slane %v6334_v9, 2  ;;  %v12962_v9 = vld [vmem:[%s16025_s2 + $0x198] sm:$0xff]  }
 0x97b   : > { %v6337_v10 = vor.u32 %v6336_v8, %v6333_v18  ;;  %v12963_v18 = vld [vmem:[%s16025_s2 + $0x1a0] sm:$0xff]  }
 0x97d   : > { %v6338_v62 = vsel %vm2016_vm3, %v6328_v19, %v6337_v10  ;;  %v15411_v19 = vrot.slane %v15095_v61, 2  ;;  %v7447_v61 = vrot.slane %v6181_v35, 3  ;;  %v7453_v35 = vrot.slane %v6187_v31, 2  ;;  %v12979_v31 = vld [vmem:[%s16025_s2 + $0x220] sm:$0xff]  }
 0x97e   : > { %11175 = vmatmul.mubr.bf16.gmra.mrb[64].mxu1 %v6311_v59  ;;  %v6641_v59 = vld [vmem:[#allocation2 + $0x8] sm:$0xfc] }
 0x97f   : > { %11178 = vmatprep.mubr.msk.bf16.mxu1 %vm13054_vm0, %v13053_v1  ;;  %v6661_v58 = vrot.slane %v6641_v59, 2  ;;  %v6665_v44 = vsel %vm2527_vm4, %v6662_v43, %v15411_v19  ;;  %v12965_v59 = vld [vmem:[%s16025_s2 + $0x1b0] sm:$0xff]  }
 0x981   : > { %v6663_v41 = vsel %vm2527_vm4, %v6661_v58, %v6662_v43  ;;  %v12966_v43 = vld [vmem:[%s16025_s2 + $0x1b8] sm:$0xff]  }
 0x986   : > { %11179 = vmatmul.mubr.bf16.gmra.mrb[68].mxu1 %v6320_v30  ;;  %v12959_v30 = vld [vmem:[%s16025_s2 + $0x180] sm:$0xff]  }
 0x987   : > { %11182 = vmatprep.mubr.msk.bf16.mxu1 %vm13054_vm0, %v13053_v1 }
 0x98e   : > { %11183 = vmatmul.mubr.bf16.gmra.mrb[72].mxu1 %v6329_v52  ;;  %v6666_v52 = vrot.slane %v15109_v12, 2 }
 0x98f   : > { %11186 = vmatprep.mubr.msk.bf16.mxu1 %vm13054_vm0, %v13053_v1 }
 0x990   : > { %v15432_v8 = vsel %vm2527_vm4, %v15411_v19, %v6666_v52 }
 0x996   : > { %11187 = vmatmul.mubr.bf16.gmra.mrb[76].mxu1 %v6338_v62  ;;  %v6668_v62 = vrot.slane %v15123_v46, 2 }
 0x997   : > { %11190 = vmatprep.mubr.msk.bf16.mxu1 %vm13054_vm0, %v13053_v1 }
 0x998   : > { %v15447_v58 = vsel %vm2527_vm4, %v6666_v52, %v6668_v62 }
 0x99e   : > { %11191 = vmatmul.mubr.bf16.gmra.mrb[112].mxu1 %v6337_v10  ;;  %v12964_v10 = vld [vmem:[%s16025_s2 + $0x1a8] sm:$0xff]  }
 0x99f   : > { %11210 = vmatprep.mubr.msk.bf16.mxu1 %vm13054_vm0, %v13053_v1 }
 0x9a6   : > { %11211 = vmatmul.mubr.bf16.vlgmr.msra.gmra.mrb[116].mxu1 %v6663_v41 }
 0x9a7   : > { %11295 = vmatpush3.bf16.msra.mxu1 %v12959_v30  ;;  %11214 = vmatprep.mubr.msk.bf16.mxu1 %vm13054_vm0, %v13053_v1  ;;  %v6670_v30 = vrot.slane %v15137_v5, 2 }
 0x9a8   : > { %11296 = vmatprep.subr.bf16.mxu1 %v13053_v1 }
 0x9a9   : > { %v15459_v41 = vsel %vm2527_vm4, %v6668_v62, %v6670_v30  ;;  %v6674_v62 = vrot.slane %v15154_v15, 2 }
 0x9ab   : > { %11297 = vmatpush3.bf16.msra.mxu1 %v12960_v7 }
 0x9ac   : > { %11298 = vmatprep.subr.bf16.mxu1 %v13053_v1 }
 0x9ae   : > { %11215 = vmatmul.mubr.bf16.gmra.mrb[4].mxu1 %v6665_v44 }
 0x9af   : > { %11218 = vmatprep.mubr.msk.bf16.mxu1 %vm13054_vm0, %v13053_v1  ;;  %11299 = vmatpush3.bf16.msra.mxu1 %v12961_v63  ;;  %v6672_v63 = vrot.slane %v15148_v47, 2 }
 0x9b0   : > { %11300 = vmatprep.subr.bf16.mxu1 %v13053_v1 }
 0x9b3   : > { %11301 = vmatpush3.bf16.msra.mxu1 %v12962_v9 }
 0x9b4   : > { %11302 = vmatprep.subr.bf16.mxu1 %v13053_v1 }
 0x9b6   : > { %11219 = vmatmul.mubr.bf16.gmra.mrb[8].mxu1 %v15432_v8 }
 0x9b7   : > { %11222 = vmatprep.mubr.msk.bf16.mxu1 %vm13054_vm0, %v13053_v1  ;;  %11303 = vmatpush3.bf16.msra.mxu1 %v12963_v18  ;;  %v15466_v18 = vsel %vm2527_vm4, %v6670_v30, %v6672_v63  ;;  %v6676_v30 = vrot.slane %v15160_v24, 2 }
 0x9b8   : > { %11304 = vmatprep.subr.bf16.mxu1 %v13053_v1 }
 0x9bb   : > { %11305 = vmatpush3.bf16.msra.mxu1 %v12964_v10 }
 0x9bc   : > { %11306 = vmatprep.subr.bf16.mxu1 %v13053_v1 }
 0x9be   : > { %11223 = vmatmul.mubr.bf16.gmra.mrb[12].mxu1 %v15447_v58 }
 0x9bf   : > { %11226 = vmatprep.mubr.msk.bf16.mxu1 %vm13054_vm0, %v13053_v1  ;;  %11307 = vmatpush3.bf16.msra.mxu1 %v12965_v59 }
 0x9c0   : > { %11308 = vmatprep.subr.bf16.mxu1 %v13053_v1 }
 0x9c3   : > { %11309 = vmatpush3.bf16.msra.mxu1 %v12966_v43 }
 0x9c4   : > { %11394 = vmatprep.subr.bf16.mxu1 %v13053_v1 }
 0x9c6   : > { %11227 = vmatmul.mubr.bf16.gmra.mrb[16].mxu1 %v15459_v41 }
 0x9c7   : > { %11230 = vmatprep.mubr.msk.bf16.mxu1 %vm13054_vm0, %v13053_v1 }
 0x9c9   : > { %v6091_v7 = vpop.f32.mrb[104].mxu1 }
 0x9ca   : > { %v11092_v44 = vpop.f32.mrb[105].mxu1  ;;  %v15473_v7 = vsel %vm2527_vm4, %v6672_v63, %v6674_v62 }
 0x9cb   : > { %v6093_v9 = vpop.f32.mrb[106].mxu1  ;;  %v15480_v44 = vsel %vm2527_vm4, %v6674_v62, %v6676_v30 }
 0x9cc   : > { %v11093_v52 = vpop.f32.mrb[107].mxu1  ;;  %v6680_v9 = vrot.slane %v15317_v36, 2  ;;  %v6686_v36 = vrot.slane %v15338_v48, 2  ;;  %v6692_v48 = vrot.slane %v15359_v27, 2  ;;  %v13026_v27 = vld [vmem:[#allocation2 + $0xa0] sm:$0xff] }
 0x9ce   : > { %11231 = vmatmul.mubr.bf16.gmra.mrb[20].mxu1 %v15466_v18 }
 0x9cf   : > { %11234 = vmatprep.mubr.msk.bf16.mxu1 %vm13054_vm0, %v13053_v1 }
 0x9d1   : > { %v6442_v10 = vpop.f32.mrb[108].mxu1 }
 0x9d2   : > { %v11112_v59 = vpop.f32.mrb[109].mxu1  ;;  %v6682_v10 = vrot.slane %v15324_v53, 2  ;;  %v6688_v53 = vrot.slane %v15345_v26, 2  ;;  %v6694_v26 = vrot.slane %v15366_v50, 2 }
 0x9d3   : > { %v6444_v43 = vpop.f32.mrb[110].mxu1  ;;  %v6684_v59 = vrot.slane %v15331_v29, 2  ;;  %v6690_v29 = vrot.slane %v15352_v22, 2  ;;  %v6696_v22 = vrot.slane %v15373_v3, 2 }
 0x9d4   : > { %v11113_v16 = vpop.f32.mrb[111].mxu1  ;;  %v6683_v62 = vsel %vm2527_vm4, %v6680_v9, %v6682_v10 }
 0x9d5   : > { %v15486_v16 = vrot.slane %v15166_v42, 2  ;;  %v6685_v43 = vsel %vm2527_vm4, %v6682_v10, %v6684_v59  ;;  %v6693_v10 = vsel %vm2527_vm4, %v6690_v29, %v6692_v48 }
 0x9d6   : > { %11235 = vmatmul.mubr.bf16.gmra.mrb[24].mxu1 %v15473_v7 }
 0x9d7   : > { %11238 = vmatprep.mubr.msk.bf16.mxu1 %vm13054_vm0, %v13053_v1  ;;  %v15490_v63 = vsel %vm2527_vm4, %v6676_v30, %v15486_v16  ;;  %v6681_v52 = vsel %vm2527_vm4, %v15486_v16, %v6680_v9  ;;  %v6687_v30 = vsel %vm2527_vm4, %v6684_v59, %v6686_v36  ;;  %v6689_v9 = vsel %vm2527_vm4, %v6686_v36, %v6688_v53 }
 0x9d8   : > { %v6697_v59 = vsel %vm2527_vm4, %v6694_v26, %v6696_v22  ;;  %v6700_v36 = vrot.slane %v15385_v51, 2 }
 0x9de   : > { %11239 = vmatmul.mubr.bf16.gmra.mrb[28].mxu1 %v15480_v44 }
 0x9df   : > { %11242 = vmatprep.mubr.msk.bf16.mxu1 %vm13054_vm0, %v13053_v1 }
 0x9e6   : > { %11243 = vmatmul.mubr.bf16.gmra.mrb[32].mxu1 %v15490_v63 }
 0x9e7   : > { %11246 = vmatprep.mubr.msk.bf16.mxu1 %vm13054_vm0, %v13053_v1 }
 0x9ee   : > { %11247 = vmatmul.mubr.bf16.gmra.mrb[36].mxu1 %v6681_v52  ;;  %v6691_v52 = vsel %vm2527_vm4, %v6688_v53, %v6690_v29  ;;  %v12968_v29 = vld [vmem:[%s16025_s2 + $0x1c8] sm:$0xff]  }
 0x9ef   : > { %11250 = vmatprep.mubr.msk.bf16.mxu1 %vm13054_vm0, %v13053_v1 }
 0x9f6   : > { %11251 = vmatmul.mubr.bf16.gmra.mrb[40].mxu1 %v6683_v62  ;;  %v6695_v62 = vsel %vm2527_vm4, %v6692_v48, %v6694_v26  ;;  %v12971_v48 = vld [vmem:[%s16025_s2 + $0x1e0] sm:$0xff]  }
 0x9f7   : > { %11254 = vmatprep.mubr.msk.bf16.mxu1 %vm13054_vm0, %v13053_v1 }
 0x9fe   : > { %11255 = vmatmul.mubr.bf16.gmra.mrb[44].mxu1 %v6685_v43  ;;  %v15532_v43 = vrot.slane %v13026_v27, 2 }
 0x9ff   : > { %11258 = vmatprep.mubr.msk.bf16.mxu1 %vm13054_vm0, %v13053_v1 }
 0xa00   : > { %v6699_v50 = vsel %vm2527_vm4, %v6696_v22, %v15532_v43  ;;  %v6701_v3 = vsel %vm2527_vm4, %v15532_v43, %v6700_v36 }
 0xa06   : > { %11259 = vmatmul.mubr.bf16.gmra.mrb[48].mxu1 %v6687_v30  ;;  %v15545_v30 = vld [vmem:[#allocation2 + $0x10] sm:$0xfc] }
 0xa07   : > { %11262 = vmatprep.mubr.msk.bf16.mxu1 %vm13054_vm0, %v13053_v1  ;;  %v7063_v53 = vrot.slane %v15545_v30, 2 }
 0xa09   : > { %v7065_v51 = vsel %vm2527_vm4, %v7063_v53, %v15411_v19  ;;  %v12970_v19 = vld [vmem:[%s16025_s2 + $0x1d8] sm:$0xff]   ;;  %v13028_v53 = vld [vmem:[#allocation2 + $0x60] sm:$0xff] }
 0xa0e   : > { %11263 = vmatmul.mubr.bf16.gmra.mrb[52].mxu1 %v6689_v9  ;;  %v12967_v9 = vld [vmem:[%s16025_s2 + $0x1c0] sm:$0xff]  }
 0xa0f   : > { %11266 = vmatprep.mubr.msk.bf16.mxu1 %vm13054_vm0, %v13053_v1 }
 0xa16   : > { %11267 = vmatmul.mubr.bf16.gmra.mrb[56].mxu1 %v6691_v52  ;;  %v12969_v52 = vld [vmem:[%s16025_s2 + $0x1d0] sm:$0xff]  }
 0xa17   : > { %11270 = vmatprep.mubr.msk.bf16.mxu1 %vm13054_vm0, %v13053_v1 }
 0xa1e   : > { %11271 = vmatmul.mubr.bf16.gmra.mrb[60].mxu1 %v6693_v10  ;;  %v12973_v10 = vld [vmem:[%s16025_s2 + $0x1f0] sm:$0xff]  }
 0xa1f   : > { %11274 = vmatprep.mubr.msk.bf16.mxu1 %vm13054_vm0, %v13053_v1 }
 0xa26   : > { %11275 = vmatmul.mubr.bf16.gmra.mrb[64].mxu1 %v6695_v62 }
 0xa27   : > { %11278 = vmatprep.mubr.msk.bf16.mxu1 %vm13054_vm0, %v13053_v1 }
 0xa2e   : > { %11279 = vmatmul.mubr.bf16.gmra.mrb[68].mxu1 %v6697_v59 }
 0xa2f   : > { %11282 = vmatprep.mubr.msk.bf16.mxu1 %vm13054_vm0, %v13053_v1 }
 0xa36   : > { %11283 = vmatmul.mubr.bf16.gmra.mrb[72].mxu1 %v6699_v50 }
 0xa37   : > { %11286 = vmatprep.mubr.msk.bf16.mxu1 %vm13054_vm0, %v13053_v1 }
 0xa3e   : > { %11287 = vmatmul.mubr.bf16.gmra.mrb[76].mxu1 %v6701_v3 }
 0xa3f   : > { %11290 = vmatprep.mubr.msk.bf16.mxu1 %vm13054_vm0, %v13053_v1 }
 0xa46   : > { %11291 = vmatmul.mubr.bf16.gmra.mrb[120].mxu1 %v6700_v36 }
 0xa47   : > { %11310 = vmatprep.mubr.msk.bf16.mxu1 %vm13054_vm0, %v13053_v1 }
 0xa4e   : > { %11311 = vmatmul.mubr.bf16.vlgmr.msra.gmra.mrb[124].mxu1 %v7065_v51 }
 0xa4f   : > { %11395 = vmatpush3.bf16.msra.mxu1 %v12967_v9  ;;  %11314 = vmatprep.mubr.msk.bf16.mxu1 %vm13054_vm0, %v13053_v1  ;;  %v7082_v9 = vrot.slane %v13028_v53, 2 }
 0xa50   : > { %11396 = vmatprep.subr.bf16.mxu1 %v13053_v1 }
 0xa53   : > { %11397 = vmatpush3.bf16.msra.mxu1 %v12968_v29 }
 0xa54   : > { %11398 = vmatprep.subr.bf16.mxu1 %v13053_v1 }
 0xa56   : > { %11315 = vmatmul.mubr.bf16.gmra.mrb[4].mxu1 %v15432_v8  ;;  %v12972_v8 = vld [vmem:[%s16025_s2 + $0x1e8] sm:$0xff]  }
 0xa57   : > { %11318 = vmatprep.mubr.msk.bf16.mxu1 %vm13054_vm0, %v13053_v1  ;;  %11399 = vmatpush3.bf16.msra.mxu1 %v12969_v52 }
 0xa58   : > { %11400 = vmatprep.subr.bf16.mxu1 %v13053_v1 }
 0xa5b   : > { %11401 = vmatpush3.bf16.msra.mxu1 %v12970_v19 }
 0xa5c   : > { %11402 = vmatprep.subr.bf16.mxu1 %v13053_v1 }
 0xa5e   : > { %11319 = vmatmul.mubr.bf16.gmra.mrb[8].mxu1 %v15447_v58  ;;  %v12974_v58 = vld [vmem:[%s16025_s2 + $0x1f8] sm:$0xff]  }
 0xa5f   : > { %11322 = vmatprep.mubr.msk.bf16.mxu1 %vm13054_vm0, %v13053_v1  ;;  %11403 = vmatpush3.bf16.msra.mxu1 %v12971_v48  ;;  %v13031_v48 = vld [vmem:[#allocation2 + $0x78] sm:$0xff] }
 0xa60   : > { %11404 = vmatprep.subr.bf16.mxu1 %v13053_v1 }
 0xa63   : > { %11405 = vmatpush3.bf16.msra.mxu1 %v12972_v8  ;;  %v7088_v8 = vrot.slane %v13031_v48, 2  ;;  %v7435_v48 = vrot.slane %v6169_v38, 2  ;;  %v7444_v38 = vrot.slane %v6178_v23, 2  ;;  %v12977_v23 = vld [vmem:[%s16025_s2 + $0x210] sm:$0xff]  }
 0xa64   : > { %11406 = vmatprep.subr.bf16.mxu1 %v13053_v1 }
 0xa66   : > { %11323 = vmatmul.mubr.bf16.gmra.mrb[12].mxu1 %v15459_v41 }
 0xa67   : > { %11326 = vmatprep.mubr.msk.bf16.mxu1 %vm13054_vm0, %v13053_v1  ;;  %11407 = vmatpush3.bf16.msra.mxu1 %v12973_v10 }
 0xa68   : > { %11408 = vmatprep.subr.bf16.mxu1 %v13053_v1 }
 0xa6b   : > { %11409 = vmatpush3.bf16.msra.mxu1 %v12974_v58  ;;  %v13032_v58 = vld [vmem:[#allocation2 + $0x80] sm:$0xff] }
 0xa6c   : > { %11494 = vmatprep.subr.bf16.mxu1 %v13053_v1 }
 0xa6e   : > { %11327 = vmatmul.mubr.bf16.gmra.mrb[16].mxu1 %v15466_v18  ;;  %v13027_v18 = vld [vmem:[#allocation2 + $0x58] sm:$0xff] }
 0xa6f   : > { %11330 = vmatprep.mubr.msk.bf16.mxu1 %vm13054_vm0, %v13053_v1  ;;  %v7080_v3 = vrot.slane %v13027_v18, 2  ;;  %v13035_v18 = vld [vmem:[#allocation2 + $0x98] sm:$0xff] }
 0xa71   : > { %v6599_v26 = vpop.f32.mrb[112].mxu1 }
 0xa72   : > { %v11192_v41 = vpop.f32.mrb[113].mxu1  ;;  %v7090_v26 = vrot.slane %v13032_v58, 2 }
 0xa73   : > { %v6601_v62 = vpop.f32.mrb[114].mxu1 }
 0xa74   : > { %v11193_v22 = vpop.f32.mrb[115].mxu1  ;;  %v7091_v41 = vsel %vm2527_vm4, %v7088_v8, %v7090_v26  ;;  %v13033_v62 = vld [vmem:[#allocation2 + $0x88] sm:$0xff] }
 0xa75   : > { %v7092_v22 = vrot.slane %v13033_v62, 2  ;;  %v7448_v62 = vor.u32 %v7447_v61, %v7444_v38  ;;  %v16048_v61 = vshll.u32 %v15160_v24, 16 }
 0xa76   : > { %11331 = vmatmul.mubr.bf16.gmra.mrb[20].mxu1 %v15473_v7  ;;  %v7081_v7 = vsel %vm2527_vm4, %v15486_v16, %v7080_v3  ;;  %v13030_v16 = vld [vmem:[#allocation2 + $0x70] sm:$0xff] }
 0xa77   : > { %11334 = vmatprep.mubr.msk.bf16.mxu1 %vm13054_vm0, %v13053_v1  ;;  %v7086_v52 = vrot.slane %v13030_v16, 2 }
 0xa79   : > { %v6805_v59 = vpop.f32.mrb[116].mxu1  ;;  %v7089_v10 = vsel %vm2527_vm4, %v7086_v52, %v7088_v8 }
 0xa7a   : > { %v11212_v27 = vpop.f32.mrb[117].mxu1  ;;  %v7093_v59 = vsel %vm2527_vm4, %v7090_v26, %v7092_v22 }
 0xa7b   : > { %v6807_v50 = vpop.f32.mrb[118].mxu1  ;;  %v13034_v27 = vld [vmem:[#allocation2 + $0x90] sm:$0xff] }
 0xa7c   : > { %v11213_v36 = vpop.f32.mrb[119].mxu1  ;;  %v7094_v50 = vrot.slane %v13034_v27, 2 }
 0xa7e   : > { %11335 = vmatmul.mubr.bf16.gmra.mrb[24].mxu1 %v15480_v44  ;;  %v7083_v44 = vsel %vm2527_vm4, %v7080_v3, %v7082_v9  ;;  %v7095_v36 = vsel %vm2527_vm4, %v7092_v22, %v7094_v50  ;;  %v7096_v3 = vrot.slane %v13035_v18, 2  ;;  %v7456_v22 = vrot.slane %v6190_v57, 3  ;;  %v12980_v18 = vld [vmem:[%s16025_s2 + $0x228] sm:$0xff]  }
 0xa7f   : > { %11338 = vmatprep.mubr.msk.bf16.mxu1 %vm13054_vm0, %v13053_v1  ;;  %v7462_v57 = vrot.slane %v6196_v56, 2  ;;  %v12981_v56 = vld [vmem:[%s16025_s2 + $0x230] sm:$0xff]  }
 0xa80   : > { %v7099_v53 = vsel %vm2527_vm4, %v7096_v3, %v15532_v43  ;;  %v7457_v27 = vor.u32 %v7456_v22, %v7453_v35 }
 0xa82   : > { %v7458_v46 = vsel %vm3291_vm5, %v7448_v62, %v7457_v27 }
 0xa86   : > { %11339 = vmatmul.mubr.bf16.gmra.mrb[28].mxu1 %v15490_v63  ;;  %v13029_v63 = vld [vmem:[#allocation2 + $0x68] sm:$0xff] }
 0xa87   : > { %11342 = vmatprep.mubr.msk.bf16.mxu1 %vm13054_vm0, %v13053_v1  ;;  %v7084_v51 = vrot.slane %v13029_v63, 2  ;;  %v7024_v63 = vld [vmem:[#allocation2 + $0xb0] sm:$0x3f] }
 0xa89   : > { %v7085_v29 = vsel %vm2527_vm4, %v7082_v9, %v7084_v51  ;;  %v7087_v19 = vsel %vm2527_vm4, %v7084_v51, %v7086_v52  ;;  %v15637_v9 = vld [vmem:[#allocation2] sm:$0xff]  ;;  %v7425_v52 = vshrl.u32 %v15545_v30, 16 }
 0xa8b   : > { %v7427_v8 = vrot.slane %v7425_v52, 2  ;;  %v16045_v52 = vshrl.u32 %v15154_v15, 16 }
 0xa8e   : > { %11343 = vmatmul.mubr.bf16.gmra.mrb[32].mxu1 %v7081_v7  ;;  %v7097_v7 = vsel %vm2527_vm4, %v7094_v50, %v7096_v3  ;;  %v16042_v50 = vshll.u32 %v15137_v5, 16 }
 0xa8f   : > { %11346 = vmatprep.mubr.msk.bf16.mxu1 %vm13054_vm0, %v13053_v1 }
 0xa96   : > { %11347 = vmatmul.mubr.bf16.gmra.mrb[36].mxu1 %v7083_v44  ;;  %v7100_v44 = vrot.slane %v15637_v9, 2 }
 0xa97   : > { %11350 = vmatprep.mubr.msk.bf16.mxu1 %vm13054_vm0, %v13053_v1 }
 0xa98   : > { %v7101_v51 = vsel %vm2527_vm4, %v15532_v43, %v7100_v44  ;;  %v7438_v43 = vrot.slane %v6172_v11, 3  ;;  %v12976_v11 = vld [vmem:[%s16025_s2 + $0x208] sm:$0xff]  }
 0xa9a   : > { %v7439_v58 = vor.u32 %v7438_v43, %v7435_v48 }
 0xa9c   : > { %v7449_v12 = vsel %vm3291_vm5, %v7439_v58, %v7448_v62 }
 0xa9e   : > { %11351 = vmatmul.mubr.bf16.gmra.mrb[40].mxu1 %v7085_v29  ;;  %v7102_v29 = vrot.slane %v7024_v63, 2 }
 0xa9f   : > { %11354 = vmatprep.mubr.msk.bf16.mxu1 %vm13054_vm0, %v13053_v1 }
 0xaa0   : > { %v7103_v16 = vsel %vm2527_vm4, %v7100_v44, %v7102_v29  ;;  %v16044_v44 = vshll.u32 %v15148_v47, 16 }
 0xaa2   : > { %v7474_v63 = vrot.slane %v16044_v44, 3 }
 0xaa6   : > { %11355 = vmatmul.mubr.bf16.gmra.mrb[44].mxu1 %v7087_v19  ;;  %v7428_v19 = vshll.u32 %v15545_v30, 16 }
 0xaa7   : > { %11358 = vmatprep.mubr.msk.bf16.mxu1 %vm13054_vm0, %v13053_v1 }
 0xaae   : > { %11359 = vmatmul.mubr.bf16.gmra.mrb[48].mxu1 %v7089_v10  ;;  %v7430_v10 = vrot.slane %v7428_v19, 3  ;;  %v7480_v19 = vrot.slane %v16045_v52, 2  ;;  %v13040_v52 = vld [vmem:[#allocation2 + $0x30] sm:$0xff] }
 0xaaf   : > { %11362 = vmatprep.mubr.msk.bf16.mxu1 %vm13054_vm0, %v13053_v1 }
 0xab0   : > { %v7431_v26 = vor.u32 %v7430_v10, %v7427_v8 }
 0xab2   : > { %v7440_v30 = vsel %vm3291_vm5, %v7431_v26, %v7439_v58 }
 0xab6   : > { %11363 = vmatmul.mubr.bf16.gmra.mrb[52].mxu1 %v7091_v41  ;;  %v12975_v41 = vld [vmem:[%s16025_s2 + $0x200] sm:$0xff]  }
 0xab7   : > { %11366 = vmatprep.mubr.msk.bf16.mxu1 %vm13054_vm0, %v13053_v1 }
 0xabe   : > { %11367 = vmatmul.mubr.bf16.gmra.mrb[56].mxu1 %v7093_v59  ;;  %v12978_v59 = vld [vmem:[%s16025_s2 + $0x218] sm:$0xff]  }
 0xabf   : > { %11370 = vmatprep.mubr.msk.bf16.mxu1 %vm13054_vm0, %v13053_v1 }
 0xac6   : > { %11371 = vmatmul.mubr.bf16.gmra.mrb[60].mxu1 %v7095_v36  ;;  %v7465_v36 = vrot.slane %v16042_v50, 3 }
 0xac7   : > { %11374 = vmatprep.mubr.msk.bf16.mxu1 %vm13054_vm0, %v13053_v1 }
 0xac8   : > { %v7466_v3 = vor.u32 %v7465_v36, %v7462_v57 }
 0xaca   : > { %v7467_v5 = vsel %vm3291_vm5, %v7457_v27, %v7466_v3 }
 0xace   : > { %11375 = vmatmul.mubr.bf16.gmra.mrb[64].mxu1 %v7097_v7  ;;  %v16043_v7 = vshrl.u32 %v15148_v47, 16  ;;  %v16046_v47 = vshll.u32 %v15154_v15, 16 }
 0xacf   : > { %11378 = vmatprep.mubr.msk.bf16.mxu1 %vm13054_vm0, %v13053_v1 }
 0xad0   : > { %v7483_v48 = vrot.slane %v16046_v47, 3 }
 0xad2   : > { %v7484_v8 = vor.u32 %v7483_v48, %v7480_v19  ;;  %v7941_v19 = vrot.slane %v13040_v52, 3  ;;  %v13041_v48 = vld [vmem:[#allocation2 + $0x38] sm:$0xff] }
 0xad6   : > { %11379 = vmatmul.mubr.bf16.gmra.mrb[68].mxu1 %v7099_v53  ;;  %v7471_v53 = vrot.slane %v16043_v7, 2 }
 0xad7   : > { %11382 = vmatprep.mubr.msk.bf16.mxu1 %vm13054_vm0, %v13053_v1 }
 0xade   : > { %11383 = vmatmul.mubr.bf16.gmra.mrb[72].mxu1 %v7101_v51  ;;  %v12982_v51 = vld [vmem:[%s16025_s2 + $0x238] sm:$0xff]  }
 0xadf   : > { %11386 = vmatprep.mubr.msk.bf16.mxu1 %vm13054_vm0, %v13053_v1 }
 0xae6   : > { %11387 = vmatmul.mubr.bf16.gmra.mrb[76].mxu1 %v7103_v16 }
 0xae7   : > { %11390 = vmatprep.mubr.msk.bf16.mxu1 %vm13054_vm0, %v13053_v1 }
 0xaee   : > { %11391 = vmatmul.mubr.bf16.gmra.mrb[128].mxu1 %v7102_v29  ;;  %v7475_v29 = vor.u32 %v7474_v63, %v7471_v53  ;;  %v13038_v53 = vld [vmem:[#allocation2 + $0x20] sm:$0xff] }
 0xaef   : > { %11410 = vmatprep.mubr.msk.bf16.mxu1 %vm13054_vm0, %v13053_v1  ;;  %v7937_v44 = vrot.slane %v13038_v53, 3 }
 0xaf0   : > { %v7476_v16 = vsel %vm3291_vm5, %v7466_v3, %v7475_v29  ;;  %v7914_v3 = vld [vmem:[#allocation2 + $0x10] sm:$0xf8] }
 0xaf1   : > { %v7934_v7 = vrot.slane %v7914_v3, 3 }
 0xaf6   : > { %11411 = vmatmul.mubr.bf16.vlgmr.msra.gmra.mrb[132].mxu1 %v7440_v30  ;;  %v16047_v30 = vshrl.u32 %v15160_v24, 16 }
 0xaf7   : > { %11495 = vmatpush3.bf16.msra.mxu1 %v12975_v41  ;;  %11414 = vmatprep.mubr.msk.bf16.mxu1 %vm13054_vm0, %v13053_v1  ;;  %v7485_v41 = vsel %vm3291_vm5, %v7475_v29, %v7484_v8 }
 0xaf8   : > { %11496 = vmatprep.subr.bf16.mxu1 %v13053_v1  ;;  %v7489_v38 = vrot.slane %v16047_v30, 2 }
 0xafb   : > { %11497 = vmatpush3.bf16.msra.mxu1 %v12976_v11  ;;  %v7492_v11 = vrot.slane %v16048_v61, 3 }
 0xafc   : > { %11498 = vmatprep.subr.bf16.mxu1 %v13053_v1 }
 0xafd   : > { %v7493_v62 = vor.u32 %v7492_v11, %v7489_v38 }
 0xafe   : > { %11415 = vmatmul.mubr.bf16.gmra.mrb[4].mxu1 %v7449_v12 }
 0xaff   : > { %11418 = vmatprep.mubr.msk.bf16.mxu1 %vm13054_vm0, %v13053_v1  ;;  %11499 = vmatpush3.bf16.msra.mxu1 %v12977_v23  ;;  %v7494_v22 = vsel %vm3291_vm5, %v7484_v8, %v7493_v62 }
 0xb00   : > { %11500 = vmatprep.subr.bf16.mxu1 %v13053_v1 }
 0xb03   : > { %11501 = vmatpush3.bf16.msra.mxu1 %v12978_v59  ;;  %v16049_v59 = vshrl.u32 %v15166_v42, 16 }
 0xb04   : > { %11502 = vmatprep.subr.bf16.mxu1 %v13053_v1 }
 0xb05   : > { %v7498_v27 = vrot.slane %v16049_v59, 2  ;;  %v13044_v59 = vld [vmem:[#allocation2 + $0x50] sm:$0xff] }
 0xb06   : > { %11419 = vmatmul.mubr.bf16.gmra.mrb[8].mxu1 %v7458_v46 }
 0xb07   : > { %11422 = vmatprep.mubr.msk.bf16.mxu1 %vm13054_vm0, %v13053_v1  ;;  %11503 = vmatpush3.bf16.msra.mxu1 %v12979_v31  ;;  %v16050_v31 = vshll.u32 %v15166_v42, 16 }
 0xb08   : > { %11504 = vmatprep.subr.bf16.mxu1 %v13053_v1 }
 0xb09   : > { %v7501_v46 = vrot.slane %v16050_v31, 3 }
 0xb0b   : > { %11505 = vmatpush3.bf16.msra.mxu1 %v12980_v18  ;;  %v7502_v24 = vor.u32 %v7501_v46, %v7498_v27  ;;  %v7949_v27 = vrot.slane %v13044_v59, 3  ;;  %v16051_v46 = vrot.slane %v14721_v17, 3  ;;  %v7971_v17 = vrot.slane %v15637_v9, 3 }
 0xb0c   : > { %11506 = vmatprep.subr.bf16.mxu1 %v13053_v1 }
 0xb0d   : > { %v7503_v57 = vsel %vm3291_vm5, %v7493_v62, %v7502_v24  ;;  %v7512_v50 = vsel %vm3291_vm5, %v7502_v24, %v14743_v60  ;;  %v7595_v60 = vshrl.u32 %v15637_v9, 16  ;;  %v7952_v24 = vsel %vm3802_vm6, %v7949_v27, %v16051_v46 }
 0xb0e   : > { %11423 = vmatmul.mubr.bf16.gmra.mrb[12].mxu1 %v7467_v5 }
 0xb0f   : > { %11426 = vmatprep.mubr.msk.bf16.mxu1 %vm13054_vm0, %v13053_v1  ;;  %11507 = vmatpush3.bf16.msra.mxu1 %v12981_v56  ;;  %v13037_v56 = vld [vmem:[#allocation2 + $0x18] sm:$0xff] }
 0xb10   : > { %11508 = vmatprep.subr.bf16.mxu1 %v13053_v1  ;;  %v7935_v5 = vrot.slane %v13037_v56, 3 }
 0xb12   : > { %v7938_v63 = vsel %vm3802_vm6, %v7935_v5, %v7937_v44 }
 0xb13   : > { %11509 = vmatpush3.bf16.msra.mxu1 %v12982_v51  ;;  %v13039_v51 = vld [vmem:[#allocation2 + $0x28] sm:$0xff] }
 0xb14   : > { %v7939_v29 = vrot.slane %v13039_v51, 3 }
 0xb16   : > { %11427 = vmatmul.mubr.bf16.gmra.mrb[16].mxu1 %v7476_v16  ;;  %v7940_v16 = vsel %vm3802_vm6, %v7937_v44, %v7939_v29  ;;  %v7942_v47 = vsel %vm3802_vm6, %v7939_v29, %v7941_v19 }
 0xb17   : > { %11430 = vmatprep.mubr.msk.bf16.mxu1 %vm13054_vm0, %v13053_v1 }
 0xb19   : > { %v6962_v43 = vpop.f32.mrb[120].mxu1 }
 0xb1a   : > { %v11292_v10 = vpop.f32.mrb[121].mxu1  ;;  %v7943_v43 = vrot.slane %v13041_v48, 3 }
 0xb1b   : > { %v6964_v58 = vpop.f32.mrb[122].mxu1 }
 0xb1c   : > { %v11293_v26 = vpop.f32.mrb[123].mxu1  ;;  %v7944_v8 = vsel %vm3802_vm6, %v7941_v19, %v7943_v43  ;;  %v13042_v58 = vld [vmem:[#allocation2 + $0x40] sm:$0xff] }
 0xb1d   : > { %v7945_v26 = vrot.slane %v13042_v58, 3 }
 0xb1e   : > { %11431 = vmatmul.mubr.bf16.gmra.mrb[20].mxu1 %v7485_v41 }
 0xb1f   : > { %11434 = vmatprep.mubr.msk.bf16.mxu1 %vm13054_vm0, %v13053_v1  ;;  %v7946_v61 = vsel %vm3802_vm6, %v7943_v43, %v7945_v26 }
 0xb21   : > { %v7207_v15 = vpop.f32.mrb[124].mxu1 }
 0xb22   : > { %v11312_v23 = vpop.f32.mrb[125].mxu1  ;;  %v13043_v15 = vld [vmem:[#allocation2 + $0x48] sm:$0xff] }
 0xb23   : > { %v7209_v12 = vpop.f32.mrb[126].mxu1  ;;  %v7947_v62 = vrot.slane %v13043_v15, 3 }
 0xb24   : > { %v11313_v35 = vpop.f32.mrb[127].mxu1 }
 0xb25   : > { %v7950_v31 = vsel %vm3802_vm6, %v7947_v62, %v7949_v27 }
 0xb26   : > { %11435 = vmatmul.mubr.bf16.gmra.mrb[24].mxu1 %v7494_v22  ;;  %v7948_v22 = vsel %vm3802_vm6, %v7945_v26, %v7947_v62 }
 0xb27   : > { %11438 = vmatprep.mubr.msk.bf16.mxu1 %vm13054_vm0, %v13053_v1 }
 0xb2e   : > { %11439 = vmatmul.mubr.bf16.gmra.mrb[28].mxu1 %v7503_v57 }
 0xb2f   : > { %11442 = vmatprep.mubr.msk.bf16.mxu1 %vm13054_vm0, %v13053_v1 }
 0xb36   : > { %11443 = vmatmul.mubr.bf16.gmra.mrb[32].mxu1 %v7512_v50 }
 0xb37   : > { %11446 = vmatprep.mubr.msk.bf16.mxu1 %vm13054_vm0, %v13053_v1 }
 0xb3e   : > { %11447 = vmatmul.mubr.bf16.gmra.mrb[36].mxu1 %v14759_v37  ;;  %v7598_v37 = vshll.u32 %v15637_v9, 16  ;;  %v9194_v9 = vld [vmem:[%s13155_s14] sm:$0xff]  }
 0xb3f   : > { %11450 = vmatprep.mubr.msk.bf16.mxu1 %vm13054_vm0, %v13053_v1 }
 0xb46   : > { %11451 = vmatmul.mubr.bf16.gmra.mrb[40].mxu1 %v14769_v28  ;;  %v15768_v28 = vld [vmem:[#allocation2 + $0xb0] sm:$0x7f] }
 0xb47   : > { %11454 = vmatprep.mubr.msk.bf16.mxu1 %vm13054_vm0, %v13053_v1 }
 0xb4e   : > { %11455 = vmatmul.mubr.bf16.gmra.mrb[44].mxu1 %v14774_v40  ;;  %v7597_v40 = vrot.slane %v7595_v60, 2  ;;  %v9195_v60 = vunpack.c.l.bf16 %v9194_v9 }
 0xb4f   : > { %11458 = vmatprep.mubr.msk.bf16.mxu1 %vm13054_vm0, %v13053_v1 }
 0xb56   : > { %11459 = vmatmul.mubr.bf16.gmra.mrb[48].mxu1 %v14778_v49  ;;  %v7600_v49 = vrot.slane %v7598_v37, 3  ;;  %v9196_v37 = vunpack.c.h.bf16 %v9194_v9 }
 0xb57   : > { %11462 = vmatprep.mubr.msk.bf16.mxu1 %vm13054_vm0, %v13053_v1 }
 0xb5e   : > { %11463 = vmatmul.mubr.bf16.gmra.mrb[52].mxu1 %v14796_v39  ;;  %v7604_v39 = vshrl.u32 %v15768_v28, 16 }
 0xb5f   : > { %11466 = vmatprep.mubr.msk.bf16.mxu1 %vm13054_vm0, %v13053_v1 }
 0xb66   : > { %11467 = vmatmul.mubr.bf16.gmra.mrb[56].mxu1 %v14799_v4  ;;  %v7607_v4 = vshll.u32 %v15768_v28, 16 }
 0xb67   : > { %11470 = vmatprep.mubr.msk.bf16.mxu1 %vm13054_vm0, %v13053_v1 }
 0xb68   : > { %v7609_v42 = vrot.slane %v7607_v4, 3 }
 0xb6e   : > { %11471 = vmatmul.mubr.bf16.gmra.mrb[60].mxu1 %v14804_v32  ;;  %v7601_v32 = vor.u32 %v7600_v49, %v7597_v40  ;;  %v8302_v49 = vrot.slane %v9195_v60, 5 }
 0xb6f   : > { %11474 = vmatprep.mubr.msk.bf16.mxu1 %vm13054_vm0, %v13053_v1 }
 0xb70   : > { %v7602_v36 = vsel %vm3291_vm5, %v14801_v25, %v7601_v32  ;;  %v7936_v25 = vsel %vm3802_vm6, %v7934_v7, %v7935_v5 }
 0xb76   : > { %11475 = vmatmul.mubr.bf16.gmra.mrb[64].mxu1 %v14811_v6  ;;  %v7606_v6 = vrot.slane %v7604_v39, 2  ;;  %v8303_v39 = vrot.slane %v9196_v37, 5 }
 0xb77   : > { %11478 = vmatprep.mubr.msk.bf16.mxu1 %vm13054_vm0, %v13053_v1 }
 0xb78   : > { %v7610_v18 = vor.u32 %v7609_v42, %v7606_v6  ;;  %v9257_v6 = vld [vmem:[%s13155_s14 + $0x8] sm:$0xff]   ;;  %v8304_v3 = vsel %vm8301_vm8, %v8302_v49, %v8303_v39 }
 0xb79   : > { %v9199_v56 = vunpack.c.l.bf16 %v9257_v6  ;;  %v9200_v5 = vunpack.c.h.bf16 %v9257_v6 }
 0xb7b   : > { %v8328_v51 = vrot.slane %v9199_v56, 3  ;;  %v8329_v29 = vrot.slane %v9200_v5, 3 }
 0xb7d   : > { %v8330_v58 = vsel %vm3802_vm6, %v8328_v51, %v8329_v29 }
 0xb7e   : > { %11479 = vmatmul.mubr.bf16.gmra.mrb[68].mxu1 %v14815_v55  ;;  %v7611_v55 = vsel %vm3291_vm5, %v7601_v32, %v7610_v18 }
 0xb7f   : > { %11482 = vmatprep.mubr.msk.bf16.mxu1 %vm13054_vm0, %v13053_v1 }
 0xb86   : > { %11483 = vmatmul.mubr.bf16.gmra.mrb[72].mxu1 %v7602_v36 }
 0xb87   : > { %11486 = vmatprep.mubr.msk.bf16.mxu1 %vm13054_vm0, %v13053_v1 }
 0xb8e   : > { %11487 = vmatmul.mubr.bf16.gmra.mrb[76].mxu1 %v7611_v55 }
 0xb8f   : > { %11490 = vmatprep.mubr.msk.bf16.mxu1 %vm13054_vm0, %v13053_v1 }
 0xb96   : > { %11491 = vmatmul.mubr.bf16.gmra.mrb[136].mxu1 %v7610_v18 }
 0xb97   : > { %11510 = vmatprep.mubr.msk.bf16.mxu1 %vm13054_vm0, %v13053_v1 }
 0xb9e   : > { %11511 = vmatmul.mubr.bf16.vlgmr.msra.gmra.mrb[140].mxu1 %v7936_v25 }
 0xb9f   : > { %11514 = vmatprep.mubr.msk.bf16.mxu1 %vm13054_vm0, %v13053_v1 }
 0xba6   : > { %11515 = vmatmul.mubr.bf16.gmra.mrb[4].mxu1 %v7938_v63 }
 0xba7   : > { %11518 = vmatprep.mubr.msk.bf16.mxu1 %vm13054_vm0, %v13053_v1 }
 0xbae   : > { %11519 = vmatmul.mubr.bf16.gmra.mrb[8].mxu1 %v7940_v16 }
 0xbaf   : > { %11522 = vmatprep.mubr.msk.bf16.mxu1 %vm13054_vm0, %v13053_v1 }
 0xbb6   : > { %11523 = vmatmul.mubr.bf16.gmra.mrb[12].mxu1 %v7942_v47  ;;  %v9258_v47 = vld [vmem:[%s13155_s14 + $0x10] sm:$0xff]  }
 0xbb7   : > { %11526 = vmatprep.mubr.msk.bf16.mxu1 %vm13054_vm0, %v13053_v1  ;;  %v9203_v26 = vunpack.c.l.bf16 %v9258_v47 }
 0xbbe   : > { %11527 = vmatmul.mubr.bf16.gmra.mrb[16].mxu1 %v7944_v8 }
 0xbbf   : > { %11530 = vmatprep.mubr.msk.bf16.mxu1 %vm13054_vm0, %v13053_v1 }
 0xbc1   : > { %v7364_v10 = vpop.f32.mrb[128].mxu1 }
 0xbc2   : > { %v11392_v41 = vpop.f32.mrb[129].mxu1 }
 0xbc3   : > { %v7366_v30 = vpop.f32.mrb[130].mxu1  ;;  %v9204_v41 = vunpack.c.h.bf16 %v9258_v47 }
 0xbc4   : > { %v11393_v38 = vpop.f32.mrb[131].mxu1 }
 0xbc6   : > { %11531 = vmatmul.mubr.bf16.gmra.mrb[20].mxu1 %v7946_v61 }
 0xbc7   : > { %11534 = vmatprep.mubr.msk.bf16.mxu1 %vm13054_vm0, %v13053_v1 }
 0xbc9   : > { %v7715_v11 = vpop.f32.mrb[132].mxu1 }
 0xbca   : > { %v11412_v23 = vpop.f32.mrb[133].mxu1 }
 0xbcb   : > { %v7717_v12 = vpop.f32.mrb[134].mxu1 }
 0xbcc   : > { %v11413_v35 = vpop.f32.mrb[135].mxu1  ;;  %v8354_v12 = vrot.slane %v9203_v26, 1 }
 0xbcd   : > { %v8355_v35 = vrot.slane %v9204_v41, 1 }
 0xbce   : > { %11535 = vmatmul.mubr.bf16.gmra.mrb[24].mxu1 %v7948_v22 }
 0xbcf   : > { %11538 = vmatprep.mubr.msk.bf16.mxu1 %vm13054_vm0, %v13053_v1 }
 0xbd6   : > { %11539 = vmatmul.mubr.bf16.gmra.mrb[28].mxu1 %v7950_v31 }
 0xbd7   : > { %11542 = vmatprep.mubr.msk.bf16.mxu1 %vm13054_vm0, %v13053_v1 }
 0xbde   : > { %11543 = vmatmul.mubr.bf16.gmra.mrb[32].mxu1 %v7952_v24 }
 0xbdf   : > { %11546 = vmatprep.mubr.msk.bf16.mxu1 %vm13054_vm0, %v13053_v1 }
 0xbe6   : > { %11547 = vmatmul.mubr.bf16.gmra.mrb[36].mxu1 %v14832_v20  ;;  %v16052_v20 = vrot.slane %v14728_v34, 3 }
 0xbe7   : > { %11550 = vmatprep.mubr.msk.bf16.mxu1 %vm13054_vm0, %v13053_v1 }
 0xbee   : > { %11551 = vmatmul.mubr.bf16.gmra.mrb[40].mxu1 %v14835_v54  ;;  %v7972_v54 = vsel %vm3802_vm6, %v16052_v20, %v7971_v17  ;;  %v8356_v20 = vsel %vm1252_vm2, %v8354_v12, %v8355_v35 }
 0xbef   : > { %11554 = vmatprep.mubr.msk.bf16.mxu1 %vm13054_vm0, %v13053_v1 }
 0xbf6   : > { %11555 = vmatmul.mubr.bf16.gmra.mrb[44].mxu1 %v14838_v21  ;;  %v7973_v21 = vrot.slane %v15768_v28, 3  ;;  %v15854_v28 = vld [vmem:[%s16028_s5] ss:$0 sm:$0xff] }
 0xbf7   : > { %11558 = vmatprep.mubr.msk.bf16.mxu1 %vm13054_vm0, %v13053_v1 }
 0xbfe   : > { %11559 = vmatmul.mubr.bf16.gmra.mrb[48].mxu1 %v14841_v14  ;;  %v7974_v14 = vsel %vm3802_vm6, %v7971_v17, %v7973_v21 }
 0xbff   : > { %11562 = vmatprep.mubr.msk.bf16.mxu1 %vm13054_vm0, %v13053_v1 }
 0xc06   : > { %11563 = vmatmul.mubr.bf16.gmra.mrb[52].mxu1 %v14852_v0 }
 0xc07   : > { %11566 = vmatprep.mubr.msk.bf16.mxu1 %vm13054_vm0, %v13053_v1 }
 0xc0e   : > { %11567 = vmatmul.mubr.bf16.gmra.mrb[56].mxu1 %v14855_v45 }
 0xc0f   : > { %11570 = vmatprep.mubr.msk.bf16.mxu1 %vm13054_vm0, %v13053_v1 }
 0xc16   : > { %11571 = vmatmul.mubr.bf16.gmra.mrb[60].mxu1 %v14858_v13 }
 0xc17   : > { %11574 = vmatprep.mubr.msk.bf16.mxu1 %vm13054_vm0, %v13053_v1 }
 0xc1e   : > { %11575 = vmatmul.mubr.bf16.gmra.mrb[64].mxu1 %v14861_v33 }
 0xc1f   : > { %11578 = vmatprep.mubr.msk.bf16.mxu1 %vm13054_vm0, %v13053_v1 }
 0xc26   : > { %11579 = vmatmul.mubr.bf16.gmra.mrb[68].mxu1 %v14876_v2 }
 0xc27   : > { %11582 = vmatprep.mubr.msk.bf16.mxu1 %vm13054_vm0, %v13053_v1 }
 0xc2e   : > { %11583 = vmatmul.mubr.bf16.gmra.mrb[72].mxu1 %v7972_v54  ;;  %v9259_v54 = vld [vmem:[%s13155_s14 + $0x18] sm:$0xff]  }
 0xc2f   : > { %11586 = vmatprep.mubr.msk.bf16.mxu1 %vm13054_vm0, %v13053_v1  ;;  %v9208_v37 = vunpack.c.h.bf16 %v9259_v54 }
 0xc36   : > { %11587 = vmatmul.mubr.bf16.gmra.mrb[76].mxu1 %v7974_v14 }
 0xc37   : > { %11590 = vmatprep.mubr.msk.bf16.mxu1 %vm13054_vm0, %v13053_v1  ;;  %v15859_v1 = vld [vmem:[%s16029_s6] ss:$0 sm:$0xff] }
 0xc3e   : > { %11591 = vmatmul.mubr.bf16.gmra.mrb[144].mxu1 %v7973_v21 }
 0xc69   : > { %v7872_v0 = vpop.f32.mrb[136].mxu1 }
 0xc6a   : > { %v11492_v45 = vpop.f32.mrb[137].mxu1 }
 0xc6b   : > { %v7874_v13 = vpop.f32.mrb[138].mxu1 }
 0xc6c   : > { %v11493_v33 = vpop.f32.mrb[139].mxu1 }
 0xc71   : > { %v8078_v34 = vpop.f32.mrb[140].mxu1 }
 0xc72   : > { %v11512_v2 = vpop.f32.mrb[141].mxu1  ;;  %v9207_v34 = vunpack.c.l.bf16 %v9259_v54 }
 0xc73   : > { %v8080_v57 = vpop.f32.mrb[142].mxu1 }
 0xc74   : > { %v11513_v50 = vpop.f32.mrb[143].mxu1 }
 0xc79   : > { %v8084_v40 = vpop.f32.mrb[4].mxu1 }
 0xc7a   : > { %v8287_v4 = vmul.f32 %v15854_v28, %v8084_v40  ;;  %v11516_v32 = vpop.f32.mrb[5].mxu1 }
 0xc7b   : > { %v8087_v42 = vpop.f32.mrb[6].mxu1  ;;  %v9260_v32 = vld [vmem:[%s13155_s14 + $0x20] sm:$0xff]  }
 0xc7c   : > { %v8296_v36 = vadd.f32 %v15859_v1, %v8287_v4  ;;  %v8288_v18 = vmul.f32 %v15854_v28, %v8087_v42  ;;  %v11517_v55 = vpop.f32.mrb[7].mxu1 }
 0xc7e   : > { %v8308_v7 = vadd.f32 %v8302_v49, %v8296_v36  ;;  %v8297_v25 = vadd.f32 %v15859_v1, %v8288_v18  ;;  %v8383_v36 = vrot.slane %v9208_v37, 7 }
 0xc80   : > { %v8311_v53 = vmax.f32 %v8308_v7, 0.0  ;;  %v8309_v44 = vadd.f32 %v8304_v3, %v8297_v25  ;;  %v9211_v3 = vunpack.c.l.bf16 %v9260_v32 }
 0xc81   : > { %v8092_v63 = vpop.f32.mrb[8].mxu1 }
 0xc82   : > { %8314 = vst [vmem:[%s15871_s9 - $0x3] sm:$0xf8] %v8311_v53  ;;  %v8312_v16 = vmax.f32 %v8309_v44, 0.0  ;;  %v8289_v52 = vmul.f32 %v15854_v28, %v8092_v63  ;;  %v11520_v19 = vpop.f32.mrb[9].mxu1  ;;  %v9212_v63 = vunpack.c.h.bf16 %v9260_v32 }
 0xc83   : > { %v8095_v48 = vpop.f32.mrb[10].mxu1  ;;  %v9261_v19 = vld [vmem:[%s13155_s14 + $0x28] sm:$0xff]  }
 0xc84   : > { %8315 = vst [vmem:[%s15871_s9 + $0x5] sm:$0xff] %v8312_v16  ;;  %v8298_v43 = vadd.f32 %v15859_v1, %v8289_v52  ;;  %v8321_v8 = vmul.f32 %v15854_v28, %v8095_v48  ;;  %v11521_v10 = vpop.f32.mrb[11].mxu1  ;;  %v8407_v16 = vrot.slane %v9211_v3, 5  ;;  %v9215_v26 = vunpack.c.l.bf16 %v9261_v19 }
 0xc86   : > { %v8310_v30 = vadd.f32 %v8303_v39, %v8298_v43  ;;  %v8334_v38 = vadd.f32 %v8328_v51, %v8298_v43  ;;  %v8323_v61 = vadd.f32 %v15859_v1, %v8321_v8  ;;  %v8382_v39 = vrot.slane %v9207_v34, 7 }
 0xc87   : > { %v8408_v43 = vrot.slane %v9212_v63, 5 }
 0xc88   : > { %v8313_v11 = vmax.f32 %v8310_v30, 0.0  ;;  %v8337_v15 = vmax.f32 %v8334_v38, 0.0  ;;  %v8335_v62 = vadd.f32 %v8330_v58, %v8323_v61  ;;  %v8384_v53 = vsel %vm8381_vm9, %v8382_v39, %v8383_v36 }
 0xc89   : > { %v8100_v23 = vpop.f32.mrb[12].mxu1 }
 0xc8a   : > { %8316 = vst [vmem:[%s15871_s9 + $0xd] sm:$0x7] %v8313_v11  ;;  %8340 = vst [vmem:[%s15871_s9 + $0xb] sm:$0xe0] %v8337_v15  ;;  %v8338_v22 = vmax.f32 %v8335_v62, 0.0  ;;  %v8322_v59 = vmul.f32 %v15854_v28, %v8100_v23  ;;  %v11524_v27 = vpop.f32.mrb[13].mxu1  ;;  %v8409_v15 = vsel %vm8301_vm8, %v8407_v16, %v8408_v43  ;;  %v9216_v23 = vunpack.c.h.bf16 %v9261_v19 }
 0xc8b   : > { %v8103_v31 = vpop.f32.mrb[14].mxu1  ;;  %v9262_v27 = vld [vmem:[%s13155_s14 + $0x30] sm:$0xff]  }
 0xc8c   : > { %8341 = vst [vmem:[%s15871_s9 + $0x13] sm:$0xff] %v8338_v22  ;;  %v8324_v46 = vadd.f32 %v15859_v1, %v8322_v59  ;;  %v8347_v24 = vmul.f32 %v15854_v28, %v8103_v31  ;;  %v11525_v17 = vpop.f32.mrb[15].mxu1  ;;  %v8432_v22 = vrot.slane %v9215_v26, 3  ;;  %v9264_v26 = vld [vmem:[%s13155_s14 + $0x40] sm:$0xff]  }
 0xc8e   : > { %v8336_v21 = vadd.f32 %v8329_v29, %v8324_v46  ;;  %v8360_v14 = vadd.f32 %v8354_v12, %v8324_v46  ;;  %v8349_v0 = vadd.f32 %v15859_v1, %v8347_v24  ;;  %v8433_v24 = vrot.slane %v9216_v23, 3 }
 0xc90   : > { %v8339_v45 = vmax.f32 %v8336_v21, 0.0  ;;  %v8363_v13 = vmax.f32 %v8360_v14, 0.0  ;;  %v8361_v33 = vadd.f32 %v8356_v20, %v8349_v0  ;;  %v9219_v21 = vunpack.c.l.bf16 %v9262_v27 }
 0xc91   : > { %v8108_v2 = vpop.f32.mrb[16].mxu1  ;;  %v8434_v34 = vsel %vm3802_vm6, %v8432_v22, %v8433_v24 }
 0xc92   : > { %8342 = vst [vmem:[%s15871_s9 + $0x1b] sm:$0x1f] %v8339_v45  ;;  %8366 = vst [vmem:[%s15871_s9 + $0x19] sm:$0x80] %v8363_v13  ;;  %v8364_v9 = vmax.f32 %v8361_v33, 0.0  ;;  %v8348_v57 = vmul.f32 %v15854_v28, %v8108_v2  ;;  %v11528_v50 = vpop.f32.mrb[17].mxu1 }
 0xc93   : > { %v8111_v60 = vpop.f32.mrb[18].mxu1 }
 0xc94   : > { %8367 = vst [vmem:[%s15871_s9 + $0x21] sm:$0xff] %v8364_v9  ;;  %v8350_v40 = vadd.f32 %v15859_v1, %v8348_v57  ;;  %v8373_v49 = vmul.f32 %v15854_v28, %v8111_v60  ;;  %v11529_v4 = vpop.f32.mrb[19].mxu1  ;;  %v9220_v9 = vunpack.c.h.bf16 %v9262_v27  ;;  %v8457_v60 = vrot.slane %v9219_v21, 1 }
 0xc96   : > { %v8362_v6 = vadd.f32 %v8355_v35, %v8350_v40  ;;  %v8376_v42 = vadd.f32 %v15859_v1, %v8373_v49 }
 0xc98   : > { %v8365_v18 = vmax.f32 %v8362_v6, 0.0  ;;  %v8388_v55 = vadd.f32 %v8382_v39, %v8376_v42  ;;  %v8458_v39 = vrot.slane %v9220_v9, 1 }
 0xc99   : > { %v8116_v56 = vpop.f32.mrb[20].mxu1 }
 0xc9a   : > { %8368 = vst [vmem:[%s15871_s9 + $0x29] sm:$0x7f] %v8365_v18  ;;  %v8391_v5 = vmax.f32 %v8388_v55, 0.0  ;;  %v8374_v7 = vmul.f32 %v15854_v28, %v8116_v56  ;;  %v11532_v25 = vpop.f32.mrb[21].mxu1  ;;  %v9263_v56 = vld [vmem:[%s13155_s14 + $0x38] sm:$0xff]  }
 0xc9b   : > { %v8119_v44 = vpop.f32.mrb[22].mxu1  ;;  %v9223_v63 = vunpack.c.l.bf16 %v9263_v56 }
 0xc9c   : > { %8394 = vst [vmem:[%s15871_s9 + $0x2f] sm:$0xfe] %v8391_v5  ;;  %v8377_v51 = vadd.f32 %v15859_v1, %v8374_v7  ;;  %v8375_v29 = vmul.f32 %v15854_v28, %v8119_v44  ;;  %v11533_v52 = vpop.f32.mrb[23].mxu1  ;;  %v8459_v5 = vsel %vm1252_vm2, %v8457_v60, %v8458_v39 }
 0xc9e   : > { %v8389_v47 = vadd.f32 %v8384_v53, %v8377_v51  ;;  %v8378_v48 = vadd.f32 %v15859_v1, %v8375_v29  ;;  %v9224_v51 = vunpack.c.h.bf16 %v9263_v56 }
 0xca0   : > { %v8392_v8 = vmax.f32 %v8389_v47, 0.0  ;;  %v8390_v10 = vadd.f32 %v8383_v36, %v8378_v48  ;;  %v8413_v58 = vadd.f32 %v8407_v16, %v8378_v48  ;;  %v8484_v48 = vrot.slane %v9223_v63, 7 }
 0xca1   : > { %v8124_v41 = vpop.f32.mrb[24].mxu1 }
 0xca2   : > { %8395 = vst [vmem:[%s15871_s9 + $0x37] sm:$0xff] %v8392_v8  ;;  %v8393_v30 = vmax.f32 %v8390_v10, 0.0  ;;  %v8416_v38 = vmax.f32 %v8413_v58, 0.0  ;;  %v8401_v61 = vmul.f32 %v15854_v28, %v8124_v41  ;;  %v11536_v11 = vpop.f32.mrb[25].mxu1 }
 0xca3   : > { %v8127_v62 = vpop.f32.mrb[26].mxu1 }
 0xca4   : > { %8396 = vst [vmem:[%s15871_s9 + $0x3f] sm:$0x1] %v8393_v30  ;;  %8419 = vst [vmem:[%s15871_s9 + $0x3d] sm:$0xf8] %v8416_v38  ;;  %v8403_v12 = vadd.f32 %v15859_v1, %v8401_v61  ;;  %v8402_v35 = vmul.f32 %v15854_v28, %v8127_v62  ;;  %v11537_v59 = vpop.f32.mrb[27].mxu1  ;;  %v9228_v62 = vunpack.c.h.bf16 %v9264_v26 }
 0xca6   : > { %v8414_v31 = vadd.f32 %v8409_v15, %v8403_v12  ;;  %v8404_v46 = vadd.f32 %v15859_v1, %v8402_v35  ;;  %v9227_v15 = vunpack.c.l.bf16 %v9264_v26 }
 0xca8   : > { %v8417_v17 = vmax.f32 %v8414_v31, 0.0  ;;  %v8415_v20 = vadd.f32 %v8408_v43, %v8404_v46  ;;  %v8438_v54 = vadd.f32 %v8432_v22, %v8404_v46  ;;  %v8485_v43 = vrot.slane %v9224_v51, 7 }
 0xca9   : > { %v8132_v14 = vpop.f32.mrb[28].mxu1  ;;  %v8509_v27 = vrot.slane %v9227_v15, 5  ;;  %v8510_v31 = vrot.slane %v9228_v62, 5 }
 0xcaa   : > { %8420 = vst [vmem:[%s15871_s9 + $0x45] sm:$0xff] %v8417_v17  ;;  %v8418_v0 = vmax.f32 %v8415_v20, 0.0  ;;  %v8441_v45 = vmax.f32 %v8438_v54, 0.0  ;;  %v8426_v13 = vmul.f32 %v15854_v28, %v8132_v14  ;;  %v11540_v33 = vpop.f32.mrb[29].mxu1  ;;  %v8486_v11 = vsel %vm8381_vm9, %v8484_v48, %v8485_v43  ;;  %v9265_v20 = vld [vmem:[%s13155_s14 + $0x48] sm:$0xff]  }
 0xcab   : > { %v8135_v2 = vpop.f32.mrb[30].mxu1  ;;  %v9232_v33 = vunpack.c.h.bf16 %v9265_v20 }
 0xcac   : > { %8421 = vst [vmem:[%s15871_s9 + $0x4d] sm:$0x7] %v8418_v0  ;;  %8444 = vst [vmem:[%s15871_s9 + $0x4b] sm:$0xe0] %v8441_v45  ;;  %v8428_v57 = vadd.f32 %v15859_v1, %v8426_v13  ;;  %v8427_v50 = vmul.f32 %v15854_v28, %v8135_v2  ;;  %v11541_v37 = vpop.f32.mrb[31].mxu1  ;;  %v8511_v45 = vsel %vm8301_vm8, %v8509_v27, %v8510_v31  ;;  %v9231_v13 = vunpack.c.l.bf16 %v9265_v20 }
 0xcae   : > { %v8439_v40 = vadd.f32 %v8434_v34, %v8428_v57  ;;  %v8429_v49 = vadd.f32 %v15859_v1, %v8427_v50 }
 0xcb0   : > { %v8442_v4 = vmax.f32 %v8439_v40, 0.0  ;;  %v8440_v32 = vadd.f32 %v8433_v24, %v8429_v49  ;;  %v8463_v6 = vadd.f32 %v8457_v60, %v8429_v49  ;;  %v8534_v40 = vrot.slane %v9231_v13, 3 }
 0xcb1   : > { %v8140_v42 = vpop.f32.mrb[32].mxu1  ;;  %v8535_v49 = vrot.slane %v9232_v33, 3 }
 0xcb2   : > { %8445 = vst [vmem:[%s15871_s9 + $0x53] sm:$0xff] %v8442_v4  ;;  %v8443_v36 = vmax.f32 %v8440_v32, 0.0  ;;  %v8466_v18 = vmax.f32 %v8463_v6, 0.0  ;;  %v8451_v55 = vmul.f32 %v15854_v28, %v8140_v42  ;;  %v11544_v3 = vpop.f32.mrb[33].mxu1  ;;  %v9266_v6 = vld [vmem:[%s13155_s14 + $0x50] sm:$0xff]  }
 0xcb3   : > { %v8143_v7 = vpop.f32.mrb[34].mxu1  ;;  %v8536_v3 = vsel %vm3802_vm6, %v8534_v40, %v8535_v49  ;;  %v9235_v56 = vunpack.c.l.bf16 %v9266_v6 }
 0xcb4   : > { %8446 = vst [vmem:[%s15871_s9 + $0x5b] sm:$0x1f] %v8443_v36  ;;  %8469 = vst [vmem:[%s15871_s9 + $0x59] sm:$0x80] %v8466_v18  ;;  %v8453_v25 = vadd.f32 %v15859_v1, %v8451_v55  ;;  %v8452_v53 = vmul.f32 %v15854_v28, %v8143_v7  ;;  %v11545_v44 = vpop.f32.mrb[35].mxu1 }
 0xcb6   : > { %v8464_v29 = vadd.f32 %v8459_v5, %v8453_v25  ;;  %v8454_v16 = vadd.f32 %v15859_v1, %v8452_v53  ;;  %v9236_v5 = vunpack.c.h.bf16 %v9266_v6 }
 0xcb8   : > { %v8467_v52 = vmax.f32 %v8464_v29, 0.0  ;;  %v8465_v19 = vadd.f32 %v8458_v39, %v8454_v16  ;;  %v8559_v16 = vrot.slane %v9235_v56, 1 }
 0xcb9   : > { %v8148_v47 = vpop.f32.mrb[36].mxu1 }
 0xcba   : > { %8470 = vst [vmem:[%s15871_s9 + $0x61] sm:$0xff] %v8467_v52  ;;  %v8468_v8 = vmax.f32 %v8465_v19, 0.0  ;;  %v8476_v10 = vmul.f32 %v15854_v28, %v8148_v47  ;;  %v11548_v58 = vpop.f32.mrb[37].mxu1  ;;  %v8560_v52 = vrot.slane %v9236_v5, 1 }
 0xcbb   : > { %v8151_v41 = vpop.f32.mrb[38].mxu1 }
 0xcbc   : > { %8471 = vst [vmem:[%s15871_s9 + $0x69] sm:$0x7f] %v8468_v8  ;;  %v8479_v30 = vadd.f32 %v15859_v1, %v8476_v10  ;;  %v8477_v38 = vmul.f32 %v15854_v28, %v8151_v41  ;;  %v11549_v61 = vpop.f32.mrb[39].mxu1  ;;  %v8561_v26 = vsel %vm1252_vm2, %v8559_v16, %v8560_v52  ;;  %v9267_v41 = vld [vmem:[%s13155_s14 + $0x58] sm:$0xff]  }
 0xcbe   : > { %v8490_v23 = vadd.f32 %v8484_v48, %v8479_v30  ;;  %v8480_v12 = vadd.f32 %v15859_v1, %v8477_v38 }
 0xcc0   : > { %v8493_v35 = vmax.f32 %v8490_v23, 0.0  ;;  %v8491_v22 = vadd.f32 %v8486_v11, %v8480_v12  ;;  %v9239_v23 = vunpack.c.l.bf16 %v9267_v41 }
 0xcc1   : > { %v8156_v59 = vpop.f32.mrb[40].mxu1 }
 0xcc2   : > { %8496 = vst [vmem:[%s15871_s9 + $0x6f] sm:$0xfe] %v8493_v35  ;;  %v8494_v46 = vmax.f32 %v8491_v22, 0.0  ;;  %v8478_v24 = vmul.f32 %v15854_v28, %v8156_v59  ;;  %v11552_v17 = vpop.f32.mrb[41].mxu1 }
 0xcc3   : > { %v8159_v54 = vpop.f32.mrb[42].mxu1  ;;  %v8586_v17 = vrot.slane %v9239_v23, 7 }
 0xcc4   : > { %8497 = vst [vmem:[%s15871_s9 + $0x77] sm:$0xff] %v8494_v46  ;;  %v8481_v21 = vadd.f32 %v15859_v1, %v8478_v24  ;;  %v8503_v14 = vmul.f32 %v15854_v28, %v8159_v54  ;;  %v11553_v0 = vpop.f32.mrb[43].mxu1  ;;  %v9268_v54 = vld [vmem:[%s13155_s14 + $0x60] sm:$0xff]  }
 0xcc5   : > { %v9243_v33 = vunpack.c.l.bf16 %v9268_v54 }
 0xcc6   : > { %v8492_v34 = vadd.f32 %v8485_v43, %v8481_v21  ;;  %v8515_v2 = vadd.f32 %v8509_v27, %v8481_v21  ;;  %v8505_v9 = vadd.f32 %v15859_v1, %v8503_v14 }
 0xcc8   : > { %v8495_v57 = vmax.f32 %v8492_v34, 0.0  ;;  %v8518_v50 = vmax.f32 %v8515_v2, 0.0  ;;  %v8516_v60 = vadd.f32 %v8511_v45, %v8505_v9 }
 0xcc9   : > { %v8164_v37 = vpop.f32.mrb[44].mxu1 }
 0xcca   : > { %8498 = vst [vmem:[%s15871_s9 + $0x7f] sm:$0x1] %v8495_v57  ;;  %8521 = vst [vmem:[%s15871_s9 + $0x7d] sm:$0xf8] %v8518_v50  ;;  %v8519_v39 = vmax.f32 %v8516_v60, 0.0  ;;  %v8504_v4 = vmul.f32 %v15854_v28, %v8164_v37  ;;  %v11556_v32 = vpop.f32.mrb[45].mxu1  ;;  %v9244_v37 = vunpack.c.h.bf16 %v9268_v54 }
 0xccb   : > { %v8167_v42 = vpop.f32.mrb[46].mxu1  ;;  %v9269_v32 = vld [vmem:[%s13155_s14 + $0x68] sm:$0xff]  }
 0xccc   : > { %8522 = vst [vmem:[%s15871_s9 + $0x85] sm:$0xff] %v8519_v39  ;;  %v8506_v36 = vadd.f32 %v15859_v1, %v8504_v4  ;;  %v8528_v18 = vmul.f32 %v15854_v28, %v8167_v42  ;;  %v11557_v55 = vpop.f32.mrb[47].mxu1  ;;  %v8611_v39 = vrot.slane %v9243_v33, 5  ;;  %v9247_v56 = vunpack.c.l.bf16 %v9269_v32 }
 0xcce   : > { %v8517_v7 = vadd.f32 %v8510_v31, %v8506_v36  ;;  %v8540_v25 = vadd.f32 %v8534_v40, %v8506_v36  ;;  %v8530_v53 = vadd.f32 %v15859_v1, %v8528_v18  ;;  %v9240_v31 = vunpack.c.h.bf16 %v9267_v41 }
 0xccf   : > { %v8612_v36 = vrot.slane %v9244_v37, 5 }
 0xcd0   : > { %v8520_v44 = vmax.f32 %v8517_v7, 0.0  ;;  %v8543_v63 = vmax.f32 %v8540_v25, 0.0  ;;  %v8541_v51 = vadd.f32 %v8536_v3, %v8530_v53  ;;  %v8587_v0 = vrot.slane %v9240_v31, 7 }
 0xcd1   : > { %v8172_v29 = vpop.f32.mrb[48].mxu1 }
 0xcd2   : > { %8523 = vst [vmem:[%s15871_s9 + $0x8d] sm:$0x7] %v8520_v44  ;;  %8546 = vst [vmem:[%s15871_s9 + $0x8b] sm:$0xe0] %v8543_v63  ;;  %v8544_v19 = vmax.f32 %v8541_v51, 0.0  ;;  %v8529_v47 = vmul.f32 %v15854_v28, %v8172_v29  ;;  %v11560_v48 = vpop.f32.mrb[49].mxu1  ;;  %v8588_v50 = vsel %vm8381_vm9, %v8586_v17, %v8587_v0  ;;  %v8613_v63 = vsel %vm8301_vm8, %v8611_v39, %v8612_v36 }
 0xcd3   : > { %v8175_v43 = vpop.f32.mrb[50].mxu1  ;;  %v9248_v29 = vunpack.c.h.bf16 %v9269_v32  ;;  %v9270_v48 = vld [vmem:[%s13155_s14 + $0x70] sm:$0xff]  }
 0xcd4   : > { %8547 = vst [vmem:[%s15871_s9 + $0x93] sm:$0xff] %v8544_v19  ;;  %v8531_v8 = vadd.f32 %v15859_v1, %v8529_v47  ;;  %v8553_v10 = vmul.f32 %v15854_v28, %v8175_v43  ;;  %v11561_v58 = vpop.f32.mrb[51].mxu1  ;;  %v8636_v19 = vrot.slane %v9247_v56, 3 }
 0xcd6   : > { %v8542_v30 = vadd.f32 %v8535_v49, %v8531_v8  ;;  %v8565_v38 = vadd.f32 %v8559_v16, %v8531_v8  ;;  %v8555_v61 = vadd.f32 %v15859_v1, %v8553_v10  ;;  %v8637_v10 = vrot.slane %v9248_v29, 3 }
 0xcd8   : > { %v8545_v11 = vmax.f32 %v8542_v30, 0.0  ;;  %v8568_v15 = vmax.f32 %v8565_v38, 0.0  ;;  %v8566_v62 = vadd.f32 %v8561_v26, %v8555_v61  ;;  %v9251_v30 = vunpack.c.l.bf16 %v9270_v48 }
 0xcd9   : > { %v8180_v12 = vpop.f32.mrb[52].mxu1  ;;  %v8638_v23 = vsel %vm3802_vm6, %v8636_v19, %v8637_v10 }
 0xcda   : > { %8548 = vst [vmem:[%s15871_s9 + $0x9b] sm:$0x1f] %v8545_v11  ;;  %8571 = vst [vmem:[%s15871_s9 + $0x99] sm:$0x80] %v8568_v15  ;;  %v8569_v35 = vmax.f32 %v8566_v62, 0.0  ;;  %v8554_v22 = vmul.f32 %v15854_v28, %v8180_v12  ;;  %v11564_v59 = vpop.f32.mrb[53].mxu1 }
 0xcdb   : > { %v8183_v27 = vpop.f32.mrb[54].mxu1 }
 0xcdc   : > { %8572 = vst [vmem:[%s15871_s9 + $0xa1] sm:$0xff] %v8569_v35  ;;  %v8556_v46 = vadd.f32 %v15859_v1, %v8554_v22  ;;  %v8578_v24 = vmul.f32 %v15854_v28, %v8183_v27  ;;  %v11565_v20 = vpop.f32.mrb[55].mxu1  ;;  %v9252_v35 = vunpack.c.h.bf16 %v9270_v48  ;;  %v8661_v27 = vrot.slane %v9251_v30, 1 }
 0xcde   : > { %v8567_v21 = vadd.f32 %v8560_v52, %v8556_v46  ;;  %v8581_v14 = vadd.f32 %v15859_v1, %v8578_v24 }
 0xce0   : > { %v8570_v45 = vmax.f32 %v8567_v21, 0.0  ;;  %v8592_v13 = vadd.f32 %v8586_v17, %v8581_v14  ;;  %v8662_v17 = vrot.slane %v9252_v35, 1 }
 0xce1   : > { %v8188_v34 = vpop.f32.mrb[56].mxu1 }
 0xce2   : > { %8573 = vst [vmem:[%s15871_s9 + $0xa9] sm:$0x7f] %v8570_v45  ;;  %v8595_v2 = vmax.f32 %v8592_v13, 0.0  ;;  %v8579_v9 = vmul.f32 %v15854_v28, %v8188_v34  ;;  %v11568_v57 = vpop.f32.mrb[57].mxu1  ;;  %v9271_v34 = vld [vmem:[%s13155_s14 + $0x78] sm:$0xff]  }
 0xce3   : > { %v8191_v60 = vpop.f32.mrb[58].mxu1  ;;  %v9255_v37 = vunpack.c.l.bf16 %v9271_v34 }
 0xce4   : > { %8598 = vst [vmem:[%s15871_s9 + $0xaf] sm:$0xfe] %v8595_v2  ;;  %v8582_v40 = vadd.f32 %v15859_v1, %v8579_v9  ;;  %v8580_v49 = vmul.f32 %v15854_v28, %v8191_v60  ;;  %v11569_v4 = vpop.f32.mrb[59].mxu1  ;;  %v8663_v2 = vsel %vm1252_vm2, %v8661_v27, %v8662_v17 }
 0xce6   : > { %v8593_v6 = vadd.f32 %v8588_v50, %v8582_v40  ;;  %v8583_v42 = vadd.f32 %v15859_v1, %v8580_v49  ;;  %v9256_v40 = vunpack.c.h.bf16 %v9271_v34 }
 0xce8   : > { %v8596_v18 = vmax.f32 %v8593_v6, 0.0  ;;  %v8594_v55 = vadd.f32 %v8587_v0, %v8583_v42  ;;  %v8617_v3 = vadd.f32 %v8611_v39, %v8583_v42  ;;  %v8688_v42 = vrot.slane %v9255_v37, 7 }
 0xce9   : > { %v8196_v5 = vpop.f32.mrb[60].mxu1 }
 0xcea   : > { %8599 = vst [vmem:[%s15871_s9 + $0xb7] sm:$0xff] %v8596_v18  ;;  %v8597_v7 = vmax.f32 %v8594_v55, 0.0  ;;  %v8620_v25 = vmax.f32 %v8617_v3, 0.0  ;;  %v8605_v53 = vmul.f32 %v15854_v28, %v8196_v5  ;;  %v11572_v44 = vpop.f32.mrb[61].mxu1 }
 0xceb   : > { %v8199_v51 = vpop.f32.mrb[62].mxu1 }
 0xcec   : > { %8600 = vst [vmem:[%s15871_s9 + $0xbf] sm:$0x1] %v8597_v7  ;;  %8623 = vst [vmem:[%s15871_s9 + $0xbd] sm:$0xf8] %v8620_v25  ;;  %v8607_v16 = vadd.f32 %v15859_v1, %v8605_v53  ;;  %v8606_v52 = vmul.f32 %v15854_v28, %v8199_v51  ;;  %v11573_v47 = vpop.f32.mrb[63].mxu1 }
 0xcee   : > { %v8618_v43 = vadd.f32 %v8613_v63, %v8607_v16  ;;  %v8608_v8 = vadd.f32 %v15859_v1, %v8606_v52 }
 0xcf0   : > { %v8621_v58 = vmax.f32 %v8618_v43, 0.0  ;;  %v8619_v26 = vadd.f32 %v8612_v36, %v8608_v8  ;;  %v8642_v41 = vadd.f32 %v8636_v19, %v8608_v8  ;;  %v8689_v36 = vrot.slane %v9256_v40, 7 }
 0xcf1   : > { %v8204_v38 = vpop.f32.mrb[64].mxu1 }
 0xcf2   : > { %8624 = vst [vmem:[%s15871_s9 + $0xc5] sm:$0xff] %v8621_v58  ;;  %v8622_v61 = vmax.f32 %v8619_v26, 0.0  ;;  %v8645_v11 = vmax.f32 %v8642_v41, 0.0  ;;  %v8630_v15 = vmul.f32 %v15854_v28, %v8204_v38  ;;  %v11576_v62 = vpop.f32.mrb[65].mxu1  ;;  %v8690_v53 = vsel %vm8381_vm9, %v8688_v42, %v8689_v36 }
 0xcf3   : > { %v8207_v12 = vpop.f32.mrb[66].mxu1 }
 0xcf4   : > { %8625 = vst [vmem:[%s15871_s9 + $0xcd] sm:$0x7] %v8622_v61  ;;  %8648 = vst [vmem:[%s15871_s9 + $0xcb] sm:$0xe0] %v8645_v11  ;;  %v8632_v22 = vadd.f32 %v15859_v1, %v8630_v15  ;;  %v8631_v59 = vmul.f32 %v15854_v28, %v8207_v12  ;;  %v11577_v31 = vpop.f32.mrb[67].mxu1 }
 0xcf6   : > { %v8643_v46 = vadd.f32 %v8638_v23, %v8632_v22  ;;  %v8633_v24 = vadd.f32 %v15859_v1, %v8631_v59 }
 0xcf8   : > { %v8646_v20 = vmax.f32 %v8643_v46, 0.0  ;;  %v8644_v54 = vadd.f32 %v8637_v10, %v8633_v24  ;;  %v8667_v21 = vadd.f32 %v8661_v27, %v8633_v24 }
 0xcf9   : > { %v8212_v14 = vpop.f32.mrb[68].mxu1 }
 0xcfa   : > { %8649 = vst [vmem:[%s15871_s9 + $0xd3] sm:$0xff] %v8646_v20  ;;  %v8647_v0 = vmax.f32 %v8644_v54, 0.0  ;;  %v8670_v45 = vmax.f32 %v8667_v21, 0.0  ;;  %v8655_v13 = vmul.f32 %v15854_v28, %v8212_v14  ;;  %v11580_v33 = vpop.f32.mrb[69].mxu1 }
 0xcfb   : > { %v8215_v9 = vpop.f32.mrb[70].mxu1 }
 0xcfc   : > { %8650 = vst [vmem:[%s15871_s9 + $0xdb] sm:$0x1f] %v8647_v0  ;;  %8673 = vst [vmem:[%s15871_s9 + $0xd9] sm:$0x80] %v8670_v45  ;;  %v8657_v57 = vadd.f32 %v15859_v1, %v8655_v13  ;;  %v8656_v50 = vmul.f32 %v15854_v28, %v8215_v9  ;;  %v11581_v60 = vpop.f32.mrb[71].mxu1 }
 0xcfe   : > { %v8668_v49 = vadd.f32 %v8663_v2, %v8657_v57  ;;  %v8658_v39 = vadd.f32 %v15859_v1, %v8656_v50 }
 0xd00   : > { %v8671_v4 = vmax.f32 %v8668_v49, 0.0  ;;  %v8669_v32 = vadd.f32 %v8662_v17, %v8658_v39 }
 0xd01   : > { %v8220_v6 = vpop.f32.mrb[72].mxu1 }
 0xd02   : > { %8674 = vst [vmem:[%s15871_s9 + $0xe1] sm:$0xff] %v8671_v4  ;;  %v8672_v18 = vmax.f32 %v8669_v32, 0.0  ;;  %v8680_v55 = vmul.f32 %v15854_v28, %v8220_v6  ;;  %v11584_v3 = vpop.f32.mrb[73].mxu1 }
 0xd03   : > { %v8223_v56 = vpop.f32.mrb[74].mxu1 }
 0xd04   : > { %8675 = vst [vmem:[%s15871_s9 + $0xe9] sm:$0x7f] %v8672_v18  ;;  %v8683_v5 = vadd.f32 %v15859_v1, %v8680_v55  ;;  %v8681_v7 = vmul.f32 %v15854_v28, %v8223_v56  ;;  %v11585_v25 = vpop.f32.mrb[75].mxu1 }
 0xd06   : > { %v8694_v44 = vadd.f32 %v8688_v42, %v8683_v5  ;;  %v8684_v63 = vadd.f32 %v15859_v1, %v8681_v7 }
 0xd08   : > { %v8697_v51 = vmax.f32 %v8694_v44, 0.0  ;;  %v8695_v29 = vadd.f32 %v8690_v53, %v8684_v63 }
 0xd09   : > { %v8228_v16 = vpop.f32.mrb[76].mxu1 }
 0xd0a   : > { %8700 = vst [vmem:[%s15871_s9 + $0xef] sm:$0xfe] %v8697_v51  ;;  %v8698_v52 = vmax.f32 %v8695_v29, 0.0  ;;  %v8682_v19 = vmul.f32 %v15854_v28, %v8228_v16  ;;  %v11588_v47 = vpop.f32.mrb[77].mxu1 }
 0xd0b   : > { %v8231_v48 = vpop.f32.mrb[78].mxu1 }
 0xd0c   : > { %8701 = vst [vmem:[%s15871_s9 + $0xf7] sm:$0xff] %v8698_v52  ;;  %v8685_v43 = vadd.f32 %v15859_v1, %v8682_v19  ;;  %v11589_v8 = vpop.f32.mrb[79].mxu1 }
 0xd0e   : > { %v8696_v10 = vadd.f32 %v8689_v36, %v8685_v43 }
 0xd10   : > { %v8699_v58 = vmax.f32 %v8696_v10, 0.0 }
 0xd11   : > { %v8235_v26 = vpop.f32.mrb[144].mxu1 }
 0xd12   : > { %8702 = vst [vmem:[%s15871_s9 + $0xff] sm:$0x1] %v8699_v58  ;;  %v11592_v41 = vpop.f32.mrb[145].mxu1 }
 0xd13   : > { %v8237_v30 = vpop.f32.mrb[146].mxu1 }
 0xd14   : > { %v11593_v38 = vpop.f32.mrb[147].mxu1 }
 0xd15 PF: > { %s17_s24 = sadd.s32 1, %s13051_s24  }
 0xd16   : > { %p14_p4 = scmp.ge.s32.totalorder %s17_s24, 4  }
 0xd18   :  { %16 = sbr.rel (!%p14_p4) target bundleno = 1 (0x1), region = 94 }

</bundles_post_ra>
